<compile_context>
chip_gen: v6e
topology: v6e:2x2x1
jax: 0.10.0
libtpu: 0.0.40
codegen_flags: <defaults>
</compile_context>

<pallas_src>
import functools

import numpy as np
import jax
import jax.numpy as jnp
from jax.experimental import pallas as pl
from jax.experimental.pallas import tpu as pltpu


# --------------------------------------------------------------------------- kernel
def _resnet_kernel(
    decays_ref, x_ref,
    mt1_ref, mb1_ref,
    m_up_ref, b_up_ref,
    m1a_ref, b1a_ref, m1b_ref, b1b_ref,
    sh1_ref, sw1_ref,
    su2_ref, sd2_ref, ls2_ref, sh2_ref, sw2_ref,
    m2a_ref, b2a_ref, m2b_ref, b2b_ref,
    selh_ref, wh_ref, bh_ref,
    o_ref,
    *, n_steps, c, h2,
):
    def dot(a, b):
        return jnp.dot(a, b, preferred_element_type=jnp.float32)

    def roll(v, shift, axis):
        # static circular roll (np.roll semantics); always pass a non-negative shift
        return pltpu.roll(v, shift=shift % v.shape[axis], axis=axis)

    mt1 = mt1_ref[...]          # (N*H, 1) zero where h == 0
    mb1 = mb1_ref[...]          # (N*H, 1) zero where h == H-1

    def plif(x, v, idx):
        # ParametricLIFNode (decay_input=True, v_th=1, hard reset to 0, Heaviside fwd):
        #   v <- v + (x - v) * sigmoid(w);  spike = [v >= 1];  v <- 0 where spiked.
        d = decays_ref[idx]
        v = v + (x - v) * d
        fire = v >= 1.0
        spike = jnp.where(fire, 1.0, 0.0)
        v_new = jnp.where(fire, 0.0, v)
        return spike, v_new

    def conv3x3_stage1(x, m_ref, b_ref):
        # 3x3 conv + folded eval-mode BN as ONE K-stacked bf16 matmul:
        #   [x(h-1) | x(h) | x(h+1)] @ [M0; M1; M2]   (K = 3*W*C)
        # Vertical taps come from XLU sublane rolls + sample-boundary masks; horizontal
        # taps / channel mixing / BN scale live inside the block-Toeplitz weight.
        x3 = jnp.concatenate(
            [roll(x, 1, 0) * mt1, x, roll(x, -1, 0) * mb1], axis=-1)
        return dot(x3.astype(jnp.bfloat16), m_ref[...]) + b_ref[...]

    def conv3x3_stage2(x, m_ref, b_ref):
        # Stage-2 map is only 64 lanes wide -> keep the small verified shift-matrix
        # form for the vertical taps; the 3 tap matmuls are independent (not chained).
        out = dot(x.astype(jnp.bfloat16), m_ref[1])
        out = out + dot(dot(sd2_ref[...], x).astype(jnp.bfloat16), m_ref[0])
        out = out + dot(dot(su2_ref[...], x).astype(jnp.bfloat16), m_ref[2])
        return out + b_ref[...]

    def maxpool_stage1(x):
        # 2x2 max-pool: neighbour max via XLU rolls. Circular wrap only contaminates
        # odd rows / odd w-groups, which the compaction matmuls below discard.
        m = jnp.maximum(x, roll(x, -1, 0))       # vertical neighbour
        m = jnp.maximum(m, roll(m, -c, 1))       # horizontal neighbour (shift by C lanes)
        return dot(dot(sh1_ref[...], m), sw1_ref[...])   # keep even rows / even w-groups

    def maxpool_stage2(x):
        m = jnp.maximum(x, dot(su2_ref[...], x))
        m = jnp.maximum(m, dot(m, ls2_ref[...]))
        return dot(dot(sh2_ref[...], m), sw2_ref[...])

    rows1, lanes1 = x_ref.shape[1], m_up_ref.shape[1]
    rows2, lanes2 = sh1_ref.shape[0], sw1_ref.shape[1]
    rows3, lanes3 = sh2_ref.shape[0], sw2_ref.shape[1]

    # PLIF membrane potentials + time-mean accumulator: f32 loop carries.
    v_up = jnp.zeros((rows1, lanes1), jnp.float32)
    v1a = jnp.zeros((rows1, lanes1), jnp.float32)
    v1b = jnp.zeros((rows1, lanes1), jnp.float32)
    v2a = jnp.zeros((rows2, lanes2), jnp.float32)
    v2b = jnp.zeros((rows2, lanes2), jnp.float32)
    acc = jnp.zeros((rows3, lanes3), jnp.float32)

    # Fully unrolled static time loop (T is small): no per-grid-step overhead, and the
    # scheduler can overlap work across time steps (only same-layer PLIF state serializes).
    for t in range(n_steps):
        x0 = x_ref[t]                                              # (N*H, W*Cin)
        # up: conv1x1(2->8) + BN + PLIF
        y, v_up = plif(dot(x0.astype(jnp.bfloat16), m_up_ref[...]) + b_up_ref[...],
                       v_up, 0)
        # SEWBlock 1 (connect_f='ADD') + MaxPool2d(2)
        s, v1a = plif(conv3x3_stage1(y, m1a_ref, b1a_ref), v1a, 1)
        s, v1b = plif(conv3x3_stage1(s, m1b_ref, b1b_ref), v1b, 2)
        p = maxpool_stage1(s + y)                                  # (N*H/2, (W/2)*C)
        # SEWBlock 2 (connect_f='ADD') + MaxPool2d(2)
        s, v2a = plif(conv3x3_stage2(p, m2a_ref, b2a_ref), v2a, 3)
        s, v2b = plif(conv3x3_stage2(s, m2b_ref, b2b_ref), v2b, 4)
        acc = acc + maxpool_stage2(s + p)                          # Flatten(2) + time sum

    # Linear head on the time-mean of the flattened features (runs once).
    meanf = acc * (1.0 / n_steps)
    total = dot(dot(selh_ref[0], meanf), wh_ref[0])
    for hh in range(1, h2):
        total = total + dot(dot(selh_ref[hh], meanf), wh_ref[hh])
    o_ref[...] = total + bh_ref[...]


# ---------------------------------------------------------- host-side constant builders
def _boundary_masks(n, h):
    """Per-row masks zeroing rolled rows that cross a sample boundary."""
    idx = np.arange(n * h)
    top = (idx % h != 0).astype(np.float32)[:, None]        # no h-1 neighbour at h==0
    bot = (idx % h != h - 1).astype(np.float32)[:, None]    # no h+1 neighbour at h==H-1
    return top, bot


def _row_shift_mats(n, h):
    """(up @ v)[n,h] = v[n,h+1] (0 at h=H-1); (dn @ v)[n,h] = v[n,h-1] (0 at h=0)."""
    r = n * h
    up = np.zeros((r, r), np.float32)
    dn = np.zeros((r, r), np.float32)
    for i in range(r):
        if (i % h) != h - 1:
            up[i, i + 1] = 1.0
        if (i % h) != 0:
            dn[i, i - 1] = 1.0
    return up, dn


def _lane_shift_mat(w, c):
    """(m @ ls)[:, w*c + ch] = m[:, (w+1)*c + ch] (0 for last w)."""
    k = w * c
    ls = np.zeros((k, k), np.float32)
    for l in range(k - c):
        ls[l + c, l] = 1.0
    return ls


def _pool_row_select(n, h):
    s = np.zeros((n * (h // 2), n * h), np.float32)
    for ni in range(n):
        for ho in range(h // 2):
            s[ni * (h // 2) + ho, ni * h + 2 * ho] = 1.0
    return s


def _pool_lane_select(w, c):
    s = np.zeros((w * c, (w // 2) * c), np.float32)
    for wo in range(w // 2):
        for ci in range(c):
            s[2 * wo * c + ci, wo * c + ci] = 1.0
    return s


def _head_row_select(n, h2):
    s = np.zeros((h2, n, n * h2), np.float32)
    for hh in range(h2):
        for ni in range(n):
            s[hh, ni, ni * h2 + hh] = 1.0
    return s


def _fold_bn(gamma, beta, mean, var, eps=1e-5):
    scale = gamma / np.sqrt(var + eps)
    bias = beta - mean * scale
    return scale.astype(np.float32), bias.astype(np.float32)


def _conv3_block_mats(w, scale, bias, w_spatial, stack_k):
    """Fold a 3x3 conv (Cout,Cin,3,3) + BN scale into block-Toeplitz lane-mixing matrices
    (w*Cin -> w*Cout), one per vertical tap dy in {0,1,2}; optionally K-stacked."""
    cout, cin = w.shape[0], w.shape[1]
    m = np.zeros((3, w_spatial * cin, w_spatial * cout), np.float32)
    ws = np.transpose(w, (2, 3, 1, 0)) * scale[None, None, None, :]   # (3,3,cin,cout)
    for dy in range(3):
        for dx in range(3):
            for wo in range(w_spatial):
                wi = wo + dx - 1
                if 0 <= wi < w_spatial:
                    m[dy, wi * cin:(wi + 1) * cin, wo * cout:(wo + 1) * cout] = ws[dy, dx]
    b = np.tile(bias.astype(np.float32), w_spatial)[None, :]
    if stack_k:
        m = m.reshape(3 * w_spatial * cin, w_spatial * cout)
    return m.astype(np.float32), b


def _conv1_block_mat(w, scale, bias, w_spatial):
    cout, cin = w.shape[0], w.shape[1]
    ws = (w.reshape(cout, cin).T * scale[None, :]).astype(np.float32)
    m = np.kron(np.eye(w_spatial, dtype=np.float32), ws)
    b = np.tile(bias.astype(np.float32), w_spatial)[None, :]
    return m.astype(np.float32), b


def _head_mats(w_lin, b_lin, c, h2, w2):
    """Torch Linear weight (nc, c*h2*w2) in (c,h,w) feature order -> (h2, w2*c, nc)."""
    nc = w_lin.shape[0]
    w4 = w_lin.reshape(nc, c, h2, w2)
    wh = np.transpose(w4, (2, 3, 1, 0)).reshape(h2, w2 * c, nc).astype(np.float32)
    bh = b_lin.astype(np.float32)[None, :]
    return wh, bh


# ------------------------------------------------------------------------ init (params)
def init_params(key, in_ch=2, ch=8, h=16, w=16, num_classes=10):
    ks = jax.random.split(key, 6)

    def conv_bn(kk, cout, cin, ksz):
        k1, k2, k3, k4, k5 = jax.random.split(kk, 5)
        fan_in = cin * ksz * ksz
        wgt = np.asarray(jax.random.normal(k1, (cout, cin, ksz, ksz))) / np.sqrt(fan_in)
        gamma = np.asarray(jax.random.uniform(k2, (cout,), minval=0.5, maxval=1.5))
        beta = np.asarray(jax.random.normal(k3, (cout,))) * 0.1
        mean = np.asarray(jax.random.normal(k4, (cout,))) * 0.1
        var = np.asarray(jax.random.uniform(k5, (cout,), minval=0.5, maxval=1.5))
        scale, bias = _fold_bn(gamma, beta, mean, var)
        return wgt.astype(np.float32), scale, bias

    up_w, up_s, up_b = conv_bn(ks[0], ch, in_ch, 1)
    c1a_w, c1a_s, c1a_b = conv_bn(ks[1], ch, ch, 3)
    c1b_w, c1b_s, c1b_b = conv_bn(ks[2], ch, ch, 3)
    c2a_w, c2a_s, c2a_b = conv_bn(ks[3], ch, ch, 3)
    c2b_w, c2b_s, c2b_b = conv_bn(ks[4], ch, ch, 3)

    h2, w2 = h // 4, w // 4
    feat = h2 * w2 * ch                                   # two k_pool=2 stages
    k_lw, k_lb = jax.random.split(ks[5])
    lin_w = (np.asarray(jax.random.normal(k_lw, (num_classes, feat))) /
             np.sqrt(feat)).astype(np.float32)
    lin_b = (np.asarray(jax.random.normal(k_lb, (num_classes,))) * 0.01).astype(np.float32)

    m_up, b_up = _conv1_block_mat(up_w, up_s, up_b, w)
    m1a, b1a = _conv3_block_mats(c1a_w, c1a_s, c1a_b, w, stack_k=True)       # (3*W*C, W*C)
    m1b, b1b = _conv3_block_mats(c1b_w, c1b_s, c1b_b, w, stack_k=True)
    m2a, b2a = _conv3_block_mats(c2a_w, c2a_s, c2a_b, w // 2, stack_k=False)  # (3, K2, K2)
    m2b, b2b = _conv3_block_mats(c2b_w, c2b_s, c2b_b, w // 2, stack_k=False)
    wh, bh = _head_mats(lin_w, lin_b, ch, h2, w2)

    kp = {
        'm_up': m_up, 'b_up': b_up,
        'm1a': m1a, 'b1a': b1a, 'm1b': m1b, 'b1b': b1b,
        'm2a': m2a, 'b2a': b2a, 'm2b': m2b, 'b2b': b2b,
        'wh': wh, 'bh': bh,
        # 5 ParametricLIF nodes; init_tau=2.0 -> w = -log(tau-1) = 0 -> sigmoid(w)=0.5
        'plif_w': np.zeros((5,), np.float32),
    }
    # Conv weight matrices are stored bf16 (MXU-native on v6e/v7x); everything else f32.
    bf16_keys = {'m_up', 'm1a', 'm1b', 'm2a', 'm2b'}
    return {k: jnp.asarray(v, dtype=jnp.bfloat16 if k in bf16_keys else jnp.float32)
            for k, v in kp.items()}


# --------------------------------------------------------------------------- forward
@jax.jit
def resnetn_forward(x_ntchw, kp):
    N, T, Cin, H, W = x_ntchw.shape
    C = kp['m_up'].shape[1] // W
    NC = kp['bh'].shape[1]
    H2, W2 = H // 4, W // 4
    del W2  # (implied by shapes)

    # x.permute(1,0,2,3,4): (N,T,C,H,W) -> (T,N,C,H,W); internal lane-dense layout
    # (T, N*H, W*C): rows = (n, h), lanes = w*C + c  (128 lanes at layer 1).
    x = jnp.transpose(x_ntchw, (1, 0, 3, 4, 2)).astype(jnp.float32)
    x = x.reshape(T, N * H, W * Cin)
    decays = jax.nn.sigmoid(kp['plif_w'])                 # (5,) PLIF decay factors

    # Trace-time structural constants (stage-1 shift matrices are gone -> rolls+masks).
    mt1, mb1 = _boundary_masks(N, H)
    su2, sd2 = _row_shift_mats(N, H // 2)
    ls2 = _lane_shift_mat(W // 2, C)
    sh1 = _pool_row_select(N, H)
    sh2 = _pool_row_select(N, H // 2)
    sw1 = _pool_lane_select(W, C)
    sw2 = _pool_lane_select(W // 2, C)
    selh = _head_row_select(N, H2)

    operands = [decays, x,
                mt1, mb1,
                kp['m_up'], kp['b_up'],
                kp['m1a'], kp['b1a'], kp['m1b'], kp['b1b'],
                sh1, sw1,
                su2, sd2, ls2, sh2, sw2,
                kp['m2a'], kp['b2a'], kp['m2b'], kp['b2b'],
                selh, kp['wh'], kp['bh']]

    def fullspec(a):
        zeros = (0,) * a.ndim
        return pl.BlockSpec(a.shape, lambda i: zeros)

    in_specs = [pl.BlockSpec(memory_space=pltpu.MemorySpace.SMEM)]   # decays
    in_specs += [fullspec(a) for a in operands[1:]]

    kern = functools.partial(_resnet_kernel, n_steps=T, c=C, h2=H2)

    return pl.pallas_call(
        kern,
        out_shape=jax.ShapeDtypeStruct((N, NC), jnp.float32),
        grid=(1,),
        in_specs=in_specs,
        out_specs=pl.BlockSpec((N, NC), lambda i: (0, 0)),
        compiler_params=pltpu.CompilerParams(
            dimension_semantics=("arbitrary",)),
    )(*operands)


# ----------------------------------------------------------------------------- main
if __name__ == "__main__":
    key = jax.random.PRNGKey(0)
    kx, kparams = jax.random.split(key)

    N, T, Cin, H, W = 2, 4, 2, 16, 16          # (batch, time, channels, H, W)
    x = jax.random.uniform(kx, (N, T, Cin, H, W), dtype=jnp.float32)
    params = init_params(kparams, in_ch=Cin, ch=8, h=H, w=W, num_classes=10)

    out = resnetn_forward(x, params)
    jax.block_until_ready(out)
    assert out.shape == (N, 10) and out.dtype == jnp.float32
    assert bool(jnp.all(jnp.isfinite(out)))
    print("KERNEL_OK")
</pallas_src>

<mosaic_0001>
module attributes {stable_mosaic.version = 11 : i64} {
  func.func @_resnet_kernel(%arg0: i32, %arg1: memref<5xf32, #tpu.memory_space<smem>>, %arg2: memref<4x32x32xf32, #tpu.memory_space<vmem>>, %arg3: memref<32x1xf32, #tpu.memory_space<vmem>>, %arg4: memref<32x1xf32, #tpu.memory_space<vmem>>, %arg5: memref<32x128xbf16, #tpu.memory_space<vmem>>, %arg6: memref<1x128xf32, #tpu.memory_space<vmem>>, %arg7: memref<384x128xbf16, #tpu.memory_space<vmem>>, %arg8: memref<1x128xf32, #tpu.memory_space<vmem>>, %arg9: memref<384x128xbf16, #tpu.memory_space<vmem>>, %arg10: memref<1x128xf32, #tpu.memory_space<vmem>>, %arg11: memref<16x32xf32, #tpu.memory_space<vmem>>, %arg12: memref<128x64xf32, #tpu.memory_space<vmem>>, %arg13: memref<16x16xf32, #tpu.memory_space<vmem>>, %arg14: memref<16x16xf32, #tpu.memory_space<vmem>>, %arg15: memref<64x64xf32, #tpu.memory_space<vmem>>, %arg16: memref<8x16xf32, #tpu.memory_space<vmem>>, %arg17: memref<64x32xf32, #tpu.memory_space<vmem>>, %arg18: memref<3x64x64xbf16, #tpu.memory_space<vmem>>, %arg19: memref<1x64xf32, #tpu.memory_space<vmem>>, %arg20: memref<3x64x64xbf16, #tpu.memory_space<vmem>>, %arg21: memref<1x64xf32, #tpu.memory_space<vmem>>, %arg22: memref<4x2x8xf32, #tpu.memory_space<vmem>>, %arg23: memref<4x32x10xf32, #tpu.memory_space<vmem>>, %arg24: memref<1x10xf32, #tpu.memory_space<vmem>>, %arg25: memref<2x10xf32, #tpu.memory_space<vmem>>) attributes {dimension_semantics = [#tpu.dimension_semantics<arbitrary>], iteration_bounds = array<i64: 1>, scalar_prefetch = 0 : i64, scratch_operands = 0 : i64, tpu.core_type = #tpu.core_type<tc>, window_params = [{transform_indices = @transform_0, window_bounds = array<i64: 5>}, {pipeline_mode = #tpu.pipeline_mode<synchronous>, transform_indices = @transform_1, window_bounds = array<i64: 4, 32, 32>}, {pipeline_mode = #tpu.pipeline_mode<synchronous>, transform_indices = @transform_2, window_bounds = array<i64: 32, 1>}, {pipeline_mode = #tpu.pipeline_mode<synchronous>, transform_indices = @transform_3, window_bounds = array<i64: 32, 1>}, {pipeline_mode = #tpu.pipeline_mode<synchronous>, transform_indices = @transform_4, window_bounds = array<i64: 32, 128>}, {pipeline_mode = #tpu.pipeline_mode<synchronous>, transform_indices = @transform_5, window_bounds = array<i64: 1, 128>}, {pipeline_mode = #tpu.pipeline_mode<synchronous>, transform_indices = @transform_6, window_bounds = array<i64: 384, 128>}, {pipeline_mode = #tpu.pipeline_mode<synchronous>, transform_indices = @transform_7, window_bounds = array<i64: 1, 128>}, {pipeline_mode = #tpu.pipeline_mode<synchronous>, transform_indices = @transform_8, window_bounds = array<i64: 384, 128>}, {pipeline_mode = #tpu.pipeline_mode<synchronous>, transform_indices = @transform_9, window_bounds = array<i64: 1, 128>}, {pipeline_mode = #tpu.pipeline_mode<synchronous>, transform_indices = @transform_10, window_bounds = array<i64: 16, 32>}, {pipeline_mode = #tpu.pipeline_mode<synchronous>, transform_indices = @transform_11, window_bounds = array<i64: 128, 64>}, {pipeline_mode = #tpu.pipeline_mode<synchronous>, transform_indices = @transform_12, window_bounds = array<i64: 16, 16>}, {pipeline_mode = #tpu.pipeline_mode<synchronous>, transform_indices = @transform_13, window_bounds = array<i64: 16, 16>}, {pipeline_mode = #tpu.pipeline_mode<synchronous>, transform_indices = @transform_14, window_bounds = array<i64: 64, 64>}, {pipeline_mode = #tpu.pipeline_mode<synchronous>, transform_indices = @transform_15, window_bounds = array<i64: 8, 16>}, {pipeline_mode = #tpu.pipeline_mode<synchronous>, transform_indices = @transform_16, window_bounds = array<i64: 64, 32>}, {pipeline_mode = #tpu.pipeline_mode<synchronous>, transform_indices = @transform_17, window_bounds = array<i64: 3, 64, 64>}, {pipeline_mode = #tpu.pipeline_mode<synchronous>, transform_indices = @transform_18, window_bounds = array<i64: 1, 64>}, {pipeline_mode = #tpu.pipeline_mode<synchronous>, transform_indices = @transform_19, window_bounds = array<i64: 3, 64, 64>}, {pipeline_mode = #tpu.pipeline_mode<synchronous>, transform_indices = @transform_20, window_bounds = array<i64: 1, 64>}, {pipeline_mode = #tpu.pipeline_mode<synchronous>, transform_indices = @transform_21, window_bounds = array<i64: 4, 2, 8>}, {pipeline_mode = #tpu.pipeline_mode<synchronous>, transform_indices = @transform_22, window_bounds = array<i64: 4, 32, 10>}, {pipeline_mode = #tpu.pipeline_mode<synchronous>, transform_indices = @transform_23, window_bounds = array<i64: 1, 10>}, {pipeline_mode = #tpu.pipeline_mode<synchronous>, transform_indices = @transform_24, window_bounds = array<i64: 2, 10>}]} {
    %c0 = arith.constant 0 : index
    %c0_0 = arith.constant 0 : index
    %0 = vector.load %arg3[%c0, %c0_0] : memref<32x1xf32, #tpu.memory_space<vmem>>, vector<32x1xf32>
    %c0_1 = arith.constant 0 : index
    %c0_2 = arith.constant 0 : index
    %1 = vector.load %arg4[%c0_1, %c0_2] : memref<32x1xf32, #tpu.memory_space<vmem>>, vector<32x1xf32>
    %cst = arith.constant 0.000000e+00 : f32
    %2 = vector.broadcast %cst : f32 to vector<32x128xf32>
    %cst_3 = arith.constant 0.000000e+00 : f32
    %3 = vector.broadcast %cst_3 : f32 to vector<32x128xf32>
    %cst_4 = arith.constant 0.000000e+00 : f32
    %4 = vector.broadcast %cst_4 : f32 to vector<32x128xf32>
    %cst_5 = arith.constant 0.000000e+00 : f32
    %5 = vector.broadcast %cst_5 : f32 to vector<16x64xf32>
    %cst_6 = arith.constant 0.000000e+00 : f32
    %6 = vector.broadcast %cst_6 : f32 to vector<16x64xf32>
    %cst_7 = arith.constant 0.000000e+00 : f32
    %7 = vector.broadcast %cst_7 : f32 to vector<8x32xf32>
    %c0_8 = arith.constant 0 : index
    %c0_9 = arith.constant 0 : index
    %c0_10 = arith.constant 0 : index
    %8 = vector.load %arg2[%c0_8, %c0_9, %c0_10] : memref<4x32x32xf32, #tpu.memory_space<vmem>>, vector<1x32x32xf32>
    %9 = vector.shape_cast %8 : vector<1x32x32xf32> to vector<32x32xf32>
    %10 = arith.truncf %9 : vector<32x32xf32> to vector<32x32xbf16>
    %c0_11 = arith.constant 0 : index
    %c0_12 = arith.constant 0 : index
    %11 = vector.load %arg5[%c0_11, %c0_12] : memref<32x128xbf16, #tpu.memory_space<vmem>>, vector<32x128xbf16>
    %cst_13 = arith.constant dense<0.000000e+00> : vector<32x128xf32>
    %12 = tpu.matmul %10, %11, %cst_13 {dimension_numbers = #tpu.dot_dimension_numbers<[1], [0], [0], [1], [0, 0, 1, 1], [], []>} : vector<32x32xbf16>, vector<32x128xbf16>, vector<32x128xf32> -> vector<32x128xf32>
    %c0_14 = arith.constant 0 : index
    %c0_15 = arith.constant 0 : index
    %13 = vector.load %arg6[%c0_14, %c0_15] : memref<1x128xf32, #tpu.memory_space<vmem>>, vector<1x128xf32>
    %14 = vector.broadcast %13 : vector<1x128xf32> to vector<32x128xf32>
    %15 = arith.addf %12, %14 : vector<32x128xf32>
    %c0_16 = arith.constant 0 : index
    %16 = memref.load %arg1[%c0_16] : memref<5xf32, #tpu.memory_space<smem>>
    %17 = arith.subf %15, %2 : vector<32x128xf32>
    %18 = vector.broadcast %16 : f32 to vector<32x128xf32>
    %19 = arith.mulf %17, %18 : vector<32x128xf32>
    %20 = arith.addf %2, %19 : vector<32x128xf32>
    %cst_17 = arith.constant 1.000000e+00 : f32
    %21 = vector.broadcast %cst_17 : f32 to vector<32x128xf32>
    %22 = arith.cmpf oge, %20, %21 : vector<32x128xf32>
    %cst_18 = arith.constant 1.000000e+00 : f32
    %cst_19 = arith.constant 0.000000e+00 : f32
    %23 = vector.broadcast %cst_18 : f32 to vector<32x128xf32>
    %24 = vector.broadcast %cst_19 : f32 to vector<32x128xf32>
    %25 = arith.select %22, %23, %24 : vector<32x128xi1>, vector<32x128xf32>
    %cst_20 = arith.constant 0.000000e+00 : f32
    %26 = vector.broadcast %cst_20 : f32 to vector<32x128xf32>
    %27 = arith.select %22, %26, %20 : vector<32x128xi1>, vector<32x128xf32>
    %c1_i32 = arith.constant 1 : i32
    %28 = tpu.dynamic_rotate %25 by %c1_i32 dim 0 : vector<32x128xf32>, i32 -> vector<32x128xf32>
    %29 = vector.broadcast %0 : vector<32x1xf32> to vector<32x128xf32>
    %30 = arith.mulf %28, %29 : vector<32x128xf32>
    %c31_i32 = arith.constant 31 : i32
    %31 = tpu.dynamic_rotate %25 by %c31_i32 dim 0 : vector<32x128xf32>, i32 -> vector<32x128xf32>
    %32 = vector.broadcast %1 : vector<32x1xf32> to vector<32x128xf32>
    %33 = arith.mulf %31, %32 : vector<32x128xf32>
    %34 = tpu.concatenate %30, %25, %33 in 1 : vector<32x128xf32>, vector<32x128xf32>, vector<32x128xf32> -> vector<32x384xf32>
    %35 = arith.truncf %34 : vector<32x384xf32> to vector<32x384xbf16>
    %c0_21 = arith.constant 0 : index
    %c0_22 = arith.constant 0 : index
    %36 = vector.load %arg7[%c0_21, %c0_22] : memref<384x128xbf16, #tpu.memory_space<vmem>>, vector<384x128xbf16>
    %cst_23 = arith.constant dense<0.000000e+00> : vector<32x128xf32>
    %37 = tpu.matmul %35, %36, %cst_23 {dimension_numbers = #tpu.dot_dimension_numbers<[1], [0], [0], [1], [0, 0, 1, 1], [], []>} : vector<32x384xbf16>, vector<384x128xbf16>, vector<32x128xf32> -> vector<32x128xf32>
    %c0_24 = arith.constant 0 : index
    %c0_25 = arith.constant 0 : index
    %38 = vector.load %arg8[%c0_24, %c0_25] : memref<1x128xf32, #tpu.memory_space<vmem>>, vector<1x128xf32>
    %39 = vector.broadcast %38 : vector<1x128xf32> to vector<32x128xf32>
    %40 = arith.addf %37, %39 : vector<32x128xf32>
    %c1 = arith.constant 1 : index
    %41 = memref.load %arg1[%c1] : memref<5xf32, #tpu.memory_space<smem>>
    %42 = arith.subf %40, %3 : vector<32x128xf32>
    %43 = vector.broadcast %41 : f32 to vector<32x128xf32>
    %44 = arith.mulf %42, %43 : vector<32x128xf32>
    %45 = arith.addf %3, %44 : vector<32x128xf32>
    %cst_26 = arith.constant 1.000000e+00 : f32
    %46 = vector.broadcast %cst_26 : f32 to vector<32x128xf32>
    %47 = arith.cmpf oge, %45, %46 : vector<32x128xf32>
    %cst_27 = arith.constant 1.000000e+00 : f32
    %cst_28 = arith.constant 0.000000e+00 : f32
    %48 = vector.broadcast %cst_27 : f32 to vector<32x128xf32>
    %49 = vector.broadcast %cst_28 : f32 to vector<32x128xf32>
    %50 = arith.select %47, %48, %49 : vector<32x128xi1>, vector<32x128xf32>
    %cst_29 = arith.constant 0.000000e+00 : f32
    %51 = vector.broadcast %cst_29 : f32 to vector<32x128xf32>
    %52 = arith.select %47, %51, %45 : vector<32x128xi1>, vector<32x128xf32>
    %c1_i32_30 = arith.constant 1 : i32
    %53 = tpu.dynamic_rotate %50 by %c1_i32_30 dim 0 : vector<32x128xf32>, i32 -> vector<32x128xf32>
    %54 = vector.broadcast %0 : vector<32x1xf32> to vector<32x128xf32>
    %55 = arith.mulf %53, %54 : vector<32x128xf32>
    %c31_i32_31 = arith.constant 31 : i32
    %56 = tpu.dynamic_rotate %50 by %c31_i32_31 dim 0 : vector<32x128xf32>, i32 -> vector<32x128xf32>
    %57 = vector.broadcast %1 : vector<32x1xf32> to vector<32x128xf32>
    %58 = arith.mulf %56, %57 : vector<32x128xf32>
    %59 = tpu.concatenate %55, %50, %58 in 1 : vector<32x128xf32>, vector<32x128xf32>, vector<32x128xf32> -> vector<32x384xf32>
    %60 = arith.truncf %59 : vector<32x384xf32> to vector<32x384xbf16>
    %c0_32 = arith.constant 0 : index
    %c0_33 = arith.constant 0 : index
    %61 = vector.load %arg9[%c0_32, %c0_33] : memref<384x128xbf16, #tpu.memory_space<vmem>>, vector<384x128xbf16>
    %cst_34 = arith.constant dense<0.000000e+00> : vector<32x128xf32>
    %62 = tpu.matmul %60, %61, %cst_34 {dimension_numbers = #tpu.dot_dimension_numbers<[1], [0], [0], [1], [0, 0, 1, 1], [], []>} : vector<32x384xbf16>, vector<384x128xbf16>, vector<32x128xf32> -> vector<32x128xf32>
    %c0_35 = arith.constant 0 : index
    %c0_36 = arith.constant 0 : index
    %63 = vector.load %arg10[%c0_35, %c0_36] : memref<1x128xf32, #tpu.memory_space<vmem>>, vector<1x128xf32>
    %64 = vector.broadcast %63 : vector<1x128xf32> to vector<32x128xf32>
    %65 = arith.addf %62, %64 : vector<32x128xf32>
    %c2 = arith.constant 2 : index
    %66 = memref.load %arg1[%c2] : memref<5xf32, #tpu.memory_space<smem>>
    %67 = arith.subf %65, %4 : vector<32x128xf32>
    %68 = vector.broadcast %66 : f32 to vector<32x128xf32>
    %69 = arith.mulf %67, %68 : vector<32x128xf32>
    %70 = arith.addf %4, %69 : vector<32x128xf32>
    %cst_37 = arith.constant 1.000000e+00 : f32
    %71 = vector.broadcast %cst_37 : f32 to vector<32x128xf32>
    %72 = arith.cmpf oge, %70, %71 : vector<32x128xf32>
    %cst_38 = arith.constant 1.000000e+00 : f32
    %cst_39 = arith.constant 0.000000e+00 : f32
    %73 = vector.broadcast %cst_38 : f32 to vector<32x128xf32>
    %74 = vector.broadcast %cst_39 : f32 to vector<32x128xf32>
    %75 = arith.select %72, %73, %74 : vector<32x128xi1>, vector<32x128xf32>
    %cst_40 = arith.constant 0.000000e+00 : f32
    %76 = vector.broadcast %cst_40 : f32 to vector<32x128xf32>
    %77 = arith.select %72, %76, %70 : vector<32x128xi1>, vector<32x128xf32>
    %78 = arith.addf %75, %25 : vector<32x128xf32>
    %c31_i32_41 = arith.constant 31 : i32
    %79 = tpu.dynamic_rotate %78 by %c31_i32_41 dim 0 : vector<32x128xf32>, i32 -> vector<32x128xf32>
    %80 = arith.maximumf %78, %79 : vector<32x128xf32>
    %c120_i32 = arith.constant 120 : i32
    %81 = tpu.dynamic_rotate %80 by %c120_i32 dim 1 : vector<32x128xf32>, i32 -> vector<32x128xf32>
    %82 = arith.maximumf %80, %81 : vector<32x128xf32>
    %c0_42 = arith.constant 0 : index
    %c0_43 = arith.constant 0 : index
    %83 = vector.load %arg11[%c0_42, %c0_43] : memref<16x32xf32, #tpu.memory_space<vmem>>, vector<16x32xf32>
    %cst_44 = arith.constant dense<0.000000e+00> : vector<16x128xf32>
    %84 = tpu.matmul %83, %82, %cst_44 {dimension_numbers = #tpu.dot_dimension_numbers<[1], [0], [0], [1], [0, 0, 1, 1], [], []>} : vector<16x32xf32>, vector<32x128xf32>, vector<16x128xf32> -> vector<16x128xf32>
    %c0_45 = arith.constant 0 : index
    %c0_46 = arith.constant 0 : index
    %85 = vector.load %arg12[%c0_45, %c0_46] : memref<128x64xf32, #tpu.memory_space<vmem>>, vector<128x64xf32>
    %cst_47 = arith.constant dense<0.000000e+00> : vector<16x64xf32>
    %86 = tpu.matmul %84, %85, %cst_47 {dimension_numbers = #tpu.dot_dimension_numbers<[1], [0], [0], [1], [0, 0, 1, 1], [], []>} : vector<16x128xf32>, vector<128x64xf32>, vector<16x64xf32> -> vector<16x64xf32>
    %87 = arith.truncf %86 : vector<16x64xf32> to vector<16x64xbf16>
    %c1_48 = arith.constant 1 : index
    %c0_49 = arith.constant 0 : index
    %c0_50 = arith.constant 0 : index
    %88 = vector.load %arg18[%c1_48, %c0_49, %c0_50] : memref<3x64x64xbf16, #tpu.memory_space<vmem>>, vector<1x64x64xbf16>
    %89 = vector.shape_cast %88 : vector<1x64x64xbf16> to vector<64x64xbf16>
    %cst_51 = arith.constant dense<0.000000e+00> : vector<16x64xf32>
    %90 = tpu.matmul %87, %89, %cst_51 {dimension_numbers = #tpu.dot_dimension_numbers<[1], [0], [0], [1], [0, 0, 1, 1], [], []>} : vector<16x64xbf16>, vector<64x64xbf16>, vector<16x64xf32> -> vector<16x64xf32>
    %c0_52 = arith.constant 0 : index
    %c0_53 = arith.constant 0 : index
    %91 = vector.load %arg14[%c0_52, %c0_53] : memref<16x16xf32, #tpu.memory_space<vmem>>, vector<16x16xf32>
    %cst_54 = arith.constant dense<0.000000e+00> : vector<16x64xf32>
    %92 = tpu.matmul %91, %86, %cst_54 {dimension_numbers = #tpu.dot_dimension_numbers<[1], [0], [0], [1], [0, 0, 1, 1], [], []>} : vector<16x16xf32>, vector<16x64xf32>, vector<16x64xf32> -> vector<16x64xf32>
    %93 = arith.truncf %92 : vector<16x64xf32> to vector<16x64xbf16>
    %c0_55 = arith.constant 0 : index
    %c0_56 = arith.constant 0 : index
    %c0_57 = arith.constant 0 : index
    %94 = vector.load %arg18[%c0_55, %c0_56, %c0_57] : memref<3x64x64xbf16, #tpu.memory_space<vmem>>, vector<1x64x64xbf16>
    %95 = vector.shape_cast %94 : vector<1x64x64xbf16> to vector<64x64xbf16>
    %cst_58 = arith.constant dense<0.000000e+00> : vector<16x64xf32>
    %96 = tpu.matmul %93, %95, %cst_58 {dimension_numbers = #tpu.dot_dimension_numbers<[1], [0], [0], [1], [0, 0, 1, 1], [], []>} : vector<16x64xbf16>, vector<64x64xbf16>, vector<16x64xf32> -> vector<16x64xf32>
    %97 = arith.addf %90, %96 : vector<16x64xf32>
    %c0_59 = arith.constant 0 : index
    %c0_60 = arith.constant 0 : index
    %98 = vector.load %arg13[%c0_59, %c0_60] : memref<16x16xf32, #tpu.memory_space<vmem>>, vector<16x16xf32>
    %cst_61 = arith.constant dense<0.000000e+00> : vector<16x64xf32>
    %99 = tpu.matmul %98, %86, %cst_61 {dimension_numbers = #tpu.dot_dimension_numbers<[1], [0], [0], [1], [0, 0, 1, 1], [], []>} : vector<16x16xf32>, vector<16x64xf32>, vector<16x64xf32> -> vector<16x64xf32>
    %100 = arith.truncf %99 : vector<16x64xf32> to vector<16x64xbf16>
    %c2_62 = arith.constant 2 : index
    %c0_63 = arith.constant 0 : index
    %c0_64 = arith.constant 0 : index
    %101 = vector.load %arg18[%c2_62, %c0_63, %c0_64] : memref<3x64x64xbf16, #tpu.memory_space<vmem>>, vector<1x64x64xbf16>
    %102 = vector.shape_cast %101 : vector<1x64x64xbf16> to vector<64x64xbf16>
    %cst_65 = arith.constant dense<0.000000e+00> : vector<16x64xf32>
    %103 = tpu.matmul %100, %102, %cst_65 {dimension_numbers = #tpu.dot_dimension_numbers<[1], [0], [0], [1], [0, 0, 1, 1], [], []>} : vector<16x64xbf16>, vector<64x64xbf16>, vector<16x64xf32> -> vector<16x64xf32>
    %104 = arith.addf %97, %103 : vector<16x64xf32>
    %c0_66 = arith.constant 0 : index
    %c0_67 = arith.constant 0 : index
    %105 = vector.load %arg19[%c0_66, %c0_67] : memref<1x64xf32, #tpu.memory_space<vmem>>, vector<1x64xf32>
    %106 = vector.broadcast %105 : vector<1x64xf32> to vector<16x64xf32>
    %107 = arith.addf %104, %106 : vector<16x64xf32>
    %c3 = arith.constant 3 : index
    %108 = memref.load %arg1[%c3] : memref<5xf32, #tpu.memory_space<smem>>
    %109 = arith.subf %107, %5 : vector<16x64xf32>
    %110 = vector.broadcast %108 : f32 to vector<16x64xf32>
    %111 = arith.mulf %109, %110 : vector<16x64xf32>
    %112 = arith.addf %5, %111 : vector<16x64xf32>
    %cst_68 = arith.constant 1.000000e+00 : f32
    %113 = vector.broadcast %cst_68 : f32 to vector<16x64xf32>
    %114 = arith.cmpf oge, %112, %113 : vector<16x64xf32>
    %cst_69 = arith.constant 1.000000e+00 : f32
    %cst_70 = arith.constant 0.000000e+00 : f32
    %115 = vector.broadcast %cst_69 : f32 to vector<16x64xf32>
    %116 = vector.broadcast %cst_70 : f32 to vector<16x64xf32>
    %117 = arith.select %114, %115, %116 : vector<16x64xi1>, vector<16x64xf32>
    %cst_71 = arith.constant 0.000000e+00 : f32
    %118 = vector.broadcast %cst_71 : f32 to vector<16x64xf32>
    %119 = arith.select %114, %118, %112 : vector<16x64xi1>, vector<16x64xf32>
    %120 = arith.truncf %117 : vector<16x64xf32> to vector<16x64xbf16>
    %c1_72 = arith.constant 1 : index
    %c0_73 = arith.constant 0 : index
    %c0_74 = arith.constant 0 : index
    %121 = vector.load %arg20[%c1_72, %c0_73, %c0_74] : memref<3x64x64xbf16, #tpu.memory_space<vmem>>, vector<1x64x64xbf16>
    %122 = vector.shape_cast %121 : vector<1x64x64xbf16> to vector<64x64xbf16>
    %cst_75 = arith.constant dense<0.000000e+00> : vector<16x64xf32>
    %123 = tpu.matmul %120, %122, %cst_75 {dimension_numbers = #tpu.dot_dimension_numbers<[1], [0], [0], [1], [0, 0, 1, 1], [], []>} : vector<16x64xbf16>, vector<64x64xbf16>, vector<16x64xf32> -> vector<16x64xf32>
    %c0_76 = arith.constant 0 : index
    %c0_77 = arith.constant 0 : index
    %124 = vector.load %arg14[%c0_76, %c0_77] : memref<16x16xf32, #tpu.memory_space<vmem>>, vector<16x16xf32>
    %cst_78 = arith.constant dense<0.000000e+00> : vector<16x64xf32>
    %125 = tpu.matmul %124, %117, %cst_78 {dimension_numbers = #tpu.dot_dimension_numbers<[1], [0], [0], [1], [0, 0, 1, 1], [], []>} : vector<16x16xf32>, vector<16x64xf32>, vector<16x64xf32> -> vector<16x64xf32>
    %126 = arith.truncf %125 : vector<16x64xf32> to vector<16x64xbf16>
    %c0_79 = arith.constant 0 : index
    %c0_80 = arith.constant 0 : index
    %c0_81 = arith.constant 0 : index
    %127 = vector.load %arg20[%c0_79, %c0_80, %c0_81] : memref<3x64x64xbf16, #tpu.memory_space<vmem>>, vector<1x64x64xbf16>
    %128 = vector.shape_cast %127 : vector<1x64x64xbf16> to vector<64x64xbf16>
    %cst_82 = arith.constant dense<0.000000e+00> : vector<16x64xf32>
    %129 = tpu.matmul %126, %128, %cst_82 {dimension_numbers = #tpu.dot_dimension_numbers<[1], [0], [0], [1], [0, 0, 1, 1], [], []>} : vector<16x64xbf16>, vector<64x64xbf16>, vector<16x64xf32> -> vector<16x64xf32>
    %130 = arith.addf %123, %129 : vector<16x64xf32>
    %c0_83 = arith.constant 0 : index
    %c0_84 = arith.constant 0 : index
    %131 = vector.load %arg13[%c0_83, %c0_84] : memref<16x16xf32, #tpu.memory_space<vmem>>, vector<16x16xf32>
    %cst_85 = arith.constant dense<0.000000e+00> : vector<16x64xf32>
    %132 = tpu.matmul %131, %117, %cst_85 {dimension_numbers = #tpu.dot_dimension_numbers<[1], [0], [0], [1], [0, 0, 1, 1], [], []>} : vector<16x16xf32>, vector<16x64xf32>, vector<16x64xf32> -> vector<16x64xf32>
    %133 = arith.truncf %132 : vector<16x64xf32> to vector<16x64xbf16>
    %c2_86 = arith.constant 2 : index
    %c0_87 = arith.constant 0 : index
    %c0_88 = arith.constant 0 : index
    %134 = vector.load %arg20[%c2_86, %c0_87, %c0_88] : memref<3x64x64xbf16, #tpu.memory_space<vmem>>, vector<1x64x64xbf16>
    %135 = vector.shape_cast %134 : vector<1x64x64xbf16> to vector<64x64xbf16>
    %cst_89 = arith.constant dense<0.000000e+00> : vector<16x64xf32>
    %136 = tpu.matmul %133, %135, %cst_89 {dimension_numbers = #tpu.dot_dimension_numbers<[1], [0], [0], [1], [0, 0, 1, 1], [], []>} : vector<16x64xbf16>, vector<64x64xbf16>, vector<16x64xf32> -> vector<16x64xf32>
    %137 = arith.addf %130, %136 : vector<16x64xf32>
    %c0_90 = arith.constant 0 : index
    %c0_91 = arith.constant 0 : index
    %138 = vector.load %arg21[%c0_90, %c0_91] : memref<1x64xf32, #tpu.memory_space<vmem>>, vector<1x64xf32>
    %139 = vector.broadcast %138 : vector<1x64xf32> to vector<16x64xf32>
    %140 = arith.addf %137, %139 : vector<16x64xf32>
    %c4 = arith.constant 4 : index
    %141 = memref.load %arg1[%c4] : memref<5xf32, #tpu.memory_space<smem>>
    %142 = arith.subf %140, %6 : vector<16x64xf32>
    %143 = vector.broadcast %141 : f32 to vector<16x64xf32>
    %144 = arith.mulf %142, %143 : vector<16x64xf32>
    %145 = arith.addf %6, %144 : vector<16x64xf32>
    %cst_92 = arith.constant 1.000000e+00 : f32
    %146 = vector.broadcast %cst_92 : f32 to vector<16x64xf32>
    %147 = arith.cmpf oge, %145, %146 : vector<16x64xf32>
    %cst_93 = arith.constant 1.000000e+00 : f32
    %cst_94 = arith.constant 0.000000e+00 : f32
    %148 = vector.broadcast %cst_93 : f32 to vector<16x64xf32>
    %149 = vector.broadcast %cst_94 : f32 to vector<16x64xf32>
    %150 = arith.select %147, %148, %149 : vector<16x64xi1>, vector<16x64xf32>
    %cst_95 = arith.constant 0.000000e+00 : f32
    %151 = vector.broadcast %cst_95 : f32 to vector<16x64xf32>
    %152 = arith.select %147, %151, %145 : vector<16x64xi1>, vector<16x64xf32>
    %153 = arith.addf %150, %86 : vector<16x64xf32>
    %c0_96 = arith.constant 0 : index
    %c0_97 = arith.constant 0 : index
    %154 = vector.load %arg13[%c0_96, %c0_97] : memref<16x16xf32, #tpu.memory_space<vmem>>, vector<16x16xf32>
    %cst_98 = arith.constant dense<0.000000e+00> : vector<16x64xf32>
    %155 = tpu.matmul %154, %153, %cst_98 {dimension_numbers = #tpu.dot_dimension_numbers<[1], [0], [0], [1], [0, 0, 1, 1], [], []>} : vector<16x16xf32>, vector<16x64xf32>, vector<16x64xf32> -> vector<16x64xf32>
    %156 = arith.maximumf %153, %155 : vector<16x64xf32>
    %c0_99 = arith.constant 0 : index
    %c0_100 = arith.constant 0 : index
    %157 = vector.load %arg15[%c0_99, %c0_100] : memref<64x64xf32, #tpu.memory_space<vmem>>, vector<64x64xf32>
    %cst_101 = arith.constant dense<0.000000e+00> : vector<16x64xf32>
    %158 = tpu.matmul %156, %157, %cst_101 {dimension_numbers = #tpu.dot_dimension_numbers<[1], [0], [0], [1], [0, 0, 1, 1], [], []>} : vector<16x64xf32>, vector<64x64xf32>, vector<16x64xf32> -> vector<16x64xf32>
    %159 = arith.maximumf %156, %158 : vector<16x64xf32>
    %c0_102 = arith.constant 0 : index
    %c0_103 = arith.constant 0 : index
    %160 = vector.load %arg16[%c0_102, %c0_103] : memref<8x16xf32, #tpu.memory_space<vmem>>, vector<8x16xf32>
    %cst_104 = arith.constant dense<0.000000e+00> : vector<8x64xf32>
    %161 = tpu.matmul %160, %159, %cst_104 {dimension_numbers = #tpu.dot_dimension_numbers<[1], [0], [0], [1], [0, 0, 1, 1], [], []>} : vector<8x16xf32>, vector<16x64xf32>, vector<8x64xf32> -> vector<8x64xf32>
    %c0_105 = arith.constant 0 : index
    %c0_106 = arith.constant 0 : index
    %162 = vector.load %arg17[%c0_105, %c0_106] : memref<64x32xf32, #tpu.memory_space<vmem>>, vector<64x32xf32>
    %cst_107 = arith.constant dense<0.000000e+00> : vector<8x32xf32>
    %163 = tpu.matmul %161, %162, %cst_107 {dimension_numbers = #tpu.dot_dimension_numbers<[1], [0], [0], [1], [0, 0, 1, 1], [], []>} : vector<8x64xf32>, vector<64x32xf32>, vector<8x32xf32> -> vector<8x32xf32>
    %164 = arith.addf %7, %163 : vector<8x32xf32>
    %c1_108 = arith.constant 1 : index
    %c0_109 = arith.constant 0 : index
    %c0_110 = arith.constant 0 : index
    %165 = vector.load %arg2[%c1_108, %c0_109, %c0_110] : memref<4x32x32xf32, #tpu.memory_space<vmem>>, vector<1x32x32xf32>
    %166 = vector.shape_cast %165 : vector<1x32x32xf32> to vector<32x32xf32>
    %167 = arith.truncf %166 : vector<32x32xf32> to vector<32x32xbf16>
    %c0_111 = arith.constant 0 : index
    %c0_112 = arith.constant 0 : index
    %168 = vector.load %arg5[%c0_111, %c0_112] : memref<32x128xbf16, #tpu.memory_space<vmem>>, vector<32x128xbf16>
    %cst_113 = arith.constant dense<0.000000e+00> : vector<32x128xf32>
    %169 = tpu.matmul %167, %168, %cst_113 {dimension_numbers = #tpu.dot_dimension_numbers<[1], [0], [0], [1], [0, 0, 1, 1], [], []>} : vector<32x32xbf16>, vector<32x128xbf16>, vector<32x128xf32> -> vector<32x128xf32>
    %c0_114 = arith.constant 0 : index
    %c0_115 = arith.constant 0 : index
    %170 = vector.load %arg6[%c0_114, %c0_115] : memref<1x128xf32, #tpu.memory_space<vmem>>, vector<1x128xf32>
    %171 = vector.broadcast %170 : vector<1x128xf32> to vector<32x128xf32>
    %172 = arith.addf %169, %171 : vector<32x128xf32>
    %c0_116 = arith.constant 0 : index
    %173 = memref.load %arg1[%c0_116] : memref<5xf32, #tpu.memory_space<smem>>
    %174 = arith.subf %172, %27 : vector<32x128xf32>
    %175 = vector.broadcast %173 : f32 to vector<32x128xf32>
    %176 = arith.mulf %174, %175 : vector<32x128xf32>
    %177 = arith.addf %27, %176 : vector<32x128xf32>
    %cst_117 = arith.constant 1.000000e+00 : f32
    %178 = vector.broadcast %cst_117 : f32 to vector<32x128xf32>
    %179 = arith.cmpf oge, %177, %178 : vector<32x128xf32>
    %cst_118 = arith.constant 1.000000e+00 : f32
    %cst_119 = arith.constant 0.000000e+00 : f32
    %180 = vector.broadcast %cst_118 : f32 to vector<32x128xf32>
    %181 = vector.broadcast %cst_119 : f32 to vector<32x128xf32>
    %182 = arith.select %179, %180, %181 : vector<32x128xi1>, vector<32x128xf32>
    %cst_120 = arith.constant 0.000000e+00 : f32
    %183 = vector.broadcast %cst_120 : f32 to vector<32x128xf32>
    %184 = arith.select %179, %183, %177 : vector<32x128xi1>, vector<32x128xf32>
    %c1_i32_121 = arith.constant 1 : i32
    %185 = tpu.dynamic_rotate %182 by %c1_i32_121 dim 0 : vector<32x128xf32>, i32 -> vector<32x128xf32>
    %186 = vector.broadcast %0 : vector<32x1xf32> to vector<32x128xf32>
    %187 = arith.mulf %185, %186 : vector<32x128xf32>
    %c31_i32_122 = arith.constant 31 : i32
    %188 = tpu.dynamic_rotate %182 by %c31_i32_122 dim 0 : vector<32x128xf32>, i32 -> vector<32x128xf32>
    %189 = vector.broadcast %1 : vector<32x1xf32> to vector<32x128xf32>
    %190 = arith.mulf %188, %189 : vector<32x128xf32>
    %191 = tpu.concatenate %187, %182, %190 in 1 : vector<32x128xf32>, vector<32x128xf32>, vector<32x128xf32> -> vector<32x384xf32>
    %192 = arith.truncf %191 : vector<32x384xf32> to vector<32x384xbf16>
    %c0_123 = arith.constant 0 : index
    %c0_124 = arith.constant 0 : index
    %193 = vector.load %arg7[%c0_123, %c0_124] : memref<384x128xbf16, #tpu.memory_space<vmem>>, vector<384x128xbf16>
    %cst_125 = arith.constant dense<0.000000e+00> : vector<32x128xf32>
    %194 = tpu.matmul %192, %193, %cst_125 {dimension_numbers = #tpu.dot_dimension_numbers<[1], [0], [0], [1], [0, 0, 1, 1], [], []>} : vector<32x384xbf16>, vector<384x128xbf16>, vector<32x128xf32> -> vector<32x128xf32>
    %c0_126 = arith.constant 0 : index
    %c0_127 = arith.constant 0 : index
    %195 = vector.load %arg8[%c0_126, %c0_127] : memref<1x128xf32, #tpu.memory_space<vmem>>, vector<1x128xf32>
    %196 = vector.broadcast %195 : vector<1x128xf32> to vector<32x128xf32>
    %197 = arith.addf %194, %196 : vector<32x128xf32>
    %c1_128 = arith.constant 1 : index
    %198 = memref.load %arg1[%c1_128] : memref<5xf32, #tpu.memory_space<smem>>
    %199 = arith.subf %197, %52 : vector<32x128xf32>
    %200 = vector.broadcast %198 : f32 to vector<32x128xf32>
    %201 = arith.mulf %199, %200 : vector<32x128xf32>
    %202 = arith.addf %52, %201 : vector<32x128xf32>
    %cst_129 = arith.constant 1.000000e+00 : f32
    %203 = vector.broadcast %cst_129 : f32 to vector<32x128xf32>
    %204 = arith.cmpf oge, %202, %203 : vector<32x128xf32>
    %cst_130 = arith.constant 1.000000e+00 : f32
    %cst_131 = arith.constant 0.000000e+00 : f32
    %205 = vector.broadcast %cst_130 : f32 to vector<32x128xf32>
    %206 = vector.broadcast %cst_131 : f32 to vector<32x128xf32>
    %207 = arith.select %204, %205, %206 : vector<32x128xi1>, vector<32x128xf32>
    %cst_132 = arith.constant 0.000000e+00 : f32
    %208 = vector.broadcast %cst_132 : f32 to vector<32x128xf32>
    %209 = arith.select %204, %208, %202 : vector<32x128xi1>, vector<32x128xf32>
    %c1_i32_133 = arith.constant 1 : i32
    %210 = tpu.dynamic_rotate %207 by %c1_i32_133 dim 0 : vector<32x128xf32>, i32 -> vector<32x128xf32>
    %211 = vector.broadcast %0 : vector<32x1xf32> to vector<32x128xf32>
    %212 = arith.mulf %210, %211 : vector<32x128xf32>
    %c31_i32_134 = arith.constant 31 : i32
    %213 = tpu.dynamic_rotate %207 by %c31_i32_134 dim 0 : vector<32x128xf32>, i32 -> vector<32x128xf32>
    %214 = vector.broadcast %1 : vector<32x1xf32> to vector<32x128xf32>
    %215 = arith.mulf %213, %214 : vector<32x128xf32>
    %216 = tpu.concatenate %212, %207, %215 in 1 : vector<32x128xf32>, vector<32x128xf32>, vector<32x128xf32> -> vector<32x384xf32>
    %217 = arith.truncf %216 : vector<32x384xf32> to vector<32x384xbf16>
    %c0_135 = arith.constant 0 : index
    %c0_136 = arith.constant 0 : index
    %218 = vector.load %arg9[%c0_135, %c0_136] : memref<384x128xbf16, #tpu.memory_space<vmem>>, vector<384x128xbf16>
    %cst_137 = arith.constant dense<0.000000e+00> : vector<32x128xf32>
    %219 = tpu.matmul %217, %218, %cst_137 {dimension_numbers = #tpu.dot_dimension_numbers<[1], [0], [0], [1], [0, 0, 1, 1], [], []>} : vector<32x384xbf16>, vector<384x128xbf16>, vector<32x128xf32> -> vector<32x128xf32>
    %c0_138 = arith.constant 0 : index
    %c0_139 = arith.constant 0 : index
    %220 = vector.load %arg10[%c0_138, %c0_139] : memref<1x128xf32, #tpu.memory_space<vmem>>, vector<1x128xf32>
    %221 = vector.broadcast %220 : vector<1x128xf32> to vector<32x128xf32>
    %222 = arith.addf %219, %221 : vector<32x128xf32>
    %c2_140 = arith.constant 2 : index
    %223 = memref.load %arg1[%c2_140] : memref<5xf32, #tpu.memory_space<smem>>
    %224 = arith.subf %222, %77 : vector<32x128xf32>
    %225 = vector.broadcast %223 : f32 to vector<32x128xf32>
    %226 = arith.mulf %224, %225 : vector<32x128xf32>
    %227 = arith.addf %77, %226 : vector<32x128xf32>
    %cst_141 = arith.constant 1.000000e+00 : f32
    %228 = vector.broadcast %cst_141 : f32 to vector<32x128xf32>
    %229 = arith.cmpf oge, %227, %228 : vector<32x128xf32>
    %cst_142 = arith.constant 1.000000e+00 : f32
    %cst_143 = arith.constant 0.000000e+00 : f32
    %230 = vector.broadcast %cst_142 : f32 to vector<32x128xf32>
    %231 = vector.broadcast %cst_143 : f32 to vector<32x128xf32>
    %232 = arith.select %229, %230, %231 : vector<32x128xi1>, vector<32x128xf32>
    %cst_144 = arith.constant 0.000000e+00 : f32
    %233 = vector.broadcast %cst_144 : f32 to vector<32x128xf32>
    %234 = arith.select %229, %233, %227 : vector<32x128xi1>, vector<32x128xf32>
    %235 = arith.addf %232, %182 : vector<32x128xf32>
    %c31_i32_145 = arith.constant 31 : i32
    %236 = tpu.dynamic_rotate %235 by %c31_i32_145 dim 0 : vector<32x128xf32>, i32 -> vector<32x128xf32>
    %237 = arith.maximumf %235, %236 : vector<32x128xf32>
    %c120_i32_146 = arith.constant 120 : i32
    %238 = tpu.dynamic_rotate %237 by %c120_i32_146 dim 1 : vector<32x128xf32>, i32 -> vector<32x128xf32>
    %239 = arith.maximumf %237, %238 : vector<32x128xf32>
    %c0_147 = arith.constant 0 : index
    %c0_148 = arith.constant 0 : index
    %240 = vector.load %arg11[%c0_147, %c0_148] : memref<16x32xf32, #tpu.memory_space<vmem>>, vector<16x32xf32>
    %cst_149 = arith.constant dense<0.000000e+00> : vector<16x128xf32>
    %241 = tpu.matmul %240, %239, %cst_149 {dimension_numbers = #tpu.dot_dimension_numbers<[1], [0], [0], [1], [0, 0, 1, 1], [], []>} : vector<16x32xf32>, vector<32x128xf32>, vector<16x128xf32> -> vector<16x128xf32>
    %c0_150 = arith.constant 0 : index
    %c0_151 = arith.constant 0 : index
    %242 = vector.load %arg12[%c0_150, %c0_151] : memref<128x64xf32, #tpu.memory_space<vmem>>, vector<128x64xf32>
    %cst_152 = arith.constant dense<0.000000e+00> : vector<16x64xf32>
    %243 = tpu.matmul %241, %242, %cst_152 {dimension_numbers = #tpu.dot_dimension_numbers<[1], [0], [0], [1], [0, 0, 1, 1], [], []>} : vector<16x128xf32>, vector<128x64xf32>, vector<16x64xf32> -> vector<16x64xf32>
    %244 = arith.truncf %243 : vector<16x64xf32> to vector<16x64xbf16>
    %c1_153 = arith.constant 1 : index
    %c0_154 = arith.constant 0 : index
    %c0_155 = arith.constant 0 : index
    %245 = vector.load %arg18[%c1_153, %c0_154, %c0_155] : memref<3x64x64xbf16, #tpu.memory_space<vmem>>, vector<1x64x64xbf16>
    %246 = vector.shape_cast %245 : vector<1x64x64xbf16> to vector<64x64xbf16>
    %cst_156 = arith.constant dense<0.000000e+00> : vector<16x64xf32>
    %247 = tpu.matmul %244, %246, %cst_156 {dimension_numbers = #tpu.dot_dimension_numbers<[1], [0], [0], [1], [0, 0, 1, 1], [], []>} : vector<16x64xbf16>, vector<64x64xbf16>, vector<16x64xf32> -> vector<16x64xf32>
    %c0_157 = arith.constant 0 : index
    %c0_158 = arith.constant 0 : index
    %248 = vector.load %arg14[%c0_157, %c0_158] : memref<16x16xf32, #tpu.memory_space<vmem>>, vector<16x16xf32>
    %cst_159 = arith.constant dense<0.000000e+00> : vector<16x64xf32>
    %249 = tpu.matmul %248, %243, %cst_159 {dimension_numbers = #tpu.dot_dimension_numbers<[1], [0], [0], [1], [0, 0, 1, 1], [], []>} : vector<16x16xf32>, vector<16x64xf32>, vector<16x64xf32> -> vector<16x64xf32>
    %250 = arith.truncf %249 : vector<16x64xf32> to vector<16x64xbf16>
    %c0_160 = arith.constant 0 : index
    %c0_161 = arith.constant 0 : index
    %c0_162 = arith.constant 0 : index
    %251 = vector.load %arg18[%c0_160, %c0_161, %c0_162] : memref<3x64x64xbf16, #tpu.memory_space<vmem>>, vector<1x64x64xbf16>
    %252 = vector.shape_cast %251 : vector<1x64x64xbf16> to vector<64x64xbf16>
    %cst_163 = arith.constant dense<0.000000e+00> : vector<16x64xf32>
    %253 = tpu.matmul %250, %252, %cst_163 {dimension_numbers = #tpu.dot_dimension_numbers<[1], [0], [0], [1], [0, 0, 1, 1], [], []>} : vector<16x64xbf16>, vector<64x64xbf16>, vector<16x64xf32> -> vector<16x64xf32>
    %254 = arith.addf %247, %253 : vector<16x64xf32>
    %c0_164 = arith.constant 0 : index
    %c0_165 = arith.constant 0 : index
    %255 = vector.load %arg13[%c0_164, %c0_165] : memref<16x16xf32, #tpu.memory_space<vmem>>, vector<16x16xf32>
    %cst_166 = arith.constant dense<0.000000e+00> : vector<16x64xf32>
    %256 = tpu.matmul %255, %243, %cst_166 {dimension_numbers = #tpu.dot_dimension_numbers<[1], [0], [0], [1], [0, 0, 1, 1], [], []>} : vector<16x16xf32>, vector<16x64xf32>, vector<16x64xf32> -> vector<16x64xf32>
    %257 = arith.truncf %256 : vector<16x64xf32> to vector<16x64xbf16>
    %c2_167 = arith.constant 2 : index
    %c0_168 = arith.constant 0 : index
    %c0_169 = arith.constant 0 : index
    %258 = vector.load %arg18[%c2_167, %c0_168, %c0_169] : memref<3x64x64xbf16, #tpu.memory_space<vmem>>, vector<1x64x64xbf16>
    %259 = vector.shape_cast %258 : vector<1x64x64xbf16> to vector<64x64xbf16>
    %cst_170 = arith.constant dense<0.000000e+00> : vector<16x64xf32>
    %260 = tpu.matmul %257, %259, %cst_170 {dimension_numbers = #tpu.dot_dimension_numbers<[1], [0], [0], [1], [0, 0, 1, 1], [], []>} : vector<16x64xbf16>, vector<64x64xbf16>, vector<16x64xf32> -> vector<16x64xf32>
    %261 = arith.addf %254, %260 : vector<16x64xf32>
    %c0_171 = arith.constant 0 : index
    %c0_172 = arith.constant 0 : index
    %262 = vector.load %arg19[%c0_171, %c0_172] : memref<1x64xf32, #tpu.memory_space<vmem>>, vector<1x64xf32>
    %263 = vector.broadcast %262 : vector<1x64xf32> to vector<16x64xf32>
    %264 = arith.addf %261, %263 : vector<16x64xf32>
    %c3_173 = arith.constant 3 : index
    %265 = memref.load %arg1[%c3_173] : memref<5xf32, #tpu.memory_space<smem>>
    %266 = arith.subf %264, %119 : vector<16x64xf32>
    %267 = vector.broadcast %265 : f32 to vector<16x64xf32>
    %268 = arith.mulf %266, %267 : vector<16x64xf32>
    %269 = arith.addf %119, %268 : vector<16x64xf32>
    %cst_174 = arith.constant 1.000000e+00 : f32
    %270 = vector.broadcast %cst_174 : f32 to vector<16x64xf32>
    %271 = arith.cmpf oge, %269, %270 : vector<16x64xf32>
    %cst_175 = arith.constant 1.000000e+00 : f32
    %cst_176 = arith.constant 0.000000e+00 : f32
    %272 = vector.broadcast %cst_175 : f32 to vector<16x64xf32>
    %273 = vector.broadcast %cst_176 : f32 to vector<16x64xf32>
    %274 = arith.select %271, %272, %273 : vector<16x64xi1>, vector<16x64xf32>
    %cst_177 = arith.constant 0.000000e+00 : f32
    %275 = vector.broadcast %cst_177 : f32 to vector<16x64xf32>
    %276 = arith.select %271, %275, %269 : vector<16x64xi1>, vector<16x64xf32>
    %277 = arith.truncf %274 : vector<16x64xf32> to vector<16x64xbf16>
    %c1_178 = arith.constant 1 : index
    %c0_179 = arith.constant 0 : index
    %c0_180 = arith.constant 0 : index
    %278 = vector.load %arg20[%c1_178, %c0_179, %c0_180] : memref<3x64x64xbf16, #tpu.memory_space<vmem>>, vector<1x64x64xbf16>
    %279 = vector.shape_cast %278 : vector<1x64x64xbf16> to vector<64x64xbf16>
    %cst_181 = arith.constant dense<0.000000e+00> : vector<16x64xf32>
    %280 = tpu.matmul %277, %279, %cst_181 {dimension_numbers = #tpu.dot_dimension_numbers<[1], [0], [0], [1], [0, 0, 1, 1], [], []>} : vector<16x64xbf16>, vector<64x64xbf16>, vector<16x64xf32> -> vector<16x64xf32>
    %c0_182 = arith.constant 0 : index
    %c0_183 = arith.constant 0 : index
    %281 = vector.load %arg14[%c0_182, %c0_183] : memref<16x16xf32, #tpu.memory_space<vmem>>, vector<16x16xf32>
    %cst_184 = arith.constant dense<0.000000e+00> : vector<16x64xf32>
    %282 = tpu.matmul %281, %274, %cst_184 {dimension_numbers = #tpu.dot_dimension_numbers<[1], [0], [0], [1], [0, 0, 1, 1], [], []>} : vector<16x16xf32>, vector<16x64xf32>, vector<16x64xf32> -> vector<16x64xf32>
    %283 = arith.truncf %282 : vector<16x64xf32> to vector<16x64xbf16>
    %c0_185 = arith.constant 0 : index
    %c0_186 = arith.constant 0 : index
    %c0_187 = arith.constant 0 : index
    %284 = vector.load %arg20[%c0_185, %c0_186, %c0_187] : memref<3x64x64xbf16, #tpu.memory_space<vmem>>, vector<1x64x64xbf16>
    %285 = vector.shape_cast %284 : vector<1x64x64xbf16> to vector<64x64xbf16>
    %cst_188 = arith.constant dense<0.000000e+00> : vector<16x64xf32>
    %286 = tpu.matmul %283, %285, %cst_188 {dimension_numbers = #tpu.dot_dimension_numbers<[1], [0], [0], [1], [0, 0, 1, 1], [], []>} : vector<16x64xbf16>, vector<64x64xbf16>, vector<16x64xf32> -> vector<16x64xf32>
    %287 = arith.addf %280, %286 : vector<16x64xf32>
    %c0_189 = arith.constant 0 : index
    %c0_190 = arith.constant 0 : index
    %288 = vector.load %arg13[%c0_189, %c0_190] : memref<16x16xf32, #tpu.memory_space<vmem>>, vector<16x16xf32>
    %cst_191 = arith.constant dense<0.000000e+00> : vector<16x64xf32>
    %289 = tpu.matmul %288, %274, %cst_191 {dimension_numbers = #tpu.dot_dimension_numbers<[1], [0], [0], [1], [0, 0, 1, 1], [], []>} : vector<16x16xf32>, vector<16x64xf32>, vector<16x64xf32> -> vector<16x64xf32>
    %290 = arith.truncf %289 : vector<16x64xf32> to vector<16x64xbf16>
    %c2_192 = arith.constant 2 : index
    %c0_193 = arith.constant 0 : index
    %c0_194 = arith.constant 0 : index
    %291 = vector.load %arg20[%c2_192, %c0_193, %c0_194] : memref<3x64x64xbf16, #tpu.memory_space<vmem>>, vector<1x64x64xbf16>
    %292 = vector.shape_cast %291 : vector<1x64x64xbf16> to vector<64x64xbf16>
    %cst_195 = arith.constant dense<0.000000e+00> : vector<16x64xf32>
    %293 = tpu.matmul %290, %292, %cst_195 {dimension_numbers = #tpu.dot_dimension_numbers<[1], [0], [0], [1], [0, 0, 1, 1], [], []>} : vector<16x64xbf16>, vector<64x64xbf16>, vector<16x64xf32> -> vector<16x64xf32>
    %294 = arith.addf %287, %293 : vector<16x64xf32>
    %c0_196 = arith.constant 0 : index
    %c0_197 = arith.constant 0 : index
    %295 = vector.load %arg21[%c0_196, %c0_197] : memref<1x64xf32, #tpu.memory_space<vmem>>, vector<1x64xf32>
    %296 = vector.broadcast %295 : vector<1x64xf32> to vector<16x64xf32>
    %297 = arith.addf %294, %296 : vector<16x64xf32>
    %c4_198 = arith.constant 4 : index
    %298 = memref.load %arg1[%c4_198] : memref<5xf32, #tpu.memory_space<smem>>
    %299 = arith.subf %297, %152 : vector<16x64xf32>
    %300 = vector.broadcast %298 : f32 to vector<16x64xf32>
    %301 = arith.mulf %299, %300 : vector<16x64xf32>
    %302 = arith.addf %152, %301 : vector<16x64xf32>
    %cst_199 = arith.constant 1.000000e+00 : f32
    %303 = vector.broadcast %cst_199 : f32 to vector<16x64xf32>
    %304 = arith.cmpf oge, %302, %303 : vector<16x64xf32>
    %cst_200 = arith.constant 1.000000e+00 : f32
    %cst_201 = arith.constant 0.000000e+00 : f32
    %305 = vector.broadcast %cst_200 : f32 to vector<16x64xf32>
    %306 = vector.broadcast %cst_201 : f32 to vector<16x64xf32>
    %307 = arith.select %304, %305, %306 : vector<16x64xi1>, vector<16x64xf32>
    %cst_202 = arith.constant 0.000000e+00 : f32
    %308 = vector.broadcast %cst_202 : f32 to vector<16x64xf32>
    %309 = arith.select %304, %308, %302 : vector<16x64xi1>, vector<16x64xf32>
    %310 = arith.addf %307, %243 : vector<16x64xf32>
    %c0_203 = arith.constant 0 : index
    %c0_204 = arith.constant 0 : index
    %311 = vector.load %arg13[%c0_203, %c0_204] : memref<16x16xf32, #tpu.memory_space<vmem>>, vector<16x16xf32>
    %cst_205 = arith.constant dense<0.000000e+00> : vector<16x64xf32>
    %312 = tpu.matmul %311, %310, %cst_205 {dimension_numbers = #tpu.dot_dimension_numbers<[1], [0], [0], [1], [0, 0, 1, 1], [], []>} : vector<16x16xf32>, vector<16x64xf32>, vector<16x64xf32> -> vector<16x64xf32>
    %313 = arith.maximumf %310, %312 : vector<16x64xf32>
    %c0_206 = arith.constant 0 : index
    %c0_207 = arith.constant 0 : index
    %314 = vector.load %arg15[%c0_206, %c0_207] : memref<64x64xf32, #tpu.memory_space<vmem>>, vector<64x64xf32>
    %cst_208 = arith.constant dense<0.000000e+00> : vector<16x64xf32>
    %315 = tpu.matmul %313, %314, %cst_208 {dimension_numbers = #tpu.dot_dimension_numbers<[1], [0], [0], [1], [0, 0, 1, 1], [], []>} : vector<16x64xf32>, vector<64x64xf32>, vector<16x64xf32> -> vector<16x64xf32>
    %316 = arith.maximumf %313, %315 : vector<16x64xf32>
    %c0_209 = arith.constant 0 : index
    %c0_210 = arith.constant 0 : index
    %317 = vector.load %arg16[%c0_209, %c0_210] : memref<8x16xf32, #tpu.memory_space<vmem>>, vector<8x16xf32>
    %cst_211 = arith.constant dense<0.000000e+00> : vector<8x64xf32>
    %318 = tpu.matmul %317, %316, %cst_211 {dimension_numbers = #tpu.dot_dimension_numbers<[1], [0], [0], [1], [0, 0, 1, 1], [], []>} : vector<8x16xf32>, vector<16x64xf32>, vector<8x64xf32> -> vector<8x64xf32>
    %c0_212 = arith.constant 0 : index
    %c0_213 = arith.constant 0 : index
    %319 = vector.load %arg17[%c0_212, %c0_213] : memref<64x32xf32, #tpu.memory_space<vmem>>, vector<64x32xf32>
    %cst_214 = arith.constant dense<0.000000e+00> : vector<8x32xf32>
    %320 = tpu.matmul %318, %319, %cst_214 {dimension_numbers = #tpu.dot_dimension_numbers<[1], [0], [0], [1], [0, 0, 1, 1], [], []>} : vector<8x64xf32>, vector<64x32xf32>, vector<8x32xf32> -> vector<8x32xf32>
    %321 = arith.addf %164, %320 : vector<8x32xf32>
    %c2_215 = arith.constant 2 : index
    %c0_216 = arith.constant 0 : index
    %c0_217 = arith.constant 0 : index
    %322 = vector.load %arg2[%c2_215, %c0_216, %c0_217] : memref<4x32x32xf32, #tpu.memory_space<vmem>>, vector<1x32x32xf32>
    %323 = vector.shape_cast %322 : vector<1x32x32xf32> to vector<32x32xf32>
    %324 = arith.truncf %323 : vector<32x32xf32> to vector<32x32xbf16>
    %c0_218 = arith.constant 0 : index
    %c0_219 = arith.constant 0 : index
    %325 = vector.load %arg5[%c0_218, %c0_219] : memref<32x128xbf16, #tpu.memory_space<vmem>>, vector<32x128xbf16>
    %cst_220 = arith.constant dense<0.000000e+00> : vector<32x128xf32>
    %326 = tpu.matmul %324, %325, %cst_220 {dimension_numbers = #tpu.dot_dimension_numbers<[1], [0], [0], [1], [0, 0, 1, 1], [], []>} : vector<32x32xbf16>, vector<32x128xbf16>, vector<32x128xf32> -> vector<32x128xf32>
    %c0_221 = arith.constant 0 : index
    %c0_222 = arith.constant 0 : index
    %327 = vector.load %arg6[%c0_221, %c0_222] : memref<1x128xf32, #tpu.memory_space<vmem>>, vector<1x128xf32>
    %328 = vector.broadcast %327 : vector<1x128xf32> to vector<32x128xf32>
    %329 = arith.addf %326, %328 : vector<32x128xf32>
    %c0_223 = arith.constant 0 : index
    %330 = memref.load %arg1[%c0_223] : memref<5xf32, #tpu.memory_space<smem>>
    %331 = arith.subf %329, %184 : vector<32x128xf32>
    %332 = vector.broadcast %330 : f32 to vector<32x128xf32>
    %333 = arith.mulf %331, %332 : vector<32x128xf32>
    %334 = arith.addf %184, %333 : vector<32x128xf32>
    %cst_224 = arith.constant 1.000000e+00 : f32
    %335 = vector.broadcast %cst_224 : f32 to vector<32x128xf32>
    %336 = arith.cmpf oge, %334, %335 : vector<32x128xf32>
    %cst_225 = arith.constant 1.000000e+00 : f32
    %cst_226 = arith.constant 0.000000e+00 : f32
    %337 = vector.broadcast %cst_225 : f32 to vector<32x128xf32>
    %338 = vector.broadcast %cst_226 : f32 to vector<32x128xf32>
    %339 = arith.select %336, %337, %338 : vector<32x128xi1>, vector<32x128xf32>
    %cst_227 = arith.constant 0.000000e+00 : f32
    %340 = vector.broadcast %cst_227 : f32 to vector<32x128xf32>
    %341 = arith.select %336, %340, %334 : vector<32x128xi1>, vector<32x128xf32>
    %c1_i32_228 = arith.constant 1 : i32
    %342 = tpu.dynamic_rotate %339 by %c1_i32_228 dim 0 : vector<32x128xf32>, i32 -> vector<32x128xf32>
    %343 = vector.broadcast %0 : vector<32x1xf32> to vector<32x128xf32>
    %344 = arith.mulf %342, %343 : vector<32x128xf32>
    %c31_i32_229 = arith.constant 31 : i32
    %345 = tpu.dynamic_rotate %339 by %c31_i32_229 dim 0 : vector<32x128xf32>, i32 -> vector<32x128xf32>
    %346 = vector.broadcast %1 : vector<32x1xf32> to vector<32x128xf32>
    %347 = arith.mulf %345, %346 : vector<32x128xf32>
    %348 = tpu.concatenate %344, %339, %347 in 1 : vector<32x128xf32>, vector<32x128xf32>, vector<32x128xf32> -> vector<32x384xf32>
    %349 = arith.truncf %348 : vector<32x384xf32> to vector<32x384xbf16>
    %c0_230 = arith.constant 0 : index
    %c0_231 = arith.constant 0 : index
    %350 = vector.load %arg7[%c0_230, %c0_231] : memref<384x128xbf16, #tpu.memory_space<vmem>>, vector<384x128xbf16>
    %cst_232 = arith.constant dense<0.000000e+00> : vector<32x128xf32>
    %351 = tpu.matmul %349, %350, %cst_232 {dimension_numbers = #tpu.dot_dimension_numbers<[1], [0], [0], [1], [0, 0, 1, 1], [], []>} : vector<32x384xbf16>, vector<384x128xbf16>, vector<32x128xf32> -> vector<32x128xf32>
    %c0_233 = arith.constant 0 : index
    %c0_234 = arith.constant 0 : index
    %352 = vector.load %arg8[%c0_233, %c0_234] : memref<1x128xf32, #tpu.memory_space<vmem>>, vector<1x128xf32>
    %353 = vector.broadcast %352 : vector<1x128xf32> to vector<32x128xf32>
    %354 = arith.addf %351, %353 : vector<32x128xf32>
    %c1_235 = arith.constant 1 : index
    %355 = memref.load %arg1[%c1_235] : memref<5xf32, #tpu.memory_space<smem>>
    %356 = arith.subf %354, %209 : vector<32x128xf32>
    %357 = vector.broadcast %355 : f32 to vector<32x128xf32>
    %358 = arith.mulf %356, %357 : vector<32x128xf32>
    %359 = arith.addf %209, %358 : vector<32x128xf32>
    %cst_236 = arith.constant 1.000000e+00 : f32
    %360 = vector.broadcast %cst_236 : f32 to vector<32x128xf32>
    %361 = arith.cmpf oge, %359, %360 : vector<32x128xf32>
    %cst_237 = arith.constant 1.000000e+00 : f32
    %cst_238 = arith.constant 0.000000e+00 : f32
    %362 = vector.broadcast %cst_237 : f32 to vector<32x128xf32>
    %363 = vector.broadcast %cst_238 : f32 to vector<32x128xf32>
    %364 = arith.select %361, %362, %363 : vector<32x128xi1>, vector<32x128xf32>
    %cst_239 = arith.constant 0.000000e+00 : f32
    %365 = vector.broadcast %cst_239 : f32 to vector<32x128xf32>
    %366 = arith.select %361, %365, %359 : vector<32x128xi1>, vector<32x128xf32>
    %c1_i32_240 = arith.constant 1 : i32
    %367 = tpu.dynamic_rotate %364 by %c1_i32_240 dim 0 : vector<32x128xf32>, i32 -> vector<32x128xf32>
    %368 = vector.broadcast %0 : vector<32x1xf32> to vector<32x128xf32>
    %369 = arith.mulf %367, %368 : vector<32x128xf32>
    %c31_i32_241 = arith.constant 31 : i32
    %370 = tpu.dynamic_rotate %364 by %c31_i32_241 dim 0 : vector<32x128xf32>, i32 -> vector<32x128xf32>
    %371 = vector.broadcast %1 : vector<32x1xf32> to vector<32x128xf32>
    %372 = arith.mulf %370, %371 : vector<32x128xf32>
    %373 = tpu.concatenate %369, %364, %372 in 1 : vector<32x128xf32>, vector<32x128xf32>, vector<32x128xf32> -> vector<32x384xf32>
    %374 = arith.truncf %373 : vector<32x384xf32> to vector<32x384xbf16>
    %c0_242 = arith.constant 0 : index
    %c0_243 = arith.constant 0 : index
    %375 = vector.load %arg9[%c0_242, %c0_243] : memref<384x128xbf16, #tpu.memory_space<vmem>>, vector<384x128xbf16>
    %cst_244 = arith.constant dense<0.000000e+00> : vector<32x128xf32>
    %376 = tpu.matmul %374, %375, %cst_244 {dimension_numbers = #tpu.dot_dimension_numbers<[1], [0], [0], [1], [0, 0, 1, 1], [], []>} : vector<32x384xbf16>, vector<384x128xbf16>, vector<32x128xf32> -> vector<32x128xf32>
    %c0_245 = arith.constant 0 : index
    %c0_246 = arith.constant 0 : index
    %377 = vector.load %arg10[%c0_245, %c0_246] : memref<1x128xf32, #tpu.memory_space<vmem>>, vector<1x128xf32>
    %378 = vector.broadcast %377 : vector<1x128xf32> to vector<32x128xf32>
    %379 = arith.addf %376, %378 : vector<32x128xf32>
    %c2_247 = arith.constant 2 : index
    %380 = memref.load %arg1[%c2_247] : memref<5xf32, #tpu.memory_space<smem>>
    %381 = arith.subf %379, %234 : vector<32x128xf32>
    %382 = vector.broadcast %380 : f32 to vector<32x128xf32>
    %383 = arith.mulf %381, %382 : vector<32x128xf32>
    %384 = arith.addf %234, %383 : vector<32x128xf32>
    %cst_248 = arith.constant 1.000000e+00 : f32
    %385 = vector.broadcast %cst_248 : f32 to vector<32x128xf32>
    %386 = arith.cmpf oge, %384, %385 : vector<32x128xf32>
    %cst_249 = arith.constant 1.000000e+00 : f32
    %cst_250 = arith.constant 0.000000e+00 : f32
    %387 = vector.broadcast %cst_249 : f32 to vector<32x128xf32>
    %388 = vector.broadcast %cst_250 : f32 to vector<32x128xf32>
    %389 = arith.select %386, %387, %388 : vector<32x128xi1>, vector<32x128xf32>
    %cst_251 = arith.constant 0.000000e+00 : f32
    %390 = vector.broadcast %cst_251 : f32 to vector<32x128xf32>
    %391 = arith.select %386, %390, %384 : vector<32x128xi1>, vector<32x128xf32>
    %392 = arith.addf %389, %339 : vector<32x128xf32>
    %c31_i32_252 = arith.constant 31 : i32
    %393 = tpu.dynamic_rotate %392 by %c31_i32_252 dim 0 : vector<32x128xf32>, i32 -> vector<32x128xf32>
    %394 = arith.maximumf %392, %393 : vector<32x128xf32>
    %c120_i32_253 = arith.constant 120 : i32
    %395 = tpu.dynamic_rotate %394 by %c120_i32_253 dim 1 : vector<32x128xf32>, i32 -> vector<32x128xf32>
    %396 = arith.maximumf %394, %395 : vector<32x128xf32>
    %c0_254 = arith.constant 0 : index
    %c0_255 = arith.constant 0 : index
    %397 = vector.load %arg11[%c0_254, %c0_255] : memref<16x32xf32, #tpu.memory_space<vmem>>, vector<16x32xf32>
    %cst_256 = arith.constant dense<0.000000e+00> : vector<16x128xf32>
    %398 = tpu.matmul %397, %396, %cst_256 {dimension_numbers = #tpu.dot_dimension_numbers<[1], [0], [0], [1], [0, 0, 1, 1], [], []>} : vector<16x32xf32>, vector<32x128xf32>, vector<16x128xf32> -> vector<16x128xf32>
    %c0_257 = arith.constant 0 : index
    %c0_258 = arith.constant 0 : index
    %399 = vector.load %arg12[%c0_257, %c0_258] : memref<128x64xf32, #tpu.memory_space<vmem>>, vector<128x64xf32>
    %cst_259 = arith.constant dense<0.000000e+00> : vector<16x64xf32>
    %400 = tpu.matmul %398, %399, %cst_259 {dimension_numbers = #tpu.dot_dimension_numbers<[1], [0], [0], [1], [0, 0, 1, 1], [], []>} : vector<16x128xf32>, vector<128x64xf32>, vector<16x64xf32> -> vector<16x64xf32>
    %401 = arith.truncf %400 : vector<16x64xf32> to vector<16x64xbf16>
    %c1_260 = arith.constant 1 : index
    %c0_261 = arith.constant 0 : index
    %c0_262 = arith.constant 0 : index
    %402 = vector.load %arg18[%c1_260, %c0_261, %c0_262] : memref<3x64x64xbf16, #tpu.memory_space<vmem>>, vector<1x64x64xbf16>
    %403 = vector.shape_cast %402 : vector<1x64x64xbf16> to vector<64x64xbf16>
    %cst_263 = arith.constant dense<0.000000e+00> : vector<16x64xf32>
    %404 = tpu.matmul %401, %403, %cst_263 {dimension_numbers = #tpu.dot_dimension_numbers<[1], [0], [0], [1], [0, 0, 1, 1], [], []>} : vector<16x64xbf16>, vector<64x64xbf16>, vector<16x64xf32> -> vector<16x64xf32>
    %c0_264 = arith.constant 0 : index
    %c0_265 = arith.constant 0 : index
    %405 = vector.load %arg14[%c0_264, %c0_265] : memref<16x16xf32, #tpu.memory_space<vmem>>, vector<16x16xf32>
    %cst_266 = arith.constant dense<0.000000e+00> : vector<16x64xf32>
    %406 = tpu.matmul %405, %400, %cst_266 {dimension_numbers = #tpu.dot_dimension_numbers<[1], [0], [0], [1], [0, 0, 1, 1], [], []>} : vector<16x16xf32>, vector<16x64xf32>, vector<16x64xf32> -> vector<16x64xf32>
    %407 = arith.truncf %406 : vector<16x64xf32> to vector<16x64xbf16>
    %c0_267 = arith.constant 0 : index
    %c0_268 = arith.constant 0 : index
    %c0_269 = arith.constant 0 : index
    %408 = vector.load %arg18[%c0_267, %c0_268, %c0_269] : memref<3x64x64xbf16, #tpu.memory_space<vmem>>, vector<1x64x64xbf16>
    %409 = vector.shape_cast %408 : vector<1x64x64xbf16> to vector<64x64xbf16>
    %cst_270 = arith.constant dense<0.000000e+00> : vector<16x64xf32>
    %410 = tpu.matmul %407, %409, %cst_270 {dimension_numbers = #tpu.dot_dimension_numbers<[1], [0], [0], [1], [0, 0, 1, 1], [], []>} : vector<16x64xbf16>, vector<64x64xbf16>, vector<16x64xf32> -> vector<16x64xf32>
    %411 = arith.addf %404, %410 : vector<16x64xf32>
    %c0_271 = arith.constant 0 : index
    %c0_272 = arith.constant 0 : index
    %412 = vector.load %arg13[%c0_271, %c0_272] : memref<16x16xf32, #tpu.memory_space<vmem>>, vector<16x16xf32>
    %cst_273 = arith.constant dense<0.000000e+00> : vector<16x64xf32>
    %413 = tpu.matmul %412, %400, %cst_273 {dimension_numbers = #tpu.dot_dimension_numbers<[1], [0], [0], [1], [0, 0, 1, 1], [], []>} : vector<16x16xf32>, vector<16x64xf32>, vector<16x64xf32> -> vector<16x64xf32>
    %414 = arith.truncf %413 : vector<16x64xf32> to vector<16x64xbf16>
    %c2_274 = arith.constant 2 : index
    %c0_275 = arith.constant 0 : index
    %c0_276 = arith.constant 0 : index
    %415 = vector.load %arg18[%c2_274, %c0_275, %c0_276] : memref<3x64x64xbf16, #tpu.memory_space<vmem>>, vector<1x64x64xbf16>
    %416 = vector.shape_cast %415 : vector<1x64x64xbf16> to vector<64x64xbf16>
    %cst_277 = arith.constant dense<0.000000e+00> : vector<16x64xf32>
    %417 = tpu.matmul %414, %416, %cst_277 {dimension_numbers = #tpu.dot_dimension_numbers<[1], [0], [0], [1], [0, 0, 1, 1], [], []>} : vector<16x64xbf16>, vector<64x64xbf16>, vector<16x64xf32> -> vector<16x64xf32>
    %418 = arith.addf %411, %417 : vector<16x64xf32>
    %c0_278 = arith.constant 0 : index
    %c0_279 = arith.constant 0 : index
    %419 = vector.load %arg19[%c0_278, %c0_279] : memref<1x64xf32, #tpu.memory_space<vmem>>, vector<1x64xf32>
    %420 = vector.broadcast %419 : vector<1x64xf32> to vector<16x64xf32>
    %421 = arith.addf %418, %420 : vector<16x64xf32>
    %c3_280 = arith.constant 3 : index
    %422 = memref.load %arg1[%c3_280] : memref<5xf32, #tpu.memory_space<smem>>
    %423 = arith.subf %421, %276 : vector<16x64xf32>
    %424 = vector.broadcast %422 : f32 to vector<16x64xf32>
    %425 = arith.mulf %423, %424 : vector<16x64xf32>
    %426 = arith.addf %276, %425 : vector<16x64xf32>
    %cst_281 = arith.constant 1.000000e+00 : f32
    %427 = vector.broadcast %cst_281 : f32 to vector<16x64xf32>
    %428 = arith.cmpf oge, %426, %427 : vector<16x64xf32>
    %cst_282 = arith.constant 1.000000e+00 : f32
    %cst_283 = arith.constant 0.000000e+00 : f32
    %429 = vector.broadcast %cst_282 : f32 to vector<16x64xf32>
    %430 = vector.broadcast %cst_283 : f32 to vector<16x64xf32>
    %431 = arith.select %428, %429, %430 : vector<16x64xi1>, vector<16x64xf32>
    %cst_284 = arith.constant 0.000000e+00 : f32
    %432 = vector.broadcast %cst_284 : f32 to vector<16x64xf32>
    %433 = arith.select %428, %432, %426 : vector<16x64xi1>, vector<16x64xf32>
    %434 = arith.truncf %431 : vector<16x64xf32> to vector<16x64xbf16>
    %c1_285 = arith.constant 1 : index
    %c0_286 = arith.constant 0 : index
    %c0_287 = arith.constant 0 : index
    %435 = vector.load %arg20[%c1_285, %c0_286, %c0_287] : memref<3x64x64xbf16, #tpu.memory_space<vmem>>, vector<1x64x64xbf16>
    %436 = vector.shape_cast %435 : vector<1x64x64xbf16> to vector<64x64xbf16>
    %cst_288 = arith.constant dense<0.000000e+00> : vector<16x64xf32>
    %437 = tpu.matmul %434, %436, %cst_288 {dimension_numbers = #tpu.dot_dimension_numbers<[1], [0], [0], [1], [0, 0, 1, 1], [], []>} : vector<16x64xbf16>, vector<64x64xbf16>, vector<16x64xf32> -> vector<16x64xf32>
    %c0_289 = arith.constant 0 : index
    %c0_290 = arith.constant 0 : index
    %438 = vector.load %arg14[%c0_289, %c0_290] : memref<16x16xf32, #tpu.memory_space<vmem>>, vector<16x16xf32>
    %cst_291 = arith.constant dense<0.000000e+00> : vector<16x64xf32>
    %439 = tpu.matmul %438, %431, %cst_291 {dimension_numbers = #tpu.dot_dimension_numbers<[1], [0], [0], [1], [0, 0, 1, 1], [], []>} : vector<16x16xf32>, vector<16x64xf32>, vector<16x64xf32> -> vector<16x64xf32>
    %440 = arith.truncf %439 : vector<16x64xf32> to vector<16x64xbf16>
    %c0_292 = arith.constant 0 : index
    %c0_293 = arith.constant 0 : index
    %c0_294 = arith.constant 0 : index
    %441 = vector.load %arg20[%c0_292, %c0_293, %c0_294] : memref<3x64x64xbf16, #tpu.memory_space<vmem>>, vector<1x64x64xbf16>
    %442 = vector.shape_cast %441 : vector<1x64x64xbf16> to vector<64x64xbf16>
    %cst_295 = arith.constant dense<0.000000e+00> : vector<16x64xf32>
    %443 = tpu.matmul %440, %442, %cst_295 {dimension_numbers = #tpu.dot_dimension_numbers<[1], [0], [0], [1], [0, 0, 1, 1], [], []>} : vector<16x64xbf16>, vector<64x64xbf16>, vector<16x64xf32> -> vector<16x64xf32>
    %444 = arith.addf %437, %443 : vector<16x64xf32>
    %c0_296 = arith.constant 0 : index
    %c0_297 = arith.constant 0 : index
    %445 = vector.load %arg13[%c0_296, %c0_297] : memref<16x16xf32, #tpu.memory_space<vmem>>, vector<16x16xf32>
    %cst_298 = arith.constant dense<0.000000e+00> : vector<16x64xf32>
    %446 = tpu.matmul %445, %431, %cst_298 {dimension_numbers = #tpu.dot_dimension_numbers<[1], [0], [0], [1], [0, 0, 1, 1], [], []>} : vector<16x16xf32>, vector<16x64xf32>, vector<16x64xf32> -> vector<16x64xf32>
    %447 = arith.truncf %446 : vector<16x64xf32> to vector<16x64xbf16>
    %c2_299 = arith.constant 2 : index
    %c0_300 = arith.constant 0 : index
    %c0_301 = arith.constant 0 : index
    %448 = vector.load %arg20[%c2_299, %c0_300, %c0_301] : memref<3x64x64xbf16, #tpu.memory_space<vmem>>, vector<1x64x64xbf16>
    %449 = vector.shape_cast %448 : vector<1x64x64xbf16> to vector<64x64xbf16>
    %cst_302 = arith.constant dense<0.000000e+00> : vector<16x64xf32>
    %450 = tpu.matmul %447, %449, %cst_302 {dimension_numbers = #tpu.dot_dimension_numbers<[1], [0], [0], [1], [0, 0, 1, 1], [], []>} : vector<16x64xbf16>, vector<64x64xbf16>, vector<16x64xf32> -> vector<16x64xf32>
    %451 = arith.addf %444, %450 : vector<16x64xf32>
    %c0_303 = arith.constant 0 : index
    %c0_304 = arith.constant 0 : index
    %452 = vector.load %arg21[%c0_303, %c0_304] : memref<1x64xf32, #tpu.memory_space<vmem>>, vector<1x64xf32>
    %453 = vector.broadcast %452 : vector<1x64xf32> to vector<16x64xf32>
    %454 = arith.addf %451, %453 : vector<16x64xf32>
    %c4_305 = arith.constant 4 : index
    %455 = memref.load %arg1[%c4_305] : memref<5xf32, #tpu.memory_space<smem>>
    %456 = arith.subf %454, %309 : vector<16x64xf32>
    %457 = vector.broadcast %455 : f32 to vector<16x64xf32>
    %458 = arith.mulf %456, %457 : vector<16x64xf32>
    %459 = arith.addf %309, %458 : vector<16x64xf32>
    %cst_306 = arith.constant 1.000000e+00 : f32
    %460 = vector.broadcast %cst_306 : f32 to vector<16x64xf32>
    %461 = arith.cmpf oge, %459, %460 : vector<16x64xf32>
    %cst_307 = arith.constant 1.000000e+00 : f32
    %cst_308 = arith.constant 0.000000e+00 : f32
    %462 = vector.broadcast %cst_307 : f32 to vector<16x64xf32>
    %463 = vector.broadcast %cst_308 : f32 to vector<16x64xf32>
    %464 = arith.select %461, %462, %463 : vector<16x64xi1>, vector<16x64xf32>
    %cst_309 = arith.constant 0.000000e+00 : f32
    %465 = vector.broadcast %cst_309 : f32 to vector<16x64xf32>
    %466 = arith.select %461, %465, %459 : vector<16x64xi1>, vector<16x64xf32>
    %467 = arith.addf %464, %400 : vector<16x64xf32>
    %c0_310 = arith.constant 0 : index
    %c0_311 = arith.constant 0 : index
    %468 = vector.load %arg13[%c0_310, %c0_311] : memref<16x16xf32, #tpu.memory_space<vmem>>, vector<16x16xf32>
    %cst_312 = arith.constant dense<0.000000e+00> : vector<16x64xf32>
    %469 = tpu.matmul %468, %467, %cst_312 {dimension_numbers = #tpu.dot_dimension_numbers<[1], [0], [0], [1], [0, 0, 1, 1], [], []>} : vector<16x16xf32>, vector<16x64xf32>, vector<16x64xf32> -> vector<16x64xf32>
    %470 = arith.maximumf %467, %469 : vector<16x64xf32>
    %c0_313 = arith.constant 0 : index
    %c0_314 = arith.constant 0 : index
    %471 = vector.load %arg15[%c0_313, %c0_314] : memref<64x64xf32, #tpu.memory_space<vmem>>, vector<64x64xf32>
    %cst_315 = arith.constant dense<0.000000e+00> : vector<16x64xf32>
    %472 = tpu.matmul %470, %471, %cst_315 {dimension_numbers = #tpu.dot_dimension_numbers<[1], [0], [0], [1], [0, 0, 1, 1], [], []>} : vector<16x64xf32>, vector<64x64xf32>, vector<16x64xf32> -> vector<16x64xf32>
    %473 = arith.maximumf %470, %472 : vector<16x64xf32>
    %c0_316 = arith.constant 0 : index
    %c0_317 = arith.constant 0 : index
    %474 = vector.load %arg16[%c0_316, %c0_317] : memref<8x16xf32, #tpu.memory_space<vmem>>, vector<8x16xf32>
    %cst_318 = arith.constant dense<0.000000e+00> : vector<8x64xf32>
    %475 = tpu.matmul %474, %473, %cst_318 {dimension_numbers = #tpu.dot_dimension_numbers<[1], [0], [0], [1], [0, 0, 1, 1], [], []>} : vector<8x16xf32>, vector<16x64xf32>, vector<8x64xf32> -> vector<8x64xf32>
    %c0_319 = arith.constant 0 : index
    %c0_320 = arith.constant 0 : index
    %476 = vector.load %arg17[%c0_319, %c0_320] : memref<64x32xf32, #tpu.memory_space<vmem>>, vector<64x32xf32>
    %cst_321 = arith.constant dense<0.000000e+00> : vector<8x32xf32>
    %477 = tpu.matmul %475, %476, %cst_321 {dimension_numbers = #tpu.dot_dimension_numbers<[1], [0], [0], [1], [0, 0, 1, 1], [], []>} : vector<8x64xf32>, vector<64x32xf32>, vector<8x32xf32> -> vector<8x32xf32>
    %478 = arith.addf %321, %477 : vector<8x32xf32>
    %c3_322 = arith.constant 3 : index
    %c0_323 = arith.constant 0 : index
    %c0_324 = arith.constant 0 : index
    %479 = vector.load %arg2[%c3_322, %c0_323, %c0_324] : memref<4x32x32xf32, #tpu.memory_space<vmem>>, vector<1x32x32xf32>
    %480 = vector.shape_cast %479 : vector<1x32x32xf32> to vector<32x32xf32>
    %481 = arith.truncf %480 : vector<32x32xf32> to vector<32x32xbf16>
    %c0_325 = arith.constant 0 : index
    %c0_326 = arith.constant 0 : index
    %482 = vector.load %arg5[%c0_325, %c0_326] : memref<32x128xbf16, #tpu.memory_space<vmem>>, vector<32x128xbf16>
    %cst_327 = arith.constant dense<0.000000e+00> : vector<32x128xf32>
    %483 = tpu.matmul %481, %482, %cst_327 {dimension_numbers = #tpu.dot_dimension_numbers<[1], [0], [0], [1], [0, 0, 1, 1], [], []>} : vector<32x32xbf16>, vector<32x128xbf16>, vector<32x128xf32> -> vector<32x128xf32>
    %c0_328 = arith.constant 0 : index
    %c0_329 = arith.constant 0 : index
    %484 = vector.load %arg6[%c0_328, %c0_329] : memref<1x128xf32, #tpu.memory_space<vmem>>, vector<1x128xf32>
    %485 = vector.broadcast %484 : vector<1x128xf32> to vector<32x128xf32>
    %486 = arith.addf %483, %485 : vector<32x128xf32>
    %c0_330 = arith.constant 0 : index
    %487 = memref.load %arg1[%c0_330] : memref<5xf32, #tpu.memory_space<smem>>
    %488 = arith.subf %486, %341 : vector<32x128xf32>
    %489 = vector.broadcast %487 : f32 to vector<32x128xf32>
    %490 = arith.mulf %488, %489 : vector<32x128xf32>
    %491 = arith.addf %341, %490 : vector<32x128xf32>
    %cst_331 = arith.constant 1.000000e+00 : f32
    %492 = vector.broadcast %cst_331 : f32 to vector<32x128xf32>
    %493 = arith.cmpf oge, %491, %492 : vector<32x128xf32>
    %cst_332 = arith.constant 1.000000e+00 : f32
    %cst_333 = arith.constant 0.000000e+00 : f32
    %494 = vector.broadcast %cst_332 : f32 to vector<32x128xf32>
    %495 = vector.broadcast %cst_333 : f32 to vector<32x128xf32>
    %496 = arith.select %493, %494, %495 : vector<32x128xi1>, vector<32x128xf32>
    %c1_i32_334 = arith.constant 1 : i32
    %497 = tpu.dynamic_rotate %496 by %c1_i32_334 dim 0 : vector<32x128xf32>, i32 -> vector<32x128xf32>
    %498 = vector.broadcast %0 : vector<32x1xf32> to vector<32x128xf32>
    %499 = arith.mulf %497, %498 : vector<32x128xf32>
    %c31_i32_335 = arith.constant 31 : i32
    %500 = tpu.dynamic_rotate %496 by %c31_i32_335 dim 0 : vector<32x128xf32>, i32 -> vector<32x128xf32>
    %501 = vector.broadcast %1 : vector<32x1xf32> to vector<32x128xf32>
    %502 = arith.mulf %500, %501 : vector<32x128xf32>
    %503 = tpu.concatenate %499, %496, %502 in 1 : vector<32x128xf32>, vector<32x128xf32>, vector<32x128xf32> -> vector<32x384xf32>
    %504 = arith.truncf %503 : vector<32x384xf32> to vector<32x384xbf16>
    %c0_336 = arith.constant 0 : index
    %c0_337 = arith.constant 0 : index
    %505 = vector.load %arg7[%c0_336, %c0_337] : memref<384x128xbf16, #tpu.memory_space<vmem>>, vector<384x128xbf16>
    %cst_338 = arith.constant dense<0.000000e+00> : vector<32x128xf32>
    %506 = tpu.matmul %504, %505, %cst_338 {dimension_numbers = #tpu.dot_dimension_numbers<[1], [0], [0], [1], [0, 0, 1, 1], [], []>} : vector<32x384xbf16>, vector<384x128xbf16>, vector<32x128xf32> -> vector<32x128xf32>
    %c0_339 = arith.constant 0 : index
    %c0_340 = arith.constant 0 : index
    %507 = vector.load %arg8[%c0_339, %c0_340] : memref<1x128xf32, #tpu.memory_space<vmem>>, vector<1x128xf32>
    %508 = vector.broadcast %507 : vector<1x128xf32> to vector<32x128xf32>
    %509 = arith.addf %506, %508 : vector<32x128xf32>
    %c1_341 = arith.constant 1 : index
    %510 = memref.load %arg1[%c1_341] : memref<5xf32, #tpu.memory_space<smem>>
    %511 = arith.subf %509, %366 : vector<32x128xf32>
    %512 = vector.broadcast %510 : f32 to vector<32x128xf32>
    %513 = arith.mulf %511, %512 : vector<32x128xf32>
    %514 = arith.addf %366, %513 : vector<32x128xf32>
    %cst_342 = arith.constant 1.000000e+00 : f32
    %515 = vector.broadcast %cst_342 : f32 to vector<32x128xf32>
    %516 = arith.cmpf oge, %514, %515 : vector<32x128xf32>
    %cst_343 = arith.constant 1.000000e+00 : f32
    %cst_344 = arith.constant 0.000000e+00 : f32
    %517 = vector.broadcast %cst_343 : f32 to vector<32x128xf32>
    %518 = vector.broadcast %cst_344 : f32 to vector<32x128xf32>
    %519 = arith.select %516, %517, %518 : vector<32x128xi1>, vector<32x128xf32>
    %c1_i32_345 = arith.constant 1 : i32
    %520 = tpu.dynamic_rotate %519 by %c1_i32_345 dim 0 : vector<32x128xf32>, i32 -> vector<32x128xf32>
    %521 = vector.broadcast %0 : vector<32x1xf32> to vector<32x128xf32>
    %522 = arith.mulf %520, %521 : vector<32x128xf32>
    %c31_i32_346 = arith.constant 31 : i32
    %523 = tpu.dynamic_rotate %519 by %c31_i32_346 dim 0 : vector<32x128xf32>, i32 -> vector<32x128xf32>
    %524 = vector.broadcast %1 : vector<32x1xf32> to vector<32x128xf32>
    %525 = arith.mulf %523, %524 : vector<32x128xf32>
    %526 = tpu.concatenate %522, %519, %525 in 1 : vector<32x128xf32>, vector<32x128xf32>, vector<32x128xf32> -> vector<32x384xf32>
    %527 = arith.truncf %526 : vector<32x384xf32> to vector<32x384xbf16>
    %c0_347 = arith.constant 0 : index
    %c0_348 = arith.constant 0 : index
    %528 = vector.load %arg9[%c0_347, %c0_348] : memref<384x128xbf16, #tpu.memory_space<vmem>>, vector<384x128xbf16>
    %cst_349 = arith.constant dense<0.000000e+00> : vector<32x128xf32>
    %529 = tpu.matmul %527, %528, %cst_349 {dimension_numbers = #tpu.dot_dimension_numbers<[1], [0], [0], [1], [0, 0, 1, 1], [], []>} : vector<32x384xbf16>, vector<384x128xbf16>, vector<32x128xf32> -> vector<32x128xf32>
    %c0_350 = arith.constant 0 : index
    %c0_351 = arith.constant 0 : index
    %530 = vector.load %arg10[%c0_350, %c0_351] : memref<1x128xf32, #tpu.memory_space<vmem>>, vector<1x128xf32>
    %531 = vector.broadcast %530 : vector<1x128xf32> to vector<32x128xf32>
    %532 = arith.addf %529, %531 : vector<32x128xf32>
    %c2_352 = arith.constant 2 : index
    %533 = memref.load %arg1[%c2_352] : memref<5xf32, #tpu.memory_space<smem>>
    %534 = arith.subf %532, %391 : vector<32x128xf32>
    %535 = vector.broadcast %533 : f32 to vector<32x128xf32>
    %536 = arith.mulf %534, %535 : vector<32x128xf32>
    %537 = arith.addf %391, %536 : vector<32x128xf32>
    %cst_353 = arith.constant 1.000000e+00 : f32
    %538 = vector.broadcast %cst_353 : f32 to vector<32x128xf32>
    %539 = arith.cmpf oge, %537, %538 : vector<32x128xf32>
    %cst_354 = arith.constant 1.000000e+00 : f32
    %cst_355 = arith.constant 0.000000e+00 : f32
    %540 = vector.broadcast %cst_354 : f32 to vector<32x128xf32>
    %541 = vector.broadcast %cst_355 : f32 to vector<32x128xf32>
    %542 = arith.select %539, %540, %541 : vector<32x128xi1>, vector<32x128xf32>
    %543 = arith.addf %542, %496 : vector<32x128xf32>
    %c31_i32_356 = arith.constant 31 : i32
    %544 = tpu.dynamic_rotate %543 by %c31_i32_356 dim 0 : vector<32x128xf32>, i32 -> vector<32x128xf32>
    %545 = arith.maximumf %543, %544 : vector<32x128xf32>
    %c120_i32_357 = arith.constant 120 : i32
    %546 = tpu.dynamic_rotate %545 by %c120_i32_357 dim 1 : vector<32x128xf32>, i32 -> vector<32x128xf32>
    %547 = arith.maximumf %545, %546 : vector<32x128xf32>
    %c0_358 = arith.constant 0 : index
    %c0_359 = arith.constant 0 : index
    %548 = vector.load %arg11[%c0_358, %c0_359] : memref<16x32xf32, #tpu.memory_space<vmem>>, vector<16x32xf32>
    %cst_360 = arith.constant dense<0.000000e+00> : vector<16x128xf32>
    %549 = tpu.matmul %548, %547, %cst_360 {dimension_numbers = #tpu.dot_dimension_numbers<[1], [0], [0], [1], [0, 0, 1, 1], [], []>} : vector<16x32xf32>, vector<32x128xf32>, vector<16x128xf32> -> vector<16x128xf32>
    %c0_361 = arith.constant 0 : index
    %c0_362 = arith.constant 0 : index
    %550 = vector.load %arg12[%c0_361, %c0_362] : memref<128x64xf32, #tpu.memory_space<vmem>>, vector<128x64xf32>
    %cst_363 = arith.constant dense<0.000000e+00> : vector<16x64xf32>
    %551 = tpu.matmul %549, %550, %cst_363 {dimension_numbers = #tpu.dot_dimension_numbers<[1], [0], [0], [1], [0, 0, 1, 1], [], []>} : vector<16x128xf32>, vector<128x64xf32>, vector<16x64xf32> -> vector<16x64xf32>
    %552 = arith.truncf %551 : vector<16x64xf32> to vector<16x64xbf16>
    %c1_364 = arith.constant 1 : index
    %c0_365 = arith.constant 0 : index
    %c0_366 = arith.constant 0 : index
    %553 = vector.load %arg18[%c1_364, %c0_365, %c0_366] : memref<3x64x64xbf16, #tpu.memory_space<vmem>>, vector<1x64x64xbf16>
    %554 = vector.shape_cast %553 : vector<1x64x64xbf16> to vector<64x64xbf16>
    %cst_367 = arith.constant dense<0.000000e+00> : vector<16x64xf32>
    %555 = tpu.matmul %552, %554, %cst_367 {dimension_numbers = #tpu.dot_dimension_numbers<[1], [0], [0], [1], [0, 0, 1, 1], [], []>} : vector<16x64xbf16>, vector<64x64xbf16>, vector<16x64xf32> -> vector<16x64xf32>
    %c0_368 = arith.constant 0 : index
    %c0_369 = arith.constant 0 : index
    %556 = vector.load %arg14[%c0_368, %c0_369] : memref<16x16xf32, #tpu.memory_space<vmem>>, vector<16x16xf32>
    %cst_370 = arith.constant dense<0.000000e+00> : vector<16x64xf32>
    %557 = tpu.matmul %556, %551, %cst_370 {dimension_numbers = #tpu.dot_dimension_numbers<[1], [0], [0], [1], [0, 0, 1, 1], [], []>} : vector<16x16xf32>, vector<16x64xf32>, vector<16x64xf32> -> vector<16x64xf32>
    %558 = arith.truncf %557 : vector<16x64xf32> to vector<16x64xbf16>
    %c0_371 = arith.constant 0 : index
    %c0_372 = arith.constant 0 : index
    %c0_373 = arith.constant 0 : index
    %559 = vector.load %arg18[%c0_371, %c0_372, %c0_373] : memref<3x64x64xbf16, #tpu.memory_space<vmem>>, vector<1x64x64xbf16>
    %560 = vector.shape_cast %559 : vector<1x64x64xbf16> to vector<64x64xbf16>
    %cst_374 = arith.constant dense<0.000000e+00> : vector<16x64xf32>
    %561 = tpu.matmul %558, %560, %cst_374 {dimension_numbers = #tpu.dot_dimension_numbers<[1], [0], [0], [1], [0, 0, 1, 1], [], []>} : vector<16x64xbf16>, vector<64x64xbf16>, vector<16x64xf32> -> vector<16x64xf32>
    %562 = arith.addf %555, %561 : vector<16x64xf32>
    %c0_375 = arith.constant 0 : index
    %c0_376 = arith.constant 0 : index
    %563 = vector.load %arg13[%c0_375, %c0_376] : memref<16x16xf32, #tpu.memory_space<vmem>>, vector<16x16xf32>
    %cst_377 = arith.constant dense<0.000000e+00> : vector<16x64xf32>
    %564 = tpu.matmul %563, %551, %cst_377 {dimension_numbers = #tpu.dot_dimension_numbers<[1], [0], [0], [1], [0, 0, 1, 1], [], []>} : vector<16x16xf32>, vector<16x64xf32>, vector<16x64xf32> -> vector<16x64xf32>
    %565 = arith.truncf %564 : vector<16x64xf32> to vector<16x64xbf16>
    %c2_378 = arith.constant 2 : index
    %c0_379 = arith.constant 0 : index
    %c0_380 = arith.constant 0 : index
    %566 = vector.load %arg18[%c2_378, %c0_379, %c0_380] : memref<3x64x64xbf16, #tpu.memory_space<vmem>>, vector<1x64x64xbf16>
    %567 = vector.shape_cast %566 : vector<1x64x64xbf16> to vector<64x64xbf16>
    %cst_381 = arith.constant dense<0.000000e+00> : vector<16x64xf32>
    %568 = tpu.matmul %565, %567, %cst_381 {dimension_numbers = #tpu.dot_dimension_numbers<[1], [0], [0], [1], [0, 0, 1, 1], [], []>} : vector<16x64xbf16>, vector<64x64xbf16>, vector<16x64xf32> -> vector<16x64xf32>
    %569 = arith.addf %562, %568 : vector<16x64xf32>
    %c0_382 = arith.constant 0 : index
    %c0_383 = arith.constant 0 : index
    %570 = vector.load %arg19[%c0_382, %c0_383] : memref<1x64xf32, #tpu.memory_space<vmem>>, vector<1x64xf32>
    %571 = vector.broadcast %570 : vector<1x64xf32> to vector<16x64xf32>
    %572 = arith.addf %569, %571 : vector<16x64xf32>
    %c3_384 = arith.constant 3 : index
    %573 = memref.load %arg1[%c3_384] : memref<5xf32, #tpu.memory_space<smem>>
    %574 = arith.subf %572, %433 : vector<16x64xf32>
    %575 = vector.broadcast %573 : f32 to vector<16x64xf32>
    %576 = arith.mulf %574, %575 : vector<16x64xf32>
    %577 = arith.addf %433, %576 : vector<16x64xf32>
    %cst_385 = arith.constant 1.000000e+00 : f32
    %578 = vector.broadcast %cst_385 : f32 to vector<16x64xf32>
    %579 = arith.cmpf oge, %577, %578 : vector<16x64xf32>
    %cst_386 = arith.constant 1.000000e+00 : f32
    %cst_387 = arith.constant 0.000000e+00 : f32
    %580 = vector.broadcast %cst_386 : f32 to vector<16x64xf32>
    %581 = vector.broadcast %cst_387 : f32 to vector<16x64xf32>
    %582 = arith.select %579, %580, %581 : vector<16x64xi1>, vector<16x64xf32>
    %583 = arith.truncf %582 : vector<16x64xf32> to vector<16x64xbf16>
    %c1_388 = arith.constant 1 : index
    %c0_389 = arith.constant 0 : index
    %c0_390 = arith.constant 0 : index
    %584 = vector.load %arg20[%c1_388, %c0_389, %c0_390] : memref<3x64x64xbf16, #tpu.memory_space<vmem>>, vector<1x64x64xbf16>
    %585 = vector.shape_cast %584 : vector<1x64x64xbf16> to vector<64x64xbf16>
    %cst_391 = arith.constant dense<0.000000e+00> : vector<16x64xf32>
    %586 = tpu.matmul %583, %585, %cst_391 {dimension_numbers = #tpu.dot_dimension_numbers<[1], [0], [0], [1], [0, 0, 1, 1], [], []>} : vector<16x64xbf16>, vector<64x64xbf16>, vector<16x64xf32> -> vector<16x64xf32>
    %c0_392 = arith.constant 0 : index
    %c0_393 = arith.constant 0 : index
    %587 = vector.load %arg14[%c0_392, %c0_393] : memref<16x16xf32, #tpu.memory_space<vmem>>, vector<16x16xf32>
    %cst_394 = arith.constant dense<0.000000e+00> : vector<16x64xf32>
    %588 = tpu.matmul %587, %582, %cst_394 {dimension_numbers = #tpu.dot_dimension_numbers<[1], [0], [0], [1], [0, 0, 1, 1], [], []>} : vector<16x16xf32>, vector<16x64xf32>, vector<16x64xf32> -> vector<16x64xf32>
    %589 = arith.truncf %588 : vector<16x64xf32> to vector<16x64xbf16>
    %c0_395 = arith.constant 0 : index
    %c0_396 = arith.constant 0 : index
    %c0_397 = arith.constant 0 : index
    %590 = vector.load %arg20[%c0_395, %c0_396, %c0_397] : memref<3x64x64xbf16, #tpu.memory_space<vmem>>, vector<1x64x64xbf16>
    %591 = vector.shape_cast %590 : vector<1x64x64xbf16> to vector<64x64xbf16>
    %cst_398 = arith.constant dense<0.000000e+00> : vector<16x64xf32>
    %592 = tpu.matmul %589, %591, %cst_398 {dimension_numbers = #tpu.dot_dimension_numbers<[1], [0], [0], [1], [0, 0, 1, 1], [], []>} : vector<16x64xbf16>, vector<64x64xbf16>, vector<16x64xf32> -> vector<16x64xf32>
    %593 = arith.addf %586, %592 : vector<16x64xf32>
    %c0_399 = arith.constant 0 : index
    %c0_400 = arith.constant 0 : index
    %594 = vector.load %arg13[%c0_399, %c0_400] : memref<16x16xf32, #tpu.memory_space<vmem>>, vector<16x16xf32>
    %cst_401 = arith.constant dense<0.000000e+00> : vector<16x64xf32>
    %595 = tpu.matmul %594, %582, %cst_401 {dimension_numbers = #tpu.dot_dimension_numbers<[1], [0], [0], [1], [0, 0, 1, 1], [], []>} : vector<16x16xf32>, vector<16x64xf32>, vector<16x64xf32> -> vector<16x64xf32>
    %596 = arith.truncf %595 : vector<16x64xf32> to vector<16x64xbf16>
    %c2_402 = arith.constant 2 : index
    %c0_403 = arith.constant 0 : index
    %c0_404 = arith.constant 0 : index
    %597 = vector.load %arg20[%c2_402, %c0_403, %c0_404] : memref<3x64x64xbf16, #tpu.memory_space<vmem>>, vector<1x64x64xbf16>
    %598 = vector.shape_cast %597 : vector<1x64x64xbf16> to vector<64x64xbf16>
    %cst_405 = arith.constant dense<0.000000e+00> : vector<16x64xf32>
    %599 = tpu.matmul %596, %598, %cst_405 {dimension_numbers = #tpu.dot_dimension_numbers<[1], [0], [0], [1], [0, 0, 1, 1], [], []>} : vector<16x64xbf16>, vector<64x64xbf16>, vector<16x64xf32> -> vector<16x64xf32>
    %600 = arith.addf %593, %599 : vector<16x64xf32>
    %c0_406 = arith.constant 0 : index
    %c0_407 = arith.constant 0 : index
    %601 = vector.load %arg21[%c0_406, %c0_407] : memref<1x64xf32, #tpu.memory_space<vmem>>, vector<1x64xf32>
    %602 = vector.broadcast %601 : vector<1x64xf32> to vector<16x64xf32>
    %603 = arith.addf %600, %602 : vector<16x64xf32>
    %c4_408 = arith.constant 4 : index
    %604 = memref.load %arg1[%c4_408] : memref<5xf32, #tpu.memory_space<smem>>
    %605 = arith.subf %603, %466 : vector<16x64xf32>
    %606 = vector.broadcast %604 : f32 to vector<16x64xf32>
    %607 = arith.mulf %605, %606 : vector<16x64xf32>
    %608 = arith.addf %466, %607 : vector<16x64xf32>
    %cst_409 = arith.constant 1.000000e+00 : f32
    %609 = vector.broadcast %cst_409 : f32 to vector<16x64xf32>
    %610 = arith.cmpf oge, %608, %609 : vector<16x64xf32>
    %cst_410 = arith.constant 1.000000e+00 : f32
    %cst_411 = arith.constant 0.000000e+00 : f32
    %611 = vector.broadcast %cst_410 : f32 to vector<16x64xf32>
    %612 = vector.broadcast %cst_411 : f32 to vector<16x64xf32>
    %613 = arith.select %610, %611, %612 : vector<16x64xi1>, vector<16x64xf32>
    %614 = arith.addf %613, %551 : vector<16x64xf32>
    %c0_412 = arith.constant 0 : index
    %c0_413 = arith.constant 0 : index
    %615 = vector.load %arg13[%c0_412, %c0_413] : memref<16x16xf32, #tpu.memory_space<vmem>>, vector<16x16xf32>
    %cst_414 = arith.constant dense<0.000000e+00> : vector<16x64xf32>
    %616 = tpu.matmul %615, %614, %cst_414 {dimension_numbers = #tpu.dot_dimension_numbers<[1], [0], [0], [1], [0, 0, 1, 1], [], []>} : vector<16x16xf32>, vector<16x64xf32>, vector<16x64xf32> -> vector<16x64xf32>
    %617 = arith.maximumf %614, %616 : vector<16x64xf32>
    %c0_415 = arith.constant 0 : index
    %c0_416 = arith.constant 0 : index
    %618 = vector.load %arg15[%c0_415, %c0_416] : memref<64x64xf32, #tpu.memory_space<vmem>>, vector<64x64xf32>
    %cst_417 = arith.constant dense<0.000000e+00> : vector<16x64xf32>
    %619 = tpu.matmul %617, %618, %cst_417 {dimension_numbers = #tpu.dot_dimension_numbers<[1], [0], [0], [1], [0, 0, 1, 1], [], []>} : vector<16x64xf32>, vector<64x64xf32>, vector<16x64xf32> -> vector<16x64xf32>
    %620 = arith.maximumf %617, %619 : vector<16x64xf32>
    %c0_418 = arith.constant 0 : index
    %c0_419 = arith.constant 0 : index
    %621 = vector.load %arg16[%c0_418, %c0_419] : memref<8x16xf32, #tpu.memory_space<vmem>>, vector<8x16xf32>
    %cst_420 = arith.constant dense<0.000000e+00> : vector<8x64xf32>
    %622 = tpu.matmul %621, %620, %cst_420 {dimension_numbers = #tpu.dot_dimension_numbers<[1], [0], [0], [1], [0, 0, 1, 1], [], []>} : vector<8x16xf32>, vector<16x64xf32>, vector<8x64xf32> -> vector<8x64xf32>
    %c0_421 = arith.constant 0 : index
    %c0_422 = arith.constant 0 : index
    %623 = vector.load %arg17[%c0_421, %c0_422] : memref<64x32xf32, #tpu.memory_space<vmem>>, vector<64x32xf32>
    %cst_423 = arith.constant dense<0.000000e+00> : vector<8x32xf32>
    %624 = tpu.matmul %622, %623, %cst_423 {dimension_numbers = #tpu.dot_dimension_numbers<[1], [0], [0], [1], [0, 0, 1, 1], [], []>} : vector<8x64xf32>, vector<64x32xf32>, vector<8x32xf32> -> vector<8x32xf32>
    %625 = arith.addf %478, %624 : vector<8x32xf32>
    %cst_424 = arith.constant 2.500000e-01 : f32
    %626 = vector.broadcast %cst_424 : f32 to vector<8x32xf32>
    %627 = arith.mulf %625, %626 : vector<8x32xf32>
    %c0_425 = arith.constant 0 : index
    %c0_426 = arith.constant 0 : index
    %c0_427 = arith.constant 0 : index
    %628 = vector.load %arg22[%c0_425, %c0_426, %c0_427] : memref<4x2x8xf32, #tpu.memory_space<vmem>>, vector<1x2x8xf32>
    %629 = vector.shape_cast %628 : vector<1x2x8xf32> to vector<2x8xf32>
    %cst_428 = arith.constant dense<0.000000e+00> : vector<2x32xf32>
    %630 = tpu.matmul %629, %627, %cst_428 {dimension_numbers = #tpu.dot_dimension_numbers<[1], [0], [0], [1], [0, 0, 1, 1], [], []>} : vector<2x8xf32>, vector<8x32xf32>, vector<2x32xf32> -> vector<2x32xf32>
    %c0_429 = arith.constant 0 : index
    %c0_430 = arith.constant 0 : index
    %c0_431 = arith.constant 0 : index
    %631 = vector.load %arg23[%c0_429, %c0_430, %c0_431] : memref<4x32x10xf32, #tpu.memory_space<vmem>>, vector<1x32x10xf32>
    %632 = vector.shape_cast %631 : vector<1x32x10xf32> to vector<32x10xf32>
    %cst_432 = arith.constant dense<0.000000e+00> : vector<2x10xf32>
    %633 = tpu.matmul %630, %632, %cst_432 {dimension_numbers = #tpu.dot_dimension_numbers<[1], [0], [0], [1], [0, 0, 1, 1], [], []>} : vector<2x32xf32>, vector<32x10xf32>, vector<2x10xf32> -> vector<2x10xf32>
    %c1_433 = arith.constant 1 : index
    %c0_434 = arith.constant 0 : index
    %c0_435 = arith.constant 0 : index
    %634 = vector.load %arg22[%c1_433, %c0_434, %c0_435] : memref<4x2x8xf32, #tpu.memory_space<vmem>>, vector<1x2x8xf32>
    %635 = vector.shape_cast %634 : vector<1x2x8xf32> to vector<2x8xf32>
    %cst_436 = arith.constant dense<0.000000e+00> : vector<2x32xf32>
    %636 = tpu.matmul %635, %627, %cst_436 {dimension_numbers = #tpu.dot_dimension_numbers<[1], [0], [0], [1], [0, 0, 1, 1], [], []>} : vector<2x8xf32>, vector<8x32xf32>, vector<2x32xf32> -> vector<2x32xf32>
    %c1_437 = arith.constant 1 : index
    %c0_438 = arith.constant 0 : index
    %c0_439 = arith.constant 0 : index
    %637 = vector.load %arg23[%c1_437, %c0_438, %c0_439] : memref<4x32x10xf32, #tpu.memory_space<vmem>>, vector<1x32x10xf32>
    %638 = vector.shape_cast %637 : vector<1x32x10xf32> to vector<32x10xf32>
    %cst_440 = arith.constant dense<0.000000e+00> : vector<2x10xf32>
    %639 = tpu.matmul %636, %638, %cst_440 {dimension_numbers = #tpu.dot_dimension_numbers<[1], [0], [0], [1], [0, 0, 1, 1], [], []>} : vector<2x32xf32>, vector<32x10xf32>, vector<2x10xf32> -> vector<2x10xf32>
    %640 = arith.addf %633, %639 : vector<2x10xf32>
    %c2_441 = arith.constant 2 : index
    %c0_442 = arith.constant 0 : index
    %c0_443 = arith.constant 0 : index
    %641 = vector.load %arg22[%c2_441, %c0_442, %c0_443] : memref<4x2x8xf32, #tpu.memory_space<vmem>>, vector<1x2x8xf32>
    %642 = vector.shape_cast %641 : vector<1x2x8xf32> to vector<2x8xf32>
    %cst_444 = arith.constant dense<0.000000e+00> : vector<2x32xf32>
    %643 = tpu.matmul %642, %627, %cst_444 {dimension_numbers = #tpu.dot_dimension_numbers<[1], [0], [0], [1], [0, 0, 1, 1], [], []>} : vector<2x8xf32>, vector<8x32xf32>, vector<2x32xf32> -> vector<2x32xf32>
    %c2_445 = arith.constant 2 : index
    %c0_446 = arith.constant 0 : index
    %c0_447 = arith.constant 0 : index
    %644 = vector.load %arg23[%c2_445, %c0_446, %c0_447] : memref<4x32x10xf32, #tpu.memory_space<vmem>>, vector<1x32x10xf32>
    %645 = vector.shape_cast %644 : vector<1x32x10xf32> to vector<32x10xf32>
    %cst_448 = arith.constant dense<0.000000e+00> : vector<2x10xf32>
    %646 = tpu.matmul %643, %645, %cst_448 {dimension_numbers = #tpu.dot_dimension_numbers<[1], [0], [0], [1], [0, 0, 1, 1], [], []>} : vector<2x32xf32>, vector<32x10xf32>, vector<2x10xf32> -> vector<2x10xf32>
    %647 = arith.addf %640, %646 : vector<2x10xf32>
    %c3_449 = arith.constant 3 : index
    %c0_450 = arith.constant 0 : index
    %c0_451 = arith.constant 0 : index
    %648 = vector.load %arg22[%c3_449, %c0_450, %c0_451] : memref<4x2x8xf32, #tpu.memory_space<vmem>>, vector<1x2x8xf32>
    %649 = vector.shape_cast %648 : vector<1x2x8xf32> to vector<2x8xf32>
    %cst_452 = arith.constant dense<0.000000e+00> : vector<2x32xf32>
    %650 = tpu.matmul %649, %627, %cst_452 {dimension_numbers = #tpu.dot_dimension_numbers<[1], [0], [0], [1], [0, 0, 1, 1], [], []>} : vector<2x8xf32>, vector<8x32xf32>, vector<2x32xf32> -> vector<2x32xf32>
    %c3_453 = arith.constant 3 : index
    %c0_454 = arith.constant 0 : index
    %c0_455 = arith.constant 0 : index
    %651 = vector.load %arg23[%c3_453, %c0_454, %c0_455] : memref<4x32x10xf32, #tpu.memory_space<vmem>>, vector<1x32x10xf32>
    %652 = vector.shape_cast %651 : vector<1x32x10xf32> to vector<32x10xf32>
    %cst_456 = arith.constant dense<0.000000e+00> : vector<2x10xf32>
    %653 = tpu.matmul %650, %652, %cst_456 {dimension_numbers = #tpu.dot_dimension_numbers<[1], [0], [0], [1], [0, 0, 1, 1], [], []>} : vector<2x32xf32>, vector<32x10xf32>, vector<2x10xf32> -> vector<2x10xf32>
    %654 = arith.addf %647, %653 : vector<2x10xf32>
    %c0_457 = arith.constant 0 : index
    %c0_458 = arith.constant 0 : index
    %655 = vector.load %arg24[%c0_457, %c0_458] : memref<1x10xf32, #tpu.memory_space<vmem>>, vector<1x10xf32>
    %656 = vector.broadcast %655 : vector<1x10xf32> to vector<2x10xf32>
    %657 = arith.addf %654, %656 : vector<2x10xf32>
    %c0_459 = arith.constant 0 : index
    %c0_460 = arith.constant 0 : index
    %658 = vector.load %arg25[%c0_459, %c0_460] : memref<2x10xf32, #tpu.memory_space<vmem>>, vector<2x10xf32>
    tpu.vector_store %arg25[%c0_459, %c0_460], %657 {strides = array<i32>} : memref<2x10xf32, #tpu.memory_space<vmem>>, vector<2x10xf32>,
    return
  }
  func.func @transform_0(%arg0: i32) -> i32 {
    %c0_i32 = arith.constant 0 : i32
    %c0_i32_0 = arith.constant 0 : i32
    return %c0_i32 : i32
  }
  func.func @transform_1(%arg0: i32) -> (i32, i32, i32) {
    %c0_i32 = arith.constant 0 : i32
    %c0_i32_0 = arith.constant 0 : i32
    %c0_i32_1 = arith.constant 0 : i32
    %c0_i32_2 = arith.constant 0 : i32
    return %c0_i32, %c0_i32_0, %c0_i32_1 : i32, i32, i32
  }
  func.func @transform_2(%arg0: i32) -> (i32, i32) {
    %c0_i32 = arith.constant 0 : i32
    %c0_i32_0 = arith.constant 0 : i32
    %c0_i32_1 = arith.constant 0 : i32
    return %c0_i32, %c0_i32_0 : i32, i32
  }
  func.func @transform_3(%arg0: i32) -> (i32, i32) {
    %c0_i32 = arith.constant 0 : i32
    %c0_i32_0 = arith.constant 0 : i32
    %c0_i32_1 = arith.constant 0 : i32
    return %c0_i32, %c0_i32_0 : i32, i32
  }
  func.func @transform_4(%arg0: i32) -> (i32, i32) {
    %c0_i32 = arith.constant 0 : i32
    %c0_i32_0 = arith.constant 0 : i32
    %c0_i32_1 = arith.constant 0 : i32
    return %c0_i32, %c0_i32_0 : i32, i32
  }
  func.func @transform_5(%arg0: i32) -> (i32, i32) {
    %c0_i32 = arith.constant 0 : i32
    %c0_i32_0 = arith.constant 0 : i32
    %c0_i32_1 = arith.constant 0 : i32
    return %c0_i32, %c0_i32_0 : i32, i32
  }
  func.func @transform_6(%arg0: i32) -> (i32, i32) {
    %c0_i32 = arith.constant 0 : i32
    %c0_i32_0 = arith.constant 0 : i32
    %c0_i32_1 = arith.constant 0 : i32
    return %c0_i32, %c0_i32_0 : i32, i32
  }
  func.func @transform_7(%arg0: i32) -> (i32, i32) {
    %c0_i32 = arith.constant 0 : i32
    %c0_i32_0 = arith.constant 0 : i32
    %c0_i32_1 = arith.constant 0 : i32
    return %c0_i32, %c0_i32_0 : i32, i32
  }
  func.func @transform_8(%arg0: i32) -> (i32, i32) {
    %c0_i32 = arith.constant 0 : i32
    %c0_i32_0 = arith.constant 0 : i32
    %c0_i32_1 = arith.constant 0 : i32
    return %c0_i32, %c0_i32_0 : i32, i32
  }
  func.func @transform_9(%arg0: i32) -> (i32, i32) {
    %c0_i32 = arith.constant 0 : i32
    %c0_i32_0 = arith.constant 0 : i32
    %c0_i32_1 = arith.constant 0 : i32
    return %c0_i32, %c0_i32_0 : i32, i32
  }
  func.func @transform_10(%arg0: i32) -> (i32, i32) {
    %c0_i32 = arith.constant 0 : i32
    %c0_i32_0 = arith.constant 0 : i32
    %c0_i32_1 = arith.constant 0 : i32
    return %c0_i32, %c0_i32_0 : i32, i32
  }
  func.func @transform_11(%arg0: i32) -> (i32, i32) {
    %c0_i32 = arith.constant 0 : i32
    %c0_i32_0 = arith.constant 0 : i32
    %c0_i32_1 = arith.constant 0 : i32
    return %c0_i32, %c0_i32_0 : i32, i32
  }
  func.func @transform_12(%arg0: i32) -> (i32, i32) {
    %c0_i32 = arith.constant 0 : i32
    %c0_i32_0 = arith.constant 0 : i32
    %c0_i32_1 = arith.constant 0 : i32
    return %c0_i32, %c0_i32_0 : i32, i32
  }
  func.func @transform_13(%arg0: i32) -> (i32, i32) {
    %c0_i32 = arith.constant 0 : i32
    %c0_i32_0 = arith.constant 0 : i32
    %c0_i32_1 = arith.constant 0 : i32
    return %c0_i32, %c0_i32_0 : i32, i32
  }
  func.func @transform_14(%arg0: i32) -> (i32, i32) {
    %c0_i32 = arith.constant 0 : i32
    %c0_i32_0 = arith.constant 0 : i32
    %c0_i32_1 = arith.constant 0 : i32
    return %c0_i32, %c0_i32_0 : i32, i32
  }
  func.func @transform_15(%arg0: i32) -> (i32, i32) {
    %c0_i32 = arith.constant 0 : i32
    %c0_i32_0 = arith.constant 0 : i32
    %c0_i32_1 = arith.constant 0 : i32
    return %c0_i32, %c0_i32_0 : i32, i32
  }
  func.func @transform_16(%arg0: i32) -> (i32, i32) {
    %c0_i32 = arith.constant 0 : i32
    %c0_i32_0 = arith.constant 0 : i32
    %c0_i32_1 = arith.constant 0 : i32
    return %c0_i32, %c0_i32_0 : i32, i32
  }
  func.func @transform_17(%arg0: i32) -> (i32, i32, i32) {
    %c0_i32 = arith.constant 0 : i32
    %c0_i32_0 = arith.constant 0 : i32
    %c0_i32_1 = arith.constant 0 : i32
    %c0_i32_2 = arith.constant 0 : i32
    return %c0_i32, %c0_i32_0, %c0_i32_1 : i32, i32, i32
  }
  func.func @transform_18(%arg0: i32) -> (i32, i32) {
    %c0_i32 = arith.constant 0 : i32
    %c0_i32_0 = arith.constant 0 : i32
    %c0_i32_1 = arith.constant 0 : i32
    return %c0_i32, %c0_i32_0 : i32, i32
  }
  func.func @transform_19(%arg0: i32) -> (i32, i32, i32) {
    %c0_i32 = arith.constant 0 : i32
    %c0_i32_0 = arith.constant 0 : i32
    %c0_i32_1 = arith.constant 0 : i32
    %c0_i32_2 = arith.constant 0 : i32
    return %c0_i32, %c0_i32_0, %c0_i32_1 : i32, i32, i32
  }
  func.func @transform_20(%arg0: i32) -> (i32, i32) {
    %c0_i32 = arith.constant 0 : i32
    %c0_i32_0 = arith.constant 0 : i32
    %c0_i32_1 = arith.constant 0 : i32
    return %c0_i32, %c0_i32_0 : i32, i32
  }
  func.func @transform_21(%arg0: i32) -> (i32, i32, i32) {
    %c0_i32 = arith.constant 0 : i32
    %c0_i32_0 = arith.constant 0 : i32
    %c0_i32_1 = arith.constant 0 : i32
    %c0_i32_2 = arith.constant 0 : i32
    return %c0_i32, %c0_i32_0, %c0_i32_1 : i32, i32, i32
  }
  func.func @transform_22(%arg0: i32) -> (i32, i32, i32) {
    %c0_i32 = arith.constant 0 : i32
    %c0_i32_0 = arith.constant 0 : i32
    %c0_i32_1 = arith.constant 0 : i32
    %c0_i32_2 = arith.constant 0 : i32
    return %c0_i32, %c0_i32_0, %c0_i32_1 : i32, i32, i32
  }
  func.func @transform_23(%arg0: i32) -> (i32, i32) {
    %c0_i32 = arith.constant 0 : i32
    %c0_i32_0 = arith.constant 0 : i32
    %c0_i32_1 = arith.constant 0 : i32
    return %c0_i32, %c0_i32_0 : i32, i32
  }
  func.func @transform_24(%arg0: i32) -> (i32, i32) {
    %c0_i32 = arith.constant 0 : i32
    %c0_i32_0 = arith.constant 0 : i32
    %c0_i32_1 = arith.constant 0 : i32
    return %c0_i32, %c0_i32_0 : i32, i32
  }
}

</mosaic_0001>

<bundles_post_ra>
// kernel: resnetn_forward.1
= control target key start
LH: loop header
LB: loop body
LE: loop exit
PB: predicated region body
PF: predicated region fallthrough
CT: control target
= control target key end

     0   :  { %s12977_s0 = inlined_call_operand.vmem [shape: f32[5], index: 0, kind: input, shape index: {}]   ;;  %s12978_s1 = inlined_call_operand.vmem [shape: f32[4,32,32], index: 1, kind: input, shape index: {}]   ;;  %s12979_s2 = inlined_call_operand.vmem [shape: f32[32,1], index: 2, kind: input, shape index: {}]   ;;  %s12980_s3 = inlined_call_operand.vmem [shape: f32[32,1], index: 3, kind: input, shape index: {}]   ;;  %s12981_s4 = inlined_call_operand.vmem [shape: bf16[32,128], index: 4, kind: input, shape index: {}]   ;;  %s12982_s5 = inlined_call_operand.vmem [shape: f32[1,128], index: 5, kind: input, shape index: {}]   ;;  %s12983_s6 = inlined_call_operand.vmem [shape: bf16[384,128], index: 6, kind: input, shape index: {}]   ;;  %s12984_s7 = inlined_call_operand.vmem [shape: f32[1,128], index: 7, kind: input, shape index: {}]   ;;  %s12985_s8 = inlined_call_operand.vmem [shape: bf16[384,128], index: 8, kind: input, shape index: {}]   ;;  %s12986_s9 = inlined_call_operand.vmem [shape: f32[1,128], index: 9, kind: input, shape index: {}]   ;;  %s12987_s10 = inlined_call_operand.vmem [shape: f32[16,32], index: 10, kind: input, shape index: {}]   ;;  %s12988_s11 = inlined_call_operand.vmem [shape: f32[128,64], index: 11, kind: input, shape index: {}]   ;;  %s12989_s12 = inlined_call_operand.vmem [shape: f32[16,16], index: 12, kind: input, shape index: {}]   ;;  %s12990_s13 = inlined_call_operand.vmem [shape: f32[16,16], index: 13, kind: input, shape index: {}]   ;;  %s12991_s14 = inlined_call_operand.vmem [shape: f32[64,64], index: 14, kind: input, shape index: {}]   ;;  %s12992_s15 = inlined_call_operand.vmem [shape: f32[8,16], index: 15, kind: input, shape index: {}]   ;;  %s12993_s16 = inlined_call_operand.vmem [shape: f32[64,32], index: 16, kind: input, shape index: {}]   ;;  %s12994_s17 = inlined_call_operand.vmem [shape: bf16[3,64,64], index: 17, kind: input, shape index: {}]   ;;  %s12995_s18 = inlined_call_operand.vmem [shape: f32[1,64], index: 18, kind: input, shape index: {}]   ;;  %s12996_s19 = inlined_call_operand.vmem [shape: bf16[3,64,64], index: 19, kind: input, shape index: {}]   ;;  %s12997_s20 = inlined_call_operand.vmem [shape: f32[1,64], index: 20, kind: input, shape index: {}]   ;;  %s12998_s21 = inlined_call_operand.vmem [shape: f32[4,2,8], index: 21, kind: input, shape index: {}]   ;;  %s12999_s22 = inlined_call_operand.vmem [shape: f32[4,32,10], index: 22, kind: input, shape index: {}]   ;;  %s13000_s23 = inlined_call_operand.vmem [shape: f32[1,10], index: 23, kind: input, shape index: {}]   ;;  %s13001_s24 = inlined_call_operand.hbm [shape: f32[2,10], index: 24, kind: output, shape index: {}]  }
   0x1   :  { %13012 = sst [smem:[#allocation8_spill]] %s12977_s0 }
   0x2   :  { %13013 = sst [smem:[#allocation9_spill]] %s12978_s1 }
   0x3   :  { %13014 = sst [smem:[#allocation10_spill]] %s12979_s2 }
   0x4   :  { %13015 = sst [smem:[#allocation11_spill]] %s12980_s3 }
   0x5   :  { %13016 = sst [smem:[#allocation12_spill]] %s12981_s4 }
   0x6   :  { %13017 = sst [smem:[#allocation13_spill]] %s12982_s5 }
   0x7   :  { %13018 = sst [smem:[#allocation14_spill]] %s12983_s6 }
   0x8   :  { %13019 = sst [smem:[#allocation15_spill]] %s12984_s7 }
   0x9   :  { %13020 = sst [smem:[#allocation16_spill]] %s12985_s8 }
   0xa   :  { %13021 = sst [smem:[#allocation17_spill]] %s13000_s23 }
   0xb   :  { %13022 = sst [smem:[#allocation18_spill]] %s13001_s24 }
   0xc   :  { %29 = vsyncpa [#allocation4], 0 }
   0xd   :  { %30 = vsyncpa [#allocation3], 0  ;;  %s13023_s27 = sld [smem:[#allocation8_spill]] }
  0x13   :  { %s37_s28 = sshll.u32 %s13023_s27, 4  ;;  %s38_s28 = int_to_ptr.vmem [resolvable:$true] %s37_s28 }
  0x14   :  { %s9858_s6 = scalar_lea.vmem %s38_s28, 16  ;;  %p9863_p1 = scmp.lt.s32.totalorder %s38_s28, %s38_s28 }
  0x15   :  { %p9859_p0 = scmp.ne.s32.totalorder %s38_s28, %s9858_s6  ;;  %p9864_p2 = scmp.lt.s32.totalorder %s9858_s6, %s9858_s6 }
  0x17   :  { %p9865_p3 = por %p9864_p2, %p9863_p1 }
  0x19   :  { %p9866_p4 = pnand %p9865_p3, %p9859_p0 }
  0x1b   :  { %9869 = shalt.err (!%p9866_p4)
}
  0x1c   :  { %s9894_s2 = smov [#allocation2]  }
  0x1d   :  { %40 = dma.vmem_to_smem %s38_s28, 16, %s9894_s2, [#allocation4]  }
  0x1e   :  { %9890 = dma.done.wait [#allocation4], 16  }
  0x1f   :  { %9891 = vsyncadd [#allocation4], 4294967280 }
  0x20   :  { %90 = sfence }
  0x21   :  { %s13024_s7 = sld [smem:[#allocation12_spill]]  ;;  %vm129_vm0 = vcmask 261120   ;;  %v9895_v5 = vmov 0   ;;  %v211_v47 = vlaneseq  ;;  %v9896_v60 = vmov 0.0   ;;  %s13036_s8 = smov 120  }
  0x22   :  { %s13025_s4 = sld [smem:[#allocation9_spill]]  ;;  %9439 = vset.pattern.permute.xlu0 %v9895_v5  ;;  %9440 = vset.pattern.permute.xlu1 %v9895_v5 }
  0x23   :  { %s13026_s0 = sld [smem:[#allocation10_spill]]  ;;  %v10160_v54 = vshrl.u32 %v211_v47, 7 }
  0x24   :  { %s13027_s28 = sld [smem:[#allocation14_spill]] }
  0x25   :  { %s13028_s29 = sld [smem:[#allocation11_spill]]  ;;  %vm213_vm3 = vcmp.lt.s32.totalorder %v10160_v54, 1  ;;  %vm246_vm5 = vcmp.lt.s32.totalorder %v10160_v54, 7 }
  0x26   :  { %s185_s1 = sld [smem:[#allocation2]] }
  0x27   :  { %v9441_v0 = vld [vmem:[%s13024_s7 + $0x8] sm:$0xff]   ;;  %v9442_v1 = vld [vmem:[%s13024_s7] sm:$0xff]   ;;  %s13029_s27 = sld [smem:[#allocation13_spill]] }
  0x28   :  { %8383 = vmatprep.subr.bf16.mxu0 %v9441_v0  ;;  %v100_v2 = vld [vmem:[%s13025_s4] sm:$0xff]  ;;  %v101_v3 = vld [vmem:[%s13025_s4 + $0x8] sm:$0xff]  ;;  %v102_v4 = vld [vmem:[%s13025_s4 + $0x10] sm:$0xff]  ;;  %s7390_s5 = sld [smem:[#allocation2 + $0x1]] }
  0x29   :  { %8384 = vmatpush3.bf16.msra.mxu0 %v9441_v0  ;;  %v104_v6 = vpack.c.bf16 %v101_v3, %v100_v2  ;;  %v103_v7 = vld [vmem:[%s13025_s4 + $0x18] sm:$0xff]  ;;  %v92_v8 = vld [vmem:[%s13026_s0] sm:$0xff]  ;;  %v94_v9 = vld [vmem:[%s13026_s0 + $0x10] sm:$0xff]  ;;  %s13031_s2 = sld [smem:[#allocation15_spill]] }
  0x2a   :  { %8385 = vmatprep.subr.bf16.mxu0 %v9442_v1  ;;  %220 = vperm.xlu0 %9439, %v92_v8   ;;  %v93_v10 = vld [vmem:[%s13026_s0 + $0x8] sm:$0xff]  ;;  %v95_v11 = vld [vmem:[%s13026_s0 + $0x18] sm:$0xff]  ;;  %v105_v12 = vpack.c.bf16 %v103_v7, %v102_v4  ;;  %v9446_v18 = vld [vmem:[%s13027_s28 + $0x70] sm:$0xff]   ;;  %s7420_s30 = sld [smem:[#allocation2 + $0x2]] }
  0x2b   :  { %8387 = vmatprep.mubr.msk.bf16.mxu0 %vm129_vm0, %v104_v6  ;;  %230 = vperm.xlu1 %9440, %v94_v9   ;;  %v9443_v13 = vld [vmem:[%s13027_s28 + $0x78] sm:$0xff]   ;;  %v96_v14 = vld [vmem:[%s13028_s29] sm:$0xff]  ;;  %v97_v16 = vld [vmem:[%s13028_s29 + $0x8] sm:$0xff]  ;;  %s7459_s26 = sld [smem:[#allocation2 + $0x3]] }
  0x2c   :  { %v9444_v15 = vld [vmem:[%s13027_s28 + $0x38] sm:$0xff]   ;;  %7655 = vmatprep.subr.bf16.mxu1 %v9443_v13  ;;  %v9447_v19 = vld [vmem:[%s13027_s28 + $0x30] sm:$0xff]   ;;  %v9449_v23 = vld [vmem:[%s13027_s28 + $0x68] sm:$0xff]   ;;  %v10153_v45 = vstv %s185_s1  ;;  %s7500_s25 = sld [smem:[#allocation2 + $0x4]] }
  0x2d   :  { %8386 = vmatpush3.bf16.msra.mxu0 %v9442_v1  ;;  %v9445_v17 = vld [vmem:[%s13027_s28 + $0xb8] sm:$0xff]   ;;  %7656 = vmatpush3.bf16.msra.mxu1 %v9444_v15  ;;  %v98_v20 = vld [vmem:[%s13028_s29 + $0x10] sm:$0xff]  ;;  %v9450_v24 = vld [vmem:[%s13027_s28 + $0x28] sm:$0xff]  }
  0x2e   :  { %225 = vperm.xlu0 %9439, %v93_v10   ;;  %8391 = vmatprep.subr.bf16.mxu0 %v9445_v17  ;;  %v9448_v21 = vld [vmem:[%s13027_s28 + $0xb0] sm:$0xff]   ;;  %v99_v22 = vld [vmem:[%s13028_s29 + $0x18] sm:$0xff]  ;;  %v9451_v25 = vld [vmem:[%s13027_s28 + $0xa8] sm:$0xff]   ;;  %s13030_s29 = sld [smem:[#allocation16_spill]] }
  0x2f   :  { %235 = vperm.xlu1 %9440, %v95_v11   ;;  %7657 = vmatprep.subr.bf16.mxu1 %v9446_v18  ;;  %v9452_v26 = vld [vmem:[%s13027_s28 + $0x60] sm:$0xff]   ;;  %v9455_v29 = vld [vmem:[%s13027_s28 + $0x58] sm:$0xff]   ;;  %v9458_v32 = vld [vmem:[%s13027_s28 + $0x50] sm:$0xff]  }
  0x30   :  { %8388 = vmatmul.mubr.msk.bf16.vlgmr.msra.gmra.mxu0 %vm129_vm0, %v105_v12  ;;  %v9453_v27 = vld [vmem:[%s13027_s28 + $0x20] sm:$0xff]   ;;  %v9456_v30 = vld [vmem:[%s13027_s28 + $0x18] sm:$0xff]   ;;  %v9459_v33 = vld [vmem:[%s13027_s28 + $0x10] sm:$0xff]  }
  0x31   :  { %8392 = vmatpush3.bf16.msra.mxu0 %v9445_v17  ;;  %7658 = vmatpush3.bf16.msra.mxu1 %v9447_v19  ;;  %v9454_v28 = vld [vmem:[%s13027_s28 + $0xa0] sm:$0xff]   ;;  %v9457_v31 = vld [vmem:[%s13027_s28 + $0x98] sm:$0xff]   ;;  %v9460_v34 = vld [vmem:[%s13027_s28 + $0x90] sm:$0xff]   ;;  %v9897_v17 = vmov 1.0|1.0  }
  0x32   :  { %253 = vperm.xlu0 %9439, %v96_v14   ;;  %8393 = vmatprep.subr.bf16.mxu0 %v9448_v21  ;;  %v9461_v35 = vld [vmem:[%s13027_s28 + $0x48] sm:$0xff]   ;;  %v9464_v38 = vld [vmem:[%s13027_s28 + $0x40] sm:$0xff]  }
  0x33   :  { %258 = vperm.xlu1 %9440, %v97_v16   ;;  %7659 = vmatprep.subr.bf16.mxu1 %v9449_v23  ;;  %v9462_v36 = vld [vmem:[%s13027_s28 + $0x8] sm:$0xff]   ;;  %v9465_v39 = vld [vmem:[%s13027_s28] sm:$0xff]  }
  0x34   :  { %v9463_v37 = vld [vmem:[%s13027_s28 + $0x88] sm:$0xff]   ;;  %v9466_v40 = vld [vmem:[%s13027_s28 + $0x80] sm:$0xff]   ;;  %v9471_v47 = vld [vmem:[%s13030_s29 + $0xb0] sm:$0xff]  }
  0x35   :  { %8394 = vmatpush3.bf16.msra.mxu0 %v9448_v21  ;;  %7660 = vmatpush3.bf16.msra.mxu1 %v9450_v24  ;;  %v7356_v43 = vld [vmem:[%s13029_s27] ss:$0 sm:$0xff] }
  0x36   :  { %263 = vperm.xlu0 %9439, %v98_v20   ;;  %8395 = vmatprep.subr.bf16.mxu0 %v9451_v25 }
  0x37   :  { %268 = vperm.xlu1 %9440, %v99_v22   ;;  %7661 = vmatprep.subr.bf16.mxu1 %v9452_v26 }
  0x39   :  { %8396 = vmatpush3.bf16.msra.mxu0 %v9451_v25  ;;  %7662 = vmatpush3.bf16.msra.mxu1 %v9453_v27 }
  0x3a   :  { %8397 = vmatprep.subr.bf16.mxu0 %v9454_v28  ;;  %7663 = vmatprep.subr.bf16.mxu1 %v9455_v29 }
  0x3d   :  { %8398 = vmatpush3.bf16.msra.mxu0 %v9454_v28  ;;  %7664 = vmatpush3.bf16.msra.mxu1 %v9456_v30 }
  0x3e   :  { %8399 = vmatprep.subr.bf16.mxu0 %v9457_v31  ;;  %7665 = vmatprep.subr.bf16.mxu1 %v9458_v32 }
  0x41   :  { %8400 = vmatpush3.bf16.msra.mxu0 %v9457_v31  ;;  %7666 = vmatpush3.bf16.msra.mxu1 %v9459_v33 }
  0x42   :  { %8401 = vmatprep.subr.bf16.mxu0 %v9460_v34  ;;  %7667 = vmatprep.subr.bf16.mxu1 %v9461_v35 }
  0x45   :  { %8402 = vmatpush3.bf16.msra.mxu0 %v9460_v34  ;;  %7668 = vmatpush3.bf16.msra.mxu1 %v9462_v36 }
  0x46   :  { %8403 = vmatprep.subr.bf16.mxu0 %v9463_v37  ;;  %7669 = vmatprep.subr.bf16.mxu1 %v9464_v38 }
  0x49   :  { %8404 = vmatpush3.bf16.msra.mxu0 %v9463_v37  ;;  %7670 = vmatpush3.bf16.msra.mxu1 %v9465_v39  ;;  %v9467_v39 = vld [vmem:[%s13030_s29 + $0x78] sm:$0xff]  }
  0x4a   :  { %8405 = vmatprep.subr.bf16.mxu0 %v9466_v40  ;;  %7693 = vmatprep.subr.bf16.mxu1 %v9467_v39 }
  0x4d   :  { %8406 = vmatpush3.bf16.msra.mxu0 %v9466_v40  ;;  %v9468_v40 = vld [vmem:[%s13030_s29 + $0xb8] sm:$0xff]  }
  0x4e   :  { %8411 = vmatprep.subr.bf16.mxu0 %v9468_v40 }
  0xa5   :  { %v10148_v42 = vpop.permute.xlu0 %220 }
  0xa6   :  { %v10146_v41 = vpop.permute.xlu1 %230 }
  0xa9   :  { %v10157_v49 = vpop.permute.xlu0 %225 }
  0xaa   :  { %v10155_v46 = vpop.permute.xlu1 %235 }
  0xad   :  { %v10173_v0 = vpop.permute.xlu0 %253 }
  0xae   :  { %v10163_v58 = vpop.permute.xlu1 %258 }
  0xb1   :  { %v10205_v14 = vpop.permute.xlu0 %263 }
  0xb2   :  { %v10201_v12 = vpop.permute.xlu1 %268 }
  0xf0   :  { %v8389_v44 = vpop.f32.mrf.mxu0 }
  0xf1   :  { %v179_v48 = vadd.f32 %v8389_v44, %v7356_v43  ;;  %v9470_v44 = vld [vmem:[%s13030_s29 + $0x70] sm:$0xff]  }
  0xf2   :  { %v170_v50 = vpop.f32.mrf.mxu0 }
  0xf3   :  { %v189_v51 = vmul.f32 %v10153_v45, %v179_v48  ;;  %v171_v52 = vadd.f32 %v7356_v43, %v170_v50  ;;  %v9472_v48 = vld [vmem:[%s13030_s29 + $0x30] sm:$0xff]   ;;  %v9473_v50 = vld [vmem:[%s13030_s29 + $0x68] sm:$0xff]  }
  0xf4   :  { %v8390_v53 = vpop.f32.mrf.mxu0 }
  0xf5   :  { %vm197_vm1 = vcmp.ge.f32.partialorder %v189_v51, 1.0  ;;  %v187_v55 = vmul.f32 %v10153_v45, %v171_v52  ;;  %v182_v56 = vadd.f32 %v8390_v53, %v7356_v43  ;;  %v9475_v52 = vld [vmem:[%s13030_s29 + $0x28] sm:$0xff]   ;;  %v9476_v53 = vld [vmem:[%s13030_s29 + $0x60] sm:$0xff]  }
  0xf6   :  { %v173_v57 = vpop.f32.mrf.mxu0  ;;  %v10166_v59 = vsel %vm197_vm1, 0.0, %v189_v51  ;;  %v10170_v61 = vsel %vm197_vm1, 1.0, %v9896_v60  ;;  %v9474_v51 = vld [vmem:[%s13030_s29 + $0xa8] sm:$0xff]  }
  0xf7   :  { %v190_v62 = vmul.f32 %v10153_v45, %v182_v56  ;;  %v174_v63 = vadd.f32 %v7356_v43, %v173_v57  ;;  %vm195_vm2 = vcmp.ge.f32.partialorder %v187_v55, 1.0  ;;  %v244_v4 = vrot.slane %v10170_v61, 1  ;;  %v9469_v43 = vld [vmem:[%s13030_s29 + $0x38] sm:$0xff]   ;;  %v9478_v56 = vld [vmem:[%s13030_s29 + $0x20] sm:$0xff]  }
  0xf8   :  { %v10179_v2 = vsel %vm195_vm2, 1.0, %v9896_v60  ;;  %v10182_v3 = vsel %vm195_vm2, 0.0, %v187_v55  ;;  %v209_v30 = vrot.slane %v10170_v61, 7  ;;  %v9477_v55 = vld [vmem:[%s13030_s29 + $0xa0] sm:$0xff]   ;;  %v9479_v57 = vld [vmem:[%s13030_s29 + $0x58] sm:$0xff]  }
  0xf9   :  { %vm198_vm4 = vcmp.ge.f32.partialorder %v190_v62, 1.0  ;;  %v188_v1 = vmul.f32 %v10153_v45, %v174_v63  ;;  %v207_v9 = vrot.slane %v10179_v2, 7  ;;  %v242_v11 = vrot.slane %v10179_v2, 1  ;;  %v9481_v63 = vld [vmem:[%s13030_s29 + $0x18] sm:$0xff]  }
  0xfa   :  { %v10187_v5 = vsel %vm198_vm4, 1.0, %v9896_v60  ;;  %v10191_v6 = vsel %vm198_vm4, 0.0, %v190_v62  ;;  %vm7388_vm8 = vmpackc.low %vm198_vm4, %vm197_vm1  ;;  %v9480_v62 = vld [vmem:[%s13030_s29 + $0x98] sm:$0xff]  }
  0xfb   :  { %v210_v7 = vrot.slane %v10187_v5, 7  ;;  %v245_v8 = vrot.slane %v10187_v5, 1  ;;  %vm196_vm6 = vcmp.ge.f32.partialorder %v188_v1, 1.0 }
  0xfc   :  { %v10197_v10 = vsel %vm196_vm6, 1.0, %v9896_v60  ;;  %vm7386_vm7 = vmpackc.low %vm196_vm6, %vm195_vm2  ;;  %v10203_v13 = vsel %vm196_vm6, 0.0, %v188_v1  ;;  %v9482_v1 = vld [vmem:[%s13030_s29 + $0x50] sm:$0xff]   ;;  %vm1163_vm6 = vcmask 130048  }
  0xfd   :  { %v208_v15 = vrot.slane %v10197_v10, 7  ;;  %v243_v16 = vrot.slane %v10197_v10, 1  ;;  %7387 = vmatprep.mubr.msk.bf16.mxu1 %vm7386_vm7, %v9897_v17  ;;  %v217_v18 = vsel %vm213_vm3, %v210_v7, %v207_v9  ;;  %v247_v19 = vsel %vm246_vm5, %v244_v4, %v245_v8 }
  0xfe   :  { %v250_v20 = vsel %vm246_vm5, %v245_v8, %v242_v11  ;;  %v273_v21 = vmul.f32 %v10205_v14, %v247_v19  ;;  %v238_v26 = vmul.f32 %v10148_v42, %v217_v18  ;;  %v214_v35 = vsel %vm213_vm3, %v209_v30, %v210_v7  ;;  %v9484_v7 = vld [vmem:[%s13030_s29 + $0x10] sm:$0xff]   ;;  %v9485_v8 = vld [vmem:[%s13030_s29 + $0x48] sm:$0xff]   ;;  %v9490_v18 = vld [vmem:[%s13030_s29] sm:$0xff]  }
  0xff   :  { %v216_v22 = vsel %vm213_vm3, %v207_v9, %v208_v15  ;;  %v248_v23 = vsel %vm246_vm5, %v243_v16, %v244_v4  ;;  %v249_v24 = vsel %vm246_vm5, %v242_v11, %v243_v16  ;;  %v274_v25 = vmul.f32 %v10201_v12, %v250_v20  ;;  %v9483_v4 = vld [vmem:[%s13030_s29 + $0x90] sm:$0xff]   ;;  %v9486_v9 = vld [vmem:[%s13030_s29 + $0x88] sm:$0xff]   ;;  %v9489_v16 = vld [vmem:[%s13030_s29 + $0x80] sm:$0xff]  }
 0x100   :  { %v239_v27 = vmul.f32 %v10157_v49, %v216_v22  ;;  %v271_v28 = vmul.f32 %v10173_v0, %v249_v24  ;;  %v272_v29 = vmul.f32 %v10163_v58, %v248_v23  ;;  %v215_v34 = vsel %vm213_vm3, %v208_v15, %v209_v30  ;;  %v9487_v11 = vld [vmem:[%s13030_s29 + $0x8] sm:$0xff]   ;;  %v9488_v15 = vld [vmem:[%s13030_s29 + $0x40] sm:$0xff]  }
 0x101   :  { %v280_v33 = vpack.c.bf16 %v274_v25, %v273_v21  ;;  %v240_v36 = vmul.f32 %v10146_v41, %v215_v34  ;;  %v241_v37 = vmul.f32 %v10155_v46, %v214_v35  ;;  %v7361_v22 = vld [vmem:[%s13031_s2] ss:$0 sm:$0xff]  ;;  %vm9899_vm7 = vmmov 0  }
 0x102   :  { %v275_v31 = vpack.c.bf16 %v239_v27, %v238_v26  ;;  %v277_v32 = vpack.c.bf16 %v272_v29, %v271_v28  ;;  %v10313_v27 = vstv %s7390_s5 }
 0x103   :  { %v278_v38 = vpack.c.bf16 %v241_v37, %v240_v36 }
 0x104   :  { %513 = vmatmul.mubr.bf16.vlgmr.msra.gmra.mxu1 %v275_v31  ;;  %8407 = vmatprep.mubr.bf16.mxu0 %v277_v32 }
 0x105   :  { %7389 = vmatprep.mubr.msk.bf16.mxu1 %vm7388_vm8, %v9897_v17  ;;  %8408 = vmatmul.mubr.bf16.vlgmr.msra.gmra.mxu0 %v280_v33  ;;  %vm1278_vm8 = vcmask 523264  }
 0x106   :  { %7694 = vmatpush3.bf16.msra.mxu1 %v9469_v43  ;;  %8412 = vmatpush3.bf16.msra.mxu0 %v9468_v40 }
 0x107   :  { %7695 = vmatprep.subr.bf16.mxu1 %v9470_v44  ;;  %8413 = vmatprep.subr.bf16.mxu0 %v9471_v47 }
 0x10a   :  { %7696 = vmatpush3.bf16.msra.mxu1 %v9472_v48  ;;  %8414 = vmatpush3.bf16.msra.mxu0 %v9471_v47 }
 0x10b   :  { %7697 = vmatprep.subr.bf16.mxu1 %v9473_v50  ;;  %8415 = vmatprep.subr.bf16.mxu0 %v9474_v51 }
 0x10c   :  { %521 = vmatmul.mubr.bf16.gmra.mxu1 %v278_v38 }
 0x10e   :  { %7698 = vmatpush3.bf16.msra.mxu1 %v9475_v52  ;;  %8416 = vmatpush3.bf16.msra.mxu0 %v9474_v51 }
 0x10f   :  { %7699 = vmatprep.subr.bf16.mxu1 %v9476_v53  ;;  %8417 = vmatprep.subr.bf16.mxu0 %v9477_v55 }
 0x112   :  { %7700 = vmatpush3.bf16.msra.mxu1 %v9478_v56  ;;  %8418 = vmatpush3.bf16.msra.mxu0 %v9477_v55 }
 0x113   :  { %7701 = vmatprep.subr.bf16.mxu1 %v9479_v57  ;;  %8419 = vmatprep.subr.bf16.mxu0 %v9480_v62 }
 0x116   :  { %7702 = vmatpush3.bf16.msra.mxu1 %v9481_v63  ;;  %8420 = vmatpush3.bf16.msra.mxu0 %v9480_v62 }
 0x117   :  { %7703 = vmatprep.subr.bf16.mxu1 %v9482_v1  ;;  %8421 = vmatprep.subr.bf16.mxu0 %v9483_v4 }
 0x11a   :  { %7704 = vmatpush3.bf16.msra.mxu1 %v9484_v7  ;;  %8422 = vmatpush3.bf16.msra.mxu0 %v9483_v4 }
 0x11b   :  { %7705 = vmatprep.subr.bf16.mxu1 %v9485_v8  ;;  %8423 = vmatprep.subr.bf16.mxu0 %v9486_v9 }
 0x11e   :  { %7706 = vmatpush3.bf16.msra.mxu1 %v9487_v11  ;;  %8424 = vmatpush3.bf16.msra.mxu0 %v9486_v9 }
 0x11f   :  { %7707 = vmatprep.subr.bf16.mxu1 %v9488_v15  ;;  %8425 = vmatprep.subr.bf16.mxu0 %v9489_v16 }
 0x122   :  { %7708 = vmatpush3.bf16.msra.mxu1 %v9490_v18  ;;  %8426 = vmatpush3.bf16.msra.mxu0 %v9489_v16 }
 0x1c4   :  { %v7671_v19 = vpop.f32.mrf.mxu1 }
 0x1c5   :  { %v8409_v20 = vpop.f32.mrf.mxu0 }
 0x1c6   :  { %v7672_v21 = vpop.f32.mrf.mxu1 }
 0x1c7   :  { %v7673_v23 = vadd.f32 %v7672_v21, %v7671_v19  ;;  %v563_v24 = vpop.f32.mrf.mxu0 }
 0x1c8   :  { %v7674_v25 = vpop.f32.mrf.mxu1 }
 0x1c9   :  { %v515_v26 = vadd.f32 %v7673_v23, %v7361_v22  ;;  %v8410_v28 = vpop.f32.mrf.mxu0 }
 0x1ca   :  { %v7675_v29 = vpop.f32.mrf.mxu1 }
 0x1cb   :  { %v564_v30 = vadd.f32 %v563_v24, %v515_v26  ;;  %v7676_v31 = vadd.f32 %v7675_v29, %v7674_v25  ;;  %v566_v35 = vpop.f32.mrf.mxu0 }
 0x1cc   :  { %v7677_v32 = vpop.f32.mrf.mxu1 }
 0x1cd   :  { %v580_v33 = vmul.f32 %v10313_v27, %v564_v30  ;;  %v518_v34 = vadd.f32 %v7676_v31, %v7361_v22 }
 0x1ce   :  { %v7678_v36 = vpop.f32.mrf.mxu1 }
 0x1cf   :  { %v567_v37 = vadd.f32 %v566_v35, %v518_v34  ;;  %v7679_v38 = vadd.f32 %v7678_v36, %v7677_v32  ;;  %vm588_vm9 = vcmp.ge.f32.partialorder %v580_v33, 1.0 }
 0x1d0   :  { %v7680_v39 = vpop.f32.mrf.mxu1  ;;  %v10316_v40 = vsel %vm588_vm9, 0.0, %v580_v33  ;;  %v592_v51 = vsel %vm588_vm9, 1.0, %v9896_v60 }
 0x1d1   :  { %v581_v43 = vmul.f32 %v10313_v27, %v567_v37  ;;  %v523_v44 = vadd.f32 %v7679_v38, %v7361_v22  ;;  %v612_v63 = vrot.slane %v592_v51, 1  ;;  %v600_v15 = vrot.slane %v592_v51, 7  ;;  %v7391_v51 = vld [vmem:[%s12986_s9] ss:$0 sm:$0xff] }
 0x1d2   :  { %v7681_v47 = vpop.f32.mrf.mxu1 }
 0x1d3   :  { %v572_v48 = vadd.f32 %v8409_v20, %v523_v44  ;;  %v7682_v50 = vadd.f32 %v7681_v47, %v7680_v39  ;;  %vm589_vm10 = vcmp.ge.f32.partialorder %v581_v43, 1.0 }
 0x1d4   :  { %v593_v52 = vsel %vm589_vm10, 1.0, %v9896_v60  ;;  %vm7416_vm11 = vmpackc.low %vm589_vm10, %vm588_vm9  ;;  %v10321_v53 = vsel %vm589_vm10, 0.0, %v581_v43 }
 0x1d5   :  { %v582_v55 = vmul.f32 %v10313_v27, %v572_v48  ;;  %v526_v56 = vadd.f32 %v7682_v50, %v7361_v22  ;;  %v613_v57 = vrot.slane %v593_v52, 1  ;;  %7417 = vmatprep.mubr.msk.bf16.mxu1 %vm7416_vm11, %v9897_v17  ;;  %v601_v8 = vrot.slane %v593_v52, 7 }
 0x1d7   :  { %vm590_vm12 = vcmp.ge.f32.partialorder %v582_v55, 1.0  ;;  %v575_v62 = vadd.f32 %v8410_v28, %v526_v56  ;;  %v618_v11 = vsel %vm246_vm5, %v612_v63, %v613_v57  ;;  %v606_v24 = vsel %vm213_vm3, %v600_v15, %v601_v8 }
 0x1d8   :  { %v594_v1 = vsel %vm590_vm12, 1.0, %v9896_v60  ;;  %v10328_v4 = vsel %vm590_vm12, 0.0, %v582_v55  ;;  %v620_v19 = vmul.f32 %v618_v11, %v10173_v0  ;;  %v609_v31 = vmul.f32 %v606_v24, %v10157_v49 }
 0x1d9   :  { %v583_v7 = vmul.f32 %v10313_v27, %v575_v62  ;;  %v614_v9 = vrot.slane %v594_v1, 1  ;;  %v602_v34 = vrot.slane %v594_v1, 7  ;;  %v10366_v62 = vstv %s7420_s30  ;;  %s13010_s30 = smov 120  }
 0x1db   :  { %vm591_vm13 = vcmp.ge.f32.partialorder %v583_v7, 1.0  ;;  %v617_v16 = vsel %vm246_vm5, %v613_v57, %v614_v9  ;;  %v605_v38 = vsel %vm213_vm3, %v601_v8, %v602_v34 }
 0x1dc   :  { %v595_v18 = vsel %vm591_vm13, 1.0, %v9896_v60  ;;  %v621_v20 = vmul.f32 %v617_v16, %v10163_v58  ;;  %v10340_v21 = vsel %vm591_vm13, 0.0, %v583_v7  ;;  %vm7418_vm14 = vmpackc.low %vm591_vm13, %vm590_vm12  ;;  %v610_v43 = vmul.f32 %v605_v38, %v10146_v41 }
 0x1dd   :  { %v603_v22 = vrot.slane %v595_v18, 7  ;;  %v615_v23 = vrot.slane %v595_v18, 1 }
 0x1de   :  { %v626_v25 = vpack.c.bf16 %v621_v20, %v620_v19 }
 0x1df   :  { %v607_v26 = vsel %vm213_vm3, %v603_v22, %v600_v15  ;;  %v616_v28 = vsel %vm246_vm5, %v614_v9, %v615_v23  ;;  %v619_v29 = vsel %vm246_vm5, %v615_v23, %v612_v63  ;;  %v604_v37 = vsel %vm213_vm3, %v602_v34, %v603_v22 }
 0x1e0   :  { %8427 = vmatprep.mubr.bf16.mxu0 %v626_v25  ;;  %v608_v30 = vmul.f32 %v607_v26, %v10148_v42  ;;  %v622_v32 = vmul.f32 %v616_v28, %v10205_v14  ;;  %v623_v33 = vmul.f32 %v619_v29, %v10201_v12  ;;  %v611_v39 = vmul.f32 %v604_v37, %v10155_v46 }
 0x1e2   :  { %v624_v35 = vpack.c.bf16 %v609_v31, %v608_v30  ;;  %v629_v36 = vpack.c.bf16 %v623_v33, %v622_v32  ;;  %v627_v44 = vpack.c.bf16 %v611_v39, %v610_v43 }
 0x1e4   :  { %862 = vmatmul.mubr.bf16.vlgmr.msra.gmra.mxu1 %v624_v35  ;;  %8428 = vmatmul.mubr.bf16.vlgmr.msra.gmra.mxu0 %v629_v36 }
 0x1e5   :  { %7419 = vmatprep.mubr.msk.bf16.mxu1 %vm7418_vm14, %v9897_v17 }
 0x1ec   :  { %870 = vmatmul.mubr.bf16.gmra.mxu1 %v627_v44 }
 0x2a4   :  { %v7709_v47 = vpop.f32.mrf.mxu1  ;;  %v8429_v48 = vpop.f32.mrf.mxu0 }
 0x2a6   :  { %v7710_v50 = vpop.f32.mrf.mxu1  ;;  %v912_v52 = vpop.f32.mrf.mxu0 }
 0x2a7   :  { %v7711_v55 = vadd.f32 %v7710_v50, %v7709_v47 }
 0x2a8   :  { %v7712_v56 = vpop.f32.mrf.mxu1  ;;  %v8430_v63 = vpop.f32.mrf.mxu0 }
 0x2a9   :  { %v864_v57 = vadd.f32 %v7711_v55, %v7391_v51 }
 0x2aa   :  { %v7713_v1 = vpop.f32.mrf.mxu1  ;;  %v915_v16 = vpop.f32.mrf.mxu0 }
 0x2ab   :  { %v913_v7 = vadd.f32 %v912_v52, %v864_v57  ;;  %v7714_v8 = vadd.f32 %v7713_v1, %v7712_v56  ;;  %v977_v57 = vld [vmem:[%s12987_s10] sm:$0xff]  ;;  %v1074_v1 = vld [vmem:[%s12988_s11 + $0x70] sm:$0xff] }
 0x2ac   :  { %v7715_v9 = vpop.f32.mrf.mxu1  ;;  %8439 = vmatprep.mubr.msk.f32.mxu0 %vm129_vm0, %v977_v57 }
 0x2ad   :  { %v929_v11 = vmul.f32 %v10366_v62, %v913_v7  ;;  %v867_v15 = vadd.f32 %v7714_v8, %v7391_v51 }
 0x2ae   :  { %v7716_v18 = vpop.f32.mrf.mxu1 }
 0x2af   :  { %vm937_vm15 = vcmp.ge.f32.partialorder %v929_v11, 1.0  ;;  %v916_v19 = vadd.f32 %v915_v16, %v867_v15  ;;  %v7717_v20 = vadd.f32 %v7716_v18, %v7715_v9  ;;  %v1073_v9 = vld [vmem:[%s12988_s11 + $0x68] sm:$0xff]  ;;  %v1072_v16 = vld [vmem:[%s12988_s11 + $0x60] sm:$0xff]  ;;  %v1071_v18 = vld [vmem:[%s12988_s11 + $0x58] sm:$0xff] }
 0x2b0   :  { %v7718_v22 = vpop.f32.mrf.mxu1  ;;  %v10370_v23 = vsel %vm937_vm15, 0.0, %v929_v11  ;;  %v941_v34 = vsel %vm937_vm15, 1.0, %v9896_v60 }
 0x2b1   :  { %v930_v24 = vmul.f32 %v10366_v62, %v916_v19  ;;  %v872_v25 = vadd.f32 %v7717_v20, %v7391_v51  ;;  %v949_v39 = vadd.f32 %v941_v34, %v10179_v2  ;;  %v1070_v19 = vld [vmem:[%s12988_s11 + $0x50] sm:$0xff]  ;;  %v1069_v20 = vld [vmem:[%s12988_s11 + $0x48] sm:$0xff] }
 0x2b2   :  { %v7719_v26 = vpop.f32.mrf.mxu1 }
 0x2b3   :  { %vm938_vm1 = vcmp.ge.f32.partialorder %v930_v24, 1.0  ;;  %v921_v28 = vadd.f32 %v8429_v48, %v872_v25  ;;  %v7720_v29 = vadd.f32 %v7719_v26, %v7718_v22  ;;  %v953_v55 = vrot.slane %v949_v39, 1  ;;  %v1068_v22 = vld [vmem:[%s12988_s11 + $0x40] sm:$0xff]  ;;  %v1066_v25 = vld [vmem:[%s12988_s11 + $0x30] sm:$0xff]  ;;  %v1065_v26 = vld [vmem:[%s12988_s11 + $0x28] sm:$0xff] }
 0x2b4   :  { %v10373_v30 = vsel %vm938_vm1, 0.0, %v930_v24  ;;  %v942_v35 = vsel %vm938_vm1, 1.0, %v9896_v60  ;;  %v1067_v24 = vld [vmem:[%s12988_s11 + $0x38] sm:$0xff] }
 0x2b5   :  { %v931_v31 = vmul.f32 %v10366_v62, %v921_v28  ;;  %v875_v32 = vadd.f32 %v7720_v29, %v7391_v51  ;;  %v950_v44 = vadd.f32 %v942_v35, %v10197_v10  ;;  %v1064_v28 = vld [vmem:[%s12988_s11 + $0x20] sm:$0xff]  ;;  %v1063_v29 = vld [vmem:[%s12988_s11 + $0x18] sm:$0xff] }
 0x2b7   :  { %v924_v33 = vadd.f32 %v8430_v63, %v875_v32  ;;  %vm939_vm2 = vcmp.ge.f32.partialorder %v931_v31, 1.0  ;;  %v954_v56 = vrot.slane %v950_v44, 1 }
 0x2b8   :  { %v943_v36 = vsel %vm939_vm2, 1.0, %v9896_v60  ;;  %v10380_v37 = vsel %vm939_vm2, 0.0, %v931_v31  ;;  %v1062_v31 = vld [vmem:[%s12988_s11 + $0x10] sm:$0xff] }
 0x2b9   :  { %v932_v38 = vmul.f32 %v10366_v62, %v924_v33  ;;  %v951_v43 = vadd.f32 %v943_v36, %v10170_v61  ;;  %v959_v8 = vsel %vm246_vm5, %v953_v55, %v954_v56 }
 0x2ba   :  { %v961_v15 = vmax.f32 %v949_v39, %v959_v8  ;;  %v9496_v8 = vld [vmem:[%s12994_s17 + $0x30] sm:$0xff]  }
 0x2bb   :  { %vm940_vm4 = vcmp.ge.f32.partialorder %v932_v38, 1.0  ;;  %v955_v51 = vrot.slane %v951_v43, 1 }
 0x2bc   :  { %v944_v47 = vsel %vm940_vm4, 1.0, %v9896_v60  ;;  %v10387_v48 = vsel %vm940_vm4, 0.0, %v932_v38 }
 0x2bd   :  { %v952_v50 = vadd.f32 %v944_v47, %v10187_v5  ;;  %v10401_v5 = vld [vmem:[%s12988_s11 + $0x78] sm:$0xff]  ;;  %v958_v7 = vsel %vm246_vm5, %v954_v56, %v955_v51  ;;  %v10460_v47 = vld [vmem:[%s12988_s11 + $0x8] sm:$0xff] }
 0x2be   :  { %8442 = vmatprep.subr.mxu1 %v10401_v5  ;;  %v962_v11 = vmax.f32 %v950_v44, %v958_v7  ;;  %v978_v44 = vld [vmem:[%s12987_s10 + $0x8] sm:$0xff]  ;;  %v9495_v7 = vld [vmem:[%s12994_s17 + $0x38] sm:$0xff]  }
 0x2bf   :  { %v956_v52 = vrot.slane %v952_v50, 1  ;;  %8443 = vmatpush3.msra.mxu1 %v10401_v5 }
 0x2c0   :  { %8444 = vmatprep.subr.mxu1 %v1074_v1 }
 0x2c1   :  { %v957_v2 = vsel %vm246_vm5, %v955_v51, %v956_v52  ;;  %v960_v61 = vsel %vm246_vm5, %v956_v52, %v953_v55  ;;  %8445 = vmatpush3.msra.mxu1 %v1074_v1  ;;  %v9491_v51 = vld [vmem:[%s12994_s17 + $0x18] sm:$0xff]   ;;  %v9492_v52 = vld [vmem:[%s12994_s17 + $0x10] sm:$0xff]   ;;  %v9493_v55 = vld [vmem:[%s12994_s17 + $0x8] sm:$0xff]  }
 0x2c2   :  { %v963_v10 = vmax.f32 %v951_v43, %v957_v2  ;;  %v964_v63 = vmax.f32 %v952_v50, %v960_v61  ;;  %8446 = vmatprep.subr.mxu1 %v1073_v9  ;;  %v10467_v50 = vld [vmem:[%s12988_s11] sm:$0xff]  ;;  %v10502_v1 = vld [vmem:[%s12990_s13 + $0x8] sm:$0xff] }
 0x2c3   :  { %8447 = vmatpush3.msra.mxu1 %v1073_v9  ;;  %v9494_v2 = vld [vmem:[%s12994_s17] sm:$0xff]   ;;  %v9497_v9 = vld [vmem:[%s12994_s17 + $0x28] sm:$0xff]  }
 0x2c4   :  { %969 = vrot.lane.b32.xlu1 %v963_v10, %s13010_s30  ;;  %971 = vrot.lane.b32.xlu0 %v964_v63, %s13010_s30  ;;  %v1161_v61 = vld [vmem:[%s12990_s13] sm:$0xff] }
 0x2c5   :  { %8448 = vmatprep.subr.mxu1 %v1072_v16 }
 0x2c6   :  { %8449 = vmatpush3.msra.mxu1 %v1072_v16 }
 0x2c7   :  { %8450 = vmatprep.subr.mxu1 %v1071_v18 }
 0x2c8   :  { %967 = vrot.lane.b32.xlu0 %v962_v11, %s13010_s30  ;;  %965 = vrot.lane.b32.xlu1 %v961_v15, %s13010_s30 }
 0x2c9   :  { %8451 = vmatpush3.msra.mxu1 %v1071_v18 }
 0x2ca   :  { %8452 = vmatprep.subr.mxu1 %v1070_v19 }
 0x2cb   :  { %8453 = vmatpush3.msra.mxu1 %v1070_v19 }
 0x2cc   :  { %8454 = vmatprep.subr.mxu1 %v1069_v20 }
 0x2cd   :  { %8455 = vmatpush3.msra.mxu1 %v1069_v20  ;;  %v10533_v20 = vld [vmem:[%s12989_s12] sm:$0xff] }
 0x2ce   :  { %8456 = vmatprep.subr.mxu1 %v1068_v22 }
 0x2cf   :  { %8457 = vmatpush3.msra.mxu1 %v1068_v22  ;;  %v10545_v22 = vld [vmem:[%s12989_s12 + $0x8] sm:$0xff] }
 0x2d0   :  { %8458 = vmatprep.subr.mxu1 %v1067_v24 }
 0x2d1   :  { %8459 = vmatpush3.msra.mxu1 %v1067_v24  ;;  %v9499_v24 = vld [vmem:[%s12994_s17 + $0x58] sm:$0xff]  }
 0x2d2   :  { %8460 = vmatprep.subr.mxu1 %v1066_v25 }
 0x2d3   :  { %8461 = vmatpush3.msra.mxu1 %v1066_v25 }
 0x2d4   :  { %8462 = vmatprep.subr.mxu1 %v1065_v26 }
 0x2d5   :  { %8463 = vmatpush3.msra.mxu1 %v1065_v26 }
 0x2d6   :  { %8464 = vmatprep.subr.mxu1 %v1064_v28 }
 0x2d7   :  { %8465 = vmatpush3.msra.mxu1 %v1064_v28 }
 0x2d8   :  { %8466 = vmatprep.subr.mxu1 %v1063_v29 }
 0x2d9   :  { %8467 = vmatpush3.msra.mxu1 %v1063_v29 }
 0x2da   :  { %8468 = vmatprep.subr.mxu1 %v1062_v31 }
 0x2db   :  { %8469 = vmatpush3.msra.mxu1 %v1062_v31  ;;  %v9500_v31 = vld [vmem:[%s12994_s17 + $0x50] sm:$0xff]  }
 0x2dc   :  { %8470 = vmatprep.subr.mxu1 %v10460_v47 }
 0x2dd   :  { %8471 = vmatpush3.msra.mxu1 %v10460_v47 }
 0x2de   :  { %8472 = vmatprep.subr.mxu1 %v10467_v50 }
 0x2df   :  { %8473 = vmatpush3.msra.mxu1 %v10467_v50 }
 0x336   :  { %v970_v32 = vpop.permute.xlu1 %969  ;;  %v972_v33 = vpop.permute.xlu0 %971 }
 0x337   :  { %v976_v34 = vmax.f32 %v964_v63, %v972_v33  ;;  %v975_v35 = vmax.f32 %v963_v10, %v970_v32  ;;  %v9501_v32 = vld [vmem:[%s12994_s17 + $0x48] sm:$0xff]   ;;  %v9502_v33 = vld [vmem:[%s12994_s17 + $0x40] sm:$0xff]  }
 0x339   :  { %8431 = vmatprep.subr.mxu0 %v976_v34 }
 0x33a   :  { %8432 = vmatpush3.msra.mxu0 %v976_v34  ;;  %v968_v36 = vpop.permute.xlu0 %967  ;;  %v966_v38 = vpop.permute.xlu1 %965 }
 0x33b   :  { %v974_v39 = vmax.f32 %v962_v11, %v968_v36  ;;  %8433 = vmatprep.subr.mxu0 %v975_v35  ;;  %v973_v43 = vmax.f32 %v961_v15, %v966_v38  ;;  %v9498_v11 = vld [vmem:[%s12994_s17 + $0x20] sm:$0xff]  }
 0x33c   :  { %8434 = vmatpush3.msra.mxu0 %v975_v35 }
 0x33d   :  { %8435 = vmatprep.subr.mxu0 %v974_v39 }
 0x33e   :  { %8436 = vmatpush3.msra.mxu0 %v974_v39 }
 0x33f   :  { %8437 = vmatprep.subr.mxu0 %v973_v43 }
 0x340   :  { %8438 = vmatpush3.msra.mxu0 %v973_v43 }
 0x341   :  { %8440 = vmatmul.mubr.msk.f32.vlgmr.msra.gmra.mxu0 %vm129_vm0, %v978_v44  ;;  %8484 = vmatprep.subr.bf16.mxu0 %v9896_v60 }
 0x342   :  { %8485 = vmatpush3.bf16.msra.mxu0 %v9491_v51  ;;  %8492 = vmatprep.mubr.msk.bf16.mxu0 %vm9899_vm7, %v9896_v60  ;;  %v9503_v51 = vld [vmem:[%s12996_s19 + $0x38] sm:$0xff]  }
 0x343   :  { %8486 = vmatprep.subr.bf16.mxu0 %v9896_v60 }
 0x346   :  { %8487 = vmatpush3.bf16.msra.mxu0 %v9492_v52  ;;  %v9504_v52 = vld [vmem:[%s12996_s19 + $0x30] sm:$0xff]  }
 0x347   :  { %8488 = vmatprep.subr.bf16.mxu0 %v9896_v60 }
 0x34a   :  { %8489 = vmatpush3.bf16.msra.mxu0 %v9493_v55  ;;  %v9505_v55 = vld [vmem:[%s12996_s19 + $0x28] sm:$0xff]  }
 0x34b   :  { %8490 = vmatprep.subr.bf16.mxu0 %v9896_v60 }
 0x34e   :  { %8491 = vmatpush3.bf16.msra.mxu0 %v9494_v2 }
 0x401   :  { %v8441_v56 = vpop.f32.mrf.mxu0 }
 0x403   :  { %v1051_v57 = vpop.f32.mrf.mxu0 }
 0x404   :  { %8474 = vmatprep.mubr.f32.mxu1 %v1051_v57 }
 0x405   :  { %8475 = vmatmul.mubr.f32.vlgmr.msra.gmra.mxu1 %v8441_v56  ;;  %v9506_v56 = vld [vmem:[%s12996_s19 + $0x20] sm:$0xff]  }
 0x406   :  { %8481 = vmatprep.mubr.msk.f32.mxu1 %vm1163_vm6, %v1161_v61 }
 0x4c5   :  { %v10492_v10 = vpop.f32.mrf.mxu1 }
 0x4c6   :  { %8477 = vmatprep.subr.mxu1 %v10492_v10  ;;  %8508 = vmatprep.subr.mxu0 %v10492_v10 }
 0x4c7   :  { %v10496_v63 = vpop.f32.mrf.mxu1  ;;  %8478 = vmatpush3.msra.mxu1 %v10492_v10 }
 0x4c8   :  { %8479 = vmatprep.subr.mxu1 %v10496_v63  ;;  %v1151_v15 = vpack.c.bf16 %v10492_v10, %v10496_v63 }
 0x4c9   :  { %8480 = vmatpush3.msra.mxu1 %v10496_v63 }
 0x4ca   :  { %8482 = vmatmul.mubr.msk.f32.vlgmr.msra.gmra.mxu1 %vm1163_vm6, %v10502_v1  ;;  %8496 = vmatprep.subr.bf16.mxu1 %v9896_v60 }
 0x4cb   :  { %8497 = vmatpush3.bf16.msra.mxu1 %v9495_v7  ;;  %8504 = vmatprep.mubr.msk.bf16.mxu1 %vm9899_vm7, %v9896_v60 }
 0x4cc   :  { %8498 = vmatprep.subr.bf16.mxu1 %v9896_v60 }
 0x4cf   :  { %8499 = vmatpush3.bf16.msra.mxu1 %v9496_v8  ;;  %v10589_v8 = vstv %s7459_s26 }
 0x4d0   :  { %8500 = vmatprep.subr.bf16.mxu1 %v9896_v60 }
 0x4d3   :  { %8501 = vmatpush3.bf16.msra.mxu1 %v9497_v9 }
 0x4d4   :  { %8502 = vmatprep.subr.bf16.mxu1 %v9896_v60 }
 0x4d7   :  { %8503 = vmatpush3.bf16.msra.mxu1 %v9498_v11 }
 0x4da   :  { %8505 = vmatmul.mubr.msk.bf16.vlgmr.msra.gmra.mxu1 %vm1278_vm8, %v1151_v15 }
 0x4db   :  { %8531 = vmatprep.mubr.msk.f32.mxu1 %vm1163_vm6, %v1161_v61  ;;  %v7458_v61 = vld [vmem:[%s12995_s18] ss:$0 sm:$0xff] }
 0x58a   :  { %v8483_v16 = vpop.f32.mrf.mxu1 }
 0x58c   :  { %v1236_v18 = vpop.f32.mrf.mxu1 }
 0x58d   :  { %v1245_v19 = vpack.c.bf16 %v8483_v16, %v1236_v18 }
 0x58f   :  { %8493 = vmatmul.mubr.msk.bf16.vlgmr.msra.gmra.mxu0 %vm1278_vm8, %v1245_v19 }
 0x590   :  { %8509 = vmatpush3.msra.mxu0 %v10492_v10  ;;  %8512 = vmatprep.mubr.msk.f32.mxu0 %vm1163_vm6, %v10533_v20 }
 0x591   :  { %8510 = vmatprep.subr.mxu0 %v10496_v63 }
 0x592   :  { %8511 = vmatpush3.msra.mxu0 %v10496_v63 }
 0x593   :  { %8515 = vmatprep.subr.bf16.mxu0 %v9896_v60 }
 0x597   :  { %8513 = vmatmul.mubr.msk.f32.vlgmr.msra.gmra.mxu0 %vm1163_vm6, %v10545_v22 }
 0x598   :  { %8516 = vmatpush3.bf16.msra.mxu0 %v9499_v24  ;;  %8523 = vmatprep.mubr.msk.bf16.mxu0 %vm9899_vm7, %v9896_v60 }
 0x599   :  { %8517 = vmatprep.subr.bf16.mxu0 %v9896_v60 }
 0x59a   :  { %v1384_v25 = vpop.f32.mrf.mxu1 }
 0x59c   :  { %v8506_v26 = vpop.f32.mrf.mxu1  ;;  %8518 = vmatpush3.bf16.msra.mxu0 %v9500_v31 }
 0x59d   :  { %8519 = vmatprep.subr.bf16.mxu0 %v9896_v60 }
 0x59e   :  { %v1387_v28 = vpop.f32.mrf.mxu1 }
 0x5a0   :  { %v8507_v29 = vpop.f32.mrf.mxu1  ;;  %8520 = vmatpush3.bf16.msra.mxu0 %v9501_v32 }
 0x5a1   :  { %8521 = vmatprep.subr.bf16.mxu0 %v9896_v60  ;;  %v9900_v29 = vmov 1.0  }
 0x5a4   :  { %8522 = vmatpush3.bf16.msra.mxu0 %v9502_v33  ;;  %v9507_v33 = vld [vmem:[%s12996_s19 + $0x18] sm:$0xff]  }
 0x5a5   :  { %8546 = vmatprep.subr.bf16.mxu0 %v9896_v60 }
 0x64f   :  { %v1316_v34 = vpop.f32.mrf.mxu0 }
 0x650   :  { %v1385_v57 = vadd.f32 %v1384_v25, %v1316_v34  ;;  %v9508_v34 = vld [vmem:[%s12996_s19 + $0x10] sm:$0xff]  }
 0x651   :  { %v8494_v35 = vpop.f32.mrf.mxu0 }
 0x652   :  { %v9510_v35 = vld [vmem:[%s12996_s19] sm:$0xff]  }
 0x653   :  { %v1319_v36 = vpop.f32.mrf.mxu0 }
 0x654   :  { %v1388_v11 = vadd.f32 %v1387_v28, %v1319_v36  ;;  %v9511_v36 = vld [vmem:[%s12996_s19 + $0x58] sm:$0xff]  }
 0x655   :  { %v8495_v38 = vpop.f32.mrf.mxu0 }
 0x657   :  { %v8514_v39 = vpop.f32.mrf.mxu0 }
 0x659   :  { %v1465_v43 = vpop.f32.mrf.mxu0 }
 0x65a   :  { %v1474_v44 = vpack.c.bf16 %v8514_v39, %v1465_v43 }
 0x65c   :  { %8524 = vmatmul.mubr.msk.bf16.vlgmr.msra.gmra.mxu0 %vm1278_vm8, %v1474_v44 }
 0x65d   :  { %8554 = vmatprep.mubr.msk.bf16.mxu0 %vm9899_vm7, %v9896_v60  ;;  %8547 = vmatpush3.bf16.msra.mxu0 %v9503_v51 }
 0x65e   :  { %8548 = vmatprep.subr.bf16.mxu0 %v9896_v60 }
 0x661   :  { %8549 = vmatpush3.bf16.msra.mxu0 %v9504_v52 }
 0x662   :  { %8550 = vmatprep.subr.bf16.mxu0 %v9896_v60 }
 0x665   :  { %8551 = vmatpush3.bf16.msra.mxu0 %v9505_v55 }
 0x666   :  { %8552 = vmatprep.subr.bf16.mxu0 %v9896_v60 }
 0x669   :  { %8553 = vmatpush3.bf16.msra.mxu0 %v9506_v56  ;;  %v9512_v56 = vld [vmem:[%s12996_s19 + $0x50] sm:$0xff]  }
 0x66a   :  { %8565 = vmatprep.subr.bf16.mxu0 %v9896_v60 }
 0x71c   :  { %v1545_v2 = vpop.f32.mrf.mxu0 }
 0x71d   :  { %v1552_v7 = vadd.f32 %v1545_v2, %v1385_v57  ;;  %v9513_v57 = vld [vmem:[%s12996_s19 + $0x48] sm:$0xff]   ;;  %v9514_v2 = vld [vmem:[%s12996_s19 + $0x40] sm:$0xff]  }
 0x71e   :  { %v8525_v9 = vpop.f32.mrf.mxu0 }
 0x71f   :  { %v1561_v15 = vadd.f32 %v7458_v61, %v1552_v7 }
 0x720   :  { %v1548_v16 = vpop.f32.mrf.mxu0 }
 0x721   :  { %v10592_v18 = vmul.f32 %v10589_v8, %v1561_v15  ;;  %v1553_v19 = vadd.f32 %v1548_v16, %v1388_v11 }
 0x722   :  { %v8526_v24 = vpop.f32.mrf.mxu0 }
 0x723   :  { %v1562_v26 = vadd.f32 %v7458_v61, %v1553_v19  ;;  %vm1569_vm9 = vcmp.ge.f32.partialorder %v10592_v18, 1.0 }
 0x724   :  { %v1571_v28 = vsel %vm1569_vm9, 1.0, %v9896_v60 }
 0x725   :  { %v10596_v25 = vmul.f32 %v10589_v8, %v1562_v26  ;;  %v7499_v26 = vld [vmem:[%s12997_s20] ss:$0 sm:$0xff] }
 0x727   :  { %vm1570_vm10 = vcmp.ge.f32.partialorder %v10596_v25, 1.0 }
 0x728   :  { %8527 = vmatprep.subr.msk.mxu1 %vm1570_vm10, %v9900_v29  ;;  %v1572_v31 = vsel %vm1570_vm10, 1.0, %v9896_v60 }
 0x729   :  { %8528 = vmatpush3.msk.msra.mxu1 %vm1570_vm10, %v9900_v29  ;;  %v1575_v32 = vpack.c.bf16 %v1572_v31, %v1571_v28  ;;  %v10681_v31 = vstv %s7500_s25 }
 0x72a   :  { %8529 = vmatprep.subr.msk.mxu1 %vm1569_vm9, %v9900_v29 }
 0x72b   :  { %8530 = vmatpush3.msk.msra.mxu1 %vm1569_vm9, %v9900_v29  ;;  %8555 = vmatmul.mubr.msk.bf16.vlgmr.msra.gmra.mxu0 %vm1278_vm8, %v1575_v32 }
 0x72c   :  { %8532 = vmatmul.mubr.msk.f32.vlgmr.msra.gmra.mxu1 %vm1163_vm6, %v10502_v1  ;;  %8534 = vmatprep.subr.bf16.mxu1 %v9896_v60  ;;  %v9509_v1 = vld [vmem:[%s12996_s19 + $0x8] sm:$0xff]  }
 0x72d   :  { %8535 = vmatpush3.bf16.msra.mxu1 %v9507_v33  ;;  %8542 = vmatprep.mubr.msk.bf16.mxu1 %vm9899_vm7, %v9896_v60 }
 0x72e   :  { %8536 = vmatprep.subr.bf16.mxu1 %v9896_v60  ;;  %8573 = vmatprep.mubr.msk.bf16.mxu0 %vm9899_vm7, %v9896_v60 }
 0x72f   :  { %8566 = vmatpush3.bf16.msra.mxu0 %v9511_v36 }
 0x730   :  { %8567 = vmatprep.subr.bf16.mxu0 %v9896_v60 }
 0x731   :  { %8537 = vmatpush3.bf16.msra.mxu1 %v9508_v34 }
 0x732   :  { %8538 = vmatprep.subr.bf16.mxu1 %v9896_v60 }
 0x733   :  { %8568 = vmatpush3.bf16.msra.mxu0 %v9512_v56 }
 0x734   :  { %8569 = vmatprep.subr.bf16.mxu0 %v9896_v60 }
 0x735   :  { %8539 = vmatpush3.bf16.msra.mxu1 %v9509_v1 }
 0x736   :  { %8540 = vmatprep.subr.bf16.mxu1 %v9896_v60 }
 0x737   :  { %8570 = vmatpush3.bf16.msra.mxu0 %v9513_v57 }
 0x738   :  { %8571 = vmatprep.subr.bf16.mxu0 %v9896_v60 }
 0x739   :  { %8541 = vmatpush3.bf16.msra.mxu1 %v9510_v35 }
 0x73a   :  { %8558 = vmatprep.subr.msk.mxu1 %vm1570_vm10, %v9900_v29 }
 0x73b   :  { %8572 = vmatpush3.bf16.msra.mxu0 %v9514_v2  ;;  %v2067_v2 = vld [vmem:[%s12991_s14 + $0x38] sm:$0xff] }
 0x73c   :  { %8603 = vmatprep.subr.mxu0 %v9896_v60 }
 0x7eb   :  { %v1798_v38 = vpop.f32.mrf.mxu0 }
 0x7ec   :  { %v8533_v39 = vpop.f32.mrf.mxu1 }
 0x7ed   :  { %v8556_v43 = vpop.f32.mrf.mxu0 }
 0x7ee   :  { %v1651_v44 = vpop.f32.mrf.mxu1 }
 0x7ef   :  { %v1660_v51 = vpack.c.bf16 %v8533_v39, %v1651_v44  ;;  %v1801_v52 = vpop.f32.mrf.mxu0 }
 0x7f1   :  { %8543 = vmatmul.mubr.msk.bf16.vlgmr.msra.gmra.mxu1 %vm1278_vm8, %v1660_v51  ;;  %v8557_v55 = vpop.f32.mrf.mxu0 }
 0x7f2   :  { %8559 = vmatpush3.msk.msra.mxu1 %vm1570_vm10, %v9900_v29  ;;  %8562 = vmatprep.mubr.msk.f32.mxu1 %vm1163_vm6, %v10533_v20 }
 0x7f3   :  { %8560 = vmatprep.subr.msk.mxu1 %vm1569_vm9, %v9900_v29 }
 0x7f4   :  { %8561 = vmatpush3.msk.msra.mxu1 %vm1569_vm9, %v9900_v29 }
 0x7f9   :  { %8563 = vmatmul.mubr.msk.f32.vlgmr.msra.gmra.mxu1 %vm1163_vm6, %v10545_v22 }
 0x7fa   :  { %8581 = vmatprep.mubr.msk.f32.mxu1 %vm1163_vm6, %v10533_v20 }
 0x8b1   :  { %v1730_v20 = vpop.f32.mrf.mxu1 }
 0x8b2   :  { %v1799_v19 = vadd.f32 %v1798_v38, %v1730_v20  ;;  %v2066_v20 = vld [vmem:[%s12991_s14 + $0x30] sm:$0xff] }
 0x8b3   :  { %v8544_v61 = vpop.f32.mrf.mxu1 }
 0x8b4   :  { %v2063_v61 = vld [vmem:[%s12991_s14 + $0x18] sm:$0xff] }
 0x8b5   :  { %v1733_v7 = vpop.f32.mrf.mxu1 }
 0x8b6   :  { %v1802_v33 = vadd.f32 %v1801_v52, %v1733_v7  ;;  %v2061_v7 = vld [vmem:[%s12991_s14 + $0x8] sm:$0xff] }
 0x8b7   :  { %v8545_v9 = vpop.f32.mrf.mxu1 }
 0x8b8   :  { %v2060_v9 = vld [vmem:[%s12991_s14] sm:$0xff] }
 0x8b9   :  { %v8564_v11 = vpop.f32.mrf.mxu1 }
 0x8bb   :  { %v1871_v15 = vpop.f32.mrf.mxu1 }
 0x8bc   :  { %v1880_v16 = vpack.c.bf16 %v8564_v11, %v1871_v15  ;;  %v9515_v11 = vld [vmem:[%s13027_s28 + $0x78] sm:$0xff]  }
 0x8be   :  { %8574 = vmatmul.mubr.msk.bf16.vlgmr.msra.gmra.mxu0 %vm1278_vm8, %v1880_v16 }
 0x8bf   :  { %8607 = vmatprep.mubr.msk.f32.mxu0 %vm9899_vm7, %v9896_v60 }
 0x97e   :  { %v1951_v24 = vpop.f32.mrf.mxu0 }
 0x97f   :  { %v1958_v28 = vadd.f32 %v1951_v24, %v1799_v19 }
 0x980   :  { %v8575_v32 = vpop.f32.mrf.mxu0 }
 0x981   :  { %v1967_v34 = vadd.f32 %v7499_v26, %v1958_v28  ;;  %v9517_v28 = vld [vmem:[%s13027_s28 + $0x70] sm:$0xff]  }
 0x982   :  { %v1954_v1 = vpop.f32.mrf.mxu0  ;;  %v9518_v32 = vld [vmem:[%s13027_s28 + $0x30] sm:$0xff]  }
 0x983   :  { %v1971_v35 = vmul.f32 %v10681_v31, %v1967_v34  ;;  %v1959_v36 = vadd.f32 %v1954_v1, %v1802_v33  ;;  %v9519_v33 = vld [vmem:[%s13027_s28 + $0x68] sm:$0xff]   ;;  %v9521_v1 = vld [vmem:[%s13027_s28 + $0x60] sm:$0xff]  }
 0x984   :  { %v8576_v39 = vpop.f32.mrf.mxu0  ;;  %v9520_v34 = vld [vmem:[%s13027_s28 + $0x28] sm:$0xff]  }
 0x985   :  { %v1968_v43 = vadd.f32 %v7499_v26, %v1959_v36  ;;  %vm1975_vm11 = vcmp.ge.f32.partialorder %v1971_v35, 1.0  ;;  %v9516_v26 = vld [vmem:[%s13027_s28 + $0x38] sm:$0xff]  }
 0x986   :  { %v10684_v44 = vsel %vm1975_vm11, 0.0, %v1971_v35  ;;  %v1977_v55 = vsel %vm1975_vm11, 1.0, %v9896_v60  ;;  %v9522_v35 = vld [vmem:[%s13027_s28 + $0x20] sm:$0xff]   ;;  %v9523_v36 = vld [vmem:[%s13027_s28 + $0x58] sm:$0xff]  }
 0x987   :  { %v1972_v38 = vmul.f32 %v10681_v31, %v1968_v43  ;;  %v1981_v57 = vadd.f32 %v1977_v55, %v10496_v63  ;;  %v2064_v63 = vld [vmem:[%s12991_s14 + $0x20] sm:$0xff]  ;;  %v9524_v39 = vld [vmem:[%s13027_s28 + $0x18] sm:$0xff]   ;;  %v9525_v43 = vld [vmem:[%s13027_s28 + $0x50] sm:$0xff]  }
 0x988   :  { %v9528_v55 = vld [vmem:[%s13027_s28 + $0x8] sm:$0xff]  }
 0x989   :  { %vm1976_vm12 = vcmp.ge.f32.partialorder %v1972_v38, 1.0 }
 0x98a   :  { %v1978_v51 = vsel %vm1976_vm12, 1.0, %v9896_v60  ;;  %v10689_v56 = vsel %vm1976_vm12, 0.0, %v1972_v38  ;;  %v9526_v38 = vld [vmem:[%s13027_s28 + $0x10] sm:$0xff]  }
 0x98b   :  { %v1982_v52 = vadd.f32 %v10492_v10, %v1978_v51  ;;  %v2065_v10 = vld [vmem:[%s12991_s14 + $0x28] sm:$0xff] }
 0x98c   :  { %v9527_v51 = vld [vmem:[%s13027_s28 + $0x48] sm:$0xff]  }
 0x98d   :  { %8577 = vmatprep.subr.mxu1 %v1982_v52 }
 0x98e   :  { %8578 = vmatpush3.msra.mxu1 %v1982_v52 }
 0x98f   :  { %8579 = vmatprep.subr.mxu1 %v1981_v57 }
 0x990   :  { %8580 = vmatpush3.msra.mxu1 %v1981_v57 }
 0x991   :  { %8582 = vmatmul.mubr.msk.f32.vlgmr.msra.gmra.mxu1 %vm1163_vm6, %v10545_v22  ;;  %8584 = vmatprep.subr.mxu1 %v2067_v2  ;;  %v2062_v22 = vld [vmem:[%s12991_s14 + $0x10] sm:$0xff] }
 0x992   :  { %8585 = vmatpush3.msra.mxu1 %v2067_v2  ;;  %v9531_v2 = vld [vmem:[%s13030_s29 + $0x78] sm:$0xff]  }
 0x993   :  { %8586 = vmatprep.subr.mxu1 %v2066_v20 }
 0x994   :  { %8587 = vmatpush3.msra.mxu1 %v2066_v20 }
 0x995   :  { %8588 = vmatprep.subr.mxu1 %v2065_v10 }
 0x996   :  { %8589 = vmatpush3.msra.mxu1 %v2065_v10  ;;  %v7506_v10 = vld [vmem:[%s13025_s4 + $0x20] sm:$0xff] }
 0x997   :  { %8590 = vmatprep.subr.mxu1 %v2064_v63 }
 0x998   :  { %8591 = vmatpush3.msra.mxu1 %v2064_v63  ;;  %v7507_v63 = vld [vmem:[%s13025_s4 + $0x28] sm:$0xff] }
 0x999   :  { %8592 = vmatprep.subr.mxu1 %v2063_v61 }
 0x99a   :  { %8593 = vmatpush3.msra.mxu1 %v2063_v61 }
 0x99b   :  { %8594 = vmatprep.subr.mxu1 %v2062_v22 }
 0x99c   :  { %8595 = vmatpush3.msra.mxu1 %v2062_v22 }
 0x99d   :  { %8596 = vmatprep.subr.mxu1 %v2061_v7 }
 0x99e   :  { %8597 = vmatpush3.msra.mxu1 %v2061_v7 }
 0x99f   :  { %8598 = vmatprep.subr.mxu1 %v2060_v9 }
 0x9a0   :  { %8599 = vmatpush3.msra.mxu1 %v2060_v9  ;;  %v2151_v9 = vld [vmem:[%s12992_s15] sm:$0xff] }
 0x9a1   :  { %7822 = vmatprep.subr.bf16.mxu1 %v9515_v11  ;;  %v2238_v11 = vpack.c.bf16 %v7507_v63, %v7506_v10 }
 0xa51   :  { %v8583_v15 = vpop.f32.mrf.mxu1 }
 0xa52   :  { %v2059_v24 = vmax.f32 %v1982_v52, %v8583_v15  ;;  %v9529_v52 = vld [vmem:[%s13027_s28 + $0x40] sm:$0xff]   ;;  %v9532_v15 = vld [vmem:[%s13024_s7 + $0x8] sm:$0xff]  }
 0xa53   :  { %v2049_v16 = vpop.f32.mrf.mxu1 }
 0xa54   :  { %v2058_v19 = vmax.f32 %v1981_v57, %v2049_v16  ;;  %v9530_v57 = vld [vmem:[%s13027_s28] sm:$0xff]   ;;  %v7508_v16 = vld [vmem:[%s13025_s4 + $0x30] sm:$0xff] }
 0xa56   :  { %8600 = vmatprep.mubr.msk.f32.mxu1 %vm1278_vm8, %v2058_v19 }
 0xa57   :  { %8601 = vmatmul.mubr.msk.f32.vlgmr.msra.gmra.mxu1 %vm1278_vm8, %v2059_v24 }
 0xa58   :  { %7823 = vmatpush3.bf16.msra.mxu1 %v9516_v26 }
 0xa59   :  { %7824 = vmatprep.subr.bf16.mxu1 %v9517_v28  ;;  %v9534_v28 = vld [vmem:[%s13027_s28 + $0xb8] sm:$0xff]  }
 0xa5c   :  { %7825 = vmatpush3.bf16.msra.mxu1 %v9518_v32  ;;  %v9535_v32 = vld [vmem:[%s13027_s28 + $0xb0] sm:$0xff]  }
 0xa5d   :  { %7826 = vmatprep.subr.bf16.mxu1 %v9519_v33  ;;  %v9536_v33 = vld [vmem:[%s13027_s28 + $0xa8] sm:$0xff]  }
 0xa60   :  { %7827 = vmatpush3.bf16.msra.mxu1 %v9520_v34  ;;  %v9537_v34 = vld [vmem:[%s13027_s28 + $0xa0] sm:$0xff]  }
 0xa61   :  { %7828 = vmatprep.subr.bf16.mxu1 %v9521_v1  ;;  %v9538_v1 = vld [vmem:[%s13027_s28 + $0x98] sm:$0xff]  }
 0xa64   :  { %7829 = vmatpush3.bf16.msra.mxu1 %v9522_v35  ;;  %v9539_v35 = vld [vmem:[%s13027_s28 + $0x90] sm:$0xff]  }
 0xa65   :  { %7830 = vmatprep.subr.bf16.mxu1 %v9523_v36  ;;  %v9540_v36 = vld [vmem:[%s13027_s28 + $0x88] sm:$0xff]  }
 0xa68   :  { %7831 = vmatpush3.bf16.msra.mxu1 %v9524_v39  ;;  %v9541_v39 = vld [vmem:[%s13027_s28 + $0x80] sm:$0xff]  }
 0xa69   :  { %7832 = vmatprep.subr.bf16.mxu1 %v9525_v43  ;;  %v10824_v43 = vld [vmem:[%s13030_s29 + $0xb8] sm:$0xff]  }
 0xa6c   :  { %7833 = vmatpush3.bf16.msra.mxu1 %v9526_v38 }
 0xa6d   :  { %7834 = vmatprep.subr.bf16.mxu1 %v9527_v51 }
 0xa70   :  { %7835 = vmatpush3.bf16.msra.mxu1 %v9528_v55 }
 0xa71   :  { %7836 = vmatprep.subr.bf16.mxu1 %v9529_v52  ;;  %v9543_v52 = vld [vmem:[%s13029_s27] ss:$0 sm:$0xff] }
 0xa74   :  { %7837 = vmatpush3.bf16.msra.mxu1 %v9530_v57 }
 0xa75   :  { %7860 = vmatprep.subr.bf16.mxu1 %v9531_v2 }
 0xb17   :  { %v8602_v20 = vpop.f32.mrf.mxu1 }
 0xb18   :  { %v2150_v61 = vmax.f32 %v2059_v24, %v8602_v20  ;;  %v9533_v24 = vld [vmem:[%s13024_s7] sm:$0xff]  }
 0xb19   :  { %v2140_v22 = vpop.f32.mrf.mxu1 }
 0xb1a   :  { %v2149_v7 = vmax.f32 %v2058_v19, %v2140_v22  ;;  %8604 = vmatpush3.msra.mxu0 %v2150_v61  ;;  %v7509_v19 = vld [vmem:[%s13025_s4 + $0x38] sm:$0xff] }
 0xb1b   :  { %8605 = vmatprep.subr.mxu0 %v9896_v60  ;;  %v2239_v26 = vpack.c.bf16 %v7509_v19, %v7508_v16 }
 0xb1c   :  { %8606 = vmatpush3.msra.mxu0 %v2149_v7 }
 0xb1d   :  { %8608 = vmatmul.mubr.msk.f32.vlgmr.msra.gmra.mxu0 %vm1163_vm6, %v2151_v9  ;;  %8610 = vmatprep.subr.bf16.mxu0 %v9532_v15 }
 0xb1e   :  { %8611 = vmatpush3.bf16.msra.mxu0 %v9532_v15  ;;  %8614 = vmatprep.mubr.msk.bf16.mxu0 %vm129_vm0, %v2238_v11 }
 0xb1f   :  { %8612 = vmatprep.subr.bf16.mxu0 %v9533_v24 }
 0xb22   :  { %8613 = vmatpush3.bf16.msra.mxu0 %v9533_v24 }
 0xb23   :  { %8618 = vmatprep.subr.bf16.mxu0 %v9534_v28 }
 0xb25   :  { %8615 = vmatmul.mubr.msk.bf16.vlgmr.msra.gmra.mxu0 %vm129_vm0, %v2239_v26 }
 0xb26   :  { %8619 = vmatpush3.bf16.msra.mxu0 %v9534_v28 }
 0xb27   :  { %8620 = vmatprep.subr.bf16.mxu0 %v9535_v32 }
 0xb2a   :  { %8621 = vmatpush3.bf16.msra.mxu0 %v9535_v32 }
 0xb2b   :  { %8622 = vmatprep.subr.bf16.mxu0 %v9536_v33 }
 0xb2e   :  { %8623 = vmatpush3.bf16.msra.mxu0 %v9536_v33 }
 0xb2f   :  { %8624 = vmatprep.subr.bf16.mxu0 %v9537_v34 }
 0xb32   :  { %8625 = vmatpush3.bf16.msra.mxu0 %v9537_v34 }
 0xb33   :  { %8626 = vmatprep.subr.bf16.mxu0 %v9538_v1 }
 0xb36   :  { %8627 = vmatpush3.bf16.msra.mxu0 %v9538_v1 }
 0xb37   :  { %8628 = vmatprep.subr.bf16.mxu0 %v9539_v35 }
 0xb3a   :  { %8629 = vmatpush3.bf16.msra.mxu0 %v9539_v35 }
 0xb3b   :  { %8630 = vmatprep.subr.bf16.mxu0 %v9540_v36 }
 0xb3e   :  { %8631 = vmatpush3.bf16.msra.mxu0 %v9540_v36 }
 0xb3f   :  { %8632 = vmatprep.subr.bf16.mxu0 %v9541_v39 }
 0xb42   :  { %8633 = vmatpush3.bf16.msra.mxu0 %v9541_v39 }
 0xb43   :  { %8638 = vmatprep.subr.bf16.mxu0 %v10824_v43 }
 0xbdd   :  { %v10827_v38 = vpop.f32.mrf.mxu0 }
 0xbdf   :  { %v8609_v51 = vpop.f32.mrf.mxu0 }
 0xbe5   :  { %v8616_v55 = vpop.f32.mrf.mxu0 }
 0xbe6   :  { %v2289_v57 = vadd.f32 %v9543_v52, %v8616_v55 }
 0xbe7   :  { %v2280_v2 = vpop.f32.mrf.mxu0 }
 0xbe8   :  { %v2297_v20 = vsub.f32 %v2289_v57, %v10166_v59  ;;  %v2281_v10 = vadd.f32 %v9543_v52, %v2280_v2 }
 0xbe9   :  { %v8617_v63 = vpop.f32.mrf.mxu0 }
 0xbea   :  { %v2301_v61 = vmul.f32 %v2297_v20, %v10153_v45  ;;  %v2295_v22 = vsub.f32 %v2281_v10, %v10182_v3  ;;  %v2292_v7 = vadd.f32 %v9543_v52, %v8617_v63 }
 0xbeb   :  { %v2283_v9 = vpop.f32.mrf.mxu0 }
 0xbec   :  { %v2305_v11 = vadd.f32 %v2301_v61, %v10166_v59  ;;  %v2299_v15 = vmul.f32 %v2295_v22, %v10153_v45  ;;  %v2298_v16 = vsub.f32 %v2292_v7, %v10191_v6  ;;  %v2284_v19 = vadd.f32 %v9543_v52, %v2283_v9 }
 0xbee   :  { %vm2309_vm13 = vcmp.ge.f32.partialorder %v2305_v11, 1.0  ;;  %v2303_v24 = vadd.f32 %v2299_v15, %v10182_v3  ;;  %v2302_v26 = vmul.f32 %v2298_v16, %v10153_v45  ;;  %v2296_v28 = vsub.f32 %v2284_v19, %v10203_v13 }
 0xbef   :  { %v10842_v32 = vsel %vm2309_vm13, 0.0, %v2305_v11  ;;  %v10846_v33 = vsel %vm2309_vm13, 1.0, %v9896_v60 }
 0xbf0   :  { %v2306_v59 = vadd.f32 %v2302_v26, %v10191_v6  ;;  %v2300_v34 = vmul.f32 %v2296_v28, %v10153_v45  ;;  %vm2307_vm14 = vcmp.ge.f32.partialorder %v2303_v24, 1.0  ;;  %v2333_v36 = vrot.slane %v10846_v33, 1  ;;  %v9546_v6 = vld [vmem:[%s13030_s29 + $0xb0] sm:$0xff]  }
 0xbf1   :  { %v10853_v3 = vsel %vm2307_vm14, 1.0, %v9896_v60  ;;  %v10856_v35 = vsel %vm2307_vm14, 0.0, %v2303_v24 }
 0xbf2   :  { %vm2310_vm15 = vcmp.ge.f32.partialorder %v2306_v59, 1.0  ;;  %v2304_v1 = vadd.f32 %v2300_v34, %v10203_v13  ;;  %v2319_v52 = vrot.slane %v10853_v3, 7  ;;  %v2331_v2 = vrot.slane %v10853_v3, 1 }
 0xbf3   :  { %v10860_v39 = vsel %vm2310_vm15, 1.0, %v9896_v60  ;;  %vm10863_vm1 = vmpackc.low %vm2310_vm15, %vm2309_vm13  ;;  %v10867_v51 = vsel %vm2310_vm15, 0.0, %v2306_v59  ;;  %v2321_v34 = vrot.slane %v10846_v33, 7 }
 0xbf4   :  { %v2322_v13 = vrot.slane %v10860_v39, 7  ;;  %v2334_v55 = vrot.slane %v10860_v39, 1  ;;  %vm2308_vm2 = vcmp.ge.f32.partialorder %v2304_v1, 1.0 }
 0xbf5   :  { %v10873_v57 = vsel %vm2308_vm2, 1.0, %v9896_v60  ;;  %vm7512_vm4 = vmpackc.low %vm2308_vm2, %vm2307_vm14  ;;  %v10877_v20 = vsel %vm2308_vm2, 0.0, %v2304_v1 }
 0xbf6   :  { %v2320_v10 = vrot.slane %v10873_v57, 7  ;;  %v2332_v63 = vrot.slane %v10873_v57, 1  ;;  %7513 = vmatprep.mubr.msk.bf16.mxu1 %vm7512_vm4, %v9897_v17  ;;  %v2326_v61 = vsel %vm213_vm3, %v2322_v13, %v2319_v52  ;;  %v2335_v22 = vsel %vm246_vm5, %v2333_v36, %v2334_v55 }
 0xbf7   :  { %v2338_v7 = vsel %vm246_vm5, %v2334_v55, %v2331_v2  ;;  %v2341_v9 = vmul.f32 %v2335_v22, %v10205_v14  ;;  %v2327_v24 = vmul.f32 %v2326_v61, %v10148_v42  ;;  %v9544_v61 = vld [vmem:[%s13030_s29 + $0x38] sm:$0xff]  }
 0xbf8   :  { %v2325_v11 = vsel %vm213_vm3, %v2319_v52, %v2320_v10  ;;  %v2336_v15 = vsel %vm246_vm5, %v2332_v63, %v2333_v36  ;;  %v2337_v16 = vsel %vm246_vm5, %v2331_v2, %v2332_v63  ;;  %v2342_v19 = vmul.f32 %v2338_v7, %v10201_v12  ;;  %v9547_v7 = vld [vmem:[%s13030_s29 + $0x30] sm:$0xff]  }
 0xbf9   :  { %v2328_v26 = vmul.f32 %v2325_v11, %v10157_v49  ;;  %v2339_v28 = vmul.f32 %v2337_v16, %v10173_v0  ;;  %v2340_v59 = vmul.f32 %v2336_v15, %v10163_v58  ;;  %v2324_v36 = vsel %vm213_vm3, %v2320_v10, %v2321_v34  ;;  %v9545_v10 = vld [vmem:[%s13030_s29 + $0x70] sm:$0xff]   ;;  %v9550_v11 = vld [vmem:[%s13030_s29 + $0x28] sm:$0xff]   ;;  %v9551_v15 = vld [vmem:[%s13030_s29 + $0x60] sm:$0xff]  }
 0xbfa   :  { %v2348_v52 = vpack.c.bf16 %v2342_v19, %v2341_v9  ;;  %v2323_v2 = vsel %vm213_vm3, %v2321_v34, %v2322_v13  ;;  %v2329_v63 = vmul.f32 %v2324_v36, %v10146_v41  ;;  %v9549_v9 = vld [vmem:[%s13030_s29 + $0xa8] sm:$0xff]   ;;  %v9552_v16 = vld [vmem:[%s13030_s29 + $0xa0] sm:$0xff]   ;;  %v9558_v34 = vld [vmem:[%s13030_s29 + $0x90] sm:$0xff]  }
 0xbfb   :  { %v2343_v1 = vpack.c.bf16 %v2328_v26, %v2327_v24  ;;  %v2345_v55 = vpack.c.bf16 %v2340_v59, %v2339_v28  ;;  %v2330_v13 = vmul.f32 %v2323_v2, %v10155_v46  ;;  %v9553_v19 = vld [vmem:[%s13030_s29 + $0x20] sm:$0xff]   ;;  %v9554_v24 = vld [vmem:[%s13030_s29 + $0x58] sm:$0xff]   ;;  %v9557_v59 = vld [vmem:[%s13030_s29 + $0x50] sm:$0xff]  }
 0xbfc   :  { %v9555_v26 = vld [vmem:[%s13030_s29 + $0x98] sm:$0xff]   ;;  %v9562_v36 = vld [vmem:[%s13030_s29 + $0x8] sm:$0xff]   ;;  %v9563_v2 = vld [vmem:[%s13030_s29 + $0x40] sm:$0xff]  }
 0xbfd   :  { %2382 = vmatmul.mubr.bf16.vlgmr.msra.gmra.mxu1 %v2343_v1  ;;  %8634 = vmatprep.mubr.bf16.mxu0 %v2345_v55  ;;  %v2346_v22 = vpack.c.bf16 %v2330_v13, %v2329_v63  ;;  %v9556_v28 = vld [vmem:[%s13030_s29 + $0x18] sm:$0xff]   ;;  %v9559_v1 = vld [vmem:[%s13030_s29 + $0x10] sm:$0xff]   ;;  %v9560_v55 = vld [vmem:[%s13030_s29 + $0x48] sm:$0xff]  }
 0xbfe   :  { %7515 = vmatprep.mubr.msk.bf16.mxu1 %vm10863_vm1, %v9897_v17  ;;  %8635 = vmatmul.mubr.bf16.vlgmr.msra.gmra.mxu0 %v2348_v52  ;;  %v9561_v52 = vld [vmem:[%s13030_s29 + $0x88] sm:$0xff]   ;;  %v9564_v63 = vld [vmem:[%s13030_s29 + $0x80] sm:$0xff]  }
 0xbff   :  { %7861 = vmatpush3.bf16.msra.mxu1 %v9544_v61  ;;  %8639 = vmatpush3.bf16.msra.mxu0 %v10824_v43  ;;  %v9548_v43 = vld [vmem:[%s13030_s29 + $0x68] sm:$0xff]   ;;  %v9565_v61 = vld [vmem:[%s13030_s29] sm:$0xff]  }
 0xc00   :  { %7862 = vmatprep.subr.bf16.mxu1 %v9545_v10  ;;  %8640 = vmatprep.subr.bf16.mxu0 %v9546_v6 }
 0xc03   :  { %7863 = vmatpush3.bf16.msra.mxu1 %v9547_v7  ;;  %8641 = vmatpush3.bf16.msra.mxu0 %v9546_v6 }
 0xc04   :  { %7864 = vmatprep.subr.bf16.mxu1 %v9548_v43  ;;  %8642 = vmatprep.subr.bf16.mxu0 %v9549_v9 }
 0xc05   :  { %2390 = vmatmul.mubr.bf16.gmra.mxu1 %v2346_v22 }
 0xc07   :  { %7865 = vmatpush3.bf16.msra.mxu1 %v9550_v11  ;;  %8643 = vmatpush3.bf16.msra.mxu0 %v9549_v9  ;;  %v9566_v9 = vld [vmem:[%s13031_s2] ss:$0 sm:$0xff] }
 0xc08   :  { %7866 = vmatprep.subr.bf16.mxu1 %v9551_v15  ;;  %8644 = vmatprep.subr.bf16.mxu0 %v9552_v16 }
 0xc0b   :  { %7867 = vmatpush3.bf16.msra.mxu1 %v9553_v19  ;;  %8645 = vmatpush3.bf16.msra.mxu0 %v9552_v16 }
 0xc0c   :  { %7868 = vmatprep.subr.bf16.mxu1 %v9554_v24  ;;  %8646 = vmatprep.subr.bf16.mxu0 %v9555_v26 }
 0xc0f   :  { %7869 = vmatpush3.bf16.msra.mxu1 %v9556_v28  ;;  %8647 = vmatpush3.bf16.msra.mxu0 %v9555_v26 }
 0xc10   :  { %7870 = vmatprep.subr.bf16.mxu1 %v9557_v59  ;;  %8648 = vmatprep.subr.bf16.mxu0 %v9558_v34 }
 0xc13   :  { %7871 = vmatpush3.bf16.msra.mxu1 %v9559_v1  ;;  %8649 = vmatpush3.bf16.msra.mxu0 %v9558_v34 }
 0xc14   :  { %7872 = vmatprep.subr.bf16.mxu1 %v9560_v55  ;;  %8650 = vmatprep.subr.bf16.mxu0 %v9561_v52 }
 0xc17   :  { %7873 = vmatpush3.bf16.msra.mxu1 %v9562_v36  ;;  %8651 = vmatpush3.bf16.msra.mxu0 %v9561_v52 }
 0xc18   :  { %7874 = vmatprep.subr.bf16.mxu1 %v9563_v2  ;;  %8652 = vmatprep.subr.bf16.mxu0 %v9564_v63 }
 0xc1b   :  { %7875 = vmatpush3.bf16.msra.mxu1 %v9565_v61  ;;  %8653 = vmatpush3.bf16.msra.mxu0 %v9564_v63 }
 0xc1c   :  { %8669 = vmatprep.subr.mxu1 %v10401_v5 }
 0xcbd   :  { %v7838_v10 = vpop.f32.mrf.mxu1 }
 0xcbe   :  { %v8636_v6 = vpop.f32.mrf.mxu0 }
 0xcbf   :  { %v7839_v13 = vpop.f32.mrf.mxu1 }
 0xcc0   :  { %v7840_v22 = vadd.f32 %v7839_v13, %v7838_v10  ;;  %v2432_v7 = vpop.f32.mrf.mxu0 }
 0xcc1   :  { %v7841_v43 = vpop.f32.mrf.mxu1 }
 0xcc2   :  { %v2384_v11 = vadd.f32 %v9566_v9, %v7840_v22  ;;  %v8637_v15 = vpop.f32.mrf.mxu0 }
 0xcc3   :  { %v7842_v16 = vpop.f32.mrf.mxu1 }
 0xcc4   :  { %v2433_v19 = vadd.f32 %v2432_v7, %v2384_v11  ;;  %v7843_v24 = vadd.f32 %v7842_v16, %v7841_v43  ;;  %v2435_v5 = vpop.f32.mrf.mxu0 }
 0xcc5   :  { %v7844_v26 = vpop.f32.mrf.mxu1 }
 0xcc6   :  { %v2447_v28 = vsub.f32 %v2433_v19, %v10316_v40  ;;  %v2387_v59 = vadd.f32 %v9566_v9, %v7843_v24 }
 0xcc7   :  { %v7845_v34 = vpop.f32.mrf.mxu1 }
 0xcc8   :  { %v2451_v1 = vmul.f32 %v2447_v28, %v10313_v27  ;;  %v2436_v55 = vadd.f32 %v2435_v5, %v2387_v59  ;;  %v7846_v52 = vadd.f32 %v7845_v34, %v7844_v26 }
 0xcc9   :  { %v7847_v36 = vpop.f32.mrf.mxu1 }
 0xcca   :  { %v2455_v2 = vadd.f32 %v2451_v1, %v10316_v40  ;;  %v2448_v63 = vsub.f32 %v2436_v55, %v10321_v53  ;;  %v2392_v61 = vadd.f32 %v9566_v9, %v7846_v52 }
 0xccb   :  { %v7848_v10 = vpop.f32.mrf.mxu1 }
 0xccc   :  { %v2452_v13 = vmul.f32 %v2448_v63, %v10313_v27  ;;  %v2441_v22 = vadd.f32 %v8636_v6, %v2392_v61  ;;  %v7849_v7 = vadd.f32 %v7848_v10, %v7847_v36  ;;  %vm2459_vm11 = vcmp.ge.f32.partialorder %v2455_v2, 1.0 }
 0xccd   :  { %v10986_v43 = vsel %vm2459_vm11, 0.0, %v2455_v2  ;;  %v2463_v24 = vsel %vm2459_vm11, 1.0, %v9896_v60 }
 0xcce   :  { %v2456_v11 = vadd.f32 %v2452_v13, %v10321_v53  ;;  %v2449_v16 = vsub.f32 %v2441_v22, %v10328_v4  ;;  %v2395_v19 = vadd.f32 %v9566_v9, %v7849_v7  ;;  %v2471_v59 = vrot.slane %v2463_v24, 7 }
 0xccf   :  { %v2483_v5 = vrot.slane %v2463_v24, 1 }
 0xcd0   :  { %v2453_v40 = vmul.f32 %v2449_v16, %v10313_v27  ;;  %v2444_v26 = vadd.f32 %v8637_v15, %v2395_v19  ;;  %vm2460_vm12 = vcmp.ge.f32.partialorder %v2456_v11, 1.0  ;;  %v9574_v16 = vld [vmem:[%s12988_s11 + $0x48] sm:$0xff] }
 0xcd1   :  { %v2464_v28 = vsel %vm2460_vm12, 1.0, %v9896_v60  ;;  %vm7516_vm13 = vmpackc.low %vm2460_vm12, %vm2459_vm11  ;;  %v10993_v6 = vsel %vm2460_vm12, 0.0, %v2456_v11 }
 0xcd2   :  { %v2457_v34 = vadd.f32 %v2453_v40, %v10328_v4  ;;  %v2450_v53 = vsub.f32 %v2444_v26, %v10340_v21  ;;  %v2472_v1 = vrot.slane %v2464_v28, 7  ;;  %v2484_v55 = vrot.slane %v2464_v28, 1  ;;  %7517 = vmatprep.mubr.msk.bf16.mxu1 %vm7516_vm13, %v9897_v17 }
 0xcd4   :  { %vm2461_vm14 = vcmp.ge.f32.partialorder %v2457_v34, 1.0  ;;  %v2454_v9 = vmul.f32 %v2450_v53, %v10313_v27  ;;  %v2477_v15 = vsel %vm213_vm3, %v2471_v59, %v2472_v1  ;;  %v2489_v52 = vsel %vm246_vm5, %v2483_v5, %v2484_v55 }
 0xcd5   :  { %v2465_v36 = vsel %vm2461_vm14, 1.0, %v9896_v60  ;;  %v11006_v4 = vsel %vm2461_vm14, 0.0, %v2457_v34  ;;  %v2491_v7 = vmul.f32 %v2489_v52, %v10173_v0  ;;  %v2480_v26 = vmul.f32 %v2477_v15, %v10157_v49 }
 0xcd6   :  { %v2458_v2 = vadd.f32 %v2454_v9, %v10340_v21  ;;  %v2485_v63 = vrot.slane %v2465_v36, 1  ;;  %v2473_v61 = vrot.slane %v2465_v36, 7 }
 0xcd8   :  { %vm2462_vm15 = vcmp.ge.f32.partialorder %v2458_v2, 1.0  ;;  %v2488_v10 = vsel %vm246_vm5, %v2484_v55, %v2485_v63  ;;  %v2476_v13 = vsel %vm213_vm3, %v2472_v1, %v2473_v61 }
 0xcd9   :  { %v2466_v22 = vsel %vm2462_vm15, 1.0, %v9896_v60  ;;  %v2492_v11 = vmul.f32 %v2488_v10, %v10163_v58  ;;  %vm11017_vm1 = vmpackc.low %vm2462_vm15, %vm2461_vm14  ;;  %v11021_v21 = vsel %vm2462_vm15, 0.0, %v2458_v2  ;;  %v2481_v28 = vmul.f32 %v2476_v13, %v10146_v41  ;;  %v9570_v13 = vld [vmem:[%s12988_s11 + $0x68] sm:$0xff] }
 0xcda   :  { %v2474_v19 = vrot.slane %v2466_v22, 7  ;;  %v2486_v24 = vrot.slane %v2466_v22, 1  ;;  %v9571_v22 = vld [vmem:[%s12988_s11 + $0x60] sm:$0xff] }
 0xcdb   :  { %v2497_v40 = vpack.c.bf16 %v2492_v11, %v2491_v7  ;;  %v9572_v7 = vld [vmem:[%s12988_s11 + $0x58] sm:$0xff]  ;;  %v9573_v11 = vld [vmem:[%s12988_s11 + $0x50] sm:$0xff] }
 0xcdc   :  { %v2478_v53 = vsel %vm213_vm3, %v2474_v19, %v2471_v59  ;;  %v2487_v1 = vsel %vm246_vm5, %v2485_v63, %v2486_v24  ;;  %v2490_v34 = vsel %vm246_vm5, %v2486_v24, %v2483_v5  ;;  %v2475_v55 = vsel %vm213_vm3, %v2473_v61, %v2474_v19  ;;  %v9567_v5 = vld [vmem:[%s12987_s10] sm:$0xff]  ;;  %v9568_v63 = vld [vmem:[%s12988_s11 + $0x78] sm:$0xff]  ;;  %v9569_v61 = vld [vmem:[%s12988_s11 + $0x70] sm:$0xff] }
 0xcdd   :  { %8654 = vmatprep.mubr.bf16.mxu0 %v2497_v40  ;;  %v2479_v9 = vmul.f32 %v2478_v53, %v10148_v42  ;;  %v2493_v52 = vmul.f32 %v2487_v1, %v10205_v14  ;;  %v2494_v15 = vmul.f32 %v2490_v34, %v10201_v12  ;;  %v2482_v36 = vmul.f32 %v2475_v55, %v10155_v46  ;;  %v9575_v19 = vld [vmem:[%s12988_s11 + $0x40] sm:$0xff]  ;;  %v9576_v24 = vld [vmem:[%s12988_s11 + $0x38] sm:$0xff]  ;;  %v9577_v40 = vld [vmem:[%s12988_s11 + $0x30] sm:$0xff] }
 0xcde   :  { %v9580_v53 = vld [vmem:[%s12988_s11 + $0x18] sm:$0xff]  ;;  %v9581_v1 = vld [vmem:[%s12988_s11 + $0x10] sm:$0xff] }
 0xcdf   :  { %v2495_v2 = vpack.c.bf16 %v2480_v26, %v2479_v9  ;;  %v2500_v59 = vpack.c.bf16 %v2494_v15, %v2493_v52  ;;  %v2498_v10 = vpack.c.bf16 %v2482_v36, %v2481_v28  ;;  %v9578_v26 = vld [vmem:[%s12988_s11 + $0x28] sm:$0xff]  ;;  %v9579_v28 = vld [vmem:[%s12988_s11 + $0x20] sm:$0xff] }
 0xce1   :  { %2534 = vmatmul.mubr.bf16.vlgmr.msra.gmra.mxu1 %v2495_v2  ;;  %8655 = vmatmul.mubr.bf16.vlgmr.msra.gmra.mxu0 %v2500_v59  ;;  %v9582_v2 = vld [vmem:[%s12986_s9] ss:$0 sm:$0xff] }
 0xce2   :  { %7519 = vmatprep.mubr.msk.bf16.mxu1 %vm11017_vm1, %v9897_v17  ;;  %8666 = vmatprep.mubr.msk.f32.mxu0 %vm129_vm0, %v9567_v5 }
 0xce3   :  { %8670 = vmatpush3.msra.mxu1 %v9568_v63 }
 0xce4   :  { %8671 = vmatprep.subr.mxu1 %v9569_v61 }
 0xce5   :  { %8672 = vmatpush3.msra.mxu1 %v9569_v61 }
 0xce6   :  { %8673 = vmatprep.subr.mxu1 %v9570_v13 }
 0xce7   :  { %8674 = vmatpush3.msra.mxu1 %v9570_v13 }
 0xce8   :  { %8675 = vmatprep.subr.mxu1 %v9571_v22 }
 0xce9   :  { %2542 = vmatmul.mubr.bf16.gmra.mxu1 %v2498_v10 }
 0xcea   :  { %8676 = vmatpush3.msra.mxu1 %v9571_v22 }
 0xceb   :  { %8677 = vmatprep.subr.mxu1 %v9572_v7 }
 0xcec   :  { %8678 = vmatpush3.msra.mxu1 %v9572_v7 }
 0xced   :  { %8679 = vmatprep.subr.mxu1 %v9573_v11 }
 0xcee   :  { %8680 = vmatpush3.msra.mxu1 %v9573_v11 }
 0xcef   :  { %8681 = vmatprep.subr.mxu1 %v9574_v16 }
 0xcf0   :  { %8682 = vmatpush3.msra.mxu1 %v9574_v16 }
 0xcf1   :  { %8683 = vmatprep.subr.mxu1 %v9575_v19 }
 0xcf2   :  { %8684 = vmatpush3.msra.mxu1 %v9575_v19 }
 0xcf3   :  { %8685 = vmatprep.subr.mxu1 %v9576_v24 }
 0xcf4   :  { %8686 = vmatpush3.msra.mxu1 %v9576_v24 }
 0xcf5   :  { %8687 = vmatprep.subr.mxu1 %v9577_v40 }
 0xcf6   :  { %8688 = vmatpush3.msra.mxu1 %v9577_v40 }
 0xcf7   :  { %8689 = vmatprep.subr.mxu1 %v9578_v26 }
 0xcf8   :  { %8690 = vmatpush3.msra.mxu1 %v9578_v26 }
 0xcf9   :  { %8691 = vmatprep.subr.mxu1 %v9579_v28 }
 0xcfa   :  { %8692 = vmatpush3.msra.mxu1 %v9579_v28 }
 0xcfb   :  { %8693 = vmatprep.subr.mxu1 %v9580_v53 }
 0xcfc   :  { %8694 = vmatpush3.msra.mxu1 %v9580_v53 }
 0xcfd   :  { %8695 = vmatprep.subr.mxu1 %v9581_v1 }
 0xcfe   :  { %8696 = vmatpush3.msra.mxu1 %v9581_v1 }
 0xcff   :  { %8697 = vmatprep.subr.mxu1 %v10460_v47 }
 0xd00   :  { %8698 = vmatpush3.msra.mxu1 %v10460_v47 }
 0xd01   :  { %8699 = vmatprep.subr.mxu1 %v10467_v50 }
 0xd02   :  { %8700 = vmatpush3.msra.mxu1 %v10467_v50 }
 0xd03   :  { %8723 = vmatprep.subr.bf16.mxu1 %v9896_v60 }
 0xda1   :  { %v7876_v34 = vpop.f32.mrf.mxu1  ;;  %v8656_v55 = vpop.f32.mrf.mxu0 }
 0xda3   :  { %v7877_v9 = vpop.f32.mrf.mxu1  ;;  %v2584_v52 = vpop.f32.mrf.mxu0 }
 0xda4   :  { %v7878_v15 = vadd.f32 %v7877_v9, %v7876_v34 }
 0xda5   :  { %v7879_v36 = vpop.f32.mrf.mxu1  ;;  %v8657_v10 = vpop.f32.mrf.mxu0 }
 0xda6   :  { %v2536_v59 = vadd.f32 %v9582_v2, %v7878_v15 }
 0xda7   :  { %v7880_v5 = vpop.f32.mrf.mxu1  ;;  %v2587_v22 = vpop.f32.mrf.mxu0 }
 0xda8   :  { %v2585_v47 = vadd.f32 %v2584_v52, %v2536_v59  ;;  %v7881_v63 = vadd.f32 %v7880_v5, %v7879_v36 }
 0xda9   :  { %v7882_v61 = vpop.f32.mrf.mxu1 }
 0xdaa   :  { %v2599_v50 = vsub.f32 %v2585_v47, %v10370_v23  ;;  %v2539_v13 = vadd.f32 %v9582_v2, %v7881_v63 }
 0xdab   :  { %v7883_v7 = vpop.f32.mrf.mxu1 }
 0xdac   :  { %v2603_v11 = vmul.f32 %v2599_v50, %v10366_v62  ;;  %v2588_v16 = vadd.f32 %v2587_v22, %v2539_v13  ;;  %v7884_v19 = vadd.f32 %v7883_v7, %v7882_v61 }
 0xdad   :  { %v7885_v24 = vpop.f32.mrf.mxu1 }
 0xdae   :  { %v2607_v40 = vadd.f32 %v2603_v11, %v10370_v23  ;;  %v2600_v26 = vsub.f32 %v2588_v16, %v10373_v30  ;;  %v2544_v28 = vadd.f32 %v9582_v2, %v7884_v19 }
 0xdaf   :  { %v7886_v53 = vpop.f32.mrf.mxu1 }
 0xdb0   :  { %vm2611_vm2 = vcmp.ge.f32.partialorder %v2607_v40, 1.0  ;;  %v2604_v1 = vmul.f32 %v2600_v26, %v10366_v62  ;;  %v2593_v34 = vadd.f32 %v8656_v55, %v2544_v28  ;;  %v7887_v9 = vadd.f32 %v7886_v53, %v7885_v24 }
 0xdb1   :  { %v2615_v52 = vsel %vm2611_vm2, 1.0, %v9896_v60  ;;  %v11100_v15 = vsel %vm2611_vm2, 0.0, %v2607_v40 }
 0xdb2   :  { %v2608_v36 = vadd.f32 %v2604_v1, %v10373_v30  ;;  %v2601_v59 = vsub.f32 %v2593_v34, %v10380_v37  ;;  %v2547_v5 = vadd.f32 %v9582_v2, %v7887_v9  ;;  %v2623_v23 = vadd.f32 %v2615_v52, %v10853_v3 }
 0xdb4   :  { %vm2612_vm4 = vcmp.ge.f32.partialorder %v2608_v36, 1.0  ;;  %v2605_v47 = vmul.f32 %v2601_v59, %v10366_v62  ;;  %v2596_v63 = vadd.f32 %v8657_v10, %v2547_v5  ;;  %v2627_v2 = vrot.slane %v2623_v23, 1 }
 0xdb5   :  { %v2616_v61 = vsel %vm2612_vm4, 1.0, %v9896_v60  ;;  %v11107_v50 = vsel %vm2612_vm4, 0.0, %v2608_v36 }
 0xdb6   :  { %v2609_v55 = vadd.f32 %v2605_v47, %v10380_v37  ;;  %v2602_v13 = vsub.f32 %v2596_v63, %v10387_v48  ;;  %v2624_v22 = vadd.f32 %v2616_v61, %v10873_v57  ;;  %v9583_v61 = vld [vmem:[%s12987_s10 + $0x8] sm:$0xff] }
 0xdb8   :  { %v2606_v30 = vmul.f32 %v2602_v13, %v10366_v62  ;;  %vm2613_vm11 = vcmp.ge.f32.partialorder %v2609_v55, 1.0  ;;  %v2628_v7 = vrot.slane %v2624_v22, 1 }
 0xdb9   :  { %v2617_v3 = vsel %vm2613_vm11, 1.0, %v9896_v60  ;;  %v11114_v11 = vsel %vm2613_vm11, 0.0, %v2609_v55  ;;  %v9584_v55 = vld [vmem:[%s12990_s13] sm:$0xff] }
 0xdba   :  { %v2610_v10 = vadd.f32 %v2606_v30, %v10387_v48  ;;  %v2625_v16 = vadd.f32 %v2617_v3, %v10846_v33  ;;  %v2633_v37 = vsel %vm246_vm5, %v2627_v2, %v2628_v7  ;;  %v9585_v30 = vld [vmem:[%s12994_s17 + $0x38] sm:$0xff]   ;;  %v9588_v3 = vld [vmem:[%s12994_s17 + $0x20] sm:$0xff]  }
 0xdbb   :  { %v2635_v19 = vmax.f32 %v2623_v23, %v2633_v37 }
 0xdbc   :  { %vm2614_vm12 = vcmp.ge.f32.partialorder %v2610_v10, 1.0  ;;  %v2629_v24 = vrot.slane %v2625_v16, 1 }
 0xdbd   :  { %v2618_v57 = vsel %vm2614_vm12, 1.0, %v9896_v60  ;;  %v11121_v40 = vsel %vm2614_vm12, 0.0, %v2610_v10 }
 0xdbe   :  { %v2626_v26 = vadd.f32 %v2618_v57, %v10860_v39  ;;  %v2632_v28 = vsel %vm246_vm5, %v2628_v7, %v2629_v24  ;;  %v9587_v7 = vld [vmem:[%s12994_s17 + $0x28] sm:$0xff]   ;;  %v9591_v57 = vld [vmem:[%s12994_s17 + $0x10] sm:$0xff]  }
 0xdbf   :  { %v2636_v53 = vmax.f32 %v2624_v22, %v2632_v28  ;;  %v9593_v28 = vld [vmem:[%s12994_s17] sm:$0xff]  }
 0xdc0   :  { %v2630_v1 = vrot.slane %v2626_v26, 1 }
 0xdc2   :  { %v2631_v48 = vsel %vm246_vm5, %v2629_v24, %v2630_v1  ;;  %v2634_v33 = vsel %vm246_vm5, %v2630_v1, %v2627_v2  ;;  %v9586_v2 = vld [vmem:[%s12994_s17 + $0x30] sm:$0xff]   ;;  %v9590_v24 = vld [vmem:[%s12994_s17 + $0x18] sm:$0xff]  }
 0xdc3   :  { %v2637_v34 = vmax.f32 %v2625_v16, %v2631_v48  ;;  %v2638_v9 = vmax.f32 %v2626_v26, %v2634_v33  ;;  %v9592_v26 = vld [vmem:[%s12994_s17 + $0x8] sm:$0xff]  }
 0xdc5   :  { %2643 = vrot.lane.b32.xlu1 %v2637_v34, %s13036_s8  ;;  %2645 = vrot.lane.b32.xlu0 %v2638_v9, %s13036_s8 }
 0xdc9   :  { %2641 = vrot.lane.b32.xlu0 %v2636_v53, %s13036_s8  ;;  %2639 = vrot.lane.b32.xlu1 %v2635_v19, %s13036_s8 }
 0xe37   :  { %v2644_v39 = vpop.permute.xlu1 %2643  ;;  %v2646_v52 = vpop.permute.xlu0 %2645 }
 0xe38   :  { %v2650_v36 = vmax.f32 %v2638_v9, %v2646_v52  ;;  %v2649_v59 = vmax.f32 %v2637_v34, %v2644_v39  ;;  %v11202_v39 = vld [vmem:[%s12989_s12] sm:$0xff] }
 0xe3a   :  { %8658 = vmatprep.subr.mxu0 %v2650_v36 }
 0xe3b   :  { %8659 = vmatpush3.msra.mxu0 %v2650_v36  ;;  %v2642_v5 = vpop.permute.xlu0 %2641  ;;  %v2640_v23 = vpop.permute.xlu1 %2639  ;;  %v11212_v36 = vld [vmem:[%s12989_s12 + $0x8] sm:$0xff] }
 0xe3c   :  { %v2648_v47 = vmax.f32 %v2636_v53, %v2642_v5  ;;  %8660 = vmatprep.subr.mxu0 %v2649_v59  ;;  %v2647_v63 = vmax.f32 %v2635_v19, %v2640_v23  ;;  %v11172_v19 = vld [vmem:[%s12990_s13 + $0x8] sm:$0xff]  ;;  %v9597_v5 = vld [vmem:[%s12994_s17 + $0x50] sm:$0xff]  }
 0xe3d   :  { %8661 = vmatpush3.msra.mxu0 %v2649_v59  ;;  %v9596_v59 = vld [vmem:[%s12994_s17 + $0x58] sm:$0xff]   ;;  %v9598_v23 = vld [vmem:[%s12994_s17 + $0x48] sm:$0xff]  }
 0xe3e   :  { %8662 = vmatprep.subr.mxu0 %v2648_v47 }
 0xe3f   :  { %8663 = vmatpush3.msra.mxu0 %v2648_v47  ;;  %v9599_v47 = vld [vmem:[%s12994_s17 + $0x40] sm:$0xff]  }
 0xe40   :  { %8664 = vmatprep.subr.mxu0 %v2647_v63 }
 0xe41   :  { %8665 = vmatpush3.msra.mxu0 %v2647_v63 }
 0xe42   :  { %8667 = vmatmul.mubr.msk.f32.vlgmr.msra.gmra.mxu0 %vm129_vm0, %v9583_v61 }
 0xe43   :  { %8708 = vmatprep.mubr.msk.f32.mxu0 %vm1163_vm6, %v9584_v55 }
 0xf02   :  { %v8668_v13 = vpop.f32.mrf.mxu0 }
 0xf04   :  { %v2717_v22 = vpop.f32.mrf.mxu0 }
 0xf05   :  { %8701 = vmatprep.mubr.f32.mxu1 %v2717_v22 }
 0xf06   :  { %8702 = vmatmul.mubr.f32.vlgmr.msra.gmra.mxu1 %v8668_v13 }
 0xf07   :  { %8724 = vmatpush3.bf16.msra.mxu1 %v9585_v30  ;;  %8731 = vmatprep.mubr.msk.bf16.mxu1 %vm9899_vm7, %v9896_v60 }
 0xf08   :  { %8725 = vmatprep.subr.bf16.mxu1 %v9896_v60 }
 0xf0b   :  { %8726 = vmatpush3.bf16.msra.mxu1 %v9586_v2 }
 0xf0c   :  { %8727 = vmatprep.subr.bf16.mxu1 %v9896_v60 }
 0xf0f   :  { %8728 = vmatpush3.bf16.msra.mxu1 %v9587_v7  ;;  %v9600_v7 = vld [vmem:[%s12996_s19 + $0x38] sm:$0xff]  }
 0xf10   :  { %8729 = vmatprep.subr.bf16.mxu1 %v9896_v60 }
 0xf13   :  { %8730 = vmatpush3.bf16.msra.mxu1 %v9588_v3  ;;  %v9601_v3 = vld [vmem:[%s12996_s19 + $0x30] sm:$0xff]  }
 0xfc6   :  { %v11159_v10 = vpop.f32.mrf.mxu1 }
 0xfc7   :  { %8704 = vmatprep.subr.mxu0 %v11159_v10 }
 0xfc8   :  { %v11162_v16 = vpop.f32.mrf.mxu1  ;;  %8705 = vmatpush3.msra.mxu0 %v11159_v10 }
 0xfc9   :  { %v2801_v37 = vpack.c.bf16 %v11159_v10, %v11162_v16  ;;  %8706 = vmatprep.subr.mxu0 %v11162_v16 }
 0xfca   :  { %8707 = vmatpush3.msra.mxu0 %v11162_v16 }
 0xfcb   :  { %8709 = vmatmul.mubr.msk.f32.vlgmr.msra.gmra.mxu0 %vm1163_vm6, %v11172_v19  ;;  %8711 = vmatprep.subr.bf16.mxu0 %v9896_v60 }
 0xfcc   :  { %8732 = vmatmul.mubr.msk.bf16.vlgmr.msra.gmra.mxu1 %vm1278_vm8, %v2801_v37  ;;  %8712 = vmatpush3.bf16.msra.mxu0 %v9590_v24  ;;  %v9602_v37 = vld [vmem:[%s12996_s19 + $0x28] sm:$0xff]   ;;  %v9603_v24 = vld [vmem:[%s12996_s19 + $0x20] sm:$0xff]  }
 0xfcd   :  { %8713 = vmatprep.subr.bf16.mxu0 %v9896_v60  ;;  %8719 = vmatprep.mubr.msk.bf16.mxu0 %vm9899_vm7, %v9896_v60 }
 0xfce   :  { %8758 = vmatprep.mubr.msk.f32.mxu1 %vm1163_vm6, %v9584_v55 }
 0xfd0   :  { %8714 = vmatpush3.bf16.msra.mxu0 %v9591_v57 }
 0xfd1   :  { %8715 = vmatprep.subr.bf16.mxu0 %v9896_v60 }
 0xfd4   :  { %8716 = vmatpush3.bf16.msra.mxu0 %v9592_v26 }
 0xfd5   :  { %8717 = vmatprep.subr.bf16.mxu0 %v9896_v60 }
 0xfd8   :  { %8718 = vmatpush3.bf16.msra.mxu0 %v9593_v28 }
 0xfd9   :  { %8735 = vmatprep.subr.mxu0 %v11159_v10 }
0x108b   :  { %v8710_v53 = vpop.f32.mrf.mxu0 }
0x108c   :  { %v2959_v1 = vpop.f32.mrf.mxu1 }
0x108d   :  { %v2868_v48 = vpop.f32.mrf.mxu0 }
0x108e   :  { %v2877_v33 = vpack.c.bf16 %v8710_v53, %v2868_v48  ;;  %v8733_v34 = vpop.f32.mrf.mxu1 }
0x1090   :  { %v2962_v9 = vpop.f32.mrf.mxu1  ;;  %8720 = vmatmul.mubr.msk.bf16.vlgmr.msra.gmra.mxu0 %vm1278_vm8, %v2877_v33  ;;  %v9604_v33 = vld [vmem:[%s12995_s18] ss:$0 sm:$0xff] }
0x1091   :  { %8736 = vmatpush3.msra.mxu0 %v11159_v10  ;;  %8739 = vmatprep.mubr.msk.f32.mxu0 %vm1163_vm6, %v11202_v39 }
0x1092   :  { %v8734_v52 = vpop.f32.mrf.mxu1  ;;  %8737 = vmatprep.subr.mxu0 %v11162_v16 }
0x1093   :  { %8738 = vmatpush3.msra.mxu0 %v11162_v16  ;;  %v1573_v52 = vsel %vm1569_vm9, 0.0, %v10592_v18 }
0x1094   :  { %8742 = vmatprep.subr.bf16.mxu0 %v9896_v60 }
0x1098   :  { %8740 = vmatmul.mubr.msk.f32.vlgmr.msra.gmra.mxu0 %vm1163_vm6, %v11212_v36 }
0x1099   :  { %8743 = vmatpush3.bf16.msra.mxu0 %v9596_v59  ;;  %8750 = vmatprep.mubr.msk.bf16.mxu0 %vm9899_vm7, %v9896_v60 }
0x109a   :  { %8744 = vmatprep.subr.bf16.mxu0 %v9896_v60 }
0x109d   :  { %8745 = vmatpush3.bf16.msra.mxu0 %v9597_v5 }
0x109e   :  { %8746 = vmatprep.subr.bf16.mxu0 %v9896_v60 }
0x10a1   :  { %8747 = vmatpush3.bf16.msra.mxu0 %v9598_v23 }
0x10a2   :  { %8748 = vmatprep.subr.bf16.mxu0 %v9896_v60 }
0x10a5   :  { %8749 = vmatpush3.bf16.msra.mxu0 %v9599_v47 }
0x10a6   :  { %8773 = vmatprep.subr.bf16.mxu0 %v9896_v60 }
0x1150   :  { %v2915_v63 = vpop.f32.mrf.mxu0 }
0x1151   :  { %v2960_v57 = vadd.f32 %v2959_v1, %v2915_v63 }
0x1152   :  { %v8721_v61 = vpop.f32.mrf.mxu0 }
0x1154   :  { %v2918_v55 = vpop.f32.mrf.mxu0 }
0x1155   :  { %v2963_v48 = vadd.f32 %v2962_v9, %v2918_v55  ;;  %v1574_v9 = vsel %vm1570_vm10, 0.0, %v10596_v25 }
0x1156   :  { %v8722_v13 = vpop.f32.mrf.mxu0 }
0x1158   :  { %v8741_v22 = vpop.f32.mrf.mxu0 }
0x115a   :  { %v3032_v30 = vpop.f32.mrf.mxu0 }
0x115b   :  { %v3041_v2 = vpack.c.bf16 %v8741_v22, %v3032_v30 }
0x115d   :  { %8751 = vmatmul.mubr.msk.bf16.vlgmr.msra.gmra.mxu0 %vm1278_vm8, %v3041_v2  ;;  %v9605_v2 = vld [vmem:[%s12996_s19 + $0x18] sm:$0xff]  }
0x115e   :  { %8774 = vmatpush3.bf16.msra.mxu0 %v9600_v7  ;;  %8781 = vmatprep.mubr.msk.bf16.mxu0 %vm9899_vm7, %v9896_v60  ;;  %v9606_v7 = vld [vmem:[%s12996_s19 + $0x58] sm:$0xff]  }
0x115f   :  { %8775 = vmatprep.subr.bf16.mxu0 %v9896_v60 }
0x1162   :  { %8776 = vmatpush3.bf16.msra.mxu0 %v9601_v3  ;;  %v9608_v3 = vld [vmem:[%s12996_s19 + $0x50] sm:$0xff]  }
0x1163   :  { %8777 = vmatprep.subr.bf16.mxu0 %v9896_v60 }
0x1166   :  { %8778 = vmatpush3.bf16.msra.mxu0 %v9602_v37  ;;  %v9609_v37 = vld [vmem:[%s12996_s19 + $0x8] sm:$0xff]  }
0x1167   :  { %8779 = vmatprep.subr.bf16.mxu0 %v9896_v60 }
0x116a   :  { %8780 = vmatpush3.bf16.msra.mxu0 %v9603_v24  ;;  %v9610_v24 = vld [vmem:[%s12996_s19 + $0x48] sm:$0xff]  }
0x116b   :  { %8792 = vmatprep.subr.bf16.mxu0 %v9896_v60 }
0x121d   :  { %v3079_v26 = vpop.f32.mrf.mxu0 }
0x121e   :  { %v3086_v28 = vadd.f32 %v3079_v26, %v2960_v57  ;;  %v9611_v57 = vld [vmem:[%s12996_s19] sm:$0xff]  }
0x121f   :  { %v8752_v53 = vpop.f32.mrf.mxu0  ;;  %v9612_v26 = vld [vmem:[%s12996_s19 + $0x40] sm:$0xff]  }
0x1220   :  { %v3088_v34 = vadd.f32 %v9604_v33, %v3086_v28 }
0x1221   :  { %v3082_v59 = vpop.f32.mrf.mxu0 }
0x1222   :  { %v3090_v5 = vsub.f32 %v3088_v34, %v1573_v52  ;;  %v3087_v23 = vadd.f32 %v3082_v59, %v2963_v48 }
0x1223   :  { %v8753_v47 = vpop.f32.mrf.mxu0 }
0x1224   :  { %v3092_v61 = vmul.f32 %v3090_v5, %v10589_v8  ;;  %v3089_v1 = vadd.f32 %v9604_v33, %v3087_v23 }
0x1226   :  { %v11263_v63 = vadd.f32 %v3092_v61, %v1573_v52  ;;  %v3091_v55 = vsub.f32 %v3089_v1, %v1574_v9 }
0x1228   :  { %v3093_v13 = vmul.f32 %v3091_v55, %v10589_v8  ;;  %vm3096_vm9 = vcmp.ge.f32.partialorder %v11263_v63, 1.0 }
0x1229   :  { %v3098_v18 = vsel %vm3096_vm9, 1.0, %v9896_v60 }
0x122a   :  { %v11266_v22 = vadd.f32 %v3093_v13, %v1574_v9 }
0x122c   :  { %vm3097_vm13 = vcmp.ge.f32.partialorder %v11266_v22, 1.0 }
0x122d   :  { %8754 = vmatprep.subr.msk.mxu1 %vm3097_vm13, %v9900_v29  ;;  %v3099_v25 = vsel %vm3097_vm13, 1.0, %v9896_v60 }
0x122e   :  { %8755 = vmatpush3.msk.msra.mxu1 %vm3097_vm13, %v9900_v29  ;;  %v3102_v30 = vpack.c.bf16 %v3099_v25, %v3098_v18 }
0x122f   :  { %8756 = vmatprep.subr.msk.mxu1 %vm3096_vm9, %v9900_v29 }
0x1230   :  { %8757 = vmatpush3.msk.msra.mxu1 %vm3096_vm9, %v9900_v29  ;;  %8782 = vmatmul.mubr.msk.bf16.vlgmr.msra.gmra.mxu0 %vm1278_vm8, %v3102_v30 }
0x1231   :  { %8759 = vmatmul.mubr.msk.f32.vlgmr.msra.gmra.mxu1 %vm1163_vm6, %v11172_v19  ;;  %8761 = vmatprep.subr.bf16.mxu1 %v9896_v60  ;;  %v9607_v19 = vld [vmem:[%s12996_s19 + $0x10] sm:$0xff]  }
0x1232   :  { %8762 = vmatpush3.bf16.msra.mxu1 %v9605_v2  ;;  %8769 = vmatprep.mubr.msk.bf16.mxu1 %vm9899_vm7, %v9896_v60 }
0x1233   :  { %8763 = vmatprep.subr.bf16.mxu1 %v9896_v60  ;;  %8793 = vmatpush3.bf16.msra.mxu0 %v9606_v7 }
0x1234   :  { %8794 = vmatprep.subr.bf16.mxu0 %v9896_v60  ;;  %8800 = vmatprep.mubr.msk.bf16.mxu0 %vm9899_vm7, %v9896_v60 }
0x1236   :  { %8764 = vmatpush3.bf16.msra.mxu1 %v9607_v19 }
0x1237   :  { %8765 = vmatprep.subr.bf16.mxu1 %v9896_v60  ;;  %8795 = vmatpush3.bf16.msra.mxu0 %v9608_v3 }
0x1238   :  { %8796 = vmatprep.subr.bf16.mxu0 %v9896_v60 }
0x123a   :  { %8766 = vmatpush3.bf16.msra.mxu1 %v9609_v37 }
0x123b   :  { %8767 = vmatprep.subr.bf16.mxu1 %v9896_v60  ;;  %8797 = vmatpush3.bf16.msra.mxu0 %v9610_v24 }
0x123c   :  { %8798 = vmatprep.subr.bf16.mxu0 %v9896_v60 }
0x123e   :  { %8768 = vmatpush3.bf16.msra.mxu1 %v9611_v57 }
0x123f   :  { %8785 = vmatprep.subr.msk.mxu1 %vm3097_vm13, %v9900_v29  ;;  %8799 = vmatpush3.bf16.msra.mxu0 %v9612_v26 }
0x1240   :  { %8830 = vmatprep.subr.mxu0 %v9896_v60 }
0x12f0   :  { %v3260_v28 = vpop.f32.mrf.mxu0 }
0x12f1   :  { %v8760_v53 = vpop.f32.mrf.mxu1 }
0x12f2   :  { %v8783_v48 = vpop.f32.mrf.mxu0 }
0x12f3   :  { %v3169_v33 = vpop.f32.mrf.mxu1 }
0x12f4   :  { %v3178_v34 = vpack.c.bf16 %v8760_v53, %v3169_v33  ;;  %v3263_v52 = vpop.f32.mrf.mxu0 }
0x12f6   :  { %8770 = vmatmul.mubr.msk.bf16.vlgmr.msra.gmra.mxu1 %vm1278_vm8, %v3178_v34  ;;  %v8784_v59 = vpop.f32.mrf.mxu0 }
0x12f7   :  { %8786 = vmatpush3.msk.msra.mxu1 %vm3097_vm13, %v9900_v29  ;;  %8789 = vmatprep.mubr.msk.f32.mxu1 %vm1163_vm6, %v11202_v39 }
0x12f8   :  { %8787 = vmatprep.subr.msk.mxu1 %vm3096_vm9, %v9900_v29 }
0x12f9   :  { %8788 = vmatpush3.msk.msra.mxu1 %vm3096_vm9, %v9900_v29 }
0x12fe   :  { %8790 = vmatmul.mubr.msk.f32.vlgmr.msra.gmra.mxu1 %vm1163_vm6, %v11212_v36 }
0x12ff   :  { %8808 = vmatprep.mubr.msk.f32.mxu1 %vm1163_vm6, %v11202_v39  ;;  %v9613_v39 = vld [vmem:[%s12997_s20] ss:$0 sm:$0xff] }
0x13b6   :  { %v3216_v5 = vpop.f32.mrf.mxu1 }
0x13b7   :  { %v3261_v13 = vadd.f32 %v3260_v28, %v3216_v5 }
0x13b8   :  { %v8771_v23 = vpop.f32.mrf.mxu1 }
0x13ba   :  { %v3219_v47 = vpop.f32.mrf.mxu1 }
0x13bb   :  { %v3264_v2 = vadd.f32 %v3263_v52, %v3219_v47  ;;  %v9615_v47 = vld [vmem:[%s12991_s14 + $0x30] sm:$0xff] }
0x13bc   :  { %v8772_v61 = vpop.f32.mrf.mxu1 }
0x13bd   :  { %v9619_v61 = vld [vmem:[%s12991_s14 + $0x10] sm:$0xff] }
0x13be   :  { %v8791_v1 = vpop.f32.mrf.mxu1 }
0x13c0   :  { %v3333_v9 = vpop.f32.mrf.mxu1 }
0x13c1   :  { %v3342_v55 = vpack.c.bf16 %v8791_v1, %v3333_v9  ;;  %v9620_v1 = vld [vmem:[%s12991_s14 + $0x8] sm:$0xff]  ;;  %v9621_v9 = vld [vmem:[%s12991_s14] sm:$0xff] }
0x13c3   :  { %8801 = vmatmul.mubr.msk.bf16.vlgmr.msra.gmra.mxu0 %vm1278_vm8, %v3342_v55 }
0x13c4   :  { %8834 = vmatprep.mubr.msk.f32.mxu0 %vm9899_vm7, %v9896_v60 }
0x1483   :  { %v3380_v18 = vpop.f32.mrf.mxu0 }
0x1484   :  { %v3387_v25 = vadd.f32 %v3380_v18, %v3261_v13 }
0x1485   :  { %v8802_v30 = vpop.f32.mrf.mxu0 }
0x1486   :  { %v3389_v7 = vadd.f32 %v9613_v39, %v3387_v25  ;;  %v11400_v30 = vld [vmem:[%s12993_s16 + $0x38] sm:$0xff] }
0x1487   :  { %v3383_v19 = vpop.f32.mrf.mxu0 }
0x1488   :  { %v3391_v3 = vsub.f32 %v3389_v7, %v10684_v44  ;;  %v3388_v37 = vadd.f32 %v3383_v19, %v3264_v2  ;;  %v11409_v2 = vld [vmem:[%s12993_s16 + $0x30] sm:$0xff]  ;;  %v11425_v7 = vld [vmem:[%s12993_s16 + $0x20] sm:$0xff]  ;;  %v11432_v19 = vld [vmem:[%s12993_s16 + $0x18] sm:$0xff] }
0x1489   :  { %v8803_v24 = vpop.f32.mrf.mxu0 }
0x148a   :  { %v3393_v57 = vmul.f32 %v3391_v3, %v10681_v31  ;;  %v3390_v26 = vadd.f32 %v9613_v39, %v3388_v37  ;;  %v11418_v39 = vld [vmem:[%s12993_s16 + $0x28] sm:$0xff]  ;;  %v11439_v3 = vld [vmem:[%s12993_s16 + $0x10] sm:$0xff]  ;;  %v11453_v24 = vld [vmem:[%s12993_s16] sm:$0xff] }
0x148b   :  { %v11446_v37 = vld [vmem:[%s12993_s16 + $0x8] sm:$0xff] }
0x148c   :  { %v3395_v53 = vadd.f32 %v3393_v57, %v10684_v44  ;;  %v3392_v28 = vsub.f32 %v3390_v26, %v10689_v56  ;;  %v9622_v57 = vld [vmem:[%s13027_s28 + $0x78] sm:$0xff]  }
0x148d   :  { %v9623_v26 = vld [vmem:[%s13027_s28 + $0x38] sm:$0xff]  }
0x148e   :  { %v3394_v48 = vmul.f32 %v3392_v28, %v10681_v31  ;;  %vm3397_vm10 = vcmp.ge.f32.partialorder %v3395_v53, 1.0  ;;  %v9625_v28 = vld [vmem:[%s13027_s28 + $0x30] sm:$0xff]  }
0x148f   :  { %v11357_v33 = vsel %vm3397_vm10, 0.0, %v3395_v53  ;;  %v3399_v59 = vsel %vm3397_vm10, 1.0, %v9896_v60  ;;  %v9624_v53 = vld [vmem:[%s13027_s28 + $0x70] sm:$0xff]  }
0x1490   :  { %v3396_v34 = vadd.f32 %v3394_v48, %v10689_v56  ;;  %v3403_v44 = vadd.f32 %v3399_v59, %v11162_v16  ;;  %v9614_v56 = vld [vmem:[%s12991_s14 + $0x38] sm:$0xff]  ;;  %v9617_v16 = vld [vmem:[%s12991_s14 + $0x20] sm:$0xff]  ;;  %v9627_v48 = vld [vmem:[%s13027_s28 + $0x28] sm:$0xff]  }
0x1491   :  { %v9630_v59 = vld [vmem:[%s13027_s28 + $0x58] sm:$0xff]  }
0x1492   :  { %vm3398_vm14 = vcmp.ge.f32.partialorder %v3396_v34, 1.0 }
0x1493   :  { %v3400_v52 = vsel %vm3398_vm14, 1.0, %v9896_v60  ;;  %v11362_v5 = vsel %vm3398_vm14, 0.0, %v3396_v34  ;;  %v9628_v34 = vld [vmem:[%s13027_s28 + $0x60] sm:$0xff]  }
0x1494   :  { %v3404_v23 = vadd.f32 %v11159_v10, %v3400_v52  ;;  %v9616_v10 = vld [vmem:[%s12991_s14 + $0x28] sm:$0xff]  ;;  %v9629_v52 = vld [vmem:[%s13027_s28 + $0x20] sm:$0xff]  }
0x1496   :  { %8804 = vmatprep.subr.mxu1 %v3404_v23 }
0x1497   :  { %8805 = vmatpush3.msra.mxu1 %v3404_v23 }
0x1498   :  { %8806 = vmatprep.subr.mxu1 %v3403_v44 }
0x1499   :  { %8807 = vmatpush3.msra.mxu1 %v3403_v44 }
0x149a   :  { %8809 = vmatmul.mubr.msk.f32.vlgmr.msra.gmra.mxu1 %vm1163_vm6, %v11212_v36  ;;  %8811 = vmatprep.subr.mxu1 %v9614_v56  ;;  %v9618_v36 = vld [vmem:[%s12991_s14 + $0x18] sm:$0xff] }
0x149b   :  { %8812 = vmatpush3.msra.mxu1 %v9614_v56  ;;  %v9633_v56 = vld [vmem:[%s13027_s28 + $0x10] sm:$0xff]  }
0x149c   :  { %8813 = vmatprep.subr.mxu1 %v9615_v47 }
0x149d   :  { %8814 = vmatpush3.msra.mxu1 %v9615_v47  ;;  %v9634_v47 = vld [vmem:[%s13027_s28 + $0x48] sm:$0xff]  }
0x149e   :  { %8815 = vmatprep.subr.mxu1 %v9616_v10 }
0x149f   :  { %8816 = vmatpush3.msra.mxu1 %v9616_v10  ;;  %v9635_v10 = vld [vmem:[%s13027_s28 + $0x8] sm:$0xff]  }
0x14a0   :  { %8817 = vmatprep.subr.mxu1 %v9617_v16 }
0x14a1   :  { %8818 = vmatpush3.msra.mxu1 %v9617_v16  ;;  %v9636_v16 = vld [vmem:[%s13027_s28 + $0x40] sm:$0xff]  }
0x14a2   :  { %8819 = vmatprep.subr.mxu1 %v9618_v36 }
0x14a3   :  { %8820 = vmatpush3.msra.mxu1 %v9618_v36  ;;  %v9637_v36 = vld [vmem:[%s13027_s28] sm:$0xff]  }
0x14a4   :  { %8821 = vmatprep.subr.mxu1 %v9619_v61 }
0x14a5   :  { %8822 = vmatpush3.msra.mxu1 %v9619_v61  ;;  %v9638_v61 = vld [vmem:[%s13030_s29 + $0x78] sm:$0xff]  }
0x14a6   :  { %8823 = vmatprep.subr.mxu1 %v9620_v1 }
0x14a7   :  { %8824 = vmatpush3.msra.mxu1 %v9620_v1 }
0x14a8   :  { %8825 = vmatprep.subr.mxu1 %v9621_v9 }
0x14a9   :  { %8826 = vmatpush3.msra.mxu1 %v9621_v9 }
0x14aa   :  { %8856 = vmatprep.subr.mxu1 %v9896_v60 }
0x155a   :  { %v8810_v55 = vpop.f32.mrf.mxu1 }
0x155b   :  { %v11395_v25 = vmax.f32 %v3404_v23, %v8810_v55  ;;  %v9631_v23 = vld [vmem:[%s13027_s28 + $0x18] sm:$0xff]  }
0x155c   :  { %v3471_v13 = vpop.f32.mrf.mxu1 }
0x155d   :  { %v11393_v18 = vmax.f32 %v3403_v44, %v3471_v13  ;;  %v9632_v44 = vld [vmem:[%s13027_s28 + $0x50] sm:$0xff]  }
0x155f   :  { %8827 = vmatprep.mubr.msk.f32.mxu1 %vm1278_vm8, %v11393_v18 }
0x1560   :  { %8828 = vmatmul.mubr.msk.f32.vlgmr.msra.gmra.mxu1 %vm1278_vm8, %v11395_v25 }
0x1561   :  { %8857 = vmatpush3.msra.mxu1 %v11400_v30  ;;  %8872 = vmatprep.mubr.msk.f32.mxu1 %vm9899_vm7, %v9896_v60 }
0x1562   :  { %8858 = vmatprep.subr.mxu1 %v9896_v60 }
0x1563   :  { %8859 = vmatpush3.msra.mxu1 %v11409_v2 }
0x1564   :  { %8860 = vmatprep.subr.mxu1 %v9896_v60 }
0x1565   :  { %8861 = vmatpush3.msra.mxu1 %v11418_v39 }
0x1566   :  { %8862 = vmatprep.subr.mxu1 %v9896_v60 }
0x1567   :  { %8863 = vmatpush3.msra.mxu1 %v11425_v7 }
0x1568   :  { %8864 = vmatprep.subr.mxu1 %v9896_v60 }
0x1569   :  { %8865 = vmatpush3.msra.mxu1 %v11432_v19 }
0x156a   :  { %8866 = vmatprep.subr.mxu1 %v9896_v60 }
0x156b   :  { %8867 = vmatpush3.msra.mxu1 %v11439_v3 }
0x156c   :  { %8868 = vmatprep.subr.mxu1 %v9896_v60 }
0x156d   :  { %8869 = vmatpush3.msra.mxu1 %v11446_v37 }
0x156e   :  { %8870 = vmatprep.subr.mxu1 %v9896_v60 }
0x156f   :  { %8871 = vmatpush3.msra.mxu1 %v11453_v24 }
0x1570   :  { %8873 = vmatmul.mubr.msk.f32.vlgmr.msra.gmra.mxu1 %vm1278_vm8, %v10827_v38  ;;  %8007 = vmatprep.subr.bf16.mxu1 %v9622_v57  ;;  %v9626_v38 = vld [vmem:[%s13027_s28 + $0x68] sm:$0xff]   ;;  %v9639_v57 = vld [vmem:[%s12992_s15] sm:$0xff] }
0x1571   :  { %8008 = vmatpush3.bf16.msra.mxu1 %v9623_v26  ;;  %v9641_v26 = vld [vmem:[%s13024_s7] sm:$0xff]  }
0x1572   :  { %8009 = vmatprep.subr.bf16.mxu1 %v9624_v53 }
0x1575   :  { %8010 = vmatpush3.bf16.msra.mxu1 %v9625_v28  ;;  %v9642_v28 = vld [vmem:[%s13027_s28 + $0xb8] sm:$0xff]  }
0x1576   :  { %8011 = vmatprep.subr.bf16.mxu1 %v9626_v38  ;;  %v9643_v38 = vld [vmem:[%s13027_s28 + $0xb0] sm:$0xff]  }
0x1579   :  { %8012 = vmatpush3.bf16.msra.mxu1 %v9627_v48  ;;  %v9644_v48 = vld [vmem:[%s13027_s28 + $0xa8] sm:$0xff]  }
0x157a   :  { %8013 = vmatprep.subr.bf16.mxu1 %v9628_v34  ;;  %v9645_v34 = vld [vmem:[%s13027_s28 + $0xa0] sm:$0xff]  }
0x157d   :  { %8014 = vmatpush3.bf16.msra.mxu1 %v9629_v52  ;;  %v9646_v52 = vld [vmem:[%s13027_s28 + $0x98] sm:$0xff]  }
0x157e   :  { %8015 = vmatprep.subr.bf16.mxu1 %v9630_v59  ;;  %v9647_v59 = vld [vmem:[%s13027_s28 + $0x90] sm:$0xff]  }
0x1581   :  { %8016 = vmatpush3.bf16.msra.mxu1 %v9631_v23  ;;  %v9648_v23 = vld [vmem:[%s13027_s28 + $0x88] sm:$0xff]  }
0x1582   :  { %8017 = vmatprep.subr.bf16.mxu1 %v9632_v44  ;;  %v9649_v44 = vld [vmem:[%s13027_s28 + $0x80] sm:$0xff]  }
0x1585   :  { %8018 = vmatpush3.bf16.msra.mxu1 %v9633_v56  ;;  %v11586_v56 = vld [vmem:[%s13030_s29 + $0xb8] sm:$0xff]  }
0x1586   :  { %8019 = vmatprep.subr.bf16.mxu1 %v9634_v47 }
0x1589   :  { %8020 = vmatpush3.bf16.msra.mxu1 %v9635_v10 }
0x158a   :  { %8021 = vmatprep.subr.bf16.mxu1 %v9636_v16 }
0x158d   :  { %8022 = vmatpush3.bf16.msra.mxu1 %v9637_v36  ;;  %v9651_v36 = vld [vmem:[%s13029_s27] ss:$0 sm:$0xff] }
0x158e   :  { %8045 = vmatprep.subr.bf16.mxu1 %v9638_v61 }
0x1620   :  { %v8829_v1 = vpop.f32.mrf.mxu1 }
0x1621   :  { %v3564_v9 = vmax.f32 %v11395_v25, %v8829_v1 }
0x1622   :  { %v3554_v55 = vpop.f32.mrf.mxu1 }
0x1623   :  { %v3563_v13 = vmax.f32 %v11393_v18, %v3554_v55  ;;  %8831 = vmatpush3.msra.mxu0 %v3564_v9 }
0x1624   :  { %8832 = vmatprep.subr.mxu0 %v9896_v60 }
0x1625   :  { %8833 = vmatpush3.msra.mxu0 %v3563_v13 }
0x1626   :  { %8835 = vmatmul.mubr.msk.f32.vlgmr.msra.gmra.mxu0 %vm1163_vm6, %v9639_v57  ;;  %8837 = vmatprep.subr.mxu0 %v9896_v60 }
0x1627   :  { %8838 = vmatpush3.msra.mxu0 %v11400_v30  ;;  %8853 = vmatprep.mubr.msk.f32.mxu0 %vm9899_vm7, %v9896_v60  ;;  %v9640_v30 = vld [vmem:[%s13024_s7 + $0x8] sm:$0xff]  }
0x1628   :  { %8839 = vmatprep.subr.mxu0 %v9896_v60 }
0x1629   :  { %8840 = vmatpush3.msra.mxu0 %v11409_v2  ;;  %v7547_v2 = vld [vmem:[%s13025_s4 + $0x40] sm:$0xff] }
0x162a   :  { %8841 = vmatprep.subr.mxu0 %v9896_v60 }
0x162b   :  { %8842 = vmatpush3.msra.mxu0 %v11418_v39  ;;  %v7548_v39 = vld [vmem:[%s13025_s4 + $0x48] sm:$0xff] }
0x162c   :  { %8843 = vmatprep.subr.mxu0 %v9896_v60 }
0x162d   :  { %8844 = vmatpush3.msra.mxu0 %v11425_v7  ;;  %v3786_v7 = vpack.c.bf16 %v7548_v39, %v7547_v2 }
0x162e   :  { %8845 = vmatprep.subr.mxu0 %v9896_v60 }
0x162f   :  { %8846 = vmatpush3.msra.mxu0 %v11432_v19 }
0x1630   :  { %v11530_v18 = vpop.f32.mrf.mxu1  ;;  %8847 = vmatprep.subr.mxu0 %v9896_v60 }
0x1631   :  { %8848 = vmatpush3.msra.mxu0 %v11439_v3 }
0x1632   :  { %v8874_v25 = vpop.f32.mrf.mxu1  ;;  %8849 = vmatprep.subr.mxu0 %v9896_v60 }
0x1633   :  { %8850 = vmatpush3.msra.mxu0 %v11446_v37  ;;  %v7549_v37 = vld [vmem:[%s13025_s4 + $0x50] sm:$0xff] }
0x1634   :  { %8851 = vmatprep.subr.mxu0 %v9896_v60 }
0x1635   :  { %8852 = vmatpush3.msra.mxu0 %v11453_v24  ;;  %v7550_v24 = vld [vmem:[%s13025_s4 + $0x58] sm:$0xff] }
0x1636   :  { %8875 = vmatprep.subr.bf16.mxu0 %v9640_v30  ;;  %v3787_v53 = vpack.c.bf16 %v7550_v24, %v7549_v37 }
0x16e6   :  { %v3631_v19 = vpop.f32.mrf.mxu0 }
0x16e7   :  { %8854 = vmatmul.mubr.msk.f32.vlgmr.msra.gmra.mxu0 %vm1278_vm8, %v3631_v19 }
0x16e8   :  { %8876 = vmatpush3.bf16.msra.mxu0 %v9640_v30  ;;  %v8836_v3 = vpop.f32.mrf.mxu0  ;;  %8879 = vmatprep.mubr.msk.bf16.mxu0 %vm129_vm0, %v3786_v7 }
0x16e9   :  { %8877 = vmatprep.subr.bf16.mxu0 %v9641_v26 }
0x16ec   :  { %8878 = vmatpush3.bf16.msra.mxu0 %v9641_v26 }
0x16ed   :  { %8883 = vmatprep.subr.bf16.mxu0 %v9642_v28 }
0x16ef   :  { %8880 = vmatmul.mubr.msk.bf16.vlgmr.msra.gmra.mxu0 %vm129_vm0, %v3787_v53 }
0x16f0   :  { %8884 = vmatpush3.bf16.msra.mxu0 %v9642_v28 }
0x16f1   :  { %8885 = vmatprep.subr.bf16.mxu0 %v9643_v38 }
0x16f4   :  { %8886 = vmatpush3.bf16.msra.mxu0 %v9643_v38 }
0x16f5   :  { %8887 = vmatprep.subr.bf16.mxu0 %v9644_v48 }
0x16f8   :  { %8888 = vmatpush3.bf16.msra.mxu0 %v9644_v48 }
0x16f9   :  { %8889 = vmatprep.subr.bf16.mxu0 %v9645_v34 }
0x16fc   :  { %8890 = vmatpush3.bf16.msra.mxu0 %v9645_v34 }
0x16fd   :  { %8891 = vmatprep.subr.bf16.mxu0 %v9646_v52 }
0x1700   :  { %8892 = vmatpush3.bf16.msra.mxu0 %v9646_v52 }
0x1701   :  { %8893 = vmatprep.subr.bf16.mxu0 %v9647_v59 }
0x1704   :  { %8894 = vmatpush3.bf16.msra.mxu0 %v9647_v59 }
0x1705   :  { %8895 = vmatprep.subr.bf16.mxu0 %v9648_v23 }
0x1708   :  { %8896 = vmatpush3.bf16.msra.mxu0 %v9648_v23 }
0x1709   :  { %8897 = vmatprep.subr.bf16.mxu0 %v9649_v44 }
0x170c   :  { %8898 = vmatpush3.bf16.msra.mxu0 %v9649_v44 }
0x170d   :  { %8903 = vmatprep.subr.bf16.mxu0 %v11586_v56 }
0x17a7   :  { %v11589_v47 = vpop.f32.mrf.mxu0 }
0x17a9   :  { %v8855_v10 = vpop.f32.mrf.mxu0 }
0x17af   :  { %v8881_v16 = vpop.f32.mrf.mxu0 }
0x17b0   :  { %v3837_v61 = vadd.f32 %v9651_v36, %v8881_v16 }
0x17b1   :  { %v3828_v1 = vpop.f32.mrf.mxu0 }
0x17b2   :  { %v3845_v9 = vsub.f32 %v3837_v61, %v10842_v32  ;;  %v3829_v55 = vadd.f32 %v9651_v36, %v3828_v1 }
0x17b3   :  { %v8882_v13 = vpop.f32.mrf.mxu0 }
0x17b4   :  { %v3849_v57 = vmul.f32 %v3845_v9, %v10153_v45  ;;  %v3843_v25 = vsub.f32 %v3829_v55, %v10856_v35  ;;  %v3840_v30 = vadd.f32 %v9651_v36, %v8882_v13 }
0x17b5   :  { %v3831_v2 = vpop.f32.mrf.mxu0 }
0x17b6   :  { %v3853_v39 = vadd.f32 %v3849_v57, %v10842_v32  ;;  %v3847_v7 = vmul.f32 %v3843_v25, %v10153_v45  ;;  %v3846_v19 = vsub.f32 %v3840_v30, %v10867_v51  ;;  %v3832_v3 = vadd.f32 %v9651_v36, %v3831_v2 }
0x17b8   :  { %vm3857_vm15 = vcmp.ge.f32.partialorder %v3853_v39, 1.0  ;;  %v3851_v37 = vadd.f32 %v3847_v7, %v10856_v35  ;;  %v3850_v24 = vmul.f32 %v3846_v19, %v10153_v45  ;;  %v3844_v26 = vsub.f32 %v3832_v3, %v10877_v20 }
0x17b9   :  { %v11604_v53 = vsel %vm3857_vm15, 0.0, %v3853_v39  ;;  %v11608_v28 = vsel %vm3857_vm15, 1.0, %v9896_v60 }
0x17ba   :  { %v3854_v32 = vadd.f32 %v3850_v24, %v10867_v51  ;;  %v3848_v38 = vmul.f32 %v3844_v26, %v10153_v45  ;;  %vm3855_vm1 = vcmp.ge.f32.partialorder %v3851_v37, 1.0  ;;  %v3881_v52 = vrot.slane %v11608_v28, 1  ;;  %v9654_v51 = vld [vmem:[%s13030_s29 + $0xb0] sm:$0xff]  }
0x17bb   :  { %v11615_v35 = vsel %vm3855_vm1, 1.0, %v9896_v60  ;;  %v11618_v34 = vsel %vm3855_vm1, 0.0, %v3851_v37  ;;  %v3869_v26 = vrot.slane %v11608_v28, 7 }
0x17bc   :  { %vm3858_vm2 = vcmp.ge.f32.partialorder %v3854_v32, 1.0  ;;  %v3852_v48 = vadd.f32 %v3848_v38, %v10877_v20  ;;  %v3867_v10 = vrot.slane %v11615_v35, 7  ;;  %v3879_v36 = vrot.slane %v11615_v35, 1 }
0x17bd   :  { %v11622_v59 = vsel %vm3858_vm2, 1.0, %v9896_v60  ;;  %vm11625_vm4 = vmpackc.low %vm3858_vm2, %vm3857_vm15  ;;  %v11629_v23 = vsel %vm3858_vm2, 0.0, %v3854_v32 }
0x17be   :  { %v3870_v20 = vrot.slane %v11622_v59, 7  ;;  %v3882_v44 = vrot.slane %v11622_v59, 1  ;;  %vm3856_vm11 = vcmp.ge.f32.partialorder %v3852_v48, 1.0 }
0x17bf   :  { %v11635_v16 = vsel %vm3856_vm11, 1.0, %v9896_v60  ;;  %vm7553_vm12 = vmpackc.low %vm3856_vm11, %vm3855_vm1  ;;  %v11639_v61 = vsel %vm3856_vm11, 0.0, %v3852_v48 }
0x17c0   :  { %v3868_v1 = vrot.slane %v11635_v16, 7  ;;  %v3880_v9 = vrot.slane %v11635_v16, 1  ;;  %7554 = vmatprep.mubr.msk.bf16.mxu1 %vm7553_vm12, %v9897_v17  ;;  %v3874_v55 = vsel %vm213_vm3, %v3870_v20, %v3867_v10  ;;  %v3883_v13 = vsel %vm246_vm5, %v3881_v52, %v3882_v44 }
0x17c1   :  { %v3886_v57 = vsel %vm246_vm5, %v3882_v44, %v3879_v36  ;;  %v3889_v25 = vmul.f32 %v3883_v13, %v10205_v14  ;;  %v3875_v19 = vmul.f32 %v3874_v55, %v10148_v42  ;;  %v3871_v44 = vsel %vm213_vm3, %v3869_v26, %v3870_v20  ;;  %v9655_v55 = vld [vmem:[%s13030_s29 + $0x30] sm:$0xff]   ;;  %v9657_v13 = vld [vmem:[%s13030_s29 + $0xa8] sm:$0xff]  }
0x17c2   :  { %v3873_v30 = vsel %vm213_vm3, %v3867_v10, %v3868_v1  ;;  %v3884_v2 = vsel %vm246_vm5, %v3880_v9, %v3881_v52  ;;  %v3885_v39 = vsel %vm246_vm5, %v3879_v36, %v3880_v9  ;;  %v3890_v7 = vmul.f32 %v3886_v57, %v10201_v12  ;;  %v9652_v36 = vld [vmem:[%s13030_s29 + $0x38] sm:$0xff]   ;;  %v9658_v57 = vld [vmem:[%s13030_s29 + $0x28] sm:$0xff]  }
0x17c3   :  { %v3876_v3 = vmul.f32 %v3873_v30, %v10157_v49  ;;  %v3887_v37 = vmul.f32 %v3885_v39, %v10173_v0  ;;  %v3888_v24 = vmul.f32 %v3884_v2, %v10163_v58  ;;  %v3872_v52 = vsel %vm213_vm3, %v3868_v1, %v3869_v26  ;;  %v9653_v1 = vld [vmem:[%s13030_s29 + $0x70] sm:$0xff]   ;;  %v9660_v30 = vld [vmem:[%s13030_s29 + $0xa0] sm:$0xff]   ;;  %v9662_v39 = vld [vmem:[%s13030_s29 + $0x58] sm:$0xff]  }
0x17c4   :  { %v3896_v48 = vpack.c.bf16 %v3890_v7, %v3889_v25  ;;  %v3877_v10 = vmul.f32 %v3872_v52, %v10146_v41  ;;  %v3878_v20 = vmul.f32 %v3871_v44, %v10155_v46  ;;  %v9659_v25 = vld [vmem:[%s13030_s29 + $0x60] sm:$0xff]   ;;  %v9663_v7 = vld [vmem:[%s13030_s29 + $0x98] sm:$0xff]   ;;  %v9668_v26 = vld [vmem:[%s13030_s29 + $0x48] sm:$0xff]  }
0x17c5   :  { %v3891_v32 = vpack.c.bf16 %v3876_v3, %v3875_v19  ;;  %v3893_v38 = vpack.c.bf16 %v3888_v24, %v3887_v37  ;;  %v9661_v2 = vld [vmem:[%s13030_s29 + $0x20] sm:$0xff]   ;;  %v9664_v19 = vld [vmem:[%s13030_s29 + $0x18] sm:$0xff]   ;;  %v9665_v3 = vld [vmem:[%s13030_s29 + $0x50] sm:$0xff]  }
0x17c6   :  { %v3894_v9 = vpack.c.bf16 %v3878_v20, %v3877_v10  ;;  %v9666_v37 = vld [vmem:[%s13030_s29 + $0x90] sm:$0xff]   ;;  %v9672_v52 = vld [vmem:[%s13030_s29 + $0x80] sm:$0xff]   ;;  %v11742_v10 = vld [vmem:[%s12988_s11 + $0x78] sm:$0xff] }
0x17c7   :  { %3930 = vmatmul.mubr.bf16.vlgmr.msra.gmra.mxu1 %v3891_v32  ;;  %8899 = vmatprep.mubr.bf16.mxu0 %v3893_v38  ;;  %v9667_v24 = vld [vmem:[%s13030_s29 + $0x10] sm:$0xff]   ;;  %v9669_v32 = vld [vmem:[%s13030_s29 + $0x88] sm:$0xff]   ;;  %v9673_v44 = vld [vmem:[%s13030_s29] sm:$0xff]  }
0x17c8   :  { %7556 = vmatprep.mubr.msk.bf16.mxu1 %vm11625_vm4, %v9897_v17  ;;  %8900 = vmatmul.mubr.bf16.vlgmr.msra.gmra.mxu0 %v3896_v48  ;;  %v9670_v38 = vld [vmem:[%s13030_s29 + $0x8] sm:$0xff]   ;;  %v9671_v48 = vld [vmem:[%s13030_s29 + $0x40] sm:$0xff]  }
0x17c9   :  { %8046 = vmatpush3.bf16.msra.mxu1 %v9652_v36  ;;  %8904 = vmatpush3.bf16.msra.mxu0 %v11586_v56  ;;  %v9656_v56 = vld [vmem:[%s13030_s29 + $0x68] sm:$0xff]  }
0x17ca   :  { %8047 = vmatprep.subr.bf16.mxu1 %v9653_v1  ;;  %8905 = vmatprep.subr.bf16.mxu0 %v9654_v51 }
0x17cd   :  { %8048 = vmatpush3.bf16.msra.mxu1 %v9655_v55  ;;  %8906 = vmatpush3.bf16.msra.mxu0 %v9654_v51 }
0x17ce   :  { %8049 = vmatprep.subr.bf16.mxu1 %v9656_v56  ;;  %8907 = vmatprep.subr.bf16.mxu0 %v9657_v13  ;;  %v9675_v56 = vld [vmem:[%s13031_s2] ss:$0 sm:$0xff] }
0x17cf   :  { %3938 = vmatmul.mubr.bf16.gmra.mxu1 %v3894_v9 }
0x17d1   :  { %8050 = vmatpush3.bf16.msra.mxu1 %v9658_v57  ;;  %8908 = vmatpush3.bf16.msra.mxu0 %v9657_v13 }
0x17d2   :  { %8051 = vmatprep.subr.bf16.mxu1 %v9659_v25  ;;  %8909 = vmatprep.subr.bf16.mxu0 %v9660_v30 }
0x17d5   :  { %8052 = vmatpush3.bf16.msra.mxu1 %v9661_v2  ;;  %8910 = vmatpush3.bf16.msra.mxu0 %v9660_v30 }
0x17d6   :  { %8053 = vmatprep.subr.bf16.mxu1 %v9662_v39  ;;  %8911 = vmatprep.subr.bf16.mxu0 %v9663_v7 }
0x17d9   :  { %8054 = vmatpush3.bf16.msra.mxu1 %v9664_v19  ;;  %8912 = vmatpush3.bf16.msra.mxu0 %v9663_v7 }
0x17da   :  { %8055 = vmatprep.subr.bf16.mxu1 %v9665_v3  ;;  %8913 = vmatprep.subr.bf16.mxu0 %v9666_v37 }
0x17dd   :  { %8056 = vmatpush3.bf16.msra.mxu1 %v9667_v24  ;;  %8914 = vmatpush3.bf16.msra.mxu0 %v9666_v37 }
0x17de   :  { %8057 = vmatprep.subr.bf16.mxu1 %v9668_v26  ;;  %8915 = vmatprep.subr.bf16.mxu0 %v9669_v32 }
0x17e1   :  { %8058 = vmatpush3.bf16.msra.mxu1 %v9670_v38  ;;  %8916 = vmatpush3.bf16.msra.mxu0 %v9669_v32 }
0x17e2   :  { %8059 = vmatprep.subr.bf16.mxu1 %v9671_v48  ;;  %8917 = vmatprep.subr.bf16.mxu0 %v9672_v52 }
0x17e5   :  { %8060 = vmatpush3.bf16.msra.mxu1 %v9673_v44  ;;  %8918 = vmatpush3.bf16.msra.mxu0 %v9672_v52 }
0x17e6   :  { %8934 = vmatprep.subr.mxu1 %v11742_v10 }
0x1887   :  { %v8023_v36 = vpop.f32.mrf.mxu1 }
0x1888   :  { %v8901_v1 = vpop.f32.mrf.mxu0 }
0x1889   :  { %v8024_v51 = vpop.f32.mrf.mxu1 }
0x188a   :  { %v8025_v20 = vadd.f32 %v8024_v51, %v8023_v36  ;;  %v3980_v9 = vpop.f32.mrf.mxu0 }
0x188b   :  { %v8026_v55 = vpop.f32.mrf.mxu1 }
0x188c   :  { %v3932_v13 = vadd.f32 %v9675_v56, %v8025_v20  ;;  %v8902_v57 = vpop.f32.mrf.mxu0 }
0x188d   :  { %v8027_v25 = vpop.f32.mrf.mxu1 }
0x188e   :  { %v3981_v30 = vadd.f32 %v3980_v9, %v3932_v13  ;;  %v8028_v2 = vadd.f32 %v8027_v25, %v8026_v55  ;;  %v3983_v3 = vpop.f32.mrf.mxu0 }
0x188f   :  { %v8029_v39 = vpop.f32.mrf.mxu1 }
0x1890   :  { %v3995_v7 = vsub.f32 %v3981_v30, %v10986_v43  ;;  %v3935_v19 = vadd.f32 %v9675_v56, %v8028_v2 }
0x1891   :  { %v8030_v37 = vpop.f32.mrf.mxu1 }
0x1892   :  { %v3999_v24 = vmul.f32 %v3995_v7, %v10313_v27  ;;  %v3984_v26 = vadd.f32 %v3983_v3, %v3935_v19  ;;  %v8031_v32 = vadd.f32 %v8030_v37, %v8029_v39 }
0x1893   :  { %v8032_v38 = vpop.f32.mrf.mxu1 }
0x1894   :  { %v4003_v48 = vadd.f32 %v3999_v24, %v10986_v43  ;;  %v3996_v52 = vsub.f32 %v3984_v26, %v10993_v6  ;;  %v3940_v44 = vadd.f32 %v9675_v56, %v8031_v32 }
0x1895   :  { %v8033_v36 = vpop.f32.mrf.mxu1 }
0x1896   :  { %v4000_v51 = vmul.f32 %v3996_v52, %v10313_v27  ;;  %v3989_v20 = vadd.f32 %v8901_v1, %v3940_v44  ;;  %v8034_v9 = vadd.f32 %v8033_v36, %v8032_v38  ;;  %vm4007_vm10 = vcmp.ge.f32.partialorder %v4003_v48, 1.0 }
0x1897   :  { %v11753_v55 = vsel %vm4007_vm10, 0.0, %v4003_v48  ;;  %v4011_v2 = vsel %vm4007_vm10, 1.0, %v9896_v60 }
0x1898   :  { %v4004_v13 = vadd.f32 %v4000_v51, %v10993_v6  ;;  %v3997_v25 = vsub.f32 %v3989_v20, %v11006_v4  ;;  %v3943_v30 = vadd.f32 %v9675_v56, %v8034_v9  ;;  %v4019_v19 = vrot.slane %v4011_v2, 7 }
0x1899   :  { %v4031_v3 = vrot.slane %v4011_v2, 1 }
0x189a   :  { %v4001_v43 = vmul.f32 %v3997_v25, %v10313_v27  ;;  %v3992_v39 = vadd.f32 %v8902_v57, %v3943_v30  ;;  %vm4008_vm14 = vcmp.ge.f32.partialorder %v4004_v13, 1.0  ;;  %v9684_v25 = vld [vmem:[%s12988_s11 + $0x38] sm:$0xff] }
0x189b   :  { %v4012_v7 = vsel %vm4008_vm14, 1.0, %v9896_v60  ;;  %vm7557_vm15 = vmpackc.low %vm4008_vm14, %vm4007_vm10  ;;  %v11760_v1 = vsel %vm4008_vm14, 0.0, %v4004_v13 }
0x189c   :  { %v4005_v37 = vadd.f32 %v4001_v43, %v11006_v4  ;;  %v3998_v6 = vsub.f32 %v3992_v39, %v11021_v21  ;;  %v4020_v24 = vrot.slane %v4012_v7, 7  ;;  %v4032_v26 = vrot.slane %v4012_v7, 1  ;;  %7558 = vmatprep.mubr.msk.bf16.mxu1 %vm7557_vm15, %v9897_v17 }
0x189e   :  { %vm4009_vm1 = vcmp.ge.f32.partialorder %v4005_v37, 1.0  ;;  %v4002_v56 = vmul.f32 %v3998_v6, %v10313_v27  ;;  %v4025_v57 = vsel %vm213_vm3, %v4019_v19, %v4020_v24  ;;  %v4037_v32 = vsel %vm246_vm5, %v4031_v3, %v4032_v26 }
0x189f   :  { %v4013_v38 = vsel %vm4009_vm1, 1.0, %v9896_v60  ;;  %v11773_v4 = vsel %vm4009_vm1, 0.0, %v4005_v37  ;;  %v4039_v9 = vmul.f32 %v4037_v32, %v10173_v0  ;;  %v4028_v39 = vmul.f32 %v4025_v57, %v10157_v49 }
0x18a0   :  { %v4006_v48 = vadd.f32 %v4002_v56, %v11021_v21  ;;  %v4033_v52 = vrot.slane %v4013_v38, 1  ;;  %v4021_v44 = vrot.slane %v4013_v38, 7 }
0x18a2   :  { %vm4010_vm2 = vcmp.ge.f32.partialorder %v4006_v48, 1.0  ;;  %v4036_v36 = vsel %vm246_vm5, %v4032_v26, %v4033_v52  ;;  %v4024_v51 = vsel %vm213_vm3, %v4020_v24, %v4021_v44 }
0x18a3   :  { %v4014_v20 = vsel %vm4010_vm2, 1.0, %v9896_v60  ;;  %v4040_v13 = vmul.f32 %v4036_v36, %v10163_v58  ;;  %vm11784_vm4 = vmpackc.low %vm4010_vm2, %vm4009_vm1  ;;  %v11788_v21 = vsel %vm4010_vm2, 0.0, %v4006_v48  ;;  %v4029_v7 = vmul.f32 %v4024_v51, %v10146_v41  ;;  %v9679_v51 = vld [vmem:[%s12988_s11 + $0x60] sm:$0xff] }
0x18a4   :  { %v4022_v30 = vrot.slane %v4014_v20, 7  ;;  %v4034_v2 = vrot.slane %v4014_v20, 1  ;;  %v9681_v20 = vld [vmem:[%s12988_s11 + $0x50] sm:$0xff] }
0x18a5   :  { %v4045_v43 = vpack.c.bf16 %v4040_v13, %v4039_v9  ;;  %v9682_v9 = vld [vmem:[%s12988_s11 + $0x48] sm:$0xff]  ;;  %v9683_v13 = vld [vmem:[%s12988_s11 + $0x40] sm:$0xff] }
0x18a6   :  { %v4026_v6 = vsel %vm213_vm3, %v4022_v30, %v4019_v19  ;;  %v4035_v24 = vsel %vm246_vm5, %v4033_v52, %v4034_v2  ;;  %v4038_v37 = vsel %vm246_vm5, %v4034_v2, %v4031_v3  ;;  %v4023_v26 = vsel %vm213_vm3, %v4021_v44, %v4022_v30  ;;  %v9676_v3 = vld [vmem:[%s12987_s10] sm:$0xff]  ;;  %v9677_v52 = vld [vmem:[%s12988_s11 + $0x70] sm:$0xff]  ;;  %v9678_v44 = vld [vmem:[%s12988_s11 + $0x68] sm:$0xff] }
0x18a7   :  { %8919 = vmatprep.mubr.bf16.mxu0 %v4045_v43  ;;  %v4027_v56 = vmul.f32 %v4026_v6, %v10148_v42  ;;  %v4041_v32 = vmul.f32 %v4035_v24, %v10205_v14  ;;  %v4042_v57 = vmul.f32 %v4038_v37, %v10201_v12  ;;  %v4030_v38 = vmul.f32 %v4023_v26, %v10155_v46  ;;  %v9685_v30 = vld [vmem:[%s12988_s11 + $0x30] sm:$0xff]  ;;  %v9686_v2 = vld [vmem:[%s12988_s11 + $0x28] sm:$0xff]  ;;  %v9687_v43 = vld [vmem:[%s12988_s11 + $0x20] sm:$0xff] }
0x18a8   :  { %v9690_v6 = vld [vmem:[%s12988_s11 + $0x8] sm:$0xff]  ;;  %v9691_v24 = vld [vmem:[%s12988_s11] sm:$0xff] }
0x18a9   :  { %v4043_v48 = vpack.c.bf16 %v4028_v39, %v4027_v56  ;;  %v4048_v19 = vpack.c.bf16 %v4042_v57, %v4041_v32  ;;  %v4046_v36 = vpack.c.bf16 %v4030_v38, %v4029_v7  ;;  %v9688_v39 = vld [vmem:[%s12988_s11 + $0x18] sm:$0xff]  ;;  %v9689_v7 = vld [vmem:[%s12988_s11 + $0x10] sm:$0xff] }
0x18ab   :  { %4082 = vmatmul.mubr.bf16.vlgmr.msra.gmra.mxu1 %v4043_v48  ;;  %8920 = vmatmul.mubr.bf16.vlgmr.msra.gmra.mxu0 %v4048_v19  ;;  %v9692_v48 = vld [vmem:[%s12986_s9] ss:$0 sm:$0xff] }
0x18ac   :  { %7560 = vmatprep.mubr.msk.bf16.mxu1 %vm11784_vm4, %v9897_v17  ;;  %8931 = vmatprep.mubr.msk.f32.mxu0 %vm129_vm0, %v9676_v3 }
0x18ad   :  { %8935 = vmatpush3.msra.mxu1 %v11742_v10  ;;  %v9680_v10 = vld [vmem:[%s12988_s11 + $0x58] sm:$0xff] }
0x18ae   :  { %8936 = vmatprep.subr.mxu1 %v9677_v52 }
0x18af   :  { %8937 = vmatpush3.msra.mxu1 %v9677_v52 }
0x18b0   :  { %8938 = vmatprep.subr.mxu1 %v9678_v44 }
0x18b1   :  { %8939 = vmatpush3.msra.mxu1 %v9678_v44 }
0x18b2   :  { %8940 = vmatprep.subr.mxu1 %v9679_v51 }
0x18b3   :  { %4090 = vmatmul.mubr.bf16.gmra.mxu1 %v4046_v36 }
0x18b4   :  { %8941 = vmatpush3.msra.mxu1 %v9679_v51 }
0x18b5   :  { %8942 = vmatprep.subr.mxu1 %v9680_v10 }
0x18b6   :  { %8943 = vmatpush3.msra.mxu1 %v9680_v10 }
0x18b7   :  { %8944 = vmatprep.subr.mxu1 %v9681_v20 }
0x18b8   :  { %8945 = vmatpush3.msra.mxu1 %v9681_v20 }
0x18b9   :  { %8946 = vmatprep.subr.mxu1 %v9682_v9 }
0x18ba   :  { %8947 = vmatpush3.msra.mxu1 %v9682_v9 }
0x18bb   :  { %8948 = vmatprep.subr.mxu1 %v9683_v13 }
0x18bc   :  { %8949 = vmatpush3.msra.mxu1 %v9683_v13 }
0x18bd   :  { %8950 = vmatprep.subr.mxu1 %v9684_v25 }
0x18be   :  { %8951 = vmatpush3.msra.mxu1 %v9684_v25 }
0x18bf   :  { %8952 = vmatprep.subr.mxu1 %v9685_v30 }
0x18c0   :  { %8953 = vmatpush3.msra.mxu1 %v9685_v30 }
0x18c1   :  { %8954 = vmatprep.subr.mxu1 %v9686_v2 }
0x18c2   :  { %8955 = vmatpush3.msra.mxu1 %v9686_v2 }
0x18c3   :  { %8956 = vmatprep.subr.mxu1 %v9687_v43 }
0x18c4   :  { %8957 = vmatpush3.msra.mxu1 %v9687_v43 }
0x18c5   :  { %8958 = vmatprep.subr.mxu1 %v9688_v39 }
0x18c6   :  { %8959 = vmatpush3.msra.mxu1 %v9688_v39 }
0x18c7   :  { %8960 = vmatprep.subr.mxu1 %v9689_v7 }
0x18c8   :  { %8961 = vmatpush3.msra.mxu1 %v9689_v7 }
0x18c9   :  { %8962 = vmatprep.subr.mxu1 %v9690_v6 }
0x18ca   :  { %8963 = vmatpush3.msra.mxu1 %v9690_v6 }
0x18cb   :  { %8964 = vmatprep.subr.mxu1 %v9691_v24 }
0x18cc   :  { %8965 = vmatpush3.msra.mxu1 %v9691_v24 }
0x18cd   :  { %8988 = vmatprep.subr.bf16.mxu1 %v9896_v60 }
0x196b   :  { %v8061_v37 = vpop.f32.mrf.mxu1  ;;  %v8921_v26 = vpop.f32.mrf.mxu0 }
0x196d   :  { %v8062_v56 = vpop.f32.mrf.mxu1  ;;  %v4132_v32 = vpop.f32.mrf.mxu0 }
0x196e   :  { %v8063_v57 = vadd.f32 %v8062_v56, %v8061_v37 }
0x196f   :  { %v8064_v38 = vpop.f32.mrf.mxu1  ;;  %v8922_v36 = vpop.f32.mrf.mxu0 }
0x1970   :  { %v4084_v19 = vadd.f32 %v9692_v48, %v8063_v57 }
0x1971   :  { %v8065_v3 = vpop.f32.mrf.mxu1  ;;  %v4135_v9 = vpop.f32.mrf.mxu0 }
0x1972   :  { %v4133_v52 = vadd.f32 %v4132_v32, %v4084_v19  ;;  %v8066_v44 = vadd.f32 %v8065_v3, %v8064_v38 }
0x1973   :  { %v8067_v51 = vpop.f32.mrf.mxu1 }
0x1974   :  { %v4147_v10 = vsub.f32 %v4133_v52, %v11100_v15  ;;  %v4087_v20 = vadd.f32 %v9692_v48, %v8066_v44 }
0x1975   :  { %v8068_v13 = vpop.f32.mrf.mxu1 }
0x1976   :  { %v4151_v25 = vmul.f32 %v4147_v10, %v10366_v62  ;;  %v4136_v30 = vadd.f32 %v4135_v9, %v4087_v20  ;;  %v8069_v2 = vadd.f32 %v8068_v13, %v8067_v51 }
0x1977   :  { %v8070_v43 = vpop.f32.mrf.mxu1 }
0x1978   :  { %v4155_v39 = vadd.f32 %v4151_v25, %v11100_v15  ;;  %v4148_v7 = vsub.f32 %v4136_v30, %v11107_v50  ;;  %v4092_v6 = vadd.f32 %v9692_v48, %v8069_v2 }
0x1979   :  { %v8071_v24 = vpop.f32.mrf.mxu1 }
0x197a   :  { %vm4159_vm11 = vcmp.ge.f32.partialorder %v4155_v39, 1.0  ;;  %v4152_v37 = vmul.f32 %v4148_v7, %v10366_v62  ;;  %v4141_v56 = vadd.f32 %v8921_v26, %v4092_v6  ;;  %v8072_v32 = vadd.f32 %v8071_v24, %v8070_v43 }
0x197b   :  { %v4163_v57 = vsel %vm4159_vm11, 1.0, %v9896_v60  ;;  %v11867_v38 = vsel %vm4159_vm11, 0.0, %v4155_v39 }
0x197c   :  { %v4156_v19 = vadd.f32 %v4152_v37, %v11107_v50  ;;  %v4149_v3 = vsub.f32 %v4141_v56, %v11114_v11  ;;  %v4095_v52 = vadd.f32 %v9692_v48, %v8072_v32  ;;  %v4171_v15 = vadd.f32 %v4163_v57, %v11615_v35 }
0x197e   :  { %vm4160_vm12 = vcmp.ge.f32.partialorder %v4156_v19, 1.0  ;;  %v4153_v44 = vmul.f32 %v4149_v3, %v10366_v62  ;;  %v4144_v51 = vadd.f32 %v8922_v36, %v4095_v52  ;;  %v4175_v48 = vrot.slane %v4171_v15, 1 }
0x197f   :  { %v4164_v10 = vsel %vm4160_vm12, 1.0, %v9896_v60  ;;  %v11874_v20 = vsel %vm4160_vm12, 0.0, %v4156_v19 }
0x1980   :  { %v4157_v26 = vadd.f32 %v4153_v44, %v11114_v11  ;;  %v4150_v9 = vsub.f32 %v4144_v51, %v11121_v40  ;;  %v4172_v13 = vadd.f32 %v4164_v10, %v11635_v16 }
0x1982   :  { %v4154_v50 = vmul.f32 %v4150_v9, %v10366_v62  ;;  %vm4161_vm10 = vcmp.ge.f32.partialorder %v4157_v26, 1.0  ;;  %v4176_v25 = vrot.slane %v4172_v13, 1  ;;  %v9694_v9 = vld [vmem:[%s12990_s13] sm:$0xff] }
0x1983   :  { %v4165_v35 = vsel %vm4161_vm10, 1.0, %v9896_v60  ;;  %v11881_v30 = vsel %vm4161_vm10, 0.0, %v4157_v26  ;;  %v9693_v26 = vld [vmem:[%s12987_s10 + $0x8] sm:$0xff] }
0x1984   :  { %v4158_v36 = vadd.f32 %v4154_v50, %v11121_v40  ;;  %v4173_v2 = vadd.f32 %v4165_v35, %v11608_v28  ;;  %v4181_v11 = vsel %vm246_vm5, %v4175_v48, %v4176_v25  ;;  %v9697_v35 = vld [vmem:[%s12994_s17 + $0x28] sm:$0xff]  }
0x1985   :  { %v4183_v43 = vmax.f32 %v4171_v15, %v4181_v11 }
0x1986   :  { %vm4162_vm14 = vcmp.ge.f32.partialorder %v4158_v36, 1.0  ;;  %v4177_v39 = vrot.slane %v4173_v2, 1 }
0x1987   :  { %v4166_v16 = vsel %vm4162_vm14, 1.0, %v9896_v60  ;;  %v11888_v7 = vsel %vm4162_vm14, 0.0, %v4158_v36  ;;  %v9698_v36 = vld [vmem:[%s12994_s17 + $0x20] sm:$0xff]  }
0x1988   :  { %v4174_v6 = vadd.f32 %v4166_v16, %v11622_v59  ;;  %v4180_v24 = vsel %vm246_vm5, %v4176_v25, %v4177_v39  ;;  %v9696_v25 = vld [vmem:[%s12994_s17 + $0x30] sm:$0xff]   ;;  %v9700_v16 = vld [vmem:[%s12994_s17 + $0x18] sm:$0xff]  }
0x1989   :  { %v4184_v37 = vmax.f32 %v4172_v13, %v4180_v24  ;;  %v9702_v24 = vld [vmem:[%s12994_s17 + $0x8] sm:$0xff]  }
0x198a   :  { %v4178_v56 = vrot.slane %v4174_v6, 1 }
0x198c   :  { %v4179_v40 = vsel %vm246_vm5, %v4177_v39, %v4178_v56  ;;  %v4182_v28 = vsel %vm246_vm5, %v4178_v56, %v4175_v48  ;;  %v9695_v48 = vld [vmem:[%s12994_s17 + $0x38] sm:$0xff]   ;;  %v11939_v39 = vld [vmem:[%s12990_s13 + $0x8] sm:$0xff] }
0x198d   :  { %v4185_v32 = vmax.f32 %v4173_v2, %v4179_v40  ;;  %v4186_v57 = vmax.f32 %v4174_v6, %v4182_v28  ;;  %v9701_v6 = vld [vmem:[%s12994_s17 + $0x10] sm:$0xff]  }
0x198f   :  { %4191 = vrot.lane.b32.xlu1 %v4185_v32, %s13036_s8  ;;  %4193 = vrot.lane.b32.xlu0 %v4186_v57, %s13036_s8 }
0x1993   :  { %4189 = vrot.lane.b32.xlu0 %v4184_v37, %s13036_s8  ;;  %4187 = vrot.lane.b32.xlu1 %v4183_v43, %s13036_s8 }
0x1a01   :  { %v4192_v59 = vpop.permute.xlu1 %4191  ;;  %v4194_v19 = vpop.permute.xlu0 %4193 }
0x1a02   :  { %v4198_v3 = vmax.f32 %v4186_v57, %v4194_v19  ;;  %v4197_v52 = vmax.f32 %v4185_v32, %v4192_v59  ;;  %v11969_v19 = vld [vmem:[%s12989_s12] sm:$0xff] }
0x1a04   :  { %8923 = vmatprep.subr.mxu0 %v4198_v3 }
0x1a05   :  { %8924 = vmatpush3.msra.mxu0 %v4198_v3  ;;  %v4190_v15 = vpop.permute.xlu0 %4189  ;;  %v4188_v44 = vpop.permute.xlu1 %4187 }
0x1a06   :  { %v4196_v51 = vmax.f32 %v4184_v37, %v4190_v15  ;;  %8925 = vmatprep.subr.mxu0 %v4197_v52  ;;  %v4195_v10 = vmax.f32 %v4183_v43, %v4188_v44  ;;  %v9703_v37 = vld [vmem:[%s12994_s17] sm:$0xff]   ;;  %v9706_v15 = vld [vmem:[%s12994_s17 + $0x58] sm:$0xff]   ;;  %v9707_v44 = vld [vmem:[%s12994_s17 + $0x50] sm:$0xff]  }
0x1a07   :  { %8926 = vmatpush3.msra.mxu0 %v4197_v52  ;;  %v11979_v52 = vld [vmem:[%s12989_s12 + $0x8] sm:$0xff] }
0x1a08   :  { %8927 = vmatprep.subr.mxu0 %v4196_v51 }
0x1a09   :  { %8928 = vmatpush3.msra.mxu0 %v4196_v51  ;;  %v9708_v51 = vld [vmem:[%s12994_s17 + $0x48] sm:$0xff]  }
0x1a0a   :  { %8929 = vmatprep.subr.mxu0 %v4195_v10 }
0x1a0b   :  { %8930 = vmatpush3.msra.mxu0 %v4195_v10  ;;  %v9709_v10 = vld [vmem:[%s12994_s17 + $0x40] sm:$0xff]  }
0x1a0c   :  { %8932 = vmatmul.mubr.msk.f32.vlgmr.msra.gmra.mxu0 %vm129_vm0, %v9693_v26 }
0x1a0d   :  { %8973 = vmatprep.mubr.msk.f32.mxu0 %vm1163_vm6, %v9694_v9 }
0x1acc   :  { %v8933_v13 = vpop.f32.mrf.mxu0 }
0x1ace   :  { %v4265_v50 = vpop.f32.mrf.mxu0 }
0x1acf   :  { %8966 = vmatprep.mubr.f32.mxu1 %v4265_v50 }
0x1ad0   :  { %8967 = vmatmul.mubr.f32.vlgmr.msra.gmra.mxu1 %v8933_v13 }
0x1ad1   :  { %8989 = vmatpush3.bf16.msra.mxu1 %v9695_v48  ;;  %8996 = vmatprep.mubr.msk.bf16.mxu1 %vm9899_vm7, %v9896_v60 }
0x1ad2   :  { %8990 = vmatprep.subr.bf16.mxu1 %v9896_v60 }
0x1ad5   :  { %8991 = vmatpush3.bf16.msra.mxu1 %v9696_v25 }
0x1ad6   :  { %8992 = vmatprep.subr.bf16.mxu1 %v9896_v60 }
0x1ad9   :  { %8993 = vmatpush3.bf16.msra.mxu1 %v9697_v35 }
0x1ada   :  { %8994 = vmatprep.subr.bf16.mxu1 %v9896_v60 }
0x1add   :  { %8995 = vmatpush3.bf16.msra.mxu1 %v9698_v36  ;;  %v9710_v36 = vld [vmem:[%s12996_s19 + $0x38] sm:$0xff]  }
0x1b90   :  { %v11926_v2 = vpop.f32.mrf.mxu1 }
0x1b91   :  { %8969 = vmatprep.subr.mxu0 %v11926_v2 }
0x1b92   :  { %v11929_v11 = vpop.f32.mrf.mxu1  ;;  %8970 = vmatpush3.msra.mxu0 %v11926_v2 }
0x1b93   :  { %v4349_v43 = vpack.c.bf16 %v11926_v2, %v11929_v11  ;;  %8971 = vmatprep.subr.mxu0 %v11929_v11 }
0x1b94   :  { %8972 = vmatpush3.msra.mxu0 %v11929_v11 }
0x1b95   :  { %8974 = vmatmul.mubr.msk.f32.vlgmr.msra.gmra.mxu0 %vm1163_vm6, %v11939_v39  ;;  %8976 = vmatprep.subr.bf16.mxu0 %v9896_v60 }
0x1b96   :  { %8997 = vmatmul.mubr.msk.bf16.vlgmr.msra.gmra.mxu1 %vm1278_vm8, %v4349_v43  ;;  %8977 = vmatpush3.bf16.msra.mxu0 %v9700_v16  ;;  %v9711_v43 = vld [vmem:[%s12996_s19 + $0x30] sm:$0xff]   ;;  %v9712_v16 = vld [vmem:[%s12996_s19 + $0x28] sm:$0xff]  }
0x1b97   :  { %8978 = vmatprep.subr.bf16.mxu0 %v9896_v60  ;;  %8984 = vmatprep.mubr.msk.bf16.mxu0 %vm9899_vm7, %v9896_v60 }
0x1b98   :  { %9023 = vmatprep.mubr.msk.f32.mxu1 %vm1163_vm6, %v9694_v9 }
0x1b9a   :  { %8979 = vmatpush3.bf16.msra.mxu0 %v9701_v6  ;;  %v9713_v6 = vld [vmem:[%s12996_s19 + $0x20] sm:$0xff]  }
0x1b9b   :  { %8980 = vmatprep.subr.bf16.mxu0 %v9896_v60 }
0x1b9e   :  { %8981 = vmatpush3.bf16.msra.mxu0 %v9702_v24 }
0x1b9f   :  { %8982 = vmatprep.subr.bf16.mxu0 %v9896_v60 }
0x1ba2   :  { %8983 = vmatpush3.bf16.msra.mxu0 %v9703_v37 }
0x1ba3   :  { %9000 = vmatprep.subr.mxu0 %v11926_v2 }
0x1c55   :  { %v8975_v56 = vpop.f32.mrf.mxu0 }
0x1c56   :  { %v4507_v40 = vpop.f32.mrf.mxu1 }
0x1c57   :  { %v4416_v28 = vpop.f32.mrf.mxu0 }
0x1c58   :  { %v4425_v32 = vpack.c.bf16 %v8975_v56, %v4416_v28  ;;  %v8998_v57 = vpop.f32.mrf.mxu1 }
0x1c59   :  { %v9714_v57 = vld [vmem:[%s12995_s18] ss:$0 sm:$0xff] }
0x1c5a   :  { %v4510_v59 = vpop.f32.mrf.mxu1  ;;  %8985 = vmatmul.mubr.msk.bf16.vlgmr.msra.gmra.mxu0 %vm1278_vm8, %v4425_v32 }
0x1c5b   :  { %9001 = vmatpush3.msra.mxu0 %v11926_v2  ;;  %9004 = vmatprep.mubr.msk.f32.mxu0 %vm1163_vm6, %v11969_v19 }
0x1c5c   :  { %v8999_v3 = vpop.f32.mrf.mxu1  ;;  %9002 = vmatprep.subr.mxu0 %v11929_v11 }
0x1c5d   :  { %9003 = vmatpush3.msra.mxu0 %v11929_v11 }
0x1c5e   :  { %9007 = vmatprep.subr.bf16.mxu0 %v9896_v60 }
0x1c62   :  { %9005 = vmatmul.mubr.msk.f32.vlgmr.msra.gmra.mxu0 %vm1163_vm6, %v11979_v52 }
0x1c63   :  { %9008 = vmatpush3.bf16.msra.mxu0 %v9706_v15  ;;  %9015 = vmatprep.mubr.msk.bf16.mxu0 %vm9899_vm7, %v9896_v60  ;;  %v3100_v15 = vsel %vm3096_vm9, 0.0, %v11263_v63 }
0x1c64   :  { %9009 = vmatprep.subr.bf16.mxu0 %v9896_v60 }
0x1c67   :  { %9010 = vmatpush3.bf16.msra.mxu0 %v9707_v44 }
0x1c68   :  { %9011 = vmatprep.subr.bf16.mxu0 %v9896_v60 }
0x1c6b   :  { %9012 = vmatpush3.bf16.msra.mxu0 %v9708_v51 }
0x1c6c   :  { %9013 = vmatprep.subr.bf16.mxu0 %v9896_v60 }
0x1c6f   :  { %9014 = vmatpush3.bf16.msra.mxu0 %v9709_v10 }
0x1c70   :  { %9038 = vmatprep.subr.bf16.mxu0 %v9896_v60 }
0x1d1a   :  { %v4463_v26 = vpop.f32.mrf.mxu0 }
0x1d1b   :  { %v4508_v24 = vadd.f32 %v4507_v40, %v4463_v26 }
0x1d1c   :  { %v8986_v9 = vpop.f32.mrf.mxu0 }
0x1d1e   :  { %v4466_v13 = vpop.f32.mrf.mxu0 }
0x1d1f   :  { %v4511_v32 = vadd.f32 %v4510_v59, %v4466_v13  ;;  %v3101_v59 = vsel %vm3097_vm13, 0.0, %v11266_v22 }
0x1d20   :  { %v8987_v50 = vpop.f32.mrf.mxu0 }
0x1d22   :  { %v9006_v48 = vpop.f32.mrf.mxu0 }
0x1d24   :  { %v4580_v25 = vpop.f32.mrf.mxu0 }
0x1d25   :  { %v4589_v35 = vpack.c.bf16 %v9006_v48, %v4580_v25 }
0x1d27   :  { %9016 = vmatmul.mubr.msk.bf16.vlgmr.msra.gmra.mxu0 %vm1278_vm8, %v4589_v35 }
0x1d28   :  { %9039 = vmatpush3.bf16.msra.mxu0 %v9710_v36  ;;  %9046 = vmatprep.mubr.msk.bf16.mxu0 %vm9899_vm7, %v9896_v60  ;;  %v9715_v36 = vld [vmem:[%s12996_s19 + $0x18] sm:$0xff]  }
0x1d29   :  { %9040 = vmatprep.subr.bf16.mxu0 %v9896_v60 }
0x1d2c   :  { %9041 = vmatpush3.bf16.msra.mxu0 %v9711_v43  ;;  %v9716_v43 = vld [vmem:[%s12996_s19 + $0x58] sm:$0xff]  }
0x1d2d   :  { %9042 = vmatprep.subr.bf16.mxu0 %v9896_v60 }
0x1d30   :  { %9043 = vmatpush3.bf16.msra.mxu0 %v9712_v16  ;;  %v9718_v16 = vld [vmem:[%s12996_s19 + $0x50] sm:$0xff]  }
0x1d31   :  { %9044 = vmatprep.subr.bf16.mxu0 %v9896_v60 }
0x1d34   :  { %9045 = vmatpush3.bf16.msra.mxu0 %v9713_v6  ;;  %v9719_v6 = vld [vmem:[%s12996_s19 + $0x8] sm:$0xff]  }
0x1d35   :  { %9057 = vmatprep.subr.bf16.mxu0 %v9896_v60 }
0x1de7   :  { %v4627_v37 = vpop.f32.mrf.mxu0 }
0x1de8   :  { %v4634_v56 = vadd.f32 %v4627_v37, %v4508_v24  ;;  %v9720_v24 = vld [vmem:[%s12996_s19 + $0x48] sm:$0xff]   ;;  %v9721_v37 = vld [vmem:[%s12996_s19] sm:$0xff]  }
0x1de9   :  { %v9017_v28 = vpop.f32.mrf.mxu0 }
0x1dea   :  { %v4636_v3 = vadd.f32 %v9714_v57, %v4634_v56  ;;  %v9722_v56 = vld [vmem:[%s12996_s19 + $0x40] sm:$0xff]  }
0x1deb   :  { %v4630_v44 = vpop.f32.mrf.mxu0 }
0x1dec   :  { %v4638_v51 = vsub.f32 %v4636_v3, %v3100_v15  ;;  %v4635_v10 = vadd.f32 %v4630_v44, %v4511_v32 }
0x1ded   :  { %v9018_v9 = vpop.f32.mrf.mxu0 }
0x1dee   :  { %v4640_v50 = vmul.f32 %v4638_v51, %v10589_v8  ;;  %v4637_v40 = vadd.f32 %v9714_v57, %v4635_v10 }
0x1df0   :  { %v12030_v26 = vadd.f32 %v4640_v50, %v3100_v15  ;;  %v4639_v13 = vsub.f32 %v4637_v40, %v3101_v59 }
0x1df2   :  { %v4641_v48 = vmul.f32 %v4639_v13, %v10589_v8  ;;  %vm4644_vm9 = vcmp.ge.f32.partialorder %v12030_v26, 1.0 }
0x1df3   :  { %v4646_v63 = vsel %vm4644_vm9, 1.0, %v9896_v60 }
0x1df4   :  { %v12033_v25 = vadd.f32 %v4641_v48, %v3101_v59 }
0x1df6   :  { %vm4645_vm15 = vcmp.ge.f32.partialorder %v12033_v25, 1.0 }
0x1df7   :  { %9019 = vmatprep.subr.msk.mxu1 %vm4645_vm15, %v9900_v29  ;;  %v4647_v22 = vsel %vm4645_vm15, 1.0, %v9896_v60 }
0x1df8   :  { %9020 = vmatpush3.msk.msra.mxu1 %vm4645_vm15, %v9900_v29  ;;  %v4650_v35 = vpack.c.bf16 %v4647_v22, %v4646_v63 }
0x1df9   :  { %9021 = vmatprep.subr.msk.mxu1 %vm4644_vm9, %v9900_v29 }
0x1dfa   :  { %9022 = vmatpush3.msk.msra.mxu1 %vm4644_vm9, %v9900_v29  ;;  %9047 = vmatmul.mubr.msk.bf16.vlgmr.msra.gmra.mxu0 %vm1278_vm8, %v4650_v35 }
0x1dfb   :  { %9024 = vmatmul.mubr.msk.f32.vlgmr.msra.gmra.mxu1 %vm1163_vm6, %v11939_v39  ;;  %9026 = vmatprep.subr.bf16.mxu1 %v9896_v60  ;;  %v9717_v39 = vld [vmem:[%s12996_s19 + $0x10] sm:$0xff]  }
0x1dfc   :  { %9027 = vmatpush3.bf16.msra.mxu1 %v9715_v36  ;;  %9034 = vmatprep.mubr.msk.bf16.mxu1 %vm9899_vm7, %v9896_v60 }
0x1dfd   :  { %9028 = vmatprep.subr.bf16.mxu1 %v9896_v60  ;;  %9058 = vmatpush3.bf16.msra.mxu0 %v9716_v43 }
0x1dfe   :  { %9059 = vmatprep.subr.bf16.mxu0 %v9896_v60  ;;  %9065 = vmatprep.mubr.msk.bf16.mxu0 %vm9899_vm7, %v9896_v60 }
0x1e00   :  { %9029 = vmatpush3.bf16.msra.mxu1 %v9717_v39 }
0x1e01   :  { %9030 = vmatprep.subr.bf16.mxu1 %v9896_v60  ;;  %9060 = vmatpush3.bf16.msra.mxu0 %v9718_v16 }
0x1e02   :  { %9061 = vmatprep.subr.bf16.mxu0 %v9896_v60 }
0x1e04   :  { %9031 = vmatpush3.bf16.msra.mxu1 %v9719_v6 }
0x1e05   :  { %9032 = vmatprep.subr.bf16.mxu1 %v9896_v60  ;;  %9062 = vmatpush3.bf16.msra.mxu0 %v9720_v24 }
0x1e06   :  { %9063 = vmatprep.subr.bf16.mxu0 %v9896_v60 }
0x1e08   :  { %9033 = vmatpush3.bf16.msra.mxu1 %v9721_v37 }
0x1e09   :  { %9050 = vmatprep.subr.msk.mxu1 %vm4645_vm15, %v9900_v29  ;;  %9064 = vmatpush3.bf16.msra.mxu0 %v9722_v56 }
0x1e0a   :  { %9095 = vmatprep.subr.mxu0 %v9896_v60 }
0x1eba   :  { %v4808_v28 = vpop.f32.mrf.mxu0 }
0x1ebb   :  { %v9025_v32 = vpop.f32.mrf.mxu1 }
0x1ebc   :  { %v9048_v57 = vpop.f32.mrf.mxu0 }
0x1ebd   :  { %v4717_v3 = vpop.f32.mrf.mxu1 }
0x1ebe   :  { %v4726_v15 = vpack.c.bf16 %v9025_v32, %v4717_v3  ;;  %v4811_v44 = vpop.f32.mrf.mxu0 }
0x1ec0   :  { %9035 = vmatmul.mubr.msk.bf16.vlgmr.msra.gmra.mxu1 %vm1278_vm8, %v4726_v15  ;;  %v9049_v51 = vpop.f32.mrf.mxu0 }
0x1ec1   :  { %9051 = vmatpush3.msk.msra.mxu1 %vm4645_vm15, %v9900_v29  ;;  %9054 = vmatprep.mubr.msk.f32.mxu1 %vm1163_vm6, %v11969_v19 }
0x1ec2   :  { %9052 = vmatprep.subr.msk.mxu1 %vm4644_vm9, %v9900_v29 }
0x1ec3   :  { %9053 = vmatpush3.msk.msra.mxu1 %vm4644_vm9, %v9900_v29 }
0x1ec8   :  { %9055 = vmatmul.mubr.msk.f32.vlgmr.msra.gmra.mxu1 %vm1163_vm6, %v11979_v52 }
0x1ec9   :  { %9073 = vmatprep.mubr.msk.f32.mxu1 %vm1163_vm6, %v11969_v19  ;;  %v9723_v19 = vld [vmem:[%s12997_s20] ss:$0 sm:$0xff] }
0x1f80   :  { %v4764_v10 = vpop.f32.mrf.mxu1 }
0x1f81   :  { %v4809_v63 = vadd.f32 %v4808_v28, %v4764_v10 }
0x1f82   :  { %v9036_v9 = vpop.f32.mrf.mxu1 }
0x1f84   :  { %v4767_v50 = vpop.f32.mrf.mxu1 }
0x1f85   :  { %v4812_v43 = vadd.f32 %v4811_v44, %v4767_v50 }
0x1f86   :  { %v9037_v40 = vpop.f32.mrf.mxu1 }
0x1f87   :  { %v9725_v40 = vld [vmem:[%s12991_s14 + $0x30] sm:$0xff] }
0x1f88   :  { %v9056_v59 = vpop.f32.mrf.mxu1 }
0x1f8a   :  { %v4881_v13 = vpop.f32.mrf.mxu1 }
0x1f8b   :  { %v4890_v48 = vpack.c.bf16 %v9056_v59, %v4881_v13  ;;  %v9729_v59 = vld [vmem:[%s12991_s14 + $0x10] sm:$0xff]  ;;  %v9730_v13 = vld [vmem:[%s12991_s14 + $0x8] sm:$0xff] }
0x1f8d   :  { %9066 = vmatmul.mubr.msk.bf16.vlgmr.msra.gmra.mxu0 %vm1278_vm8, %v4890_v48  ;;  %v9731_v48 = vld [vmem:[%s12991_s14] sm:$0xff] }
0x1f8e   :  { %9099 = vmatprep.mubr.msk.f32.mxu0 %vm9899_vm7, %v9896_v60 }
0x204d   :  { %v4928_v22 = vpop.f32.mrf.mxu0 }
0x204e   :  { %v4935_v35 = vadd.f32 %v4928_v22, %v4809_v63  ;;  %v9732_v63 = vld [vmem:[%s13024_s7 + $0x8] sm:$0xff]  }
0x204f   :  { %v9067_v36 = vpop.f32.mrf.mxu0 }
0x2050   :  { %v4937_v39 = vadd.f32 %v9723_v19, %v4935_v35  ;;  %v7587_v35 = vld [vmem:[%s13025_s4 + $0x60] sm:$0xff]  ;;  %v7588_v36 = vld [vmem:[%s13025_s4 + $0x68] sm:$0xff] }
0x2051   :  { %v4931_v16 = vpop.f32.mrf.mxu0 }
0x2052   :  { %v4939_v6 = vsub.f32 %v4937_v39, %v11357_v33  ;;  %v4936_v24 = vadd.f32 %v4931_v16, %v4812_v43  ;;  %v5262_v39 = vpack.c.bf16 %v7588_v36, %v7587_v35 }
0x2053   :  { %v9068_v37 = vpop.f32.mrf.mxu0 }
0x2054   :  { %v4941_v56 = vmul.f32 %v4939_v6, %v10681_v31  ;;  %v4938_v32 = vadd.f32 %v9723_v19, %v4936_v24  ;;  %v7589_v6 = vld [vmem:[%s13025_s4 + $0x70] sm:$0xff]  ;;  %v7590_v24 = vld [vmem:[%s13025_s4 + $0x78] sm:$0xff]  ;;  %v9733_v37 = vld [vmem:[%s13024_s7] sm:$0xff]  }
0x2056   :  { %v4943_v57 = vadd.f32 %v4941_v56, %v11357_v33  ;;  %v4940_v28 = vsub.f32 %v4938_v32, %v11362_v5  ;;  %v5263_v56 = vpack.c.bf16 %v7590_v24, %v7589_v6  ;;  %v9734_v32 = vld [vmem:[%s13027_s28 + $0x78] sm:$0xff]   ;;  %v9754_v24 = vld [vmem:[%s12993_s16 + $0x30] sm:$0xff] }
0x2058   :  { %v4942_v3 = vmul.f32 %v4940_v28, %v10681_v31  ;;  %vm4945_vm13 = vcmp.ge.f32.partialorder %v4943_v57, 1.0  ;;  %v9736_v28 = vld [vmem:[%s13027_s28 + $0x70] sm:$0xff]  }
0x2059   :  { %v12124_v15 = vsel %vm4945_vm13, 0.0, %v4943_v57  ;;  %v4947_v10 = vsel %vm4945_vm13, 1.0, %v9896_v60  ;;  %v9735_v57 = vld [vmem:[%s13027_s28 + $0x38] sm:$0xff]  }
0x205a   :  { %v4944_v44 = vadd.f32 %v4942_v3, %v11362_v5  ;;  %v4951_v33 = vadd.f32 %v4947_v10, %v11929_v11  ;;  %v9724_v5 = vld [vmem:[%s12991_s14 + $0x38] sm:$0xff]  ;;  %v9727_v11 = vld [vmem:[%s12991_s14 + $0x20] sm:$0xff]  ;;  %v9737_v3 = vld [vmem:[%s13027_s28 + $0x30] sm:$0xff]  }
0x205b   :  { %v9740_v10 = vld [vmem:[%s13027_s28 + $0x60] sm:$0xff]  }
0x205c   :  { %vm4946_vm1 = vcmp.ge.f32.partialorder %v4944_v44, 1.0 }
0x205d   :  { %v4948_v51 = vsel %vm4946_vm1, 1.0, %v9896_v60  ;;  %v12129_v9 = vsel %vm4946_vm1, 0.0, %v4944_v44  ;;  %v9738_v44 = vld [vmem:[%s13027_s28 + $0x68] sm:$0xff]  }
0x205e   :  { %v4952_v50 = vadd.f32 %v11926_v2, %v4948_v51  ;;  %v9726_v2 = vld [vmem:[%s12991_s14 + $0x28] sm:$0xff] }
0x205f   :  { %v9739_v51 = vld [vmem:[%s13027_s28 + $0x28] sm:$0xff]  }
0x2060   :  { %9069 = vmatprep.subr.mxu1 %v4952_v50 }
0x2061   :  { %9070 = vmatpush3.msra.mxu1 %v4952_v50 }
0x2062   :  { %9071 = vmatprep.subr.mxu1 %v4951_v33 }
0x2063   :  { %9072 = vmatpush3.msra.mxu1 %v4951_v33 }
0x2064   :  { %9074 = vmatmul.mubr.msk.f32.vlgmr.msra.gmra.mxu1 %vm1163_vm6, %v11979_v52  ;;  %9076 = vmatprep.subr.mxu1 %v9724_v5  ;;  %v9728_v52 = vld [vmem:[%s12991_s14 + $0x18] sm:$0xff] }
0x2065   :  { %9077 = vmatpush3.msra.mxu1 %v9724_v5  ;;  %v9743_v5 = vld [vmem:[%s13027_s28 + $0x18] sm:$0xff]  }
0x2066   :  { %9078 = vmatprep.subr.mxu1 %v9725_v40 }
0x2067   :  { %9079 = vmatpush3.msra.mxu1 %v9725_v40  ;;  %v9744_v40 = vld [vmem:[%s13027_s28 + $0x50] sm:$0xff]  }
0x2068   :  { %9080 = vmatprep.subr.mxu1 %v9726_v2 }
0x2069   :  { %9081 = vmatpush3.msra.mxu1 %v9726_v2  ;;  %v9745_v2 = vld [vmem:[%s13027_s28 + $0x10] sm:$0xff]  }
0x206a   :  { %9082 = vmatprep.subr.mxu1 %v9727_v11 }
0x206b   :  { %9083 = vmatpush3.msra.mxu1 %v9727_v11  ;;  %v9746_v11 = vld [vmem:[%s13027_s28 + $0x48] sm:$0xff]  }
0x206c   :  { %9084 = vmatprep.subr.mxu1 %v9728_v52 }
0x206d   :  { %9085 = vmatpush3.msra.mxu1 %v9728_v52  ;;  %v9747_v52 = vld [vmem:[%s13027_s28 + $0x8] sm:$0xff]  }
0x206e   :  { %9086 = vmatprep.subr.mxu1 %v9729_v59 }
0x206f   :  { %9087 = vmatpush3.msra.mxu1 %v9729_v59  ;;  %v9748_v59 = vld [vmem:[%s13027_s28 + $0x40] sm:$0xff]  }
0x2070   :  { %9088 = vmatprep.subr.mxu1 %v9730_v13 }
0x2071   :  { %9089 = vmatpush3.msra.mxu1 %v9730_v13  ;;  %v9749_v13 = vld [vmem:[%s13027_s28] sm:$0xff]  }
0x2072   :  { %9090 = vmatprep.subr.mxu1 %v9731_v48 }
0x2073   :  { %9091 = vmatpush3.msra.mxu1 %v9731_v48  ;;  %v9750_v48 = vld [vmem:[%s13030_s29 + $0x78] sm:$0xff]  }
0x2074   :  { %9121 = vmatprep.subr.bf16.mxu1 %v9732_v63 }
0x2124   :  { %v9075_v22 = vpop.f32.mrf.mxu1 }
0x2125   :  { %v5029_v16 = vmax.f32 %v4952_v50, %v9075_v22  ;;  %v9741_v50 = vld [vmem:[%s13027_s28 + $0x20] sm:$0xff]  }
0x2126   :  { %v5019_v43 = vpop.f32.mrf.mxu1 }
0x2127   :  { %v5028_v19 = vmax.f32 %v4951_v33, %v5019_v43  ;;  %v9742_v33 = vld [vmem:[%s13027_s28 + $0x58] sm:$0xff]   ;;  %v9751_v43 = vld [vmem:[%s12992_s15] sm:$0xff] }
0x2129   :  { %9092 = vmatprep.mubr.msk.f32.mxu1 %vm1278_vm8, %v5028_v19 }
0x212a   :  { %9093 = vmatmul.mubr.msk.f32.vlgmr.msra.gmra.mxu1 %vm1278_vm8, %v5029_v16 }
0x212b   :  { %9122 = vmatpush3.bf16.msra.mxu1 %v9732_v63  ;;  %9125 = vmatprep.mubr.msk.bf16.mxu1 %vm129_vm0, %v5262_v39  ;;  %v9752_v39 = vld [vmem:[%s12993_s16 + $0x38] sm:$0xff] }
0x212c   :  { %9123 = vmatprep.subr.bf16.mxu1 %v9733_v37 }
0x212f   :  { %9124 = vmatpush3.bf16.msra.mxu1 %v9733_v37 }
0x2130   :  { %8183 = vmatprep.subr.bf16.mxu1 %v9734_v32 }
0x2132   :  { %9126 = vmatmul.mubr.msk.bf16.vlgmr.msra.gmra.mxu1 %vm129_vm0, %v5263_v56 }
0x2133   :  { %8184 = vmatpush3.bf16.msra.mxu1 %v9735_v57  ;;  %v9755_v57 = vld [vmem:[%s12993_s16 + $0x28] sm:$0xff] }
0x2134   :  { %8185 = vmatprep.subr.bf16.mxu1 %v9736_v28 }
0x2137   :  { %8186 = vmatpush3.bf16.msra.mxu1 %v9737_v3 }
0x2138   :  { %8187 = vmatprep.subr.bf16.mxu1 %v9738_v44 }
0x213b   :  { %8188 = vmatpush3.bf16.msra.mxu1 %v9739_v51 }
0x213c   :  { %8189 = vmatprep.subr.bf16.mxu1 %v9740_v10  ;;  %v9756_v10 = vld [vmem:[%s12993_s16 + $0x20] sm:$0xff] }
0x213f   :  { %8190 = vmatpush3.bf16.msra.mxu1 %v9741_v50 }
0x2140   :  { %8191 = vmatprep.subr.bf16.mxu1 %v9742_v33 }
0x2143   :  { %8192 = vmatpush3.bf16.msra.mxu1 %v9743_v5 }
0x2144   :  { %8193 = vmatprep.subr.bf16.mxu1 %v9744_v40 }
0x2147   :  { %8194 = vmatpush3.bf16.msra.mxu1 %v9745_v2  ;;  %v9757_v2 = vld [vmem:[%s12993_s16 + $0x18] sm:$0xff] }
0x2148   :  { %8195 = vmatprep.subr.bf16.mxu1 %v9746_v11 }
0x214b   :  { %8196 = vmatpush3.bf16.msra.mxu1 %v9747_v52 }
0x214c   :  { %8197 = vmatprep.subr.bf16.mxu1 %v9748_v59 }
0x214f   :  { %8198 = vmatpush3.bf16.msra.mxu1 %v9749_v13 }
0x2150   :  { %8221 = vmatprep.subr.bf16.mxu1 %v9750_v48  ;;  %v9758_v48 = vld [vmem:[%s12993_s16 + $0x10] sm:$0xff] }
0x21ea   :  { %v9094_v63 = vpop.f32.mrf.mxu1 }
0x21eb   :  { %v5112_v22 = vmax.f32 %v5029_v16, %v9094_v63  ;;  %v9753_v16 = vld [vmem:[%s13029_s27] ss:$0 sm:$0xff] }
0x21ec   :  { %v5102_v35 = vpop.f32.mrf.mxu1 }
0x21ed   :  { %v5111_v36 = vmax.f32 %v5028_v19, %v5102_v35  ;;  %9096 = vmatpush3.msra.mxu0 %v5112_v22 }
0x21ee   :  { %9097 = vmatprep.subr.mxu0 %v9896_v60 }
0x21ef   :  { %9098 = vmatpush3.msra.mxu0 %v5111_v36  ;;  %v9775_v36 = vld [vmem:[%s13030_s29 + $0x40] sm:$0xff]  }
0x21f0   :  { %9100 = vmatmul.mubr.msk.f32.vlgmr.msra.gmra.mxu0 %vm1163_vm6, %v9751_v43  ;;  %9102 = vmatprep.subr.mxu0 %v9896_v60  ;;  %v12303_v43 = vld [vmem:[%s13027_s28 + $0xb8] sm:$0xff]  }
0x21f1   :  { %9103 = vmatpush3.msra.mxu0 %v9752_v39  ;;  %9118 = vmatprep.mubr.msk.f32.mxu0 %vm9899_vm7, %v9896_v60 }
0x21f2   :  { %v9127_v19 = vpop.f32.mrf.mxu1  ;;  %9104 = vmatprep.subr.mxu0 %v9896_v60 }
0x21f3   :  { %v5313_v6 = vadd.f32 %v9753_v16, %v9127_v19  ;;  %9105 = vmatpush3.msra.mxu0 %v9754_v24 }
0x21f4   :  { %v5304_v37 = vpop.f32.mrf.mxu1  ;;  %9106 = vmatprep.subr.mxu0 %v9896_v60 }
0x21f5   :  { %v5321_v56 = vsub.f32 %v5313_v6, %v11604_v53  ;;  %v5305_v32 = vadd.f32 %v9753_v16, %v5304_v37  ;;  %9107 = vmatpush3.msra.mxu0 %v9755_v57 }
0x21f6   :  { %v9128_v28 = vpop.f32.mrf.mxu1  ;;  %9108 = vmatprep.subr.mxu0 %v9896_v60 }
0x21f7   :  { %v5325_v3 = vmul.f32 %v5321_v56, %v10153_v45  ;;  %v5319_v44 = vsub.f32 %v5305_v32, %v11618_v34  ;;  %v5316_v51 = vadd.f32 %v9753_v16, %v9128_v28  ;;  %9109 = vmatpush3.msra.mxu0 %v9756_v10 }
0x21f8   :  { %v5307_v50 = vpop.f32.mrf.mxu1  ;;  %9110 = vmatprep.subr.mxu0 %v9896_v60 }
0x21f9   :  { %v5323_v33 = vmul.f32 %v5319_v44, %v10153_v45  ;;  %v5322_v5 = vsub.f32 %v5316_v51, %v11629_v23  ;;  %v5308_v40 = vadd.f32 %v9753_v16, %v5307_v50  ;;  %9111 = vmatpush3.msra.mxu0 %v9757_v2  ;;  %v5329_v11 = vadd.f32 %v5325_v3, %v11604_v53  ;;  %v9759_v53 = vld [vmem:[%s12993_s16 + $0x8] sm:$0xff]  ;;  %v9762_v51 = vld [vmem:[%s13030_s29 + $0x38] sm:$0xff]   ;;  %v9763_v50 = vld [vmem:[%s13030_s29 + $0x70] sm:$0xff]  }
0x21fa   :  { %9112 = vmatprep.subr.mxu0 %v9896_v60  ;;  %v9765_v2 = vld [vmem:[%s13030_s29 + $0x68] sm:$0xff]  }
0x21fb   :  { %v5327_v52 = vadd.f32 %v5323_v33, %v11618_v34  ;;  %v5326_v59 = vmul.f32 %v5322_v5, %v10153_v45  ;;  %v5320_v13 = vsub.f32 %v5308_v40, %v11639_v61  ;;  %9113 = vmatpush3.msra.mxu0 %v9758_v48  ;;  %vm5333_vm11 = vcmp.ge.f32.partialorder %v5329_v11, 1.0  ;;  %v9764_v5 = vld [vmem:[%s13030_s29 + $0x30] sm:$0xff]   ;;  %v9766_v11 = vld [vmem:[%s13030_s29 + $0x28] sm:$0xff]   ;;  %v9770_v48 = vld [vmem:[%s13030_s29 + $0x18] sm:$0xff]  }
0x21fc   :  { %9114 = vmatprep.subr.mxu0 %v9896_v60  ;;  %v12317_v24 = vsel %vm5333_vm11, 1.0, %v9896_v60 }
0x21fd   :  { %v5330_v63 = vadd.f32 %v5326_v59, %v11629_v23  ;;  %v5324_v22 = vmul.f32 %v5320_v13, %v10153_v45  ;;  %vm5331_vm2 = vcmp.ge.f32.partialorder %v5327_v52, 1.0  ;;  %9115 = vmatpush3.msra.mxu0 %v9759_v53  ;;  %v12290_v45 = vld [vmem:[%s12993_s16] sm:$0xff]  ;;  %v5341_v57 = vrot.slane %v12317_v24, 7  ;;  %v9769_v13 = vld [vmem:[%s13030_s29 + $0x58] sm:$0xff]   ;;  %v9773_v53 = vld [vmem:[%s13030_s29 + $0x48] sm:$0xff]  }
0x21fe   :  { %v12283_v34 = vsel %vm5331_vm2, 1.0, %v9896_v60  ;;  %9116 = vmatprep.subr.mxu0 %v9896_v60  ;;  %v9767_v52 = vld [vmem:[%s13030_s29 + $0x60] sm:$0xff]  }
0x21ff   :  { %vm5334_vm4 = vcmp.ge.f32.partialorder %v5330_v63, 1.0  ;;  %v5328_v35 = vadd.f32 %v5324_v22, %v11639_v61  ;;  %9117 = vmatpush3.msra.mxu0 %v12290_v45  ;;  %v5339_v39 = vrot.slane %v12283_v34, 7  ;;  %v9768_v59 = vld [vmem:[%s13030_s29 + $0x20] sm:$0xff]   ;;  %v9771_v63 = vld [vmem:[%s13030_s29 + $0x50] sm:$0xff]  }
0x2200   :  { %v12294_v23 = vsel %vm5334_vm4, 1.0, %v9896_v60  ;;  %vm12296_vm12 = vmpackc.low %vm5334_vm4, %vm5333_vm11  ;;  %9129 = vmatprep.subr.bf16.mxu0 %v12303_v43  ;;  %v9772_v22 = vld [vmem:[%s13030_s29 + $0x10] sm:$0xff]  }
0x2201   :  { %v5342_v61 = vrot.slane %v12294_v23, 7  ;;  %vm5332_vm10 = vcmp.ge.f32.partialorder %v5328_v35, 1.0  ;;  %v9774_v35 = vld [vmem:[%s13030_s29 + $0x8] sm:$0xff]  }
0x2202   :  { %v12309_v19 = vsel %vm5332_vm10, 1.0, %v9896_v60  ;;  %vm7593_vm14 = vmpackc.low %vm5332_vm10, %vm5331_vm2 }
0x2203   :  { %v5340_v16 = vrot.slane %v12309_v19, 7  ;;  %v5346_v6 = vsel %vm213_vm3, %v5342_v61, %v5339_v39  ;;  %7594 = vmatprep.mubr.msk.bf16.mxu1 %vm7593_vm14, %v9897_v17  ;;  %v5343_v44 = vsel %vm213_vm3, %v5341_v57, %v5342_v61  ;;  %v9776_v61 = vld [vmem:[%s13030_s29] sm:$0xff]  }
0x2204   :  { %v5347_v56 = vmul.f32 %v5346_v6, %v10148_v42  ;;  %v5350_v33 = vmul.f32 %v5343_v44, %v10155_v46  ;;  %v5351_v6 = vrot.slane %v12283_v34, 1 }
0x2205   :  { %v5345_v37 = vsel %vm213_vm3, %v5339_v39, %v5340_v16  ;;  %v5344_v3 = vsel %vm213_vm3, %v5340_v16, %v5341_v57  ;;  %v12381_v39 = vld [vmem:[%s12988_s11 + $0x78] sm:$0xff]  ;;  %v5352_v16 = vrot.slane %v12309_v19, 1 }
0x2206   :  { %v5348_v32 = vmul.f32 %v5345_v37, %v10157_v49  ;;  %v5349_v10 = vmul.f32 %v5344_v3, %v10146_v41  ;;  %v5353_v37 = vrot.slane %v12317_v24, 1 }
0x2208   :  { %v5363_v28 = vpack.c.bf16 %v5348_v32, %v5347_v56  ;;  %v5366_v40 = vpack.c.bf16 %v5350_v33, %v5349_v10  ;;  %v5356_v56 = vsel %vm246_vm5, %v5352_v16, %v5353_v37  ;;  %v5357_v32 = vsel %vm246_vm5, %v5351_v6, %v5352_v16  ;;  %v9778_v10 = vld [vmem:[%s13027_s28 + $0xb0] sm:$0xff]   ;;  %v9780_v33 = vld [vmem:[%s13027_s28 + $0xa0] sm:$0xff]  }
0x2209   :  { %v5359_v57 = vmul.f32 %v5357_v32, %v10173_v0  ;;  %v9790_v16 = vld [vmem:[%s13030_s29 + $0x90] sm:$0xff]  }
0x220a   :  { %5402 = vmatmul.mubr.bf16.vlgmr.msra.gmra.mxu1 %v5363_v28  ;;  %v5360_v28 = vmul.f32 %v5356_v56, %v10163_v58  ;;  %v3778_v56 = vadd.f32 %v11530_v18, %v11589_v47 }
0x220b   :  { %7596 = vmatprep.mubr.msk.bf16.mxu1 %vm12296_vm12, %v9897_v17  ;;  %8222 = vmatpush3.bf16.msra.mxu1 %v9762_v51 }
0x220c   :  { %8223 = vmatprep.subr.bf16.mxu1 %v9763_v50  ;;  %v5365_v44 = vpack.c.bf16 %v5360_v28, %v5359_v57  ;;  %v9779_v50 = vld [vmem:[%s13027_s28 + $0xa8] sm:$0xff]  }
0x220f   :  { %8224 = vmatpush3.bf16.msra.mxu1 %v9764_v5  ;;  %v9782_v5 = vld [vmem:[%s13027_s28 + $0x90] sm:$0xff]  }
0x2210   :  { %8225 = vmatprep.subr.bf16.mxu1 %v9765_v2  ;;  %v9783_v2 = vld [vmem:[%s13027_s28 + $0x88] sm:$0xff]  }
0x2212   :  { %5410 = vmatmul.mubr.bf16.gmra.mxu1 %v5366_v40  ;;  %v5354_v40 = vrot.slane %v12294_v23, 1 }
0x2213   :  { %8226 = vmatpush3.bf16.msra.mxu1 %v9766_v11 }
0x2214   :  { %8227 = vmatprep.subr.bf16.mxu1 %v9767_v52  ;;  %v5358_v11 = vsel %vm246_vm5, %v5354_v40, %v5351_v6  ;;  %v5355_v52 = vsel %vm246_vm5, %v5353_v37, %v5354_v40  ;;  %v9791_v6 = vld [vmem:[%s13030_s29 + $0x88] sm:$0xff]   ;;  %v9792_v37 = vld [vmem:[%s13030_s29 + $0x80] sm:$0xff]  }
0x2217   :  { %8228 = vmatpush3.bf16.msra.mxu1 %v9768_v59  ;;  %v5362_v59 = vmul.f32 %v5358_v11, %v10201_v12 }
0x2218   :  { %8229 = vmatprep.subr.bf16.mxu1 %v9769_v13  ;;  %v5361_v13 = vmul.f32 %v5355_v52, %v10205_v14  ;;  %v9793_v52 = vld [vmem:[%s13031_s2] ss:$0 sm:$0xff] }
0x221b   :  { %8230 = vmatpush3.bf16.msra.mxu1 %v9770_v48  ;;  %v9784_v48 = vld [vmem:[%s13027_s28 + $0x80] sm:$0xff]  }
0x221c   :  { %8231 = vmatprep.subr.bf16.mxu1 %v9771_v63  ;;  %v5368_v63 = vpack.c.bf16 %v5362_v59, %v5361_v13 }
0x221f   :  { %8232 = vmatpush3.bf16.msra.mxu1 %v9772_v22  ;;  %v9785_v22 = vld [vmem:[%s13030_s29 + $0xb8] sm:$0xff]  }
0x2220   :  { %8233 = vmatprep.subr.bf16.mxu1 %v9773_v53  ;;  %v9786_v53 = vld [vmem:[%s13030_s29 + $0xb0] sm:$0xff]  }
0x2223   :  { %8234 = vmatpush3.bf16.msra.mxu1 %v9774_v35  ;;  %v9787_v35 = vld [vmem:[%s13030_s29 + $0xa8] sm:$0xff]  }
0x2224   :  { %8235 = vmatprep.subr.bf16.mxu1 %v9775_v36  ;;  %v9788_v36 = vld [vmem:[%s13030_s29 + $0xa0] sm:$0xff]  }
0x2227   :  { %8236 = vmatpush3.bf16.msra.mxu1 %v9776_v61  ;;  %v9789_v61 = vld [vmem:[%s13030_s29 + $0x98] sm:$0xff]  }
0x2228   :  { %9180 = vmatprep.subr.mxu1 %v12381_v39 }
0x22b0   :  { %v5179_v3 = vpop.f32.mrf.mxu0 }
0x22b1   :  { %9119 = vmatmul.mubr.msk.f32.vlgmr.msra.gmra.mxu0 %vm1278_vm8, %v5179_v3 }
0x22b2   :  { %9130 = vmatpush3.bf16.msra.mxu0 %v12303_v43  ;;  %v9101_v51 = vpop.f32.mrf.mxu0  ;;  %9145 = vmatprep.mubr.bf16.mxu0 %v5365_v44  ;;  %v9781_v43 = vld [vmem:[%s13027_s28 + $0x98] sm:$0xff]   ;;  %s13045_s28 = sld [smem:[#allocation17_spill]] }
0x22b3   :  { %9131 = vmatprep.subr.bf16.mxu0 %v9778_v10 }
0x22b6   :  { %9132 = vmatpush3.bf16.msra.mxu0 %v9778_v10 }
0x22b7   :  { %9133 = vmatprep.subr.bf16.mxu0 %v9779_v50 }
0x22ba   :  { %9134 = vmatpush3.bf16.msra.mxu0 %v9779_v50 }
0x22bb   :  { %9135 = vmatprep.subr.bf16.mxu0 %v9780_v33 }
0x22be   :  { %9136 = vmatpush3.bf16.msra.mxu0 %v9780_v33 }
0x22bf   :  { %9137 = vmatprep.subr.bf16.mxu0 %v9781_v43 }
0x22c2   :  { %9138 = vmatpush3.bf16.msra.mxu0 %v9781_v43 }
0x22c3   :  { %9139 = vmatprep.subr.bf16.mxu0 %v9782_v5 }
0x22c6   :  { %9140 = vmatpush3.bf16.msra.mxu0 %v9782_v5 }
0x22c7   :  { %9141 = vmatprep.subr.bf16.mxu0 %v9783_v2 }
0x22ca   :  { %9142 = vmatpush3.bf16.msra.mxu0 %v9783_v2  ;;  %v8199_v32 = vpop.f32.mrf.mxu1 }
0x22cb   :  { %9143 = vmatprep.subr.bf16.mxu0 %v9784_v48 }
0x22cc   :  { %v8200_v44 = vpop.f32.mrf.mxu1 }
0x22cd   :  { %v8201_v2 = vadd.f32 %v8200_v44, %v8199_v32 }
0x22ce   :  { %9144 = vmatpush3.bf16.msra.mxu0 %v9784_v48  ;;  %v8202_v51 = vpop.f32.mrf.mxu1 }
0x22cf   :  { %9149 = vmatprep.subr.bf16.mxu0 %v9785_v22  ;;  %v5404_v48 = vadd.f32 %v9793_v52, %v8201_v2 }
0x22d0   :  { %v8203_v10 = vpop.f32.mrf.mxu1 }
0x22d1   :  { %9146 = vmatmul.mubr.bf16.vlgmr.msra.gmra.mxu0 %v5368_v63  ;;  %v8204_v59 = vadd.f32 %v8203_v10, %v8202_v51 }
0x22d2   :  { %9150 = vmatpush3.bf16.msra.mxu0 %v9785_v22  ;;  %v8205_v50 = vpop.f32.mrf.mxu1 }
0x22d3   :  { %9151 = vmatprep.subr.bf16.mxu0 %v9786_v53 }
0x22d4   :  { %v8206_v33 = vpop.f32.mrf.mxu1 }
0x22d5   :  { %v8207_v5 = vadd.f32 %v8206_v33, %v8205_v50 }
0x22d6   :  { %9152 = vmatpush3.bf16.msra.mxu0 %v9786_v53  ;;  %v8208_v43 = vpop.f32.mrf.mxu1 }
0x22d7   :  { %9153 = vmatprep.subr.bf16.mxu0 %v9787_v35  ;;  %v5412_v18 = vadd.f32 %v9793_v52, %v8207_v5 }
0x22d8   :  { %v8209_v40 = vpop.f32.mrf.mxu1 }
0x22d9   :  { %v8210_v11 = vadd.f32 %v8209_v40, %v8208_v43 }
0x22da   :  { %9154 = vmatpush3.bf16.msra.mxu0 %v9787_v35 }
0x22db   :  { %9155 = vmatprep.subr.bf16.mxu0 %v9788_v36  ;;  %v5415_v35 = vadd.f32 %v9793_v52, %v8210_v11 }
0x22de   :  { %9156 = vmatpush3.bf16.msra.mxu0 %v9788_v36 }
0x22df   :  { %9157 = vmatprep.subr.bf16.mxu0 %v9789_v61 }
0x22e2   :  { %9158 = vmatpush3.bf16.msra.mxu0 %v9789_v61 }
0x22e3   :  { %9159 = vmatprep.subr.bf16.mxu0 %v9790_v16 }
0x22e6   :  { %9160 = vmatpush3.bf16.msra.mxu0 %v9790_v16 }
0x22e7   :  { %9161 = vmatprep.subr.bf16.mxu0 %v9791_v6 }
0x22ea   :  { %9162 = vmatpush3.bf16.msra.mxu0 %v9791_v6 }
0x22eb   :  { %9163 = vmatprep.subr.bf16.mxu0 %v9792_v37 }
0x22ee   :  { %9164 = vmatpush3.bf16.msra.mxu0 %v9792_v37  ;;  %v5407_v37 = vadd.f32 %v9793_v52, %v8204_v59 }
0x2371   :  { %v5252_v57 = vpop.f32.mrf.mxu0 }
0x2372   :  { %v12449_v28 = vadd.f32 %v5252_v57, %v3778_v56 }
0x2373   :  { %v9120_v3 = vpop.f32.mrf.mxu0 }
0x2391   :  { %v9147_v47 = vpop.f32.mrf.mxu0 }
0x2392   :  { %v5461_v13 = vadd.f32 %v9147_v47, %v5412_v18 }
0x2393   :  { %v5452_v63 = vpop.f32.mrf.mxu0 }
0x2394   :  { %v5469_v22 = vsub.f32 %v5461_v13, %v11773_v4  ;;  %v5453_v53 = vadd.f32 %v5452_v63, %v5404_v48 }
0x2395   :  { %v9148_v36 = vpop.f32.mrf.mxu0 }
0x2396   :  { %v5473_v61 = vmul.f32 %v5469_v22, %v10313_v27  ;;  %v5467_v16 = vsub.f32 %v5453_v53, %v11753_v55  ;;  %v5464_v6 = vadd.f32 %v9148_v36, %v5415_v35 }
0x2397   :  { %v5455_v56 = vpop.f32.mrf.mxu0 }
0x2398   :  { %v5477_v32 = vadd.f32 %v5473_v61, %v11773_v4  ;;  %v5471_v57 = vmul.f32 %v5467_v16, %v10313_v27  ;;  %v5470_v3 = vsub.f32 %v5464_v6, %v11788_v21  ;;  %v5456_v44 = vadd.f32 %v5455_v56, %v5407_v37 }
0x239a   :  { %vm5481_vm13 = vcmp.ge.f32.partialorder %v5477_v32, 1.0  ;;  %v5475_v51 = vadd.f32 %v5471_v57, %v11753_v55  ;;  %v5474_v10 = vmul.f32 %v5470_v3, %v10313_v27  ;;  %v5468_v50 = vsub.f32 %v5456_v44, %v11760_v1  ;;  %v9809_v55 = vld [vmem:[%s12988_s11] sm:$0xff] }
0x239b   :  { %v5485_v33 = vsel %vm5481_vm13, 1.0, %v9896_v60 }
0x239c   :  { %v5478_v43 = vadd.f32 %v5474_v10, %v11788_v21  ;;  %v5472_v5 = vmul.f32 %v5468_v50, %v10313_v27  ;;  %vm5479_vm1 = vcmp.ge.f32.partialorder %v5475_v51, 1.0  ;;  %v5501_v2 = vrot.slane %v5485_v33, 1  ;;  %v9801_v50 = vld [vmem:[%s12988_s11 + $0x40] sm:$0xff] }
0x239d   :  { %v5483_v40 = vsel %vm5479_vm1, 1.0, %v9896_v60  ;;  %v5489_v21 = vrot.slane %v5485_v33, 7  ;;  %v9802_v33 = vld [vmem:[%s12988_s11 + $0x38] sm:$0xff] }
0x239e   :  { %vm5482_vm2 = vcmp.ge.f32.partialorder %v5478_v43, 1.0  ;;  %v5476_v4 = vadd.f32 %v5472_v5, %v11760_v1  ;;  %v5487_v47 = vrot.slane %v5483_v40, 7  ;;  %v5499_v59 = vrot.slane %v5483_v40, 1  ;;  %v9803_v43 = vld [vmem:[%s12988_s11 + $0x30] sm:$0xff]  ;;  %v9804_v5 = vld [vmem:[%s12988_s11 + $0x28] sm:$0xff]  ;;  %v9806_v40 = vld [vmem:[%s12988_s11 + $0x18] sm:$0xff] }
0x239f   :  { %v5486_v11 = vsel %vm5482_vm2, 1.0, %v9896_v60  ;;  %vm12469_vm4 = vmpackc.low %vm5482_vm2, %vm5481_vm13 }
0x23a0   :  { %v5490_v52 = vrot.slane %v5486_v11, 7  ;;  %v5502_v18 = vrot.slane %v5486_v11, 1  ;;  %vm5480_vm11 = vcmp.ge.f32.partialorder %v5476_v4, 1.0  ;;  %v9805_v4 = vld [vmem:[%s12988_s11 + $0x20] sm:$0xff]  ;;  %v9808_v11 = vld [vmem:[%s12988_s11 + $0x8] sm:$0xff] }
0x23a1   :  { %v5484_v27 = vsel %vm5480_vm11, 1.0, %v9896_v60  ;;  %vm7597_vm12 = vmpackc.low %vm5480_vm11, %vm5479_vm1 }
0x23a2   :  { %v5503_v1 = vsel %vm246_vm5, %v5501_v2, %v5502_v18  ;;  %v5488_v13 = vrot.slane %v5484_v27, 7  ;;  %v5494_v48 = vsel %vm213_vm3, %v5490_v52, %v5487_v47  ;;  %v5500_v63 = vrot.slane %v5484_v27, 1  ;;  %7598 = vmatprep.mubr.msk.bf16.mxu1 %vm7597_vm12, %v9897_v17 }
0x23a3   :  { %v5509_v22 = vmul.f32 %v5503_v1, %v10205_v14  ;;  %v5495_v53 = vmul.f32 %v5494_v48, %v10148_v42  ;;  %v5506_v35 = vsel %vm246_vm5, %v5502_v18, %v5499_v59  ;;  %v5491_v36 = vsel %vm213_vm3, %v5489_v21, %v5490_v52  ;;  %v9810_v1 = vld [vmem:[%s12986_s9] ss:$0 sm:$0xff] }
0x23a4   :  { %v5493_v61 = vsel %vm213_vm3, %v5487_v47, %v5488_v13  ;;  %v5510_v16 = vmul.f32 %v5506_v35, %v10201_v12  ;;  %v5504_v6 = vsel %vm246_vm5, %v5500_v63, %v5501_v2  ;;  %v5505_v37 = vsel %vm246_vm5, %v5499_v59, %v5500_v63  ;;  %v9807_v2 = vld [vmem:[%s12988_s11 + $0x10] sm:$0xff] }
0x23a5   :  { %v5496_v14 = vmul.f32 %v5493_v61, %v10157_v49  ;;  %v5507_v42 = vmul.f32 %v5505_v37, %v10173_v0  ;;  %v5508_v56 = vmul.f32 %v5504_v6, %v10163_v58  ;;  %v5492_v32 = vsel %vm213_vm3, %v5488_v13, %v5489_v21  ;;  %v9794_v49 = vld [vmem:[%s12987_s10] sm:$0xff]  ;;  %v9798_v0 = vld [vmem:[%s12988_s11 + $0x58] sm:$0xff] }
0x23a6   :  { %v5516_v57 = vpack.c.bf16 %v5510_v16, %v5509_v22  ;;  %v5497_v3 = vmul.f32 %v5492_v32, %v10146_v41  ;;  %v5498_v12 = vmul.f32 %v5491_v36, %v10155_v46  ;;  %v9795_v41 = vld [vmem:[%s12988_s11 + $0x70] sm:$0xff]  ;;  %v9796_v46 = vld [vmem:[%s12988_s11 + $0x68] sm:$0xff]  ;;  %v9797_v58 = vld [vmem:[%s12988_s11 + $0x60] sm:$0xff] }
0x23a7   :  { %v5511_v44 = vpack.c.bf16 %v5496_v14, %v5495_v53  ;;  %v5513_v51 = vpack.c.bf16 %v5508_v56, %v5507_v42 }
0x23a8   :  { %v5514_v10 = vpack.c.bf16 %v5498_v12, %v5497_v3 }
0x23a9   :  { %5550 = vmatmul.mubr.bf16.vlgmr.msra.gmra.mxu1 %v5511_v44  ;;  %9165 = vmatprep.mubr.bf16.mxu0 %v5513_v51 }
0x23aa   :  { %7600 = vmatprep.mubr.msk.bf16.mxu1 %vm12469_vm4, %v9897_v17  ;;  %9166 = vmatmul.mubr.bf16.vlgmr.msra.gmra.mxu0 %v5516_v57  ;;  %v9799_v17 = vld [vmem:[%s12988_s11 + $0x50] sm:$0xff] }
0x23ab   :  { %9177 = vmatprep.mubr.msk.f32.mxu0 %vm129_vm0, %v9794_v49  ;;  %9181 = vmatpush3.msra.mxu1 %v12381_v39  ;;  %v9800_v39 = vld [vmem:[%s12988_s11 + $0x48] sm:$0xff] }
0x23ac   :  { %9182 = vmatprep.subr.mxu1 %v9795_v41 }
0x23ad   :  { %9183 = vmatpush3.msra.mxu1 %v9795_v41 }
0x23ae   :  { %9184 = vmatprep.subr.mxu1 %v9796_v46 }
0x23af   :  { %9185 = vmatpush3.msra.mxu1 %v9796_v46 }
0x23b0   :  { %9186 = vmatprep.subr.mxu1 %v9797_v58 }
0x23b1   :  { %5558 = vmatmul.mubr.bf16.gmra.mxu1 %v5514_v10 }
0x23b2   :  { %9187 = vmatpush3.msra.mxu1 %v9797_v58 }
0x23b3   :  { %9188 = vmatprep.subr.mxu1 %v9798_v0 }
0x23b4   :  { %9189 = vmatpush3.msra.mxu1 %v9798_v0 }
0x23b5   :  { %9190 = vmatprep.subr.mxu1 %v9799_v17 }
0x23b6   :  { %9191 = vmatpush3.msra.mxu1 %v9799_v17 }
0x23b7   :  { %9192 = vmatprep.subr.mxu1 %v9800_v39 }
0x23b8   :  { %9193 = vmatpush3.msra.mxu1 %v9800_v39 }
0x23b9   :  { %9194 = vmatprep.subr.mxu1 %v9801_v50 }
0x23ba   :  { %9195 = vmatpush3.msra.mxu1 %v9801_v50 }
0x23bb   :  { %9196 = vmatprep.subr.mxu1 %v9802_v33 }
0x23bc   :  { %9197 = vmatpush3.msra.mxu1 %v9802_v33 }
0x23bd   :  { %9198 = vmatprep.subr.mxu1 %v9803_v43 }
0x23be   :  { %9199 = vmatpush3.msra.mxu1 %v9803_v43 }
0x23bf   :  { %9200 = vmatprep.subr.mxu1 %v9804_v5 }
0x23c0   :  { %9201 = vmatpush3.msra.mxu1 %v9804_v5 }
0x23c1   :  { %9202 = vmatprep.subr.mxu1 %v9805_v4 }
0x23c2   :  { %9203 = vmatpush3.msra.mxu1 %v9805_v4 }
0x23c3   :  { %9204 = vmatprep.subr.mxu1 %v9806_v40 }
0x23c4   :  { %9205 = vmatpush3.msra.mxu1 %v9806_v40 }
0x23c5   :  { %9206 = vmatprep.subr.mxu1 %v9807_v2 }
0x23c6   :  { %9207 = vmatpush3.msra.mxu1 %v9807_v2 }
0x23c7   :  { %9208 = vmatprep.subr.mxu1 %v9808_v11 }
0x23c8   :  { %9209 = vmatpush3.msra.mxu1 %v9808_v11 }
0x23c9   :  { %9210 = vmatprep.subr.mxu1 %v9809_v55 }
0x23ca   :  { %9211 = vmatpush3.msra.mxu1 %v9809_v55 }
0x23cb   :  { %9234 = vmatprep.subr.bf16.mxu1 %v9896_v60 }
0x2469   :  { %v8237_v52 = vpop.f32.mrf.mxu1 }
0x246a   :  { %v9167_v18 = vpop.f32.mrf.mxu0 }
0x246b   :  { %v8238_v47 = vpop.f32.mrf.mxu1 }
0x246c   :  { %v8239_v21 = vadd.f32 %v8238_v47, %v8237_v52  ;;  %v5600_v27 = vpop.f32.mrf.mxu0 }
0x246d   :  { %v8240_v59 = vpop.f32.mrf.mxu1 }
0x246e   :  { %v5552_v13 = vadd.f32 %v9810_v1, %v8239_v21  ;;  %v9168_v48 = vpop.f32.mrf.mxu0 }
0x246f   :  { %v8241_v63 = vpop.f32.mrf.mxu1 }
0x2470   :  { %v5601_v22 = vadd.f32 %v5600_v27, %v5552_v13  ;;  %v8242_v53 = vadd.f32 %v8241_v63, %v8240_v59  ;;  %v5603_v16 = vpop.f32.mrf.mxu0 }
0x2471   :  { %v8243_v35 = vpop.f32.mrf.mxu1 }
0x2472   :  { %v5615_v36 = vsub.f32 %v5601_v22, %v11867_v38  ;;  %v5555_v61 = vadd.f32 %v9810_v1, %v8242_v53  ;;  %v9811_v53 = vld [vmem:[%s12987_s10 + $0x8] sm:$0xff]  ;;  %s9901_s10 = smov [#allocation5]  }
0x2473   :  { %v8244_v6 = vpop.f32.mrf.mxu1 }
0x2474   :  { %v5619_v37 = vmul.f32 %v5615_v36, %v10366_v62  ;;  %v5604_v14 = vadd.f32 %v5603_v16, %v5555_v61  ;;  %v8245_v42 = vadd.f32 %v8244_v6, %v8243_v35  ;;  %v9812_v35 = vld [vmem:[%s12990_s13] sm:$0xff]  ;;  %v9813_v16 = vld [vmem:[%s12994_s17 + $0x38] sm:$0xff]   ;;  %v9814_v6 = vld [vmem:[%s12994_s17 + $0x30] sm:$0xff]  }
0x2475   :  { %v8246_v56 = vpop.f32.mrf.mxu1 }
0x2476   :  { %v5623_v32 = vadd.f32 %v5619_v37, %v11867_v38  ;;  %v5616_v57 = vsub.f32 %v5604_v14, %v11874_v20  ;;  %v5560_v3 = vadd.f32 %v9810_v1, %v8245_v42  ;;  %v9815_v37 = vld [vmem:[%s12994_s17 + $0x28] sm:$0xff]   ;;  %v9816_v14 = vld [vmem:[%s12994_s17 + $0x20] sm:$0xff]  }
0x2477   :  { %v8247_v12 = vpop.f32.mrf.mxu1 }
0x2478   :  { %vm5627_vm3 = vcmp.ge.f32.partialorder %v5623_v32, 1.0  ;;  %v5620_v44 = vmul.f32 %v5616_v57, %v10366_v62  ;;  %v5609_v51 = vadd.f32 %v9167_v18, %v5560_v3  ;;  %v8248_v10 = vadd.f32 %v8247_v12, %v8246_v56  ;;  %v12626_v57 = vld [vmem:[%s12990_s13 + $0x8] sm:$0xff]  ;;  %v9818_v3 = vld [vmem:[%s12994_s17 + $0x18] sm:$0xff]   ;;  %v9819_v12 = vld [vmem:[%s12994_s17 + $0x10] sm:$0xff]  }
0x2479   :  { %v5631_v49 = vsel %vm5627_vm3, 1.0, %v9896_v60 }
0x247a   :  { %v5624_v41 = vadd.f32 %v5620_v44, %v11874_v20  ;;  %v5617_v46 = vsub.f32 %v5609_v51, %v11881_v30  ;;  %v5563_v58 = vadd.f32 %v9810_v1, %v8248_v10  ;;  %v5635_v0 = vadd.f32 %v5631_v49, %v12283_v34  ;;  %v9820_v44 = vld [vmem:[%s12994_s17 + $0x8] sm:$0xff]   ;;  %v9821_v51 = vld [vmem:[%s12994_s17] sm:$0xff]  }
0x247c   :  { %vm5628_vm10 = vcmp.ge.f32.partialorder %v5624_v41, 1.0  ;;  %v5621_v38 = vmul.f32 %v5617_v46, %v10366_v62  ;;  %v5612_v17 = vadd.f32 %v9168_v48, %v5563_v58  ;;  %v5639_v5 = vrot.slane %v5635_v0, 1 }
0x247d   :  { %v5632_v39 = vsel %vm5628_vm10, 1.0, %v9896_v60 }
0x247e   :  { %v5618_v50 = vsub.f32 %v5612_v17, %v11888_v7  ;;  %v5625_v33 = vadd.f32 %v5621_v38, %v11881_v30  ;;  %v5636_v43 = vadd.f32 %v5632_v39, %v12309_v19  ;;  %v12656_v38 = vld [vmem:[%s12989_s12] sm:$0xff]  ;;  %v12666_v39 = vld [vmem:[%s12989_s12 + $0x8] sm:$0xff] }
0x2480   :  { %v5622_v20 = vmul.f32 %v5618_v50, %v10366_v62  ;;  %vm5629_vm14 = vcmp.ge.f32.partialorder %v5625_v33, 1.0  ;;  %v5640_v4 = vrot.slane %v5636_v43, 1  ;;  %v9824_v50 = vld [vmem:[%s12994_s17 + $0x58] sm:$0xff]   ;;  %v9825_v33 = vld [vmem:[%s12994_s17 + $0x50] sm:$0xff]  }
0x2481   :  { %v5633_v40 = vsel %vm5629_vm14, 1.0, %v9896_v60 }
0x2482   :  { %v5626_v34 = vadd.f32 %v5622_v20, %v11888_v7  ;;  %v5637_v2 = vadd.f32 %v5633_v40, %v12317_v24  ;;  %v5645_v11 = vsel %vm246_vm5, %v5639_v5, %v5640_v4 }
0x2483   :  { %v5647_v55 = vmax.f32 %v5635_v0, %v5645_v11 }
0x2484   :  { %vm5630_vm13 = vcmp.ge.f32.partialorder %v5626_v34, 1.0  ;;  %v5641_v52 = vrot.slane %v5637_v2, 1 }
0x2485   :  { %v5634_v30 = vsel %vm5630_vm13, 1.0, %v9896_v60 }
0x2486   :  { %v5638_v19 = vadd.f32 %v5634_v30, %v12294_v23  ;;  %v5644_v62 = vsel %vm246_vm5, %v5640_v4, %v5641_v52  ;;  %v9829_v30 = vld [vmem:[%s12996_s19 + $0x30] sm:$0xff]  }
0x2487   :  { %v5648_v18 = vmax.f32 %v5636_v43, %v5644_v62  ;;  %v9826_v43 = vld [vmem:[%s12994_s17 + $0x48] sm:$0xff]   ;;  %v9831_v62 = vld [vmem:[%s12996_s19 + $0x20] sm:$0xff]  }
0x2488   :  { %v5642_v47 = vrot.slane %v5638_v19, 1 }
0x248a   :  { %v5643_v7 = vsel %vm246_vm5, %v5641_v52, %v5642_v47  ;;  %v5646_v24 = vsel %vm246_vm5, %v5642_v47, %v5639_v5  ;;  %v9827_v5 = vld [vmem:[%s12994_s17 + $0x40] sm:$0xff]   ;;  %v9828_v52 = vld [vmem:[%s12996_s19 + $0x38] sm:$0xff]  }
0x248b   :  { %v5649_v21 = vmax.f32 %v5637_v2, %v5643_v7  ;;  %v5650_v27 = vmax.f32 %v5638_v19, %v5646_v24  ;;  %v9830_v19 = vld [vmem:[%s12996_s19 + $0x28] sm:$0xff]  }
0x248d   :  { %5655 = vrot.lane.b32.xlu1 %v5649_v21, %s13036_s8  ;;  %5657 = vrot.lane.b32.xlu0 %v5650_v27, %s13036_s8 }
0x2491   :  { %5653 = vrot.lane.b32.xlu0 %v5648_v18, %s13036_s8  ;;  %5651 = vrot.lane.b32.xlu1 %v5647_v55, %s13036_s8 }
0x24ff   :  { %v5656_v23 = vpop.permute.xlu1 %5655  ;;  %v5658_v59 = vpop.permute.xlu0 %5657 }
0x2500   :  { %v5662_v1 = vmax.f32 %v5650_v27, %v5658_v59  ;;  %v5661_v13 = vmax.f32 %v5649_v21, %v5656_v23  ;;  %v9832_v27 = vld [vmem:[%s12995_s18] ss:$0 sm:$0xff]  ;;  %v4648_v59 = vsel %vm4644_vm9, 0.0, %v12030_v26 }
0x2502   :  { %9169 = vmatprep.subr.mxu0 %v5662_v1 }
0x2503   :  { %9170 = vmatpush3.msra.mxu0 %v5662_v1  ;;  %v5654_v48 = vpop.permute.xlu0 %5653  ;;  %v5652_v63 = vpop.permute.xlu1 %5651 }
0x2504   :  { %v5660_v54 = vmax.f32 %v5648_v18, %v5654_v48  ;;  %9171 = vmatprep.subr.mxu0 %v5661_v13  ;;  %v5659_v22 = vmax.f32 %v5647_v55, %v5652_v63 }
0x2505   :  { %9172 = vmatpush3.msra.mxu0 %v5661_v13 }
0x2506   :  { %9173 = vmatprep.subr.mxu0 %v5660_v54 }
0x2507   :  { %9174 = vmatpush3.msra.mxu0 %v5660_v54 }
0x2508   :  { %9175 = vmatprep.subr.mxu0 %v5659_v22 }
0x2509   :  { %9176 = vmatpush3.msra.mxu0 %v5659_v22 }
0x250a   :  { %9178 = vmatmul.mubr.msk.f32.vlgmr.msra.gmra.mxu0 %vm129_vm0, %v9811_v53  ;;  %v4649_v53 = vsel %vm4645_vm15, 0.0, %v12033_v25 }
0x250b   :  { %9219 = vmatprep.mubr.msk.f32.mxu0 %vm1163_vm6, %v9812_v35 }
0x25ca   :  { %v9179_v36 = vpop.f32.mrf.mxu0 }
0x25cc   :  { %v5729_v61 = vpop.f32.mrf.mxu0 }
0x25cd   :  { %9212 = vmatprep.mubr.f32.mxu1 %v5729_v61 }
0x25ce   :  { %9213 = vmatmul.mubr.f32.vlgmr.msra.gmra.mxu1 %v9179_v36 }
0x25cf   :  { %9235 = vmatpush3.bf16.msra.mxu1 %v9813_v16  ;;  %9242 = vmatprep.mubr.msk.bf16.mxu1 %vm9899_vm7, %v9896_v60 }
0x25d0   :  { %9236 = vmatprep.subr.bf16.mxu1 %v9896_v60 }
0x25d3   :  { %9237 = vmatpush3.bf16.msra.mxu1 %v9814_v6 }
0x25d4   :  { %9238 = vmatprep.subr.bf16.mxu1 %v9896_v60 }
0x25d7   :  { %9239 = vmatpush3.bf16.msra.mxu1 %v9815_v37  ;;  %v9834_v37 = vld [vmem:[%s12996_s19 + $0x58] sm:$0xff]  }
0x25d8   :  { %9240 = vmatprep.subr.bf16.mxu1 %v9896_v60 }
0x25db   :  { %9241 = vmatpush3.bf16.msra.mxu1 %v9816_v14  ;;  %v9835_v14 = vld [vmem:[%s12996_s19 + $0x10] sm:$0xff]  }
0x268e   :  { %v12613_v42 = vpop.f32.mrf.mxu1 }
0x268f   :  { %9215 = vmatprep.subr.mxu0 %v12613_v42 }
0x2690   :  { %v12616_v56 = vpop.f32.mrf.mxu1  ;;  %9216 = vmatpush3.msra.mxu0 %v12613_v42 }
0x2691   :  { %v5813_v32 = vpack.c.bf16 %v12613_v42, %v12616_v56  ;;  %9217 = vmatprep.subr.mxu0 %v12616_v56 }
0x2692   :  { %9218 = vmatpush3.msra.mxu0 %v12616_v56 }
0x2693   :  { %9220 = vmatmul.mubr.msk.f32.vlgmr.msra.gmra.mxu0 %vm1163_vm6, %v12626_v57  ;;  %9222 = vmatprep.subr.bf16.mxu0 %v9896_v60 }
0x2694   :  { %9243 = vmatmul.mubr.msk.bf16.vlgmr.msra.gmra.mxu1 %vm1278_vm8, %v5813_v32  ;;  %9223 = vmatpush3.bf16.msra.mxu0 %v9818_v3  ;;  %v9836_v32 = vld [vmem:[%s12996_s19 + $0x50] sm:$0xff]   ;;  %v9838_v3 = vld [vmem:[%s12996_s19 + $0x48] sm:$0xff]  }
0x2695   :  { %9224 = vmatprep.subr.bf16.mxu0 %v9896_v60  ;;  %9230 = vmatprep.mubr.msk.bf16.mxu0 %vm9899_vm7, %v9896_v60 }
0x2696   :  { %9269 = vmatprep.mubr.msk.f32.mxu1 %vm1163_vm6, %v9812_v35 }
0x2698   :  { %9225 = vmatpush3.bf16.msra.mxu0 %v9819_v12  ;;  %v9839_v12 = vld [vmem:[%s12996_s19] sm:$0xff]  }
0x2699   :  { %9226 = vmatprep.subr.bf16.mxu0 %v9896_v60 }
0x269c   :  { %9227 = vmatpush3.bf16.msra.mxu0 %v9820_v44  ;;  %v9840_v44 = vld [vmem:[%s12996_s19 + $0x40] sm:$0xff]  }
0x269d   :  { %9228 = vmatprep.subr.bf16.mxu0 %v9896_v60 }
0x26a0   :  { %9229 = vmatpush3.bf16.msra.mxu0 %v9821_v51 }
0x26a1   :  { %9246 = vmatprep.subr.mxu0 %v12613_v42 }
0x2753   :  { %v9221_v10 = vpop.f32.mrf.mxu0 }
0x2754   :  { %v5971_v49 = vpop.f32.mrf.mxu1 }
0x2755   :  { %v5880_v41 = vpop.f32.mrf.mxu0 }
0x2756   :  { %v5889_v46 = vpack.c.bf16 %v9221_v10, %v5880_v41  ;;  %v9244_v58 = vpop.f32.mrf.mxu1 }
0x2758   :  { %v5974_v0 = vpop.f32.mrf.mxu1  ;;  %9231 = vmatmul.mubr.msk.bf16.vlgmr.msra.gmra.mxu0 %vm1278_vm8, %v5889_v46 }
0x2759   :  { %9247 = vmatpush3.msra.mxu0 %v12613_v42  ;;  %9250 = vmatprep.mubr.msk.f32.mxu0 %vm1163_vm6, %v12656_v38 }
0x275a   :  { %v9245_v17 = vpop.f32.mrf.mxu1  ;;  %9248 = vmatprep.subr.mxu0 %v12616_v56 }
0x275b   :  { %9249 = vmatpush3.msra.mxu0 %v12616_v56 }
0x275c   :  { %9253 = vmatprep.subr.bf16.mxu0 %v9896_v60 }
0x2760   :  { %9251 = vmatmul.mubr.msk.f32.vlgmr.msra.gmra.mxu0 %vm1163_vm6, %v12666_v39 }
0x2761   :  { %9254 = vmatpush3.bf16.msra.mxu0 %v9824_v50  ;;  %9261 = vmatprep.mubr.msk.bf16.mxu0 %vm9899_vm7, %v9896_v60 }
0x2762   :  { %9255 = vmatprep.subr.bf16.mxu0 %v9896_v60 }
0x2765   :  { %9256 = vmatpush3.bf16.msra.mxu0 %v9825_v33 }
0x2766   :  { %9257 = vmatprep.subr.bf16.mxu0 %v9896_v60 }
0x2769   :  { %9258 = vmatpush3.bf16.msra.mxu0 %v9826_v43 }
0x276a   :  { %9259 = vmatprep.subr.bf16.mxu0 %v9896_v60 }
0x276d   :  { %9260 = vmatpush3.bf16.msra.mxu0 %v9827_v5 }
0x276e   :  { %9284 = vmatprep.subr.bf16.mxu0 %v9896_v60 }
0x2818   :  { %v5927_v20 = vpop.f32.mrf.mxu0 }
0x2819   :  { %v5972_v18 = vadd.f32 %v5971_v49, %v5927_v20 }
0x281a   :  { %v9232_v4 = vpop.f32.mrf.mxu0 }
0x281c   :  { %v5930_v40 = vpop.f32.mrf.mxu0 }
0x281d   :  { %v5975_v21 = vadd.f32 %v5974_v0, %v5930_v40 }
0x281e   :  { %v9233_v34 = vpop.f32.mrf.mxu0 }
0x2820   :  { %v9252_v2 = vpop.f32.mrf.mxu0 }
0x2822   :  { %v6044_v11 = vpop.f32.mrf.mxu0 }
0x2823   :  { %v6053_v55 = vpack.c.bf16 %v9252_v2, %v6044_v11 }
0x2825   :  { %9262 = vmatmul.mubr.msk.bf16.vlgmr.msra.gmra.mxu0 %vm1278_vm8, %v6053_v55 }
0x2826   :  { %9285 = vmatpush3.bf16.msra.mxu0 %v9828_v52  ;;  %9292 = vmatprep.mubr.msk.bf16.mxu0 %vm9899_vm7, %v9896_v60 }
0x2827   :  { %9286 = vmatprep.subr.bf16.mxu0 %v9896_v60 }
0x282a   :  { %9287 = vmatpush3.bf16.msra.mxu0 %v9829_v30 }
0x282b   :  { %9288 = vmatprep.subr.bf16.mxu0 %v9896_v60 }
0x282e   :  { %9289 = vmatpush3.bf16.msra.mxu0 %v9830_v19 }
0x282f   :  { %9290 = vmatprep.subr.bf16.mxu0 %v9896_v60 }
0x2832   :  { %9291 = vmatpush3.bf16.msra.mxu0 %v9831_v62 }
0x2833   :  { %9303 = vmatprep.subr.bf16.mxu0 %v9896_v60 }
0x28e5   :  { %v6091_v47 = vpop.f32.mrf.mxu0 }
0x28e6   :  { %v6098_v7 = vadd.f32 %v6091_v47, %v5972_v18 }
0x28e7   :  { %v9263_v24 = vpop.f32.mrf.mxu0 }
0x28e8   :  { %v6100_v23 = vadd.f32 %v9832_v27, %v6098_v7 }
0x28e9   :  { %v6094_v1 = vpop.f32.mrf.mxu0 }
0x28ea   :  { %v6102_v13 = vsub.f32 %v6100_v23, %v4648_v59  ;;  %v6099_v48 = vadd.f32 %v6094_v1, %v5975_v21 }
0x28eb   :  { %v9264_v63 = vpop.f32.mrf.mxu0 }
0x28ec   :  { %v6104_v54 = vmul.f32 %v6102_v13, %v10589_v8  ;;  %v6101_v22 = vadd.f32 %v9832_v27, %v6099_v48  ;;  %v9848_v48 = vld [vmem:[%s12991_s14 + $0x8] sm:$0xff]  ;;  %v9849_v63 = vld [vmem:[%s12991_s14] sm:$0xff] }
0x28ee   :  { %v6103_v35 = vsub.f32 %v6101_v22, %v4649_v53  ;;  %v6106_v36 = vadd.f32 %v6104_v54, %v4648_v59 }
0x28f0   :  { %v6105_v61 = vmul.f32 %v6103_v35, %v10589_v8  ;;  %vm6108_vm5 = vcmp.ge.f32.partialorder %v6106_v36, 1.0  ;;  %v9833_v8 = vld [vmem:[%s12996_s19 + $0x18] sm:$0xff]  }
0x28f1   :  { %v6110_v6 = vsel %vm6108_vm5, 1.0, %v9896_v60 }
0x28f2   :  { %v6107_v16 = vadd.f32 %v6105_v61, %v4649_v53 }
0x28f4   :  { %vm6109_vm1 = vcmp.ge.f32.partialorder %v6107_v16, 1.0 }
0x28f5   :  { %v6111_v26 = vsel %vm6109_vm1, 1.0, %v9896_v60  ;;  %9265 = vmatprep.subr.msk.mxu1 %vm6109_vm1, %v9900_v29 }
0x28f6   :  { %9266 = vmatpush3.msk.msra.mxu1 %vm6109_vm1, %v9900_v29  ;;  %v6112_v25 = vpack.c.bf16 %v6111_v26, %v6110_v6  ;;  %v9850_v6 = vld [vmem:[%s12992_s15] sm:$0xff] }
0x28f7   :  { %9267 = vmatprep.subr.msk.mxu1 %vm6108_vm5, %v9900_v29 }
0x28f8   :  { %9268 = vmatpush3.msk.msra.mxu1 %vm6108_vm5, %v9900_v29  ;;  %9293 = vmatmul.mubr.msk.bf16.vlgmr.msra.gmra.mxu0 %vm1278_vm8, %v6112_v25  ;;  %v9851_v25 = vld [vmem:[%s12993_s16 + $0x38] sm:$0xff] }
0x28f9   :  { %9270 = vmatmul.mubr.msk.f32.vlgmr.msra.gmra.mxu1 %vm1163_vm6, %v12626_v57  ;;  %9272 = vmatprep.subr.bf16.mxu1 %v9896_v60  ;;  %v9837_v57 = vld [vmem:[%s12996_s19 + $0x8] sm:$0xff]  }
0x28fa   :  { %9273 = vmatpush3.bf16.msra.mxu1 %v9833_v8  ;;  %9280 = vmatprep.mubr.msk.bf16.mxu1 %vm9899_vm7, %v9896_v60  ;;  %v9852_v8 = vld [vmem:[%s12993_s16 + $0x30] sm:$0xff] }
0x28fb   :  { %9274 = vmatprep.subr.bf16.mxu1 %v9896_v60  ;;  %9304 = vmatpush3.bf16.msra.mxu0 %v9834_v37  ;;  %v9853_v37 = vld [vmem:[%s12993_s16 + $0x28] sm:$0xff] }
0x28fc   :  { %9305 = vmatprep.subr.bf16.mxu0 %v9896_v60  ;;  %9311 = vmatprep.mubr.msk.bf16.mxu0 %vm9899_vm7, %v9896_v60 }
0x28fe   :  { %9275 = vmatpush3.bf16.msra.mxu1 %v9835_v14  ;;  %v9854_v14 = vld [vmem:[%s12993_s16 + $0x20] sm:$0xff] }
0x28ff   :  { %9276 = vmatprep.subr.bf16.mxu1 %v9896_v60  ;;  %9306 = vmatpush3.bf16.msra.mxu0 %v9836_v32  ;;  %v9855_v32 = vld [vmem:[%s12993_s16 + $0x18] sm:$0xff] }
0x2900   :  { %9307 = vmatprep.subr.bf16.mxu0 %v9896_v60 }
0x2902   :  { %9277 = vmatpush3.bf16.msra.mxu1 %v9837_v57  ;;  %v9856_v57 = vld [vmem:[%s12993_s16 + $0x10] sm:$0xff] }
0x2903   :  { %9278 = vmatprep.subr.bf16.mxu1 %v9896_v60  ;;  %9308 = vmatpush3.bf16.msra.mxu0 %v9838_v3  ;;  %v9857_v3 = vld [vmem:[%s12993_s16 + $0x8] sm:$0xff] }
0x2904   :  { %9309 = vmatprep.subr.bf16.mxu0 %v9896_v60 }
0x2906   :  { %9279 = vmatpush3.bf16.msra.mxu1 %v9839_v12 }
0x2907   :  { %9296 = vmatprep.subr.msk.mxu1 %vm6109_vm1, %v9900_v29  ;;  %9310 = vmatpush3.bf16.msra.mxu0 %v9840_v44 }
0x2908   :  { %9341 = vmatprep.subr.mxu0 %v9896_v60 }
0x29b8   :  { %v6270_v51 = vpop.f32.mrf.mxu0 }
0x29b9   :  { %v9271_v10 = vpop.f32.mrf.mxu1 }
0x29ba   :  { %v9294_v49 = vpop.f32.mrf.mxu0 }
0x29bb   :  { %v6179_v41 = vpop.f32.mrf.mxu1  ;;  %v6793_v49 = vld [vmem:[%s12999_s22] sm:$0xff] }
0x29bc   :  { %v6188_v46 = vpack.c.bf16 %v9271_v10, %v6179_v41  ;;  %v6273_v58 = vpop.f32.mrf.mxu0  ;;  %v6795_v10 = vld [vmem:[%s12999_s22 + $0x10] sm:$0xff] }
0x29be   :  { %9281 = vmatmul.mubr.msk.bf16.vlgmr.msra.gmra.mxu1 %vm1278_vm8, %v6188_v46  ;;  %v9295_v0 = vpop.f32.mrf.mxu0 }
0x29bf   :  { %9297 = vmatpush3.msk.msra.mxu1 %vm6109_vm1, %v9900_v29  ;;  %9300 = vmatprep.mubr.msk.f32.mxu1 %vm1163_vm6, %v12656_v38 }
0x29c0   :  { %9298 = vmatprep.subr.msk.mxu1 %vm6108_vm5, %v9900_v29 }
0x29c1   :  { %9299 = vmatpush3.msk.msra.mxu1 %vm6108_vm5, %v9900_v29 }
0x29c6   :  { %9301 = vmatmul.mubr.msk.f32.vlgmr.msra.gmra.mxu1 %vm1163_vm6, %v12666_v39 }
0x29c7   :  { %9319 = vmatprep.mubr.msk.f32.mxu1 %vm1163_vm6, %v12656_v38  ;;  %v9841_v38 = vld [vmem:[%s12997_s20] ss:$0 sm:$0xff] }
0x2a7e   :  { %v6226_v17 = vpop.f32.mrf.mxu1 }
0x2a7f   :  { %v6271_v40 = vadd.f32 %v6270_v51, %v6226_v17  ;;  %v6796_v51 = vld [vmem:[%s12999_s22 + $0x18] sm:$0xff]  ;;  %v6718_v17 = vld [vmem:[%s12998_s21] sm:$0x3] }
0x2a80   :  { %v9282_v50 = vpop.f32.mrf.mxu1 }
0x2a81   :  { %v7633_v50 = vld [vmem:[%s12999_s22 + $0x38] sm:$0xff] }
0x2a82   :  { %v6229_v33 = vpop.f32.mrf.mxu1 }
0x2a83   :  { %v6274_v11 = vadd.f32 %v6273_v58, %v6229_v33  ;;  %v7632_v33 = vld [vmem:[%s12999_s22 + $0x30] sm:$0xff] }
0x2a84   :  { %v9283_v43 = vpop.f32.mrf.mxu1 }
0x2a85   :  { %v7631_v43 = vld [vmem:[%s12999_s22 + $0x28] sm:$0xff] }
0x2a86   :  { %v9302_v5 = vpop.f32.mrf.mxu1 }
0x2a88   :  { %v6343_v20 = vpop.f32.mrf.mxu1 }
0x2a89   :  { %v6352_v4 = vpack.c.bf16 %v9302_v5, %v6343_v20  ;;  %v7630_v5 = vld [vmem:[%s12999_s22 + $0x20] sm:$0xff] }
0x2a8b   :  { %9312 = vmatmul.mubr.msk.bf16.vlgmr.msra.gmra.mxu0 %vm1278_vm8, %v6352_v4 }
0x2a8c   :  { %9345 = vmatprep.mubr.msk.f32.mxu0 %vm9899_vm7, %v9896_v60 }
0x2b4b   :  { %v6390_v29 = vpop.f32.mrf.mxu0 }
0x2b4c   :  { %v6397_v34 = vadd.f32 %v6390_v29, %v6271_v40  ;;  %v7643_v40 = vld [vmem:[%s12998_s21 + $0x6] sm:$0x3] }
0x2b4d   :  { %v9313_v2 = vpop.f32.mrf.mxu0 }
0x2b4e   :  { %v6399_v55 = vadd.f32 %v9841_v38, %v6397_v34  ;;  %v7636_v2 = vld [vmem:[%s12998_s21 + $0x4] sm:$0x3] }
0x2b4f   :  { %v6393_v52 = vpop.f32.mrf.mxu0 }
0x2b50   :  { %v6401_v30 = vsub.f32 %v6399_v55, %v12124_v15  ;;  %v6398_v19 = vadd.f32 %v6393_v52, %v6274_v11  ;;  %v7641_v11 = vld [vmem:[%s12999_s22 + $0x58] sm:$0xff]  ;;  %v7640_v55 = vld [vmem:[%s12999_s22 + $0x50] sm:$0xff]  ;;  %v7639_v52 = vld [vmem:[%s12999_s22 + $0x48] sm:$0xff] }
0x2b51   :  { %v9314_v62 = vpop.f32.mrf.mxu0 }
0x2b52   :  { %v6403_v18 = vmul.f32 %v6401_v30, %v10681_v31  ;;  %v6400_v47 = vadd.f32 %v9841_v38, %v6398_v19  ;;  %v7648_v38 = vld [vmem:[%s12999_s22 + $0x78] sm:$0xff]  ;;  %v7647_v30 = vld [vmem:[%s12999_s22 + $0x70] sm:$0xff]  ;;  %v7638_v19 = vld [vmem:[%s12999_s22 + $0x40] sm:$0xff] }
0x2b53   :  { %v7646_v62 = vld [vmem:[%s12999_s22 + $0x68] sm:$0xff] }
0x2b54   :  { %v6402_v7 = vsub.f32 %v6400_v47, %v12129_v9  ;;  %v6405_v24 = vadd.f32 %v6403_v18, %v12124_v15  ;;  %v9843_v15 = vld [vmem:[%s12991_s14 + $0x30] sm:$0xff]  ;;  %v7645_v18 = vld [vmem:[%s12999_s22 + $0x60] sm:$0xff] }
0x2b56   :  { %v6404_v21 = vmul.f32 %v6402_v7, %v10681_v31  ;;  %vm6407_vm9 = vcmp.ge.f32.partialorder %v6405_v24, 1.0  ;;  %v9842_v31 = vld [vmem:[%s12991_s14 + $0x38] sm:$0xff] }
0x2b57   :  { %v6409_v59 = vsel %vm6407_vm9, 1.0, %v9896_v60 }
0x2b58   :  { %v6406_v27 = vadd.f32 %v6404_v21, %v12129_v9  ;;  %v6411_v13 = vadd.f32 %v6409_v59, %v12616_v56  ;;  %v9844_v9 = vld [vmem:[%s12991_s14 + $0x28] sm:$0xff]  ;;  %v9846_v56 = vld [vmem:[%s12991_s14 + $0x18] sm:$0xff] }
0x2b5a   :  { %vm6408_vm15 = vcmp.ge.f32.partialorder %v6406_v27, 1.0 }
0x2b5b   :  { %v6410_v23 = vsel %vm6408_vm15, 1.0, %v9896_v60 }
0x2b5c   :  { %v6412_v1 = vadd.f32 %v12613_v42, %v6410_v23  ;;  %v9845_v42 = vld [vmem:[%s12991_s14 + $0x20] sm:$0xff] }
0x2b5e   :  { %9315 = vmatprep.subr.mxu1 %v6412_v1 }
0x2b5f   :  { %9316 = vmatpush3.msra.mxu1 %v6412_v1 }
0x2b60   :  { %9317 = vmatprep.subr.mxu1 %v6411_v13 }
0x2b61   :  { %9318 = vmatpush3.msra.mxu1 %v6411_v13 }
0x2b62   :  { %9320 = vmatmul.mubr.msk.f32.vlgmr.msra.gmra.mxu1 %vm1163_vm6, %v12666_v39  ;;  %9322 = vmatprep.subr.mxu1 %v9842_v31  ;;  %v9847_v39 = vld [vmem:[%s12991_s14 + $0x10] sm:$0xff]  ;;  %s7347_s14 = sshll.u32 %s9901_s10, 4  ;;  %s7348_s14 = int_to_ptr.vmem [resolvable:$true] %s7347_s14 }
0x2b63   :  { %9323 = vmatpush3.msra.mxu1 %v9842_v31  ;;  %s9870_s0 = scalar_lea.vmem %s7348_s14, 32  ;;  %p9875_p6 = scmp.lt.s32.totalorder %s7348_s14, %s7348_s14 }
0x2b64   :  { %9324 = vmatprep.subr.mxu1 %v9843_v15  ;;  %p9871_p5 = scmp.ne.s32.totalorder %s7348_s14, %s9870_s0  ;;  %p9876_p7 = scmp.lt.s32.totalorder %s9870_s0, %s9870_s0 }
0x2b65   :  { %9325 = vmatpush3.msra.mxu1 %v9843_v15 }
0x2b66   :  { %9326 = vmatprep.subr.mxu1 %v9844_v9  ;;  %p9877_p8 = por %p9876_p7, %p9875_p6 }
0x2b67   :  { %9327 = vmatpush3.msra.mxu1 %v9844_v9 }
0x2b68   :  { %9328 = vmatprep.subr.mxu1 %v9845_v42  ;;  %p9878_p9 = pnand %p9877_p8, %p9871_p5 }
0x2b69   :  { %9329 = vmatpush3.msra.mxu1 %v9845_v42 }
0x2b6a   :  { %9330 = vmatprep.subr.mxu1 %v9846_v56 }
0x2b6b   :  { %9331 = vmatpush3.msra.mxu1 %v9846_v56 }
0x2b6c   :  { %9332 = vmatprep.subr.mxu1 %v9847_v39 }
0x2b6d   :  { %9333 = vmatpush3.msra.mxu1 %v9847_v39 }
0x2b6e   :  { %9334 = vmatprep.subr.mxu1 %v9848_v48 }
0x2b6f   :  { %9335 = vmatpush3.msra.mxu1 %v9848_v48 }
0x2b70   :  { %9336 = vmatprep.subr.mxu1 %v9849_v63 }
0x2b71   :  { %9337 = vmatpush3.msra.mxu1 %v9849_v63 }
0x2b72   :  { %9367 = vmatprep.subr.mxu1 %v9896_v60 }
0x2c22   :  { %v9321_v54 = vpop.f32.mrf.mxu1 }
0x2c23   :  { %v6489_v35 = vmax.f32 %v6412_v1, %v9321_v54 }
0x2c24   :  { %v6479_v22 = vpop.f32.mrf.mxu1 }
0x2c25   :  { %v6488_v53 = vmax.f32 %v6411_v13, %v6479_v22 }
0x2c27   :  { %9338 = vmatprep.mubr.msk.f32.mxu1 %vm1278_vm8, %v6488_v53 }
0x2c28   :  { %9339 = vmatmul.mubr.msk.f32.vlgmr.msra.gmra.mxu1 %vm1278_vm8, %v6489_v35 }
0x2c29   :  { %9369 = vmatprep.mubr.msk.f32.mxu1 %vm9899_vm7, %v9896_v60 }
0x2ce8   :  { %v9340_v36 = vpop.f32.mrf.mxu1 }
0x2ce9   :  { %v6572_v61 = vmax.f32 %v6489_v35, %v9340_v36 }
0x2cea   :  { %v6562_v16 = vpop.f32.mrf.mxu1 }
0x2ceb   :  { %v6571_v26 = vmax.f32 %v6488_v53, %v6562_v16  ;;  %9342 = vmatpush3.msra.mxu0 %v6572_v61 }
0x2cec   :  { %9343 = vmatprep.subr.mxu0 %v9896_v60 }
0x2ced   :  { %9344 = vmatpush3.msra.mxu0 %v6571_v26 }
0x2cee   :  { %9346 = vmatmul.mubr.msk.f32.vlgmr.msra.gmra.mxu0 %vm1163_vm6, %v9850_v6  ;;  %9348 = vmatprep.subr.mxu0 %v9896_v60  ;;  %vm6719_vm6 = vcmask 64512  }
0x2cef   :  { %9349 = vmatpush3.msra.mxu0 %v9851_v25  ;;  %9364 = vmatprep.mubr.msk.f32.mxu0 %vm9899_vm7, %v9896_v60 }
0x2cf0   :  { %9350 = vmatprep.subr.mxu0 %v9896_v60 }
0x2cf1   :  { %9351 = vmatpush3.msra.mxu0 %v9852_v8 }
0x2cf2   :  { %9352 = vmatprep.subr.mxu0 %v9896_v60 }
0x2cf3   :  { %9353 = vmatpush3.msra.mxu0 %v9853_v37 }
0x2cf4   :  { %9354 = vmatprep.subr.mxu0 %v9896_v60 }
0x2cf5   :  { %9355 = vmatpush3.msra.mxu0 %v9854_v14 }
0x2cf6   :  { %9356 = vmatprep.subr.mxu0 %v9896_v60 }
0x2cf7   :  { %9357 = vmatpush3.msra.mxu0 %v9855_v32 }
0x2cf8   :  { %9358 = vmatprep.subr.mxu0 %v9896_v60 }
0x2cf9   :  { %9359 = vmatpush3.msra.mxu0 %v9856_v57 }
0x2cfa   :  { %9360 = vmatprep.subr.mxu0 %v9896_v60 }
0x2cfb   :  { %9361 = vmatpush3.msra.mxu0 %v9857_v3 }
0x2cfc   :  { %9362 = vmatprep.subr.mxu0 %v9896_v60 }
0x2cfd   :  { %9363 = vmatpush3.msra.mxu0 %v12290_v45  ;;  %v6794_v45 = vld [vmem:[%s12999_s22 + $0x8] sm:$0xff] }
0x2cfe   :  { %9388 = vmatprep.subr.mxu0 %v9896_v60 }
0x2dae   :  { %v6639_v12 = vpop.f32.mrf.mxu0 }
0x2daf   :  { %9365 = vmatmul.mubr.msk.f32.vlgmr.msra.gmra.mxu0 %vm1278_vm8, %v6639_v12 }
0x2db0   :  { %v9347_v44 = vpop.f32.mrf.mxu0  ;;  %9396 = vmatprep.mubr.msk.f32.mxu0 %vm9899_vm7, %v9896_v60  ;;  %9389 = vmatpush3.msra.mxu0 %v6796_v51 }
0x2db1   :  { %9390 = vmatprep.subr.mxu0 %v9896_v60 }
0x2db2   :  { %9391 = vmatpush3.msra.mxu0 %v6795_v10 }
0x2db3   :  { %9392 = vmatprep.subr.mxu0 %v9896_v60 }
0x2db4   :  { %9393 = vmatpush3.msra.mxu0 %v6794_v45 }
0x2db5   :  { %9394 = vmatprep.subr.mxu0 %v9896_v60 }
0x2db6   :  { %9395 = vmatpush3.msra.mxu0 %v6793_v49 }
0x2db7   :  { %9415 = vmatprep.subr.mxu0 %v9896_v60 }
0x2e6f   :  { %v6712_v41 = vpop.f32.mrf.mxu0 }
0x2e70   :  { %v6716_v46 = vadd.f32 %v6712_v41, %v12449_v28  ;;  %v7628_v28 = vld [vmem:[%s12998_s21 + $0x2] sm:$0x3] }
0x2e71   :  { %v9366_v58 = vpop.f32.mrf.mxu0 }
0x2e72   :  { %v6717_v0 = vmul.f32 0.25, %v6716_v46 }
0x2e74   :  { %9368 = vmatpush3.msra.mxu1 %v6717_v0 }
0x2e75   :  { %9370 = vmatmul.mubr.msk.f32.vlgmr.msra.gmra.mxu1 %vm6719_vm6, %v6718_v17  ;;  %9372 = vmatprep.subr.mxu1 %v9896_v60 }
0x2e76   :  { %9373 = vmatpush3.msra.mxu1 %v6717_v0  ;;  %9374 = vmatprep.mubr.msk.f32.mxu1 %vm9899_vm7, %v9896_v60 }
0x2e77   :  { %9377 = vmatprep.subr.mxu1 %v9896_v60 }
0x2e79   :  { %9375 = vmatmul.mubr.msk.f32.vlgmr.msra.gmra.mxu1 %vm6719_vm6, %v7628_v28 }
0x2e7a   :  { %9378 = vmatpush3.msra.mxu1 %v7633_v50  ;;  %9385 = vmatprep.mubr.msk.f32.mxu1 %vm9899_vm7, %v9896_v60 }
0x2e7b   :  { %9379 = vmatprep.subr.mxu1 %v9896_v60 }
0x2e7c   :  { %9380 = vmatpush3.msra.mxu1 %v7632_v33 }
0x2e7d   :  { %9381 = vmatprep.subr.mxu1 %v9896_v60 }
0x2e7e   :  { %9382 = vmatpush3.msra.mxu1 %v7631_v43 }
0x2e7f   :  { %9383 = vmatprep.subr.mxu1 %v9896_v60 }
0x2e80   :  { %9384 = vmatpush3.msra.mxu1 %v7630_v5 }
0x2e81   :  { %9399 = vmatprep.subr.mxu1 %v9896_v60 }
0x2f35   :  { %v6789_v20 = vpop.f32.mrf.mxu1 }
0x2f36   :  { %9397 = vmatmul.mubr.msk.f32.vlgmr.msra.gmra.mxu0 %vm129_vm0, %v6789_v20 }
0x2f37   :  { %9416 = vmatpush3.msra.mxu0 %v6717_v0  ;;  %v9371_v4 = vpop.f32.mrf.mxu1  ;;  %9417 = vmatprep.mubr.msk.f32.mxu0 %vm9899_vm7, %v9896_v60 }
0x2f38   :  { %9420 = vmatprep.subr.mxu0 %v9896_v60 }
0x2f39   :  { %v6868_v29 = vpop.f32.mrf.mxu1 }
0x2f3a   :  { %9386 = vmatmul.mubr.msk.f32.vlgmr.msra.gmra.mxu1 %vm129_vm0, %v6868_v29  ;;  %9418 = vmatmul.mubr.msk.f32.vlgmr.msra.gmra.mxu0 %vm6719_vm6, %v7643_v40 }
0x2f3b   :  { %9400 = vmatpush3.msra.mxu1 %v6717_v0  ;;  %9401 = vmatprep.mubr.msk.f32.mxu1 %vm9899_vm7, %v9896_v60  ;;  %v9376_v34 = vpop.f32.mrf.mxu1 }
0x2f3c   :  { %9404 = vmatprep.subr.mxu1 %v9896_v60  ;;  %9428 = vmatprep.mubr.msk.f32.mxu0 %vm9899_vm7, %v9896_v60 }
0x2f3d   :  { %9421 = vmatpush3.msra.mxu0 %v7648_v38 }
0x2f3e   :  { %9402 = vmatmul.mubr.msk.f32.vlgmr.msra.gmra.mxu1 %vm6719_vm6, %v7636_v2  ;;  %9422 = vmatprep.subr.mxu0 %v9896_v60 }
0x2f3f   :  { %9405 = vmatpush3.msra.mxu1 %v7641_v11  ;;  %9412 = vmatprep.mubr.msk.f32.mxu1 %vm9899_vm7, %v9896_v60  ;;  %vm7339_vm7 = vcmask 74752  }
0x2f40   :  { %9406 = vmatprep.subr.mxu1 %v9896_v60  ;;  %9423 = vmatpush3.msra.mxu0 %v7647_v30 }
0x2f41   :  { %9407 = vmatpush3.msra.mxu1 %v7640_v55  ;;  %9424 = vmatprep.subr.mxu0 %v9896_v60 }
0x2f42   :  { %9408 = vmatprep.subr.mxu1 %v9896_v60  ;;  %9425 = vmatpush3.msra.mxu0 %v7646_v62 }
0x2f43   :  { %9409 = vmatpush3.msra.mxu1 %v7639_v52  ;;  %9426 = vmatprep.subr.mxu0 %v9896_v60 }
0x2f44   :  { %9410 = vmatprep.subr.mxu1 %v9896_v60  ;;  %9427 = vmatpush3.msra.mxu0 %v7645_v18  ;;  %v7650_v60 = vld [vmem:[%s13045_s28] ss:$0 sm:$0xff] }
0x2f45   :  { %9411 = vmatpush3.msra.mxu1 %v7638_v19 }
0x2ff6   :  { %v7019_v47 = vpop.f32.mrf.mxu0 }
0x2ff8   :  { %v9398_v7 = vpop.f32.mrf.mxu0 }
0x2ffa   :  { %v6946_v24 = vpop.f32.mrf.mxu1  ;;  %v7248_v21 = vpop.f32.mrf.mxu0 }
0x2ffb   :  { %v7020_v27 = vadd.f32 %v7019_v47, %v6946_v24  ;;  %9429 = vmatmul.mubr.msk.f32.vlgmr.msra.gmra.mxu0 %vm129_vm0, %v7248_v21 }
0x2ffc   :  { %v9387_v23 = vpop.f32.mrf.mxu1  ;;  %v9419_v59 = vpop.f32.mrf.mxu0 }
0x2ffe   :  { %v7094_v1 = vpop.f32.mrf.mxu1 }
0x2fff   :  { %9413 = vmatmul.mubr.msk.f32.vlgmr.msra.gmra.mxu1 %vm129_vm0, %v7094_v1 }
0x3000   :  { %v9403_v13 = vpop.f32.mrf.mxu1 }
0x30bb   :  { %v7326_v31 = vpop.f32.mrf.mxu0 }
0x30bd   :  { %v9430_v15 = vpop.f32.mrf.mxu0 }
0x30bf   :  { %v7172_v9 = vpop.f32.mrf.mxu1 }
0x30c0   :  { %v7176_v42 = vadd.f32 %v7172_v9, %v7020_v27 }
0x30c1   :  { %v9414_v56 = vpop.f32.mrf.mxu1 }
0x30c2   :  { %v7330_v39 = vadd.f32 %v7326_v31, %v7176_v42 }
0x30c4   :  { %v7338_v48 = vadd.f32 %v7650_v60, %v7330_v39 }
0x30c6   :  { %7340 = vst.msk [vmem:[#allocation5] sm:$0x3] %vm7339_vm7, %v7338_v48 }
0x30c7   :  { %9881 = shalt.err (!%p9878_p9)
}
0x30c8   :  { %s13046_s1 = sld [smem:[#allocation18_spill]] }
0x30ce   :  { %7350 = dma.vmem_to_hbm [thread:$0]  %s7348_s14, 32, %s13046_s1, [#allocation3]  }
0x30cf   :  { %9892 = dma.done.wait [#allocation3], 32  }
0x30d0   :  { %9893 = vsyncadd [#allocation3], 4294967264 }
0x30d1   :  { %7354 = vsyncpa [#allocation3], 1 }
0x30d2   :  { %7355 = vsyncpa [#allocation4], 1 }

</bundles_post_ra>
